<compile_context>
chip_gen: v6e
topology: v6e:2x2x1
jax: 0.10.0
libtpu: 0.0.40
codegen_flags: <defaults>
</compile_context>

<pallas_src>
import functools

import jax
import jax.numpy as jnp
from jax import lax
from jax.experimental import pallas as pl
from jax.experimental.pallas import tpu as pltpu
import numpy as np

KSZ = 3  # Conv1d kernel_size inside DilatedResidualLayer


# --------------------------------------------------------------------------------------
# Pallas kernel: full MultiStageModel forward on a (channels, lane_tile) slab.
# --------------------------------------------------------------------------------------
def _mstcn_kernel(x_ref,
                  s1_win_ref, s1_bin_ref, s1_wd_ref, s1_bd_ref,
                  s1_w1_ref, s1_b1_ref, s1_wout_ref, s1_bout_ref,
                  r_win_ref, r_bin_ref, r_wd_ref, r_bd_ref,
                  r_w1_ref, r_b1_ref, r_wout_ref, r_bout_ref,
                  out_ref,
                  *, num_layers, num_stages, seq_len, num_classes):
    lanes = x_ref.shape[-1]
    cls_p = out_ref.shape[1]

    # ---- hoisted constants (computed once, reused by every stage/layer/tap) ------------
    # Position of each lane inside its own sequence (batch folded along lanes; lane tiles
    # are whole-sequence aligned, so this is tile-invariant).
    pos = lax.broadcasted_iota(jnp.int32, (1, lanes), 1) % seq_len
    # One causal mask per distinct shift {d, 2d : d = 1,2,4,...}.
    shift_vals = sorted({(KSZ - 1 - k) * (2 ** l)
                         for l in range(num_layers) for k in range(KSZ)} - {0})
    causal_mask = {s: pos >= s for s in shift_vals if s < seq_len}
    # Additive mask pushing padded class rows to -inf before the inter-stage softmax.
    cls_row = lax.broadcasted_iota(jnp.int32, (cls_p, 1), 0)
    cls_mask = jnp.where(cls_row < num_classes, 0.0, -1e30).astype(jnp.float32)

    def shift_right(v, s):
        # Causal zero-filled shift by static s along lanes, never crossing sequence borders.
        if s == 0:
            return v
        if s >= seq_len:
            return jnp.zeros_like(v)
        rolled = pltpu.roll(v, shift=s, axis=1)
        return jnp.where(causal_mask[s], rolled, jnp.float32(0.0))

    def dilated_residual(h, wd, bd, w1, b1, dilation):
        # im2col: stack the KSZ causally shifted copies along sublanes -> ONE MXU matmul
        # (replaces KSZ per-tap matmuls + VALU accumulate adds).  bf16 operands, f32 acc.
        stack = jnp.concatenate(
            [shift_right(h, (KSZ - 1 - k) * dilation) for k in range(KSZ)], axis=0)
        z = jnp.dot(wd, stack.astype(wd.dtype), preferred_element_type=jnp.float32) + bd
        z = jnp.maximum(z, 0.0)
        # TODO(synk): nn.Dropout() treated as identity (eval-mode forward); no RNG mask applied.
        return h + jnp.dot(w1, z.astype(w1.dtype), preferred_element_type=jnp.float32) + b1

    def run_stage(inp, win, bin_, get_layer, wout, bout):
        h = jnp.dot(win, inp.astype(win.dtype), preferred_element_type=jnp.float32) + bin_
        for l in range(num_layers):
            wd, bd, w1, b1 = get_layer(l)          # loaded lazily -> lower vreg pressure
            h = dilated_residual(h, wd, bd, w1, b1, 2 ** l)
        return jnp.dot(wout, h.astype(wout.dtype), preferred_element_type=jnp.float32) + bout

    def masked_softmax(logits):
        # Softmax over the channel (sublane) axis, padded class rows forced to ~0 probability.
        m = logits + cls_mask
        mx = jnp.max(m, axis=0, keepdims=True)
        e = jnp.exp(m - mx)
        denom = jnp.sum(e, axis=0, keepdims=True)
        return e * pl.reciprocal(denom, approx=False)     # divide on the EUP path

    out = run_stage(
        x_ref[...], s1_win_ref[...], s1_bin_ref[...],
        lambda l: (s1_wd_ref[l], s1_bd_ref[l], s1_w1_ref[l], s1_b1_ref[l]),
        s1_wout_ref[...], s1_bout_ref[...])
    out_ref[0] = out.astype(out_ref.dtype)

    for s in range(num_stages - 1):
        prob = masked_softmax(out)
        out = run_stage(
            prob, r_win_ref[s], r_bin_ref[s],
            lambda l, s=s: (r_wd_ref[s, l], r_bd_ref[s, l], r_w1_ref[s, l], r_b1_ref[s, l]),
            r_wout_ref[s], r_bout_ref[s])
        out_ref[s + 1] = out.astype(out_ref.dtype)


# --------------------------------------------------------------------------------------
# Wrapper: parameter repacking (torch layout -> kernel layout) and pallas_call.
# --------------------------------------------------------------------------------------
def _round_up(n, m):
    return (n + m - 1) // m * m


def _pad_axis(a, axis, target):
    pad = target - a.shape[axis]
    if pad <= 0:
        return a
    widths = [(0, 0)] * a.ndim
    widths[axis] = (0, pad)
    return jnp.pad(a, widths)


def prepare_kernel_params(stage1, rest, feature_dim, num_classes):
    """Torch-layout stage params -> kernel layout.

    Weights are tap-repacked, channel-padded, stage-stacked and cast to bf16 (MXU operands);
    biases stay f32 (added to the f32 accumulator).
    """
    assert rest, "MultiStageModel has at least 2 stages"
    cls_p = _round_up(num_classes, 8)
    dim_p = _round_up(feature_dim, 8)

    def pack(p, in_pad):
        w_in = _pad_axis(p["w_in"][:, :, 0], 1, in_pad).astype(jnp.bfloat16)   # (f, in_p)
        b_in = p["b_in"][:, None]                                              # (f, 1) f32
        wd = jnp.stack([jnp.concatenate([w[:, :, k] for k in range(KSZ)], axis=1)
                        for w in p["wd"]]).astype(jnp.bfloat16)                # (L, f, KSZ*f)
        bd = jnp.stack(p["bd"])[:, :, None]                                    # (L, f, 1) f32
        w1 = jnp.stack([w[:, :, 0] for w in p["w1"]]).astype(jnp.bfloat16)     # (L, f, f)
        b1 = jnp.stack(p["b1"])[:, :, None]                                    # (L, f, 1) f32
        w_out = _pad_axis(p["w_out"][:, :, 0], 0, cls_p).astype(jnp.bfloat16)  # (cls_p, f)
        b_out = _pad_axis(p["b_out"], 0, cls_p)[:, None]                       # (cls_p, 1) f32
        return (w_in, b_in, wd, bd, w1, b1, w_out, b_out)

    s1 = pack(stage1, dim_p)
    rest_packed = [pack(p, cls_p) for p in rest]
    r = tuple(jnp.stack([rp[i] for rp in rest_packed]) for i in range(8))
    return s1 + r                                                              # 16 arrays


def _choose_seqs_per_tile(batch, seq_len, target_lanes):
    """Whole-sequence lane tiles: smallest tile reaching target_lanes with a 128-multiple
    lane count (so output stores stay unmasked); falls back to a single tile."""
    for s in range(1, batch + 1):
        if batch % s:
            continue
        lanes = s * seq_len
        if s != batch and lanes % 128:
            continue
        if lanes >= target_lanes:
            return s
    return batch


def multi_stage_forward(x, kparams, *, num_layers, num_stages, num_classes,
                        target_tile_lanes=512):
    """x: (B, T, feature_dim) float32 -> (B, num_stages, T, num_classes), matching the module."""
    B, T, dim = x.shape
    dim_p = _round_up(dim, 8)
    cls_p = _round_up(num_classes, 8)
    bt = B * T

    # Fold batch into the lane axis: (B, T, dim) -> (dim_p, B*T), lane = b*T + t.
    xk = _pad_axis(jnp.transpose(x, (2, 0, 1)).reshape(dim, bt), 0, dim_p)

    spt = _choose_seqs_per_tile(B, T, target_tile_lanes)
    lane_tile = spt * T
    n_tiles = B // spt

    args = (xk,) + tuple(kparams)

    def const_spec(a):
        n = a.ndim
        return pl.BlockSpec(a.shape, lambda g, n=n: (0,) * n)   # VMEM-resident weights

    in_specs = [pl.BlockSpec((dim_p, lane_tile), lambda g: (0, g))]
    in_specs += [const_spec(a) for a in kparams]
    out_spec = pl.BlockSpec((num_stages, cls_p, lane_tile), lambda g: (0, 0, g))

    kernel = functools.partial(_mstcn_kernel, num_layers=num_layers,
                               num_stages=num_stages, seq_len=T,
                               num_classes=num_classes)

    out = pl.pallas_call(
        kernel,
        grid=(n_tiles,),
        out_shape=jax.ShapeDtypeStruct((num_stages, cls_p, bt), jnp.float32),
        in_specs=in_specs,
        out_specs=out_spec,
        compiler_params=pltpu.CompilerParams(
            dimension_semantics=("parallel",),                  # megacore split on v7x
            vmem_limit_bytes=48 * 1024 * 1024),                 # explicit; < v7x 64 MiB phys
    )(*args)

    out = out.reshape(num_stages, cls_p, B, T)
    return jnp.transpose(out, (2, 0, 3, 1))[..., :num_classes]  # (B, S, T, C)


# --------------------------------------------------------------------------------------
# Pure-JAX reference mirroring the PyTorch forward exactly (f32 everywhere).
# --------------------------------------------------------------------------------------
def _conv1d(x, w, b, padding, dilation):
    y = lax.conv_general_dilated(
        x, w, window_strides=(1,), padding=[(padding, padding)],
        rhs_dilation=(dilation,), dimension_numbers=("NCH", "OIH", "NCH"),
        precision=lax.Precision.HIGHEST)
    return y + b[None, :, None]


def _ref_stage(x, p, num_layers):
    out = _conv1d(x, p["w_in"], p["b_in"], 0, 1)
    for l in range(num_layers):
        d = 2 ** l
        z = jax.nn.relu(_conv1d(out, p["wd"][l], p["bd"][l], 2 * d, d))
        z = z[:, :, :-(2 * d)]                      # causal crop
        z = _conv1d(z, p["w1"][l], p["b1"][l], 0, 1)
        out = out + z                               # dropout = identity (eval)
    return _conv1d(out, p["w_out"], p["b_out"], 0, 1)


def reference_forward(x, stage1, rest, num_layers):
    xc = jnp.transpose(x, (0, 2, 1))                # (B, dim, T)
    out = _ref_stage(xc, stage1, num_layers)
    outs = [out]
    for p in rest:
        out = _ref_stage(jax.nn.softmax(out, axis=1), p, num_layers)
        outs.append(out)
    stacked = jnp.stack(outs, axis=1)               # (B, S, C, T)
    return jnp.transpose(stacked, (0, 1, 3, 2))     # (B, S, T, C)


# --------------------------------------------------------------------------------------
# Deterministic parameter init (PyTorch Conv1d-style uniform bounds).
# --------------------------------------------------------------------------------------
def _conv_init(key, cout, cin, ksz):
    kw, kb = jax.random.split(key)
    bound = 1.0 / np.sqrt(cin * ksz)
    w = jax.random.uniform(kw, (cout, cin, ksz), jnp.float32, -bound, bound)
    b = jax.random.uniform(kb, (cout,), jnp.float32, -bound, bound)
    return w, b


def init_stage(key, in_dim, f_maps, out_dim, num_layers):
    keys = jax.random.split(key, 2 * num_layers + 2)
    w_in, b_in = _conv_init(keys[0], f_maps, in_dim, 1)
    wd, bd, w1, b1 = [], [], [], []
    for l in range(num_layers):
        w, b = _conv_init(keys[1 + 2 * l], f_maps, f_maps, KSZ)
        wd.append(w); bd.append(b)
        w, b = _conv_init(keys[2 + 2 * l], f_maps, f_maps, 1)
        w1.append(w); b1.append(b)
    w_out, b_out = _conv_init(keys[2 * num_layers + 1], out_dim, f_maps, 1)
    return dict(w_in=w_in, b_in=b_in, wd=wd, bd=bd, w1=w1, b1=b1,
                w_out=w_out, b_out=b_out)


if __name__ == "__main__":
    # Small shapes consistent with MultiStageModel(stages, layers, feature_maps, feature_dim,
    # out_features, causal_conv=True); the forward implies x is (batch, seq_len, feature_dim).
    # B*T = 1024 lanes per call (>= 1024 target), split into 2 lane tiles of 512 for megacore.
    STAGES, LAYERS, F_MAPS, DIM, CLASSES = 3, 4, 32, 64, 10
    B, T = 8, 128
    assert F_MAPS % 8 == 0          # full-sublane feature-map slabs
    assert KSZ * F_MAPS <= 128      # tap-stack K fits one weight load on v5e's 128-deep MXU

    key = jax.random.PRNGKey(0)
    kx, k1, kr = jax.random.split(key, 3)
    x = jax.random.normal(kx, (B, T, DIM), jnp.float32)

    stage1 = init_stage(k1, DIM, F_MAPS, CLASSES, LAYERS)
    rest = [init_stage(k, CLASSES, F_MAPS, CLASSES, LAYERS)
            for k in jax.random.split(kr, STAGES - 1)]

    kparams = prepare_kernel_params(stage1, rest, DIM, CLASSES)
    y = multi_stage_forward(x, kparams, num_layers=LAYERS, num_stages=STAGES,
                            num_classes=CLASSES)
    y = jax.block_until_ready(y)

    # bf16 MXU operands (f32 accumulation) vs. the pure-f32 reference: 3e-2 tolerance.
    y_ref = reference_forward(x, stage1, rest, LAYERS)
    np.testing.assert_allclose(np.asarray(y), np.asarray(y_ref), rtol=3e-2, atol=3e-2)
    print("KERNEL_OK")
</pallas_src>

<mosaic_0001>
module attributes {stable_mosaic.version = 11 : i64} {
  func.func @_mstcn_kernel(%arg0: i32, %arg1: memref<64x512xf32, #tpu.memory_space<vmem>>, %arg2: memref<32x64xbf16, #tpu.memory_space<vmem>>, %arg3: memref<32x1xf32, #tpu.memory_space<vmem>>, %arg4: memref<4x32x96xbf16, #tpu.memory_space<vmem>>, %arg5: memref<4x32x1xf32, #tpu.memory_space<vmem>>, %arg6: memref<4x32x32xbf16, #tpu.memory_space<vmem>>, %arg7: memref<4x32x1xf32, #tpu.memory_space<vmem>>, %arg8: memref<16x32xbf16, #tpu.memory_space<vmem>>, %arg9: memref<16x1xf32, #tpu.memory_space<vmem>>, %arg10: memref<2x32x16xbf16, #tpu.memory_space<vmem>>, %arg11: memref<2x32x1xf32, #tpu.memory_space<vmem>>, %arg12: memref<2x4x32x96xbf16, #tpu.memory_space<vmem>>, %arg13: memref<2x4x32x1xf32, #tpu.memory_space<vmem>>, %arg14: memref<2x4x32x32xbf16, #tpu.memory_space<vmem>>, %arg15: memref<2x4x32x1xf32, #tpu.memory_space<vmem>>, %arg16: memref<2x16x32xbf16, #tpu.memory_space<vmem>>, %arg17: memref<2x16x1xf32, #tpu.memory_space<vmem>>, %arg18: memref<3x16x512xf32, #tpu.memory_space<vmem>>) attributes {dimension_semantics = [#tpu.dimension_semantics<parallel>], iteration_bounds = array<i64: 2>, scalar_prefetch = 0 : i64, scratch_operands = 0 : i64, tpu.core_type = #tpu.core_type<tc>, window_params = [{transform_indices = @transform_0, window_bounds = array<i64: 64, 512>}, {pipeline_mode = #tpu.pipeline_mode<synchronous>, transform_indices = @transform_1, window_bounds = array<i64: 32, 64>}, {pipeline_mode = #tpu.pipeline_mode<synchronous>, transform_indices = @transform_2, window_bounds = array<i64: 32, 1>}, {pipeline_mode = #tpu.pipeline_mode<synchronous>, transform_indices = @transform_3, window_bounds = array<i64: 4, 32, 96>}, {pipeline_mode = #tpu.pipeline_mode<synchronous>, transform_indices = @transform_4, window_bounds = array<i64: 4, 32, 1>}, {pipeline_mode = #tpu.pipeline_mode<synchronous>, transform_indices = @transform_5, window_bounds = array<i64: 4, 32, 32>}, {pipeline_mode = #tpu.pipeline_mode<synchronous>, transform_indices = @transform_6, window_bounds = array<i64: 4, 32, 1>}, {pipeline_mode = #tpu.pipeline_mode<synchronous>, transform_indices = @transform_7, window_bounds = array<i64: 16, 32>}, {pipeline_mode = #tpu.pipeline_mode<synchronous>, transform_indices = @transform_8, window_bounds = array<i64: 16, 1>}, {pipeline_mode = #tpu.pipeline_mode<synchronous>, transform_indices = @transform_9, window_bounds = array<i64: 2, 32, 16>}, {pipeline_mode = #tpu.pipeline_mode<synchronous>, transform_indices = @transform_10, window_bounds = array<i64: 2, 32, 1>}, {pipeline_mode = #tpu.pipeline_mode<synchronous>, transform_indices = @transform_11, window_bounds = array<i64: 2, 4, 32, 96>}, {pipeline_mode = #tpu.pipeline_mode<synchronous>, transform_indices = @transform_12, window_bounds = array<i64: 2, 4, 32, 1>}, {pipeline_mode = #tpu.pipeline_mode<synchronous>, transform_indices = @transform_13, window_bounds = array<i64: 2, 4, 32, 32>}, {pipeline_mode = #tpu.pipeline_mode<synchronous>, transform_indices = @transform_14, window_bounds = array<i64: 2, 4, 32, 1>}, {pipeline_mode = #tpu.pipeline_mode<synchronous>, transform_indices = @transform_15, window_bounds = array<i64: 2, 16, 32>}, {pipeline_mode = #tpu.pipeline_mode<synchronous>, transform_indices = @transform_16, window_bounds = array<i64: 2, 16, 1>}, {transform_indices = @transform_17, window_bounds = array<i64: 3, 16, 512>}]} {
    %0 = tpu.iota {dimensions = array<i32: 1>} : vector<1x512xi32>
    %c128_i32 = arith.constant 128 : i32
    %c0_i32 = arith.constant 0 : i32
    %1 = arith.cmpi eq, %c128_i32, %c0_i32 : i32
    %c1_i32 = arith.constant 1 : i32
    %2 = arith.select %1, %c1_i32, %c128_i32 : i32
    %3 = vector.broadcast %2 : i32 to vector<1x512xi32>
    %4 = arith.remsi %0, %3 : vector<1x512xi32>
    %c0_i32_0 = arith.constant 0 : i32
    %5 = vector.broadcast %c0_i32_0 : i32 to vector<1x512xi32>
    %6 = arith.cmpi ne, %4, %5 : vector<1x512xi32>
    %c0_i32_1 = arith.constant 0 : i32
    %7 = vector.broadcast %c0_i32_1 : i32 to vector<1x512xi32>
    %8 = arith.cmpi slt, %4, %7 : vector<1x512xi32>
    %c0_i32_2 = arith.constant 0 : i32
    %9 = arith.cmpi slt, %2, %c0_i32_2 : i32
    %10 = vector.broadcast %9 : i1 to vector<1x512xi1>
    %11 = vector.broadcast %10 : vector<1x512xi1> to vector<1x512xi1>
    %12 = arith.xori %8, %11 : vector<1x512xi1>
    %13 = arith.andi %12, %6 : vector<1x512xi1>
    %14 = vector.broadcast %2 : i32 to vector<1x512xi32>
    %15 = arith.addi %4, %14 : vector<1x512xi32>
    %16 = arith.select %13, %15, %4 : vector<1x512xi1>, vector<1x512xi32>
    %c1_i32_3 = arith.constant 1 : i32
    %17 = vector.broadcast %c1_i32_3 : i32 to vector<1x512xi32>
    %18 = arith.cmpi sge, %16, %17 : vector<1x512xi32>
    %c2_i32 = arith.constant 2 : i32
    %19 = vector.broadcast %c2_i32 : i32 to vector<1x512xi32>
    %20 = arith.cmpi sge, %16, %19 : vector<1x512xi32>
    %c4_i32 = arith.constant 4 : i32
    %21 = vector.broadcast %c4_i32 : i32 to vector<1x512xi32>
    %22 = arith.cmpi sge, %16, %21 : vector<1x512xi32>
    %c8_i32 = arith.constant 8 : i32
    %23 = vector.broadcast %c8_i32 : i32 to vector<1x512xi32>
    %24 = arith.cmpi sge, %16, %23 : vector<1x512xi32>
    %c16_i32 = arith.constant 16 : i32
    %25 = vector.broadcast %c16_i32 : i32 to vector<1x512xi32>
    %26 = arith.cmpi sge, %16, %25 : vector<1x512xi32>
    %27 = tpu.iota {dimensions = array<i32: 0>} : vector<16x1xi32>
    %c10_i32 = arith.constant 10 : i32
    %28 = vector.broadcast %c10_i32 : i32 to vector<16x1xi32>
    %29 = arith.cmpi slt, %27, %28 : vector<16x1xi32>
    %cst = arith.constant 0.000000e+00 : f32
    %cst_4 = arith.constant -1.000000e+30 : f32
    %30 = vector.broadcast %cst : f32 to vector<16x1xf32>
    %31 = vector.broadcast %cst_4 : f32 to vector<16x1xf32>
    %32 = arith.select %29, %30, %31 : vector<16x1xi1>, vector<16x1xf32>
    %c0 = arith.constant 0 : index
    %c0_5 = arith.constant 0 : index
    %33 = vector.load %arg1[%c0, %c0_5] : memref<64x512xf32, #tpu.memory_space<vmem>>, vector<64x512xf32>
    %c0_6 = arith.constant 0 : index
    %c0_7 = arith.constant 0 : index
    %34 = vector.load %arg2[%c0_6, %c0_7] : memref<32x64xbf16, #tpu.memory_space<vmem>>, vector<32x64xbf16>
    %c0_8 = arith.constant 0 : index
    %c0_9 = arith.constant 0 : index
    %35 = vector.load %arg3[%c0_8, %c0_9] : memref<32x1xf32, #tpu.memory_space<vmem>>, vector<32x1xf32>
    %c0_10 = arith.constant 0 : index
    %c0_11 = arith.constant 0 : index
    %36 = vector.load %arg8[%c0_10, %c0_11] : memref<16x32xbf16, #tpu.memory_space<vmem>>, vector<16x32xbf16>
    %c0_12 = arith.constant 0 : index
    %c0_13 = arith.constant 0 : index
    %37 = vector.load %arg9[%c0_12, %c0_13] : memref<16x1xf32, #tpu.memory_space<vmem>>, vector<16x1xf32>
    %38 = arith.truncf %33 : vector<64x512xf32> to vector<64x512xbf16>
    %cst_14 = arith.constant dense<0.000000e+00> : vector<32x512xf32>
    %39 = tpu.matmul %34, %38, %cst_14 {dimension_numbers = #tpu.dot_dimension_numbers<[1], [0], [0], [1], [0, 0, 1, 1], [], []>} : vector<32x64xbf16>, vector<64x512xbf16>, vector<32x512xf32> -> vector<32x512xf32>
    %40 = vector.broadcast %35 : vector<32x1xf32> to vector<32x512xf32>
    %41 = arith.addf %39, %40 : vector<32x512xf32>
    %c0_15 = arith.constant 0 : index
    %c0_16 = arith.constant 0 : index
    %c0_17 = arith.constant 0 : index
    %42 = vector.load %arg4[%c0_15, %c0_16, %c0_17] : memref<4x32x96xbf16, #tpu.memory_space<vmem>>, vector<1x32x96xbf16>
    %43 = vector.shape_cast %42 : vector<1x32x96xbf16> to vector<32x96xbf16>
    %c0_18 = arith.constant 0 : index
    %c0_19 = arith.constant 0 : index
    %c0_20 = arith.constant 0 : index
    %44 = vector.load %arg5[%c0_18, %c0_19, %c0_20] : memref<4x32x1xf32, #tpu.memory_space<vmem>>, vector<1x32x1xf32>
    %45 = vector.shape_cast %44 : vector<1x32x1xf32> to vector<32x1xf32>
    %c0_21 = arith.constant 0 : index
    %c0_22 = arith.constant 0 : index
    %c0_23 = arith.constant 0 : index
    %46 = vector.load %arg6[%c0_21, %c0_22, %c0_23] : memref<4x32x32xbf16, #tpu.memory_space<vmem>>, vector<1x32x32xbf16>
    %47 = vector.shape_cast %46 : vector<1x32x32xbf16> to vector<32x32xbf16>
    %c0_24 = arith.constant 0 : index
    %c0_25 = arith.constant 0 : index
    %c0_26 = arith.constant 0 : index
    %48 = vector.load %arg7[%c0_24, %c0_25, %c0_26] : memref<4x32x1xf32, #tpu.memory_space<vmem>>, vector<1x32x1xf32>
    %49 = vector.shape_cast %48 : vector<1x32x1xf32> to vector<32x1xf32>
    %c2_i32_27 = arith.constant 2 : i32
    %50 = tpu.dynamic_rotate %41 by %c2_i32_27 dim 1 : vector<32x512xf32>, i32 -> vector<32x512xf32>
    %cst_28 = arith.constant 0.000000e+00 : f32
    %51 = vector.shape_cast %20 : vector<1x512xi1> to vector<1x512xi1>
    %52 = vector.broadcast %51 : vector<1x512xi1> to vector<32x512xi1>
    %53 = vector.broadcast %cst_28 : f32 to vector<32x512xf32>
    %54 = arith.select %52, %50, %53 : vector<32x512xi1>, vector<32x512xf32>
    %c1_i32_29 = arith.constant 1 : i32
    %55 = tpu.dynamic_rotate %41 by %c1_i32_29 dim 1 : vector<32x512xf32>, i32 -> vector<32x512xf32>
    %cst_30 = arith.constant 0.000000e+00 : f32
    %56 = vector.shape_cast %18 : vector<1x512xi1> to vector<1x512xi1>
    %57 = vector.broadcast %56 : vector<1x512xi1> to vector<32x512xi1>
    %58 = vector.broadcast %cst_30 : f32 to vector<32x512xf32>
    %59 = arith.select %57, %55, %58 : vector<32x512xi1>, vector<32x512xf32>
    %60 = tpu.concatenate %54, %59, %41 in 0 : vector<32x512xf32>, vector<32x512xf32>, vector<32x512xf32> -> vector<96x512xf32>
    %61 = arith.truncf %60 : vector<96x512xf32> to vector<96x512xbf16>
    %cst_31 = arith.constant dense<0.000000e+00> : vector<32x512xf32>
    %62 = tpu.matmul %43, %61, %cst_31 {dimension_numbers = #tpu.dot_dimension_numbers<[1], [0], [0], [1], [0, 0, 1, 1], [], []>} : vector<32x96xbf16>, vector<96x512xbf16>, vector<32x512xf32> -> vector<32x512xf32>
    %63 = vector.broadcast %45 : vector<32x1xf32> to vector<32x512xf32>
    %64 = arith.addf %62, %63 : vector<32x512xf32>
    %cst_32 = arith.constant 0.000000e+00 : f32
    %65 = vector.broadcast %cst_32 : f32 to vector<32x512xf32>
    %66 = arith.maximumf %64, %65 : vector<32x512xf32>
    %67 = arith.truncf %66 : vector<32x512xf32> to vector<32x512xbf16>
    %cst_33 = arith.constant dense<0.000000e+00> : vector<32x512xf32>
    %68 = tpu.matmul %47, %67, %cst_33 {dimension_numbers = #tpu.dot_dimension_numbers<[1], [0], [0], [1], [0, 0, 1, 1], [], []>} : vector<32x32xbf16>, vector<32x512xbf16>, vector<32x512xf32> -> vector<32x512xf32>
    %69 = arith.addf %41, %68 : vector<32x512xf32>
    %70 = vector.broadcast %49 : vector<32x1xf32> to vector<32x512xf32>
    %71 = arith.addf %69, %70 : vector<32x512xf32>
    %c1 = arith.constant 1 : index
    %c0_34 = arith.constant 0 : index
    %c0_35 = arith.constant 0 : index
    %72 = vector.load %arg4[%c1, %c0_34, %c0_35] : memref<4x32x96xbf16, #tpu.memory_space<vmem>>, vector<1x32x96xbf16>
    %73 = vector.shape_cast %72 : vector<1x32x96xbf16> to vector<32x96xbf16>
    %c1_36 = arith.constant 1 : index
    %c0_37 = arith.constant 0 : index
    %c0_38 = arith.constant 0 : index
    %74 = vector.load %arg5[%c1_36, %c0_37, %c0_38] : memref<4x32x1xf32, #tpu.memory_space<vmem>>, vector<1x32x1xf32>
    %75 = vector.shape_cast %74 : vector<1x32x1xf32> to vector<32x1xf32>
    %c1_39 = arith.constant 1 : index
    %c0_40 = arith.constant 0 : index
    %c0_41 = arith.constant 0 : index
    %76 = vector.load %arg6[%c1_39, %c0_40, %c0_41] : memref<4x32x32xbf16, #tpu.memory_space<vmem>>, vector<1x32x32xbf16>
    %77 = vector.shape_cast %76 : vector<1x32x32xbf16> to vector<32x32xbf16>
    %c1_42 = arith.constant 1 : index
    %c0_43 = arith.constant 0 : index
    %c0_44 = arith.constant 0 : index
    %78 = vector.load %arg7[%c1_42, %c0_43, %c0_44] : memref<4x32x1xf32, #tpu.memory_space<vmem>>, vector<1x32x1xf32>
    %79 = vector.shape_cast %78 : vector<1x32x1xf32> to vector<32x1xf32>
    %c4_i32_45 = arith.constant 4 : i32
    %80 = tpu.dynamic_rotate %71 by %c4_i32_45 dim 1 : vector<32x512xf32>, i32 -> vector<32x512xf32>
    %cst_46 = arith.constant 0.000000e+00 : f32
    %81 = vector.shape_cast %22 : vector<1x512xi1> to vector<1x512xi1>
    %82 = vector.broadcast %81 : vector<1x512xi1> to vector<32x512xi1>
    %83 = vector.broadcast %cst_46 : f32 to vector<32x512xf32>
    %84 = arith.select %82, %80, %83 : vector<32x512xi1>, vector<32x512xf32>
    %c2_i32_47 = arith.constant 2 : i32
    %85 = tpu.dynamic_rotate %71 by %c2_i32_47 dim 1 : vector<32x512xf32>, i32 -> vector<32x512xf32>
    %cst_48 = arith.constant 0.000000e+00 : f32
    %86 = vector.shape_cast %20 : vector<1x512xi1> to vector<1x512xi1>
    %87 = vector.broadcast %86 : vector<1x512xi1> to vector<32x512xi1>
    %88 = vector.broadcast %cst_48 : f32 to vector<32x512xf32>
    %89 = arith.select %87, %85, %88 : vector<32x512xi1>, vector<32x512xf32>
    %90 = tpu.concatenate %84, %89, %71 in 0 : vector<32x512xf32>, vector<32x512xf32>, vector<32x512xf32> -> vector<96x512xf32>
    %91 = arith.truncf %90 : vector<96x512xf32> to vector<96x512xbf16>
    %cst_49 = arith.constant dense<0.000000e+00> : vector<32x512xf32>
    %92 = tpu.matmul %73, %91, %cst_49 {dimension_numbers = #tpu.dot_dimension_numbers<[1], [0], [0], [1], [0, 0, 1, 1], [], []>} : vector<32x96xbf16>, vector<96x512xbf16>, vector<32x512xf32> -> vector<32x512xf32>
    %93 = vector.broadcast %75 : vector<32x1xf32> to vector<32x512xf32>
    %94 = arith.addf %92, %93 : vector<32x512xf32>
    %cst_50 = arith.constant 0.000000e+00 : f32
    %95 = vector.broadcast %cst_50 : f32 to vector<32x512xf32>
    %96 = arith.maximumf %94, %95 : vector<32x512xf32>
    %97 = arith.truncf %96 : vector<32x512xf32> to vector<32x512xbf16>
    %cst_51 = arith.constant dense<0.000000e+00> : vector<32x512xf32>
    %98 = tpu.matmul %77, %97, %cst_51 {dimension_numbers = #tpu.dot_dimension_numbers<[1], [0], [0], [1], [0, 0, 1, 1], [], []>} : vector<32x32xbf16>, vector<32x512xbf16>, vector<32x512xf32> -> vector<32x512xf32>
    %99 = arith.addf %71, %98 : vector<32x512xf32>
    %100 = vector.broadcast %79 : vector<32x1xf32> to vector<32x512xf32>
    %101 = arith.addf %99, %100 : vector<32x512xf32>
    %c2 = arith.constant 2 : index
    %c0_52 = arith.constant 0 : index
    %c0_53 = arith.constant 0 : index
    %102 = vector.load %arg4[%c2, %c0_52, %c0_53] : memref<4x32x96xbf16, #tpu.memory_space<vmem>>, vector<1x32x96xbf16>
    %103 = vector.shape_cast %102 : vector<1x32x96xbf16> to vector<32x96xbf16>
    %c2_54 = arith.constant 2 : index
    %c0_55 = arith.constant 0 : index
    %c0_56 = arith.constant 0 : index
    %104 = vector.load %arg5[%c2_54, %c0_55, %c0_56] : memref<4x32x1xf32, #tpu.memory_space<vmem>>, vector<1x32x1xf32>
    %105 = vector.shape_cast %104 : vector<1x32x1xf32> to vector<32x1xf32>
    %c2_57 = arith.constant 2 : index
    %c0_58 = arith.constant 0 : index
    %c0_59 = arith.constant 0 : index
    %106 = vector.load %arg6[%c2_57, %c0_58, %c0_59] : memref<4x32x32xbf16, #tpu.memory_space<vmem>>, vector<1x32x32xbf16>
    %107 = vector.shape_cast %106 : vector<1x32x32xbf16> to vector<32x32xbf16>
    %c2_60 = arith.constant 2 : index
    %c0_61 = arith.constant 0 : index
    %c0_62 = arith.constant 0 : index
    %108 = vector.load %arg7[%c2_60, %c0_61, %c0_62] : memref<4x32x1xf32, #tpu.memory_space<vmem>>, vector<1x32x1xf32>
    %109 = vector.shape_cast %108 : vector<1x32x1xf32> to vector<32x1xf32>
    %c8_i32_63 = arith.constant 8 : i32
    %110 = tpu.dynamic_rotate %101 by %c8_i32_63 dim 1 : vector<32x512xf32>, i32 -> vector<32x512xf32>
    %cst_64 = arith.constant 0.000000e+00 : f32
    %111 = vector.shape_cast %24 : vector<1x512xi1> to vector<1x512xi1>
    %112 = vector.broadcast %111 : vector<1x512xi1> to vector<32x512xi1>
    %113 = vector.broadcast %cst_64 : f32 to vector<32x512xf32>
    %114 = arith.select %112, %110, %113 : vector<32x512xi1>, vector<32x512xf32>
    %c4_i32_65 = arith.constant 4 : i32
    %115 = tpu.dynamic_rotate %101 by %c4_i32_65 dim 1 : vector<32x512xf32>, i32 -> vector<32x512xf32>
    %cst_66 = arith.constant 0.000000e+00 : f32
    %116 = vector.shape_cast %22 : vector<1x512xi1> to vector<1x512xi1>
    %117 = vector.broadcast %116 : vector<1x512xi1> to vector<32x512xi1>
    %118 = vector.broadcast %cst_66 : f32 to vector<32x512xf32>
    %119 = arith.select %117, %115, %118 : vector<32x512xi1>, vector<32x512xf32>
    %120 = tpu.concatenate %114, %119, %101 in 0 : vector<32x512xf32>, vector<32x512xf32>, vector<32x512xf32> -> vector<96x512xf32>
    %121 = arith.truncf %120 : vector<96x512xf32> to vector<96x512xbf16>
    %cst_67 = arith.constant dense<0.000000e+00> : vector<32x512xf32>
    %122 = tpu.matmul %103, %121, %cst_67 {dimension_numbers = #tpu.dot_dimension_numbers<[1], [0], [0], [1], [0, 0, 1, 1], [], []>} : vector<32x96xbf16>, vector<96x512xbf16>, vector<32x512xf32> -> vector<32x512xf32>
    %123 = vector.broadcast %105 : vector<32x1xf32> to vector<32x512xf32>
    %124 = arith.addf %122, %123 : vector<32x512xf32>
    %cst_68 = arith.constant 0.000000e+00 : f32
    %125 = vector.broadcast %cst_68 : f32 to vector<32x512xf32>
    %126 = arith.maximumf %124, %125 : vector<32x512xf32>
    %127 = arith.truncf %126 : vector<32x512xf32> to vector<32x512xbf16>
    %cst_69 = arith.constant dense<0.000000e+00> : vector<32x512xf32>
    %128 = tpu.matmul %107, %127, %cst_69 {dimension_numbers = #tpu.dot_dimension_numbers<[1], [0], [0], [1], [0, 0, 1, 1], [], []>} : vector<32x32xbf16>, vector<32x512xbf16>, vector<32x512xf32> -> vector<32x512xf32>
    %129 = arith.addf %101, %128 : vector<32x512xf32>
    %130 = vector.broadcast %109 : vector<32x1xf32> to vector<32x512xf32>
    %131 = arith.addf %129, %130 : vector<32x512xf32>
    %c3 = arith.constant 3 : index
    %c0_70 = arith.constant 0 : index
    %c0_71 = arith.constant 0 : index
    %132 = vector.load %arg4[%c3, %c0_70, %c0_71] : memref<4x32x96xbf16, #tpu.memory_space<vmem>>, vector<1x32x96xbf16>
    %133 = vector.shape_cast %132 : vector<1x32x96xbf16> to vector<32x96xbf16>
    %c3_72 = arith.constant 3 : index
    %c0_73 = arith.constant 0 : index
    %c0_74 = arith.constant 0 : index
    %134 = vector.load %arg5[%c3_72, %c0_73, %c0_74] : memref<4x32x1xf32, #tpu.memory_space<vmem>>, vector<1x32x1xf32>
    %135 = vector.shape_cast %134 : vector<1x32x1xf32> to vector<32x1xf32>
    %c3_75 = arith.constant 3 : index
    %c0_76 = arith.constant 0 : index
    %c0_77 = arith.constant 0 : index
    %136 = vector.load %arg6[%c3_75, %c0_76, %c0_77] : memref<4x32x32xbf16, #tpu.memory_space<vmem>>, vector<1x32x32xbf16>
    %137 = vector.shape_cast %136 : vector<1x32x32xbf16> to vector<32x32xbf16>
    %c3_78 = arith.constant 3 : index
    %c0_79 = arith.constant 0 : index
    %c0_80 = arith.constant 0 : index
    %138 = vector.load %arg7[%c3_78, %c0_79, %c0_80] : memref<4x32x1xf32, #tpu.memory_space<vmem>>, vector<1x32x1xf32>
    %139 = vector.shape_cast %138 : vector<1x32x1xf32> to vector<32x1xf32>
    %c16_i32_81 = arith.constant 16 : i32
    %140 = tpu.dynamic_rotate %131 by %c16_i32_81 dim 1 : vector<32x512xf32>, i32 -> vector<32x512xf32>
    %cst_82 = arith.constant 0.000000e+00 : f32
    %141 = vector.shape_cast %26 : vector<1x512xi1> to vector<1x512xi1>
    %142 = vector.broadcast %141 : vector<1x512xi1> to vector<32x512xi1>
    %143 = vector.broadcast %cst_82 : f32 to vector<32x512xf32>
    %144 = arith.select %142, %140, %143 : vector<32x512xi1>, vector<32x512xf32>
    %c8_i32_83 = arith.constant 8 : i32
    %145 = tpu.dynamic_rotate %131 by %c8_i32_83 dim 1 : vector<32x512xf32>, i32 -> vector<32x512xf32>
    %cst_84 = arith.constant 0.000000e+00 : f32
    %146 = vector.shape_cast %24 : vector<1x512xi1> to vector<1x512xi1>
    %147 = vector.broadcast %146 : vector<1x512xi1> to vector<32x512xi1>
    %148 = vector.broadcast %cst_84 : f32 to vector<32x512xf32>
    %149 = arith.select %147, %145, %148 : vector<32x512xi1>, vector<32x512xf32>
    %150 = tpu.concatenate %144, %149, %131 in 0 : vector<32x512xf32>, vector<32x512xf32>, vector<32x512xf32> -> vector<96x512xf32>
    %151 = arith.truncf %150 : vector<96x512xf32> to vector<96x512xbf16>
    %cst_85 = arith.constant dense<0.000000e+00> : vector<32x512xf32>
    %152 = tpu.matmul %133, %151, %cst_85 {dimension_numbers = #tpu.dot_dimension_numbers<[1], [0], [0], [1], [0, 0, 1, 1], [], []>} : vector<32x96xbf16>, vector<96x512xbf16>, vector<32x512xf32> -> vector<32x512xf32>
    %153 = vector.broadcast %135 : vector<32x1xf32> to vector<32x512xf32>
    %154 = arith.addf %152, %153 : vector<32x512xf32>
    %cst_86 = arith.constant 0.000000e+00 : f32
    %155 = vector.broadcast %cst_86 : f32 to vector<32x512xf32>
    %156 = arith.maximumf %154, %155 : vector<32x512xf32>
    %157 = arith.truncf %156 : vector<32x512xf32> to vector<32x512xbf16>
    %cst_87 = arith.constant dense<0.000000e+00> : vector<32x512xf32>
    %158 = tpu.matmul %137, %157, %cst_87 {dimension_numbers = #tpu.dot_dimension_numbers<[1], [0], [0], [1], [0, 0, 1, 1], [], []>} : vector<32x32xbf16>, vector<32x512xbf16>, vector<32x512xf32> -> vector<32x512xf32>
    %159 = arith.addf %131, %158 : vector<32x512xf32>
    %160 = vector.broadcast %139 : vector<32x1xf32> to vector<32x512xf32>
    %161 = arith.addf %159, %160 : vector<32x512xf32>
    %162 = arith.truncf %161 : vector<32x512xf32> to vector<32x512xbf16>
    %cst_88 = arith.constant dense<0.000000e+00> : vector<16x512xf32>
    %163 = tpu.matmul %36, %162, %cst_88 {dimension_numbers = #tpu.dot_dimension_numbers<[1], [0], [0], [1], [0, 0, 1, 1], [], []>} : vector<16x32xbf16>, vector<32x512xbf16>, vector<16x512xf32> -> vector<16x512xf32>
    %164 = vector.broadcast %37 : vector<16x1xf32> to vector<16x512xf32>
    %165 = arith.addf %163, %164 : vector<16x512xf32>
    %c0_89 = arith.constant 0 : index
    %c0_90 = arith.constant 0 : index
    %c0_91 = arith.constant 0 : index
    %166 = vector.load %arg18[%c0_89, %c0_90, %c0_91] : memref<3x16x512xf32, #tpu.memory_space<vmem>>, vector<1x16x512xf32>
    %167 = vector.shape_cast %166 : vector<1x16x512xf32> to vector<16x512xf32>
    %168 = vector.shape_cast %165 : vector<16x512xf32> to vector<1x16x512xf32>
    tpu.vector_store %arg18[%c0_89, %c0_90, %c0_91], %168 {strides = array<i32>} : memref<3x16x512xf32, #tpu.memory_space<vmem>>, vector<1x16x512xf32>,
    %169 = vector.broadcast %32 : vector<16x1xf32> to vector<16x512xf32>
    %170 = arith.addf %165, %169 : vector<16x512xf32>
    %cst_92 = arith.constant dense<0xFF800000> : vector<512xf32>
    %171 = vector.multi_reduction <maximumf>, %170, %cst_92 [0] : vector<16x512xf32> to vector<512xf32>
    %172 = vector.shape_cast %171 : vector<512xf32> to vector<1x512xf32>
    %173 = vector.broadcast %172 : vector<1x512xf32> to vector<16x512xf32>
    %174 = arith.subf %170, %173 : vector<16x512xf32>
    %175 = math.exp %174 : vector<16x512xf32>
    %cst_93 = arith.constant dense<0.000000e+00> : vector<512xf32>
    %176 = vector.multi_reduction <add>, %175, %cst_93 [0] : vector<16x512xf32> to vector<512xf32>
    %177 = vector.shape_cast %176 : vector<512xf32> to vector<1x512xf32>
    %178 = tpu.reciprocal %177 : vector<1x512xf32> -> vector<1x512xf32>
    %179 = vector.broadcast %178 : vector<1x512xf32> to vector<16x512xf32>
    %180 = arith.mulf %175, %179 : vector<16x512xf32>
    %c0_94 = arith.constant 0 : index
    %c0_95 = arith.constant 0 : index
    %c0_96 = arith.constant 0 : index
    %181 = vector.load %arg10[%c0_94, %c0_95, %c0_96] : memref<2x32x16xbf16, #tpu.memory_space<vmem>>, vector<1x32x16xbf16>
    %182 = vector.shape_cast %181 : vector<1x32x16xbf16> to vector<32x16xbf16>
    %c0_97 = arith.constant 0 : index
    %c0_98 = arith.constant 0 : index
    %c0_99 = arith.constant 0 : index
    %183 = vector.load %arg11[%c0_97, %c0_98, %c0_99] : memref<2x32x1xf32, #tpu.memory_space<vmem>>, vector<1x32x1xf32>
    %184 = vector.shape_cast %183 : vector<1x32x1xf32> to vector<32x1xf32>
    %c0_100 = arith.constant 0 : index
    %c0_101 = arith.constant 0 : index
    %c0_102 = arith.constant 0 : index
    %185 = vector.load %arg16[%c0_100, %c0_101, %c0_102] : memref<2x16x32xbf16, #tpu.memory_space<vmem>>, vector<1x16x32xbf16>
    %186 = vector.shape_cast %185 : vector<1x16x32xbf16> to vector<16x32xbf16>
    %c0_103 = arith.constant 0 : index
    %c0_104 = arith.constant 0 : index
    %c0_105 = arith.constant 0 : index
    %187 = vector.load %arg17[%c0_103, %c0_104, %c0_105] : memref<2x16x1xf32, #tpu.memory_space<vmem>>, vector<1x16x1xf32>
    %188 = vector.shape_cast %187 : vector<1x16x1xf32> to vector<16x1xf32>
    %189 = arith.truncf %180 : vector<16x512xf32> to vector<16x512xbf16>
    %cst_106 = arith.constant dense<0.000000e+00> : vector<32x512xf32>
    %190 = tpu.matmul %182, %189, %cst_106 {dimension_numbers = #tpu.dot_dimension_numbers<[1], [0], [0], [1], [0, 0, 1, 1], [], []>} : vector<32x16xbf16>, vector<16x512xbf16>, vector<32x512xf32> -> vector<32x512xf32>
    %191 = vector.broadcast %184 : vector<32x1xf32> to vector<32x512xf32>
    %192 = arith.addf %190, %191 : vector<32x512xf32>
    %c0_107 = arith.constant 0 : index
    %c0_108 = arith.constant 0 : index
    %c0_109 = arith.constant 0 : index
    %c0_110 = arith.constant 0 : index
    %193 = vector.load %arg12[%c0_107, %c0_108, %c0_109, %c0_110] : memref<2x4x32x96xbf16, #tpu.memory_space<vmem>>, vector<1x1x32x96xbf16>
    %194 = vector.shape_cast %193 : vector<1x1x32x96xbf16> to vector<32x96xbf16>
    %c0_111 = arith.constant 0 : index
    %c0_112 = arith.constant 0 : index
    %c0_113 = arith.constant 0 : index
    %c0_114 = arith.constant 0 : index
    %195 = vector.load %arg13[%c0_111, %c0_112, %c0_113, %c0_114] : memref<2x4x32x1xf32, #tpu.memory_space<vmem>>, vector<1x1x32x1xf32>
    %196 = vector.shape_cast %195 : vector<1x1x32x1xf32> to vector<32x1xf32>
    %c0_115 = arith.constant 0 : index
    %c0_116 = arith.constant 0 : index
    %c0_117 = arith.constant 0 : index
    %c0_118 = arith.constant 0 : index
    %197 = vector.load %arg14[%c0_115, %c0_116, %c0_117, %c0_118] : memref<2x4x32x32xbf16, #tpu.memory_space<vmem>>, vector<1x1x32x32xbf16>
    %198 = vector.shape_cast %197 : vector<1x1x32x32xbf16> to vector<32x32xbf16>
    %c0_119 = arith.constant 0 : index
    %c0_120 = arith.constant 0 : index
    %c0_121 = arith.constant 0 : index
    %c0_122 = arith.constant 0 : index
    %199 = vector.load %arg15[%c0_119, %c0_120, %c0_121, %c0_122] : memref<2x4x32x1xf32, #tpu.memory_space<vmem>>, vector<1x1x32x1xf32>
    %200 = vector.shape_cast %199 : vector<1x1x32x1xf32> to vector<32x1xf32>
    %c2_i32_123 = arith.constant 2 : i32
    %201 = tpu.dynamic_rotate %192 by %c2_i32_123 dim 1 : vector<32x512xf32>, i32 -> vector<32x512xf32>
    %cst_124 = arith.constant 0.000000e+00 : f32
    %202 = vector.shape_cast %20 : vector<1x512xi1> to vector<1x512xi1>
    %203 = vector.broadcast %202 : vector<1x512xi1> to vector<32x512xi1>
    %204 = vector.broadcast %cst_124 : f32 to vector<32x512xf32>
    %205 = arith.select %203, %201, %204 : vector<32x512xi1>, vector<32x512xf32>
    %c1_i32_125 = arith.constant 1 : i32
    %206 = tpu.dynamic_rotate %192 by %c1_i32_125 dim 1 : vector<32x512xf32>, i32 -> vector<32x512xf32>
    %cst_126 = arith.constant 0.000000e+00 : f32
    %207 = vector.shape_cast %18 : vector<1x512xi1> to vector<1x512xi1>
    %208 = vector.broadcast %207 : vector<1x512xi1> to vector<32x512xi1>
    %209 = vector.broadcast %cst_126 : f32 to vector<32x512xf32>
    %210 = arith.select %208, %206, %209 : vector<32x512xi1>, vector<32x512xf32>
    %211 = tpu.concatenate %205, %210, %192 in 0 : vector<32x512xf32>, vector<32x512xf32>, vector<32x512xf32> -> vector<96x512xf32>
    %212 = arith.truncf %211 : vector<96x512xf32> to vector<96x512xbf16>
    %cst_127 = arith.constant dense<0.000000e+00> : vector<32x512xf32>
    %213 = tpu.matmul %194, %212, %cst_127 {dimension_numbers = #tpu.dot_dimension_numbers<[1], [0], [0], [1], [0, 0, 1, 1], [], []>} : vector<32x96xbf16>, vector<96x512xbf16>, vector<32x512xf32> -> vector<32x512xf32>
    %214 = vector.broadcast %196 : vector<32x1xf32> to vector<32x512xf32>
    %215 = arith.addf %213, %214 : vector<32x512xf32>
    %cst_128 = arith.constant 0.000000e+00 : f32
    %216 = vector.broadcast %cst_128 : f32 to vector<32x512xf32>
    %217 = arith.maximumf %215, %216 : vector<32x512xf32>
    %218 = arith.truncf %217 : vector<32x512xf32> to vector<32x512xbf16>
    %cst_129 = arith.constant dense<0.000000e+00> : vector<32x512xf32>
    %219 = tpu.matmul %198, %218, %cst_129 {dimension_numbers = #tpu.dot_dimension_numbers<[1], [0], [0], [1], [0, 0, 1, 1], [], []>} : vector<32x32xbf16>, vector<32x512xbf16>, vector<32x512xf32> -> vector<32x512xf32>
    %220 = arith.addf %192, %219 : vector<32x512xf32>
    %221 = vector.broadcast %200 : vector<32x1xf32> to vector<32x512xf32>
    %222 = arith.addf %220, %221 : vector<32x512xf32>
    %c0_130 = arith.constant 0 : index
    %c1_131 = arith.constant 1 : index
    %c0_132 = arith.constant 0 : index
    %c0_133 = arith.constant 0 : index
    %223 = vector.load %arg12[%c0_130, %c1_131, %c0_132, %c0_133] : memref<2x4x32x96xbf16, #tpu.memory_space<vmem>>, vector<1x1x32x96xbf16>
    %224 = vector.shape_cast %223 : vector<1x1x32x96xbf16> to vector<32x96xbf16>
    %c0_134 = arith.constant 0 : index
    %c1_135 = arith.constant 1 : index
    %c0_136 = arith.constant 0 : index
    %c0_137 = arith.constant 0 : index
    %225 = vector.load %arg13[%c0_134, %c1_135, %c0_136, %c0_137] : memref<2x4x32x1xf32, #tpu.memory_space<vmem>>, vector<1x1x32x1xf32>
    %226 = vector.shape_cast %225 : vector<1x1x32x1xf32> to vector<32x1xf32>
    %c0_138 = arith.constant 0 : index
    %c1_139 = arith.constant 1 : index
    %c0_140 = arith.constant 0 : index
    %c0_141 = arith.constant 0 : index
    %227 = vector.load %arg14[%c0_138, %c1_139, %c0_140, %c0_141] : memref<2x4x32x32xbf16, #tpu.memory_space<vmem>>, vector<1x1x32x32xbf16>
    %228 = vector.shape_cast %227 : vector<1x1x32x32xbf16> to vector<32x32xbf16>
    %c0_142 = arith.constant 0 : index
    %c1_143 = arith.constant 1 : index
    %c0_144 = arith.constant 0 : index
    %c0_145 = arith.constant 0 : index
    %229 = vector.load %arg15[%c0_142, %c1_143, %c0_144, %c0_145] : memref<2x4x32x1xf32, #tpu.memory_space<vmem>>, vector<1x1x32x1xf32>
    %230 = vector.shape_cast %229 : vector<1x1x32x1xf32> to vector<32x1xf32>
    %c4_i32_146 = arith.constant 4 : i32
    %231 = tpu.dynamic_rotate %222 by %c4_i32_146 dim 1 : vector<32x512xf32>, i32 -> vector<32x512xf32>
    %cst_147 = arith.constant 0.000000e+00 : f32
    %232 = vector.shape_cast %22 : vector<1x512xi1> to vector<1x512xi1>
    %233 = vector.broadcast %232 : vector<1x512xi1> to vector<32x512xi1>
    %234 = vector.broadcast %cst_147 : f32 to vector<32x512xf32>
    %235 = arith.select %233, %231, %234 : vector<32x512xi1>, vector<32x512xf32>
    %c2_i32_148 = arith.constant 2 : i32
    %236 = tpu.dynamic_rotate %222 by %c2_i32_148 dim 1 : vector<32x512xf32>, i32 -> vector<32x512xf32>
    %cst_149 = arith.constant 0.000000e+00 : f32
    %237 = vector.shape_cast %20 : vector<1x512xi1> to vector<1x512xi1>
    %238 = vector.broadcast %237 : vector<1x512xi1> to vector<32x512xi1>
    %239 = vector.broadcast %cst_149 : f32 to vector<32x512xf32>
    %240 = arith.select %238, %236, %239 : vector<32x512xi1>, vector<32x512xf32>
    %241 = tpu.concatenate %235, %240, %222 in 0 : vector<32x512xf32>, vector<32x512xf32>, vector<32x512xf32> -> vector<96x512xf32>
    %242 = arith.truncf %241 : vector<96x512xf32> to vector<96x512xbf16>
    %cst_150 = arith.constant dense<0.000000e+00> : vector<32x512xf32>
    %243 = tpu.matmul %224, %242, %cst_150 {dimension_numbers = #tpu.dot_dimension_numbers<[1], [0], [0], [1], [0, 0, 1, 1], [], []>} : vector<32x96xbf16>, vector<96x512xbf16>, vector<32x512xf32> -> vector<32x512xf32>
    %244 = vector.broadcast %226 : vector<32x1xf32> to vector<32x512xf32>
    %245 = arith.addf %243, %244 : vector<32x512xf32>
    %cst_151 = arith.constant 0.000000e+00 : f32
    %246 = vector.broadcast %cst_151 : f32 to vector<32x512xf32>
    %247 = arith.maximumf %245, %246 : vector<32x512xf32>
    %248 = arith.truncf %247 : vector<32x512xf32> to vector<32x512xbf16>
    %cst_152 = arith.constant dense<0.000000e+00> : vector<32x512xf32>
    %249 = tpu.matmul %228, %248, %cst_152 {dimension_numbers = #tpu.dot_dimension_numbers<[1], [0], [0], [1], [0, 0, 1, 1], [], []>} : vector<32x32xbf16>, vector<32x512xbf16>, vector<32x512xf32> -> vector<32x512xf32>
    %250 = arith.addf %222, %249 : vector<32x512xf32>
    %251 = vector.broadcast %230 : vector<32x1xf32> to vector<32x512xf32>
    %252 = arith.addf %250, %251 : vector<32x512xf32>
    %c0_153 = arith.constant 0 : index
    %c2_154 = arith.constant 2 : index
    %c0_155 = arith.constant 0 : index
    %c0_156 = arith.constant 0 : index
    %253 = vector.load %arg12[%c0_153, %c2_154, %c0_155, %c0_156] : memref<2x4x32x96xbf16, #tpu.memory_space<vmem>>, vector<1x1x32x96xbf16>
    %254 = vector.shape_cast %253 : vector<1x1x32x96xbf16> to vector<32x96xbf16>
    %c0_157 = arith.constant 0 : index
    %c2_158 = arith.constant 2 : index
    %c0_159 = arith.constant 0 : index
    %c0_160 = arith.constant 0 : index
    %255 = vector.load %arg13[%c0_157, %c2_158, %c0_159, %c0_160] : memref<2x4x32x1xf32, #tpu.memory_space<vmem>>, vector<1x1x32x1xf32>
    %256 = vector.shape_cast %255 : vector<1x1x32x1xf32> to vector<32x1xf32>
    %c0_161 = arith.constant 0 : index
    %c2_162 = arith.constant 2 : index
    %c0_163 = arith.constant 0 : index
    %c0_164 = arith.constant 0 : index
    %257 = vector.load %arg14[%c0_161, %c2_162, %c0_163, %c0_164] : memref<2x4x32x32xbf16, #tpu.memory_space<vmem>>, vector<1x1x32x32xbf16>
    %258 = vector.shape_cast %257 : vector<1x1x32x32xbf16> to vector<32x32xbf16>
    %c0_165 = arith.constant 0 : index
    %c2_166 = arith.constant 2 : index
    %c0_167 = arith.constant 0 : index
    %c0_168 = arith.constant 0 : index
    %259 = vector.load %arg15[%c0_165, %c2_166, %c0_167, %c0_168] : memref<2x4x32x1xf32, #tpu.memory_space<vmem>>, vector<1x1x32x1xf32>
    %260 = vector.shape_cast %259 : vector<1x1x32x1xf32> to vector<32x1xf32>
    %c8_i32_169 = arith.constant 8 : i32
    %261 = tpu.dynamic_rotate %252 by %c8_i32_169 dim 1 : vector<32x512xf32>, i32 -> vector<32x512xf32>
    %cst_170 = arith.constant 0.000000e+00 : f32
    %262 = vector.shape_cast %24 : vector<1x512xi1> to vector<1x512xi1>
    %263 = vector.broadcast %262 : vector<1x512xi1> to vector<32x512xi1>
    %264 = vector.broadcast %cst_170 : f32 to vector<32x512xf32>
    %265 = arith.select %263, %261, %264 : vector<32x512xi1>, vector<32x512xf32>
    %c4_i32_171 = arith.constant 4 : i32
    %266 = tpu.dynamic_rotate %252 by %c4_i32_171 dim 1 : vector<32x512xf32>, i32 -> vector<32x512xf32>
    %cst_172 = arith.constant 0.000000e+00 : f32
    %267 = vector.shape_cast %22 : vector<1x512xi1> to vector<1x512xi1>
    %268 = vector.broadcast %267 : vector<1x512xi1> to vector<32x512xi1>
    %269 = vector.broadcast %cst_172 : f32 to vector<32x512xf32>
    %270 = arith.select %268, %266, %269 : vector<32x512xi1>, vector<32x512xf32>
    %271 = tpu.concatenate %265, %270, %252 in 0 : vector<32x512xf32>, vector<32x512xf32>, vector<32x512xf32> -> vector<96x512xf32>
    %272 = arith.truncf %271 : vector<96x512xf32> to vector<96x512xbf16>
    %cst_173 = arith.constant dense<0.000000e+00> : vector<32x512xf32>
    %273 = tpu.matmul %254, %272, %cst_173 {dimension_numbers = #tpu.dot_dimension_numbers<[1], [0], [0], [1], [0, 0, 1, 1], [], []>} : vector<32x96xbf16>, vector<96x512xbf16>, vector<32x512xf32> -> vector<32x512xf32>
    %274 = vector.broadcast %256 : vector<32x1xf32> to vector<32x512xf32>
    %275 = arith.addf %273, %274 : vector<32x512xf32>
    %cst_174 = arith.constant 0.000000e+00 : f32
    %276 = vector.broadcast %cst_174 : f32 to vector<32x512xf32>
    %277 = arith.maximumf %275, %276 : vector<32x512xf32>
    %278 = arith.truncf %277 : vector<32x512xf32> to vector<32x512xbf16>
    %cst_175 = arith.constant dense<0.000000e+00> : vector<32x512xf32>
    %279 = tpu.matmul %258, %278, %cst_175 {dimension_numbers = #tpu.dot_dimension_numbers<[1], [0], [0], [1], [0, 0, 1, 1], [], []>} : vector<32x32xbf16>, vector<32x512xbf16>, vector<32x512xf32> -> vector<32x512xf32>
    %280 = arith.addf %252, %279 : vector<32x512xf32>
    %281 = vector.broadcast %260 : vector<32x1xf32> to vector<32x512xf32>
    %282 = arith.addf %280, %281 : vector<32x512xf32>
    %c0_176 = arith.constant 0 : index
    %c3_177 = arith.constant 3 : index
    %c0_178 = arith.constant 0 : index
    %c0_179 = arith.constant 0 : index
    %283 = vector.load %arg12[%c0_176, %c3_177, %c0_178, %c0_179] : memref<2x4x32x96xbf16, #tpu.memory_space<vmem>>, vector<1x1x32x96xbf16>
    %284 = vector.shape_cast %283 : vector<1x1x32x96xbf16> to vector<32x96xbf16>
    %c0_180 = arith.constant 0 : index
    %c3_181 = arith.constant 3 : index
    %c0_182 = arith.constant 0 : index
    %c0_183 = arith.constant 0 : index
    %285 = vector.load %arg13[%c0_180, %c3_181, %c0_182, %c0_183] : memref<2x4x32x1xf32, #tpu.memory_space<vmem>>, vector<1x1x32x1xf32>
    %286 = vector.shape_cast %285 : vector<1x1x32x1xf32> to vector<32x1xf32>
    %c0_184 = arith.constant 0 : index
    %c3_185 = arith.constant 3 : index
    %c0_186 = arith.constant 0 : index
    %c0_187 = arith.constant 0 : index
    %287 = vector.load %arg14[%c0_184, %c3_185, %c0_186, %c0_187] : memref<2x4x32x32xbf16, #tpu.memory_space<vmem>>, vector<1x1x32x32xbf16>
    %288 = vector.shape_cast %287 : vector<1x1x32x32xbf16> to vector<32x32xbf16>
    %c0_188 = arith.constant 0 : index
    %c3_189 = arith.constant 3 : index
    %c0_190 = arith.constant 0 : index
    %c0_191 = arith.constant 0 : index
    %289 = vector.load %arg15[%c0_188, %c3_189, %c0_190, %c0_191] : memref<2x4x32x1xf32, #tpu.memory_space<vmem>>, vector<1x1x32x1xf32>
    %290 = vector.shape_cast %289 : vector<1x1x32x1xf32> to vector<32x1xf32>
    %c16_i32_192 = arith.constant 16 : i32
    %291 = tpu.dynamic_rotate %282 by %c16_i32_192 dim 1 : vector<32x512xf32>, i32 -> vector<32x512xf32>
    %cst_193 = arith.constant 0.000000e+00 : f32
    %292 = vector.shape_cast %26 : vector<1x512xi1> to vector<1x512xi1>
    %293 = vector.broadcast %292 : vector<1x512xi1> to vector<32x512xi1>
    %294 = vector.broadcast %cst_193 : f32 to vector<32x512xf32>
    %295 = arith.select %293, %291, %294 : vector<32x512xi1>, vector<32x512xf32>
    %c8_i32_194 = arith.constant 8 : i32
    %296 = tpu.dynamic_rotate %282 by %c8_i32_194 dim 1 : vector<32x512xf32>, i32 -> vector<32x512xf32>
    %cst_195 = arith.constant 0.000000e+00 : f32
    %297 = vector.shape_cast %24 : vector<1x512xi1> to vector<1x512xi1>
    %298 = vector.broadcast %297 : vector<1x512xi1> to vector<32x512xi1>
    %299 = vector.broadcast %cst_195 : f32 to vector<32x512xf32>
    %300 = arith.select %298, %296, %299 : vector<32x512xi1>, vector<32x512xf32>
    %301 = tpu.concatenate %295, %300, %282 in 0 : vector<32x512xf32>, vector<32x512xf32>, vector<32x512xf32> -> vector<96x512xf32>
    %302 = arith.truncf %301 : vector<96x512xf32> to vector<96x512xbf16>
    %cst_196 = arith.constant dense<0.000000e+00> : vector<32x512xf32>
    %303 = tpu.matmul %284, %302, %cst_196 {dimension_numbers = #tpu.dot_dimension_numbers<[1], [0], [0], [1], [0, 0, 1, 1], [], []>} : vector<32x96xbf16>, vector<96x512xbf16>, vector<32x512xf32> -> vector<32x512xf32>
    %304 = vector.broadcast %286 : vector<32x1xf32> to vector<32x512xf32>
    %305 = arith.addf %303, %304 : vector<32x512xf32>
    %cst_197 = arith.constant 0.000000e+00 : f32
    %306 = vector.broadcast %cst_197 : f32 to vector<32x512xf32>
    %307 = arith.maximumf %305, %306 : vector<32x512xf32>
    %308 = arith.truncf %307 : vector<32x512xf32> to vector<32x512xbf16>
    %cst_198 = arith.constant dense<0.000000e+00> : vector<32x512xf32>
    %309 = tpu.matmul %288, %308, %cst_198 {dimension_numbers = #tpu.dot_dimension_numbers<[1], [0], [0], [1], [0, 0, 1, 1], [], []>} : vector<32x32xbf16>, vector<32x512xbf16>, vector<32x512xf32> -> vector<32x512xf32>
    %310 = arith.addf %282, %309 : vector<32x512xf32>
    %311 = vector.broadcast %290 : vector<32x1xf32> to vector<32x512xf32>
    %312 = arith.addf %310, %311 : vector<32x512xf32>
    %313 = arith.truncf %312 : vector<32x512xf32> to vector<32x512xbf16>
    %cst_199 = arith.constant dense<0.000000e+00> : vector<16x512xf32>
    %314 = tpu.matmul %186, %313, %cst_199 {dimension_numbers = #tpu.dot_dimension_numbers<[1], [0], [0], [1], [0, 0, 1, 1], [], []>} : vector<16x32xbf16>, vector<32x512xbf16>, vector<16x512xf32> -> vector<16x512xf32>
    %315 = vector.broadcast %188 : vector<16x1xf32> to vector<16x512xf32>
    %316 = arith.addf %314, %315 : vector<16x512xf32>
    %c1_200 = arith.constant 1 : index
    %c0_201 = arith.constant 0 : index
    %c0_202 = arith.constant 0 : index
    %317 = vector.load %arg18[%c1_200, %c0_201, %c0_202] : memref<3x16x512xf32, #tpu.memory_space<vmem>>, vector<1x16x512xf32>
    %318 = vector.shape_cast %317 : vector<1x16x512xf32> to vector<16x512xf32>
    %319 = vector.shape_cast %316 : vector<16x512xf32> to vector<1x16x512xf32>
    tpu.vector_store %arg18[%c1_200, %c0_201, %c0_202], %319 {strides = array<i32>} : memref<3x16x512xf32, #tpu.memory_space<vmem>>, vector<1x16x512xf32>,
    %320 = vector.broadcast %32 : vector<16x1xf32> to vector<16x512xf32>
    %321 = arith.addf %316, %320 : vector<16x512xf32>
    %cst_203 = arith.constant dense<0xFF800000> : vector<512xf32>
    %322 = vector.multi_reduction <maximumf>, %321, %cst_203 [0] : vector<16x512xf32> to vector<512xf32>
    %323 = vector.shape_cast %322 : vector<512xf32> to vector<1x512xf32>
    %324 = vector.broadcast %323 : vector<1x512xf32> to vector<16x512xf32>
    %325 = arith.subf %321, %324 : vector<16x512xf32>
    %326 = math.exp %325 : vector<16x512xf32>
    %cst_204 = arith.constant dense<0.000000e+00> : vector<512xf32>
    %327 = vector.multi_reduction <add>, %326, %cst_204 [0] : vector<16x512xf32> to vector<512xf32>
    %328 = vector.shape_cast %327 : vector<512xf32> to vector<1x512xf32>
    %329 = tpu.reciprocal %328 : vector<1x512xf32> -> vector<1x512xf32>
    %330 = vector.broadcast %329 : vector<1x512xf32> to vector<16x512xf32>
    %331 = arith.mulf %326, %330 : vector<16x512xf32>
    %c1_205 = arith.constant 1 : index
    %c0_206 = arith.constant 0 : index
    %c0_207 = arith.constant 0 : index
    %332 = vector.load %arg10[%c1_205, %c0_206, %c0_207] : memref<2x32x16xbf16, #tpu.memory_space<vmem>>, vector<1x32x16xbf16>
    %333 = vector.shape_cast %332 : vector<1x32x16xbf16> to vector<32x16xbf16>
    %c1_208 = arith.constant 1 : index
    %c0_209 = arith.constant 0 : index
    %c0_210 = arith.constant 0 : index
    %334 = vector.load %arg11[%c1_208, %c0_209, %c0_210] : memref<2x32x1xf32, #tpu.memory_space<vmem>>, vector<1x32x1xf32>
    %335 = vector.shape_cast %334 : vector<1x32x1xf32> to vector<32x1xf32>
    %c1_211 = arith.constant 1 : index
    %c0_212 = arith.constant 0 : index
    %c0_213 = arith.constant 0 : index
    %336 = vector.load %arg16[%c1_211, %c0_212, %c0_213] : memref<2x16x32xbf16, #tpu.memory_space<vmem>>, vector<1x16x32xbf16>
    %337 = vector.shape_cast %336 : vector<1x16x32xbf16> to vector<16x32xbf16>
    %c1_214 = arith.constant 1 : index
    %c0_215 = arith.constant 0 : index
    %c0_216 = arith.constant 0 : index
    %338 = vector.load %arg17[%c1_214, %c0_215, %c0_216] : memref<2x16x1xf32, #tpu.memory_space<vmem>>, vector<1x16x1xf32>
    %339 = vector.shape_cast %338 : vector<1x16x1xf32> to vector<16x1xf32>
    %340 = arith.truncf %331 : vector<16x512xf32> to vector<16x512xbf16>
    %cst_217 = arith.constant dense<0.000000e+00> : vector<32x512xf32>
    %341 = tpu.matmul %333, %340, %cst_217 {dimension_numbers = #tpu.dot_dimension_numbers<[1], [0], [0], [1], [0, 0, 1, 1], [], []>} : vector<32x16xbf16>, vector<16x512xbf16>, vector<32x512xf32> -> vector<32x512xf32>
    %342 = vector.broadcast %335 : vector<32x1xf32> to vector<32x512xf32>
    %343 = arith.addf %341, %342 : vector<32x512xf32>
    %c1_218 = arith.constant 1 : index
    %c0_219 = arith.constant 0 : index
    %c0_220 = arith.constant 0 : index
    %c0_221 = arith.constant 0 : index
    %344 = vector.load %arg12[%c1_218, %c0_219, %c0_220, %c0_221] : memref<2x4x32x96xbf16, #tpu.memory_space<vmem>>, vector<1x1x32x96xbf16>
    %345 = vector.shape_cast %344 : vector<1x1x32x96xbf16> to vector<32x96xbf16>
    %c1_222 = arith.constant 1 : index
    %c0_223 = arith.constant 0 : index
    %c0_224 = arith.constant 0 : index
    %c0_225 = arith.constant 0 : index
    %346 = vector.load %arg13[%c1_222, %c0_223, %c0_224, %c0_225] : memref<2x4x32x1xf32, #tpu.memory_space<vmem>>, vector<1x1x32x1xf32>
    %347 = vector.shape_cast %346 : vector<1x1x32x1xf32> to vector<32x1xf32>
    %c1_226 = arith.constant 1 : index
    %c0_227 = arith.constant 0 : index
    %c0_228 = arith.constant 0 : index
    %c0_229 = arith.constant 0 : index
    %348 = vector.load %arg14[%c1_226, %c0_227, %c0_228, %c0_229] : memref<2x4x32x32xbf16, #tpu.memory_space<vmem>>, vector<1x1x32x32xbf16>
    %349 = vector.shape_cast %348 : vector<1x1x32x32xbf16> to vector<32x32xbf16>
    %c1_230 = arith.constant 1 : index
    %c0_231 = arith.constant 0 : index
    %c0_232 = arith.constant 0 : index
    %c0_233 = arith.constant 0 : index
    %350 = vector.load %arg15[%c1_230, %c0_231, %c0_232, %c0_233] : memref<2x4x32x1xf32, #tpu.memory_space<vmem>>, vector<1x1x32x1xf32>
    %351 = vector.shape_cast %350 : vector<1x1x32x1xf32> to vector<32x1xf32>
    %c2_i32_234 = arith.constant 2 : i32
    %352 = tpu.dynamic_rotate %343 by %c2_i32_234 dim 1 : vector<32x512xf32>, i32 -> vector<32x512xf32>
    %cst_235 = arith.constant 0.000000e+00 : f32
    %353 = vector.shape_cast %20 : vector<1x512xi1> to vector<1x512xi1>
    %354 = vector.broadcast %353 : vector<1x512xi1> to vector<32x512xi1>
    %355 = vector.broadcast %cst_235 : f32 to vector<32x512xf32>
    %356 = arith.select %354, %352, %355 : vector<32x512xi1>, vector<32x512xf32>
    %c1_i32_236 = arith.constant 1 : i32
    %357 = tpu.dynamic_rotate %343 by %c1_i32_236 dim 1 : vector<32x512xf32>, i32 -> vector<32x512xf32>
    %cst_237 = arith.constant 0.000000e+00 : f32
    %358 = vector.shape_cast %18 : vector<1x512xi1> to vector<1x512xi1>
    %359 = vector.broadcast %358 : vector<1x512xi1> to vector<32x512xi1>
    %360 = vector.broadcast %cst_237 : f32 to vector<32x512xf32>
    %361 = arith.select %359, %357, %360 : vector<32x512xi1>, vector<32x512xf32>
    %362 = tpu.concatenate %356, %361, %343 in 0 : vector<32x512xf32>, vector<32x512xf32>, vector<32x512xf32> -> vector<96x512xf32>
    %363 = arith.truncf %362 : vector<96x512xf32> to vector<96x512xbf16>
    %cst_238 = arith.constant dense<0.000000e+00> : vector<32x512xf32>
    %364 = tpu.matmul %345, %363, %cst_238 {dimension_numbers = #tpu.dot_dimension_numbers<[1], [0], [0], [1], [0, 0, 1, 1], [], []>} : vector<32x96xbf16>, vector<96x512xbf16>, vector<32x512xf32> -> vector<32x512xf32>
    %365 = vector.broadcast %347 : vector<32x1xf32> to vector<32x512xf32>
    %366 = arith.addf %364, %365 : vector<32x512xf32>
    %cst_239 = arith.constant 0.000000e+00 : f32
    %367 = vector.broadcast %cst_239 : f32 to vector<32x512xf32>
    %368 = arith.maximumf %366, %367 : vector<32x512xf32>
    %369 = arith.truncf %368 : vector<32x512xf32> to vector<32x512xbf16>
    %cst_240 = arith.constant dense<0.000000e+00> : vector<32x512xf32>
    %370 = tpu.matmul %349, %369, %cst_240 {dimension_numbers = #tpu.dot_dimension_numbers<[1], [0], [0], [1], [0, 0, 1, 1], [], []>} : vector<32x32xbf16>, vector<32x512xbf16>, vector<32x512xf32> -> vector<32x512xf32>
    %371 = arith.addf %343, %370 : vector<32x512xf32>
    %372 = vector.broadcast %351 : vector<32x1xf32> to vector<32x512xf32>
    %373 = arith.addf %371, %372 : vector<32x512xf32>
    %c1_241 = arith.constant 1 : index
    %c1_242 = arith.constant 1 : index
    %c0_243 = arith.constant 0 : index
    %c0_244 = arith.constant 0 : index
    %374 = vector.load %arg12[%c1_241, %c1_242, %c0_243, %c0_244] : memref<2x4x32x96xbf16, #tpu.memory_space<vmem>>, vector<1x1x32x96xbf16>
    %375 = vector.shape_cast %374 : vector<1x1x32x96xbf16> to vector<32x96xbf16>
    %c1_245 = arith.constant 1 : index
    %c1_246 = arith.constant 1 : index
    %c0_247 = arith.constant 0 : index
    %c0_248 = arith.constant 0 : index
    %376 = vector.load %arg13[%c1_245, %c1_246, %c0_247, %c0_248] : memref<2x4x32x1xf32, #tpu.memory_space<vmem>>, vector<1x1x32x1xf32>
    %377 = vector.shape_cast %376 : vector<1x1x32x1xf32> to vector<32x1xf32>
    %c1_249 = arith.constant 1 : index
    %c1_250 = arith.constant 1 : index
    %c0_251 = arith.constant 0 : index
    %c0_252 = arith.constant 0 : index
    %378 = vector.load %arg14[%c1_249, %c1_250, %c0_251, %c0_252] : memref<2x4x32x32xbf16, #tpu.memory_space<vmem>>, vector<1x1x32x32xbf16>
    %379 = vector.shape_cast %378 : vector<1x1x32x32xbf16> to vector<32x32xbf16>
    %c1_253 = arith.constant 1 : index
    %c1_254 = arith.constant 1 : index
    %c0_255 = arith.constant 0 : index
    %c0_256 = arith.constant 0 : index
    %380 = vector.load %arg15[%c1_253, %c1_254, %c0_255, %c0_256] : memref<2x4x32x1xf32, #tpu.memory_space<vmem>>, vector<1x1x32x1xf32>
    %381 = vector.shape_cast %380 : vector<1x1x32x1xf32> to vector<32x1xf32>
    %c4_i32_257 = arith.constant 4 : i32
    %382 = tpu.dynamic_rotate %373 by %c4_i32_257 dim 1 : vector<32x512xf32>, i32 -> vector<32x512xf32>
    %cst_258 = arith.constant 0.000000e+00 : f32
    %383 = vector.shape_cast %22 : vector<1x512xi1> to vector<1x512xi1>
    %384 = vector.broadcast %383 : vector<1x512xi1> to vector<32x512xi1>
    %385 = vector.broadcast %cst_258 : f32 to vector<32x512xf32>
    %386 = arith.select %384, %382, %385 : vector<32x512xi1>, vector<32x512xf32>
    %c2_i32_259 = arith.constant 2 : i32
    %387 = tpu.dynamic_rotate %373 by %c2_i32_259 dim 1 : vector<32x512xf32>, i32 -> vector<32x512xf32>
    %cst_260 = arith.constant 0.000000e+00 : f32
    %388 = vector.shape_cast %20 : vector<1x512xi1> to vector<1x512xi1>
    %389 = vector.broadcast %388 : vector<1x512xi1> to vector<32x512xi1>
    %390 = vector.broadcast %cst_260 : f32 to vector<32x512xf32>
    %391 = arith.select %389, %387, %390 : vector<32x512xi1>, vector<32x512xf32>
    %392 = tpu.concatenate %386, %391, %373 in 0 : vector<32x512xf32>, vector<32x512xf32>, vector<32x512xf32> -> vector<96x512xf32>
    %393 = arith.truncf %392 : vector<96x512xf32> to vector<96x512xbf16>
    %cst_261 = arith.constant dense<0.000000e+00> : vector<32x512xf32>
    %394 = tpu.matmul %375, %393, %cst_261 {dimension_numbers = #tpu.dot_dimension_numbers<[1], [0], [0], [1], [0, 0, 1, 1], [], []>} : vector<32x96xbf16>, vector<96x512xbf16>, vector<32x512xf32> -> vector<32x512xf32>
    %395 = vector.broadcast %377 : vector<32x1xf32> to vector<32x512xf32>
    %396 = arith.addf %394, %395 : vector<32x512xf32>
    %cst_262 = arith.constant 0.000000e+00 : f32
    %397 = vector.broadcast %cst_262 : f32 to vector<32x512xf32>
    %398 = arith.maximumf %396, %397 : vector<32x512xf32>
    %399 = arith.truncf %398 : vector<32x512xf32> to vector<32x512xbf16>
    %cst_263 = arith.constant dense<0.000000e+00> : vector<32x512xf32>
    %400 = tpu.matmul %379, %399, %cst_263 {dimension_numbers = #tpu.dot_dimension_numbers<[1], [0], [0], [1], [0, 0, 1, 1], [], []>} : vector<32x32xbf16>, vector<32x512xbf16>, vector<32x512xf32> -> vector<32x512xf32>
    %401 = arith.addf %373, %400 : vector<32x512xf32>
    %402 = vector.broadcast %381 : vector<32x1xf32> to vector<32x512xf32>
    %403 = arith.addf %401, %402 : vector<32x512xf32>
    %c1_264 = arith.constant 1 : index
    %c2_265 = arith.constant 2 : index
    %c0_266 = arith.constant 0 : index
    %c0_267 = arith.constant 0 : index
    %404 = vector.load %arg12[%c1_264, %c2_265, %c0_266, %c0_267] : memref<2x4x32x96xbf16, #tpu.memory_space<vmem>>, vector<1x1x32x96xbf16>
    %405 = vector.shape_cast %404 : vector<1x1x32x96xbf16> to vector<32x96xbf16>
    %c1_268 = arith.constant 1 : index
    %c2_269 = arith.constant 2 : index
    %c0_270 = arith.constant 0 : index
    %c0_271 = arith.constant 0 : index
    %406 = vector.load %arg13[%c1_268, %c2_269, %c0_270, %c0_271] : memref<2x4x32x1xf32, #tpu.memory_space<vmem>>, vector<1x1x32x1xf32>
    %407 = vector.shape_cast %406 : vector<1x1x32x1xf32> to vector<32x1xf32>
    %c1_272 = arith.constant 1 : index
    %c2_273 = arith.constant 2 : index
    %c0_274 = arith.constant 0 : index
    %c0_275 = arith.constant 0 : index
    %408 = vector.load %arg14[%c1_272, %c2_273, %c0_274, %c0_275] : memref<2x4x32x32xbf16, #tpu.memory_space<vmem>>, vector<1x1x32x32xbf16>
    %409 = vector.shape_cast %408 : vector<1x1x32x32xbf16> to vector<32x32xbf16>
    %c1_276 = arith.constant 1 : index
    %c2_277 = arith.constant 2 : index
    %c0_278 = arith.constant 0 : index
    %c0_279 = arith.constant 0 : index
    %410 = vector.load %arg15[%c1_276, %c2_277, %c0_278, %c0_279] : memref<2x4x32x1xf32, #tpu.memory_space<vmem>>, vector<1x1x32x1xf32>
    %411 = vector.shape_cast %410 : vector<1x1x32x1xf32> to vector<32x1xf32>
    %c8_i32_280 = arith.constant 8 : i32
    %412 = tpu.dynamic_rotate %403 by %c8_i32_280 dim 1 : vector<32x512xf32>, i32 -> vector<32x512xf32>
    %cst_281 = arith.constant 0.000000e+00 : f32
    %413 = vector.shape_cast %24 : vector<1x512xi1> to vector<1x512xi1>
    %414 = vector.broadcast %413 : vector<1x512xi1> to vector<32x512xi1>
    %415 = vector.broadcast %cst_281 : f32 to vector<32x512xf32>
    %416 = arith.select %414, %412, %415 : vector<32x512xi1>, vector<32x512xf32>
    %c4_i32_282 = arith.constant 4 : i32
    %417 = tpu.dynamic_rotate %403 by %c4_i32_282 dim 1 : vector<32x512xf32>, i32 -> vector<32x512xf32>
    %cst_283 = arith.constant 0.000000e+00 : f32
    %418 = vector.shape_cast %22 : vector<1x512xi1> to vector<1x512xi1>
    %419 = vector.broadcast %418 : vector<1x512xi1> to vector<32x512xi1>
    %420 = vector.broadcast %cst_283 : f32 to vector<32x512xf32>
    %421 = arith.select %419, %417, %420 : vector<32x512xi1>, vector<32x512xf32>
    %422 = tpu.concatenate %416, %421, %403 in 0 : vector<32x512xf32>, vector<32x512xf32>, vector<32x512xf32> -> vector<96x512xf32>
    %423 = arith.truncf %422 : vector<96x512xf32> to vector<96x512xbf16>
    %cst_284 = arith.constant dense<0.000000e+00> : vector<32x512xf32>
    %424 = tpu.matmul %405, %423, %cst_284 {dimension_numbers = #tpu.dot_dimension_numbers<[1], [0], [0], [1], [0, 0, 1, 1], [], []>} : vector<32x96xbf16>, vector<96x512xbf16>, vector<32x512xf32> -> vector<32x512xf32>
    %425 = vector.broadcast %407 : vector<32x1xf32> to vector<32x512xf32>
    %426 = arith.addf %424, %425 : vector<32x512xf32>
    %cst_285 = arith.constant 0.000000e+00 : f32
    %427 = vector.broadcast %cst_285 : f32 to vector<32x512xf32>
    %428 = arith.maximumf %426, %427 : vector<32x512xf32>
    %429 = arith.truncf %428 : vector<32x512xf32> to vector<32x512xbf16>
    %cst_286 = arith.constant dense<0.000000e+00> : vector<32x512xf32>
    %430 = tpu.matmul %409, %429, %cst_286 {dimension_numbers = #tpu.dot_dimension_numbers<[1], [0], [0], [1], [0, 0, 1, 1], [], []>} : vector<32x32xbf16>, vector<32x512xbf16>, vector<32x512xf32> -> vector<32x512xf32>
    %431 = arith.addf %403, %430 : vector<32x512xf32>
    %432 = vector.broadcast %411 : vector<32x1xf32> to vector<32x512xf32>
    %433 = arith.addf %431, %432 : vector<32x512xf32>
    %c1_287 = arith.constant 1 : index
    %c3_288 = arith.constant 3 : index
    %c0_289 = arith.constant 0 : index
    %c0_290 = arith.constant 0 : index
    %434 = vector.load %arg12[%c1_287, %c3_288, %c0_289, %c0_290] : memref<2x4x32x96xbf16, #tpu.memory_space<vmem>>, vector<1x1x32x96xbf16>
    %435 = vector.shape_cast %434 : vector<1x1x32x96xbf16> to vector<32x96xbf16>
    %c1_291 = arith.constant 1 : index
    %c3_292 = arith.constant 3 : index
    %c0_293 = arith.constant 0 : index
    %c0_294 = arith.constant 0 : index
    %436 = vector.load %arg13[%c1_291, %c3_292, %c0_293, %c0_294] : memref<2x4x32x1xf32, #tpu.memory_space<vmem>>, vector<1x1x32x1xf32>
    %437 = vector.shape_cast %436 : vector<1x1x32x1xf32> to vector<32x1xf32>
    %c1_295 = arith.constant 1 : index
    %c3_296 = arith.constant 3 : index
    %c0_297 = arith.constant 0 : index
    %c0_298 = arith.constant 0 : index
    %438 = vector.load %arg14[%c1_295, %c3_296, %c0_297, %c0_298] : memref<2x4x32x32xbf16, #tpu.memory_space<vmem>>, vector<1x1x32x32xbf16>
    %439 = vector.shape_cast %438 : vector<1x1x32x32xbf16> to vector<32x32xbf16>
    %c1_299 = arith.constant 1 : index
    %c3_300 = arith.constant 3 : index
    %c0_301 = arith.constant 0 : index
    %c0_302 = arith.constant 0 : index
    %440 = vector.load %arg15[%c1_299, %c3_300, %c0_301, %c0_302] : memref<2x4x32x1xf32, #tpu.memory_space<vmem>>, vector<1x1x32x1xf32>
    %441 = vector.shape_cast %440 : vector<1x1x32x1xf32> to vector<32x1xf32>
    %c16_i32_303 = arith.constant 16 : i32
    %442 = tpu.dynamic_rotate %433 by %c16_i32_303 dim 1 : vector<32x512xf32>, i32 -> vector<32x512xf32>
    %cst_304 = arith.constant 0.000000e+00 : f32
    %443 = vector.shape_cast %26 : vector<1x512xi1> to vector<1x512xi1>
    %444 = vector.broadcast %443 : vector<1x512xi1> to vector<32x512xi1>
    %445 = vector.broadcast %cst_304 : f32 to vector<32x512xf32>
    %446 = arith.select %444, %442, %445 : vector<32x512xi1>, vector<32x512xf32>
    %c8_i32_305 = arith.constant 8 : i32
    %447 = tpu.dynamic_rotate %433 by %c8_i32_305 dim 1 : vector<32x512xf32>, i32 -> vector<32x512xf32>
    %cst_306 = arith.constant 0.000000e+00 : f32
    %448 = vector.shape_cast %24 : vector<1x512xi1> to vector<1x512xi1>
    %449 = vector.broadcast %448 : vector<1x512xi1> to vector<32x512xi1>
    %450 = vector.broadcast %cst_306 : f32 to vector<32x512xf32>
    %451 = arith.select %449, %447, %450 : vector<32x512xi1>, vector<32x512xf32>
    %452 = tpu.concatenate %446, %451, %433 in 0 : vector<32x512xf32>, vector<32x512xf32>, vector<32x512xf32> -> vector<96x512xf32>
    %453 = arith.truncf %452 : vector<96x512xf32> to vector<96x512xbf16>
    %cst_307 = arith.constant dense<0.000000e+00> : vector<32x512xf32>
    %454 = tpu.matmul %435, %453, %cst_307 {dimension_numbers = #tpu.dot_dimension_numbers<[1], [0], [0], [1], [0, 0, 1, 1], [], []>} : vector<32x96xbf16>, vector<96x512xbf16>, vector<32x512xf32> -> vector<32x512xf32>
    %455 = vector.broadcast %437 : vector<32x1xf32> to vector<32x512xf32>
    %456 = arith.addf %454, %455 : vector<32x512xf32>
    %cst_308 = arith.constant 0.000000e+00 : f32
    %457 = vector.broadcast %cst_308 : f32 to vector<32x512xf32>
    %458 = arith.maximumf %456, %457 : vector<32x512xf32>
    %459 = arith.truncf %458 : vector<32x512xf32> to vector<32x512xbf16>
    %cst_309 = arith.constant dense<0.000000e+00> : vector<32x512xf32>
    %460 = tpu.matmul %439, %459, %cst_309 {dimension_numbers = #tpu.dot_dimension_numbers<[1], [0], [0], [1], [0, 0, 1, 1], [], []>} : vector<32x32xbf16>, vector<32x512xbf16>, vector<32x512xf32> -> vector<32x512xf32>
    %461 = arith.addf %433, %460 : vector<32x512xf32>
    %462 = vector.broadcast %441 : vector<32x1xf32> to vector<32x512xf32>
    %463 = arith.addf %461, %462 : vector<32x512xf32>
    %464 = arith.truncf %463 : vector<32x512xf32> to vector<32x512xbf16>
    %cst_310 = arith.constant dense<0.000000e+00> : vector<16x512xf32>
    %465 = tpu.matmul %337, %464, %cst_310 {dimension_numbers = #tpu.dot_dimension_numbers<[1], [0], [0], [1], [0, 0, 1, 1], [], []>} : vector<16x32xbf16>, vector<32x512xbf16>, vector<16x512xf32> -> vector<16x512xf32>
    %466 = vector.broadcast %339 : vector<16x1xf32> to vector<16x512xf32>
    %467 = arith.addf %465, %466 : vector<16x512xf32>
    %c2_311 = arith.constant 2 : index
    %c0_312 = arith.constant 0 : index
    %c0_313 = arith.constant 0 : index
    %468 = vector.load %arg18[%c2_311, %c0_312, %c0_313] : memref<3x16x512xf32, #tpu.memory_space<vmem>>, vector<1x16x512xf32>
    %469 = vector.shape_cast %468 : vector<1x16x512xf32> to vector<16x512xf32>
    %470 = vector.shape_cast %467 : vector<16x512xf32> to vector<1x16x512xf32>
    tpu.vector_store %arg18[%c2_311, %c0_312, %c0_313], %470 {strides = array<i32>} : memref<3x16x512xf32, #tpu.memory_space<vmem>>, vector<1x16x512xf32>,
    return
  }
  func.func @transform_0(%arg0: i32) -> (i32, i32) {
    %c0_i32 = arith.constant 0 : i32
    %c0_i32_0 = arith.constant 0 : i32
    return %c0_i32, %arg0 : i32, i32
  }
  func.func @transform_1(%arg0: i32) -> (i32, i32) {
    %c0_i32 = arith.constant 0 : i32
    %c0_i32_0 = arith.constant 0 : i32
    %c0_i32_1 = arith.constant 0 : i32
    return %c0_i32, %c0_i32_0 : i32, i32
  }
  func.func @transform_2(%arg0: i32) -> (i32, i32) {
    %c0_i32 = arith.constant 0 : i32
    %c0_i32_0 = arith.constant 0 : i32
    %c0_i32_1 = arith.constant 0 : i32
    return %c0_i32, %c0_i32_0 : i32, i32
  }
  func.func @transform_3(%arg0: i32) -> (i32, i32, i32) {
    %c0_i32 = arith.constant 0 : i32
    %c0_i32_0 = arith.constant 0 : i32
    %c0_i32_1 = arith.constant 0 : i32
    %c0_i32_2 = arith.constant 0 : i32
    return %c0_i32, %c0_i32_0, %c0_i32_1 : i32, i32, i32
  }
  func.func @transform_4(%arg0: i32) -> (i32, i32, i32) {
    %c0_i32 = arith.constant 0 : i32
    %c0_i32_0 = arith.constant 0 : i32
    %c0_i32_1 = arith.constant 0 : i32
    %c0_i32_2 = arith.constant 0 : i32
    return %c0_i32, %c0_i32_0, %c0_i32_1 : i32, i32, i32
  }
  func.func @transform_5(%arg0: i32) -> (i32, i32, i32) {
    %c0_i32 = arith.constant 0 : i32
    %c0_i32_0 = arith.constant 0 : i32
    %c0_i32_1 = arith.constant 0 : i32
    %c0_i32_2 = arith.constant 0 : i32
    return %c0_i32, %c0_i32_0, %c0_i32_1 : i32, i32, i32
  }
  func.func @transform_6(%arg0: i32) -> (i32, i32, i32) {
    %c0_i32 = arith.constant 0 : i32
    %c0_i32_0 = arith.constant 0 : i32
    %c0_i32_1 = arith.constant 0 : i32
    %c0_i32_2 = arith.constant 0 : i32
    return %c0_i32, %c0_i32_0, %c0_i32_1 : i32, i32, i32
  }
  func.func @transform_7(%arg0: i32) -> (i32, i32) {
    %c0_i32 = arith.constant 0 : i32
    %c0_i32_0 = arith.constant 0 : i32
    %c0_i32_1 = arith.constant 0 : i32
    return %c0_i32, %c0_i32_0 : i32, i32
  }
  func.func @transform_8(%arg0: i32) -> (i32, i32) {
    %c0_i32 = arith.constant 0 : i32
    %c0_i32_0 = arith.constant 0 : i32
    %c0_i32_1 = arith.constant 0 : i32
    return %c0_i32, %c0_i32_0 : i32, i32
  }
  func.func @transform_9(%arg0: i32) -> (i32, i32, i32) {
    %c0_i32 = arith.constant 0 : i32
    %c0_i32_0 = arith.constant 0 : i32
    %c0_i32_1 = arith.constant 0 : i32
    %c0_i32_2 = arith.constant 0 : i32
    return %c0_i32, %c0_i32_0, %c0_i32_1 : i32, i32, i32
  }
  func.func @transform_10(%arg0: i32) -> (i32, i32, i32) {
    %c0_i32 = arith.constant 0 : i32
    %c0_i32_0 = arith.constant 0 : i32
    %c0_i32_1 = arith.constant 0 : i32
    %c0_i32_2 = arith.constant 0 : i32
    return %c0_i32, %c0_i32_0, %c0_i32_1 : i32, i32, i32
  }
  func.func @transform_11(%arg0: i32) -> (i32, i32, i32, i32) {
    %c0_i32 = arith.constant 0 : i32
    %c0_i32_0 = arith.constant 0 : i32
    %c0_i32_1 = arith.constant 0 : i32
    %c0_i32_2 = arith.constant 0 : i32
    %c0_i32_3 = arith.constant 0 : i32
    return %c0_i32, %c0_i32_0, %c0_i32_1, %c0_i32_2 : i32, i32, i32, i32
  }
  func.func @transform_12(%arg0: i32) -> (i32, i32, i32, i32) {
    %c0_i32 = arith.constant 0 : i32
    %c0_i32_0 = arith.constant 0 : i32
    %c0_i32_1 = arith.constant 0 : i32
    %c0_i32_2 = arith.constant 0 : i32
    %c0_i32_3 = arith.constant 0 : i32
    return %c0_i32, %c0_i32_0, %c0_i32_1, %c0_i32_2 : i32, i32, i32, i32
  }
  func.func @transform_13(%arg0: i32) -> (i32, i32, i32, i32) {
    %c0_i32 = arith.constant 0 : i32
    %c0_i32_0 = arith.constant 0 : i32
    %c0_i32_1 = arith.constant 0 : i32
    %c0_i32_2 = arith.constant 0 : i32
    %c0_i32_3 = arith.constant 0 : i32
    return %c0_i32, %c0_i32_0, %c0_i32_1, %c0_i32_2 : i32, i32, i32, i32
  }
  func.func @transform_14(%arg0: i32) -> (i32, i32, i32, i32) {
    %c0_i32 = arith.constant 0 : i32
    %c0_i32_0 = arith.constant 0 : i32
    %c0_i32_1 = arith.constant 0 : i32
    %c0_i32_2 = arith.constant 0 : i32
    %c0_i32_3 = arith.constant 0 : i32
    return %c0_i32, %c0_i32_0, %c0_i32_1, %c0_i32_2 : i32, i32, i32, i32
  }
  func.func @transform_15(%arg0: i32) -> (i32, i32, i32) {
    %c0_i32 = arith.constant 0 : i32
    %c0_i32_0 = arith.constant 0 : i32
    %c0_i32_1 = arith.constant 0 : i32
    %c0_i32_2 = arith.constant 0 : i32
    return %c0_i32, %c0_i32_0, %c0_i32_1 : i32, i32, i32
  }
  func.func @transform_16(%arg0: i32) -> (i32, i32, i32) {
    %c0_i32 = arith.constant 0 : i32
    %c0_i32_0 = arith.constant 0 : i32
    %c0_i32_1 = arith.constant 0 : i32
    %c0_i32_2 = arith.constant 0 : i32
    return %c0_i32, %c0_i32_0, %c0_i32_1 : i32, i32, i32
  }
  func.func @transform_17(%arg0: i32) -> (i32, i32, i32) {
    %c0_i32 = arith.constant 0 : i32
    %c0_i32_0 = arith.constant 0 : i32
    %c0_i32_1 = arith.constant 0 : i32
    return %c0_i32, %c0_i32_0, %arg0 : i32, i32, i32
  }
}

</mosaic_0001>

<bundles_post_ra>
// kernel: tpu_custom_call.1
= control target key start
LH: loop header
LB: loop body
LE: loop exit
PB: predicated region body
PF: predicated region fallthrough
CT: control target
= control target key end

     0   :  { %s13916_s0 = inlined_call_operand.vmem [shape: f32[64,1024], index: 0, kind: input, shape index: {}]   ;;  %s13917_s1 = inlined_call_operand.vmem [shape: bf16[32,64], index: 1, kind: input, shape index: {}]   ;;  %s13918_s2 = inlined_call_operand.vmem [shape: f32[32,1], index: 2, kind: input, shape index: {}]   ;;  %s13919_s3 = inlined_call_operand.vmem [shape: bf16[4,32,96], index: 3, kind: input, shape index: {}]   ;;  %s13920_s4 = inlined_call_operand.vmem [shape: f32[4,32,1], index: 4, kind: input, shape index: {}]   ;;  %s13921_s5 = inlined_call_operand.vmem [shape: bf16[4,32,32], index: 5, kind: input, shape index: {}]   ;;  %s13922_s6 = inlined_call_operand.vmem [shape: f32[4,32,1], index: 6, kind: input, shape index: {}]   ;;  %s13923_s7 = inlined_call_operand.vmem [shape: bf16[16,32], index: 7, kind: input, shape index: {}]   ;;  %s13924_s8 = inlined_call_operand.vmem [shape: f32[16,1], index: 8, kind: input, shape index: {}]   ;;  %s13925_s9 = inlined_call_operand.vmem [shape: bf16[2,32,16], index: 9, kind: input, shape index: {}]   ;;  %s13926_s10 = inlined_call_operand.vmem [shape: f32[2,32,1], index: 10, kind: input, shape index: {}]   ;;  %s13927_s11 = inlined_call_operand.vmem [shape: bf16[2,4,32,96], index: 11, kind: input, shape index: {}]   ;;  %s13928_s12 = inlined_call_operand.vmem [shape: f32[2,4,32,1], index: 12, kind: input, shape index: {}]   ;;  %s13929_s13 = inlined_call_operand.vmem [shape: bf16[2,4,32,32], index: 13, kind: input, shape index: {}]   ;;  %s13930_s14 = inlined_call_operand.vmem [shape: f32[2,4,32,1], index: 14, kind: input, shape index: {}]   ;;  %s13931_s15 = inlined_call_operand.vmem [shape: bf16[2,16,32], index: 15, kind: input, shape index: {}]   ;;  %s13932_s16 = inlined_call_operand.vmem [shape: f32[2,16,1], index: 16, kind: input, shape index: {}]   ;;  %s13933_s17 = inlined_call_operand.hbm [shape: f32[3,16,1024], index: 17, kind: output, shape index: {}]  }
   0x1   :  { %14058 = sst [smem:[#allocation33_spill]] %s13916_s0 }
   0x2   :  { %14059 = sst [smem:[#allocation34_spill]] %s13917_s1 }
   0x3   :  { %14060 = sst [smem:[#allocation35_spill]] %s13918_s2 }
   0x4   :  { %14061 = sst [smem:[#allocation36_spill]] %s13919_s3 }
   0x5   :  { %14062 = sst [smem:[#allocation37_spill]] %s13920_s4 }
   0x6   :  { %14063 = sst [smem:[#allocation38_spill]] %s13921_s5 }
   0x7   :  { %22 = vsyncpa [#allocation4], 0 }
   0x8   :  { %24 = vsyncpa [#allocation4 + $0x1], 0  ;;  %s10292_s24 = smov 0   ;;  %s10294_s25 = smov 0  }
   0x9   :  { %s10296_s26 = smov 0   ;;  %s10298_s27 = smov 0  }
   0xa LB: > { %14064 = sst [smem:[#allocation6_spill]] %s10177_s24  ;;  %s13935_s28 = sadd.s32 4294967295, %s10189_s27   ;;  %s10189_s27 = sphi %s10298_s27, %s14599_s27   ;;  %s10185_s26 = sphi %s10296_s26, %s14602_s26   ;;  %s10181_s25 = sphi %s10294_s25, %s14601_s25   ;;  %s10177_s24 = sphi %s10292_s24, %s14600_s24  }
   0xb   : > { %14065 = sst [smem:[#allocation7_spill]] %s10181_s25  ;;  %s8063_s29 = sadd.s32 4294967294, %s10189_s27  }
   0xc   : > { %14066 = sst [smem:[#allocation8_spill]] %s10185_s26  ;;  %s10315_s0 = sadd.s32 1, %s10189_s27  }
   0xd   : > { %14067 = sst [smem:[#allocation9_spill]] %s10315_s0  ;;  %s37_s30 = sadd.s32 1, %s10185_s26 }
   0xe   : > { %s34_s18 = ssub.s32 %s10189_s27, %s10315_s0  ;;  %p44_p0 = scmp.ne.s32.totalorder %s10185_s26, %s10181_s25 }
   0xf   : > { %p35_p1 = scmp.eq.s32.totalorder %s34_s18, 0  ;;  %p45_p2 = scmp.eq.s32.totalorder %s10189_s27, 0 }
  0x10   : > { %p410_p3 = scmp.eq.s32.totalorder %s13935_s28, 1  ;;  %p415_p4 = scmp.ne.s32.totalorder %s10181_s25, %s10177_s24 }
  0x11   : > { %s10328_s19 = scalar_select %p35_p1, %s10185_s26, %s37_s30  }
  0x12   : > { %p46_p5 = por %p45_p2, %p44_p0  ;;  %p10330_p6 = por %p410_p3, %p44_p0 }
  0x13   : > { %14068 = sst [smem:[#allocation10_spill]] %s10328_s19  ;;  %p416_p7 = scmp.eq.s32.totalorder %s8063_s29, 1 }
  0x14   : > { %p8065_p9 = scmp.ge.s32.totalorder %s10189_s27, 2 }
  0x15   : > { %p10334_p8 = por %p416_p7, %p415_p4 }
  0x16   : > { %480 = sbr.rel (%p8065_p9) target bundleno = 53 (0x35), region = 80 }
  0x17   : > { %s14070_s20 = scalar_select %p10334_p8, 1, 0 }
  0x19   : > { %14071 = sst [smem:[#allocation11_spill]] %s14070_s20 }
  0x1b   : > { %483 = sbr.rel (!%p46_p5) target bundleno = 53 (0x35), region = 84  ;;  %s485_s21 = sand.u32 (%p46_p5), 1, %s10185_s26  }
  0x1c   : > { %s9010_s22 = sshll.u32 (%p46_p5), %s10189_s27, 5  ;;  %s8066_s23 = sshll.u32 (%p46_p5), %s485_s21, 8 }
  0x1d   : > { %s14072_s28 = sld [smem:[#allocation33_spill]] (%p46_p5)  ;;  %s10351_s29 = scalar_lea.vmem (%p46_p5), [#allocation2], %s8066_s23 }
  0x23   : > { %s10346_s19 = scalar_lea.vmem %s14072_s28, %s9010_s22 }
  0x24   : > { %v503_v0 = vld [vmem:[%s10346_s19] sm:$0xff]  ;;  %v505_v1 = vld [vmem:[%s10346_s19 + $0x8] sm:$0xff]  ;;  %v507_v2 = vld [vmem:[%s10346_s19 + $0x10] sm:$0xff] }
  0x25   : > { %504 = vst [vmem:[%s10351_s29] sm:$0xff] %v503_v0  ;;  %506 = vst [vmem:[%s10351_s29 + $0x8] sm:$0xff] %v505_v1  ;;  %v509_v3 = vld [vmem:[%s10346_s19 + $0x18] sm:$0xff]  ;;  %v511_v4 = vld [vmem:[%s10346_s19 + $0x40] sm:$0xff] }
  0x26   : > { %508 = vst [vmem:[%s10351_s29 + $0x10] sm:$0xff] %v507_v2  ;;  %v513_v5 = vld [vmem:[%s10346_s19 + $0x48] sm:$0xff]  ;;  %510 = vst [vmem:[%s10351_s29 + $0x18] sm:$0xff] %v509_v3  ;;  %v515_v6 = vld [vmem:[%s10346_s19 + $0x50] sm:$0xff] }
  0x27   : > { %512 = vst [vmem:[%s10351_s29 + $0x20] sm:$0xff] %v511_v4  ;;  %514 = vst [vmem:[%s10351_s29 + $0x28] sm:$0xff] %v513_v5  ;;  %v517_v7 = vld [vmem:[%s10346_s19 + $0x58] sm:$0xff]  ;;  %v519_v8 = vld [vmem:[%s10346_s19 + $0x80] sm:$0xff] }
  0x28   : > { %516 = vst [vmem:[%s10351_s29 + $0x30] sm:$0xff] %v515_v6  ;;  %518 = vst [vmem:[%s10351_s29 + $0x38] sm:$0xff] %v517_v7  ;;  %v521_v9 = vld [vmem:[%s10346_s19 + $0x88] sm:$0xff]  ;;  %v523_v10 = vld [vmem:[%s10346_s19 + $0x90] sm:$0xff] }
  0x29   : > { %520 = vst [vmem:[%s10351_s29 + $0x40] sm:$0xff] %v519_v8  ;;  %v525_v11 = vld [vmem:[%s10346_s19 + $0x98] sm:$0xff]  ;;  %522 = vst [vmem:[%s10351_s29 + $0x48] sm:$0xff] %v521_v9  ;;  %v527_v12 = vld [vmem:[%s10346_s19 + $0xc0] sm:$0xff] }
  0x2a   : > { %524 = vst [vmem:[%s10351_s29 + $0x50] sm:$0xff] %v523_v10  ;;  %526 = vst [vmem:[%s10351_s29 + $0x58] sm:$0xff] %v525_v11  ;;  %v529_v13 = vld [vmem:[%s10346_s19 + $0xc8] sm:$0xff]  ;;  %v531_v14 = vld [vmem:[%s10346_s19 + $0xd0] sm:$0xff] }
  0x2b   : > { %528 = vst [vmem:[%s10351_s29 + $0x60] sm:$0xff] %v527_v12  ;;  %530 = vst [vmem:[%s10351_s29 + $0x68] sm:$0xff] %v529_v13  ;;  %v533_v15 = vld [vmem:[%s10346_s19 + $0xd8] sm:$0xff]  ;;  %v535_v16 = vld [vmem:[%s10346_s19 + $0x100] sm:$0xff] }
  0x2c   : > { %532 = vst [vmem:[%s10351_s29 + $0x70] sm:$0xff] %v531_v14  ;;  %v537_v17 = vld [vmem:[%s10346_s19 + $0x108] sm:$0xff]  ;;  %534 = vst [vmem:[%s10351_s29 + $0x78] sm:$0xff] %v533_v15  ;;  %v539_v18 = vld [vmem:[%s10346_s19 + $0x110] sm:$0xff] }
  0x2d   : > { %536 = vst [vmem:[%s10351_s29 + $0x80] sm:$0xff] %v535_v16  ;;  %538 = vst [vmem:[%s10351_s29 + $0x88] sm:$0xff] %v537_v17  ;;  %v541_v19 = vld [vmem:[%s10346_s19 + $0x118] sm:$0xff]  ;;  %v543_v20 = vld [vmem:[%s10346_s19 + $0x140] sm:$0xff] }
  0x2e   : > { %540 = vst [vmem:[%s10351_s29 + $0x90] sm:$0xff] %v539_v18  ;;  %542 = vst [vmem:[%s10351_s29 + $0x98] sm:$0xff] %v541_v19  ;;  %v545_v21 = vld [vmem:[%s10346_s19 + $0x148] sm:$0xff]  ;;  %v547_v22 = vld [vmem:[%s10346_s19 + $0x150] sm:$0xff] }
  0x2f   : > { %544 = vst [vmem:[%s10351_s29 + $0xa0] sm:$0xff] %v543_v20  ;;  %v549_v23 = vld [vmem:[%s10346_s19 + $0x158] sm:$0xff]  ;;  %546 = vst [vmem:[%s10351_s29 + $0xa8] sm:$0xff] %v545_v21  ;;  %v551_v24 = vld [vmem:[%s10346_s19 + $0x180] sm:$0xff] }
  0x30   : > { %548 = vst [vmem:[%s10351_s29 + $0xb0] sm:$0xff] %v547_v22  ;;  %550 = vst [vmem:[%s10351_s29 + $0xb8] sm:$0xff] %v549_v23  ;;  %v553_v25 = vld [vmem:[%s10346_s19 + $0x188] sm:$0xff]  ;;  %v555_v26 = vld [vmem:[%s10346_s19 + $0x190] sm:$0xff] }
  0x31   : > { %552 = vst [vmem:[%s10351_s29 + $0xc0] sm:$0xff] %v551_v24  ;;  %554 = vst [vmem:[%s10351_s29 + $0xc8] sm:$0xff] %v553_v25  ;;  %v557_v27 = vld [vmem:[%s10346_s19 + $0x198] sm:$0xff]  ;;  %v559_v28 = vld [vmem:[%s10346_s19 + $0x1c0] sm:$0xff] }
  0x32   : > { %556 = vst [vmem:[%s10351_s29 + $0xd0] sm:$0xff] %v555_v26  ;;  %v561_v29 = vld [vmem:[%s10346_s19 + $0x1c8] sm:$0xff]  ;;  %558 = vst [vmem:[%s10351_s29 + $0xd8] sm:$0xff] %v557_v27  ;;  %v563_v30 = vld [vmem:[%s10346_s19 + $0x1d0] sm:$0xff] }
  0x33   : > { %560 = vst [vmem:[%s10351_s29 + $0xe0] sm:$0xff] %v559_v28  ;;  %562 = vst [vmem:[%s10351_s29 + $0xe8] sm:$0xff] %v561_v29  ;;  %v565_v31 = vld [vmem:[%s10346_s19 + $0x1d8] sm:$0xff] }
  0x34   : > { %564 = vst [vmem:[%s10351_s29 + $0xf0] sm:$0xff] %v563_v30  ;;  %566 = vst [vmem:[%s10351_s29 + $0xf8] sm:$0xff] %v565_v31 }
  0x35 PF: > { %p8069_p10 = scmp.ge.s32.totalorder %s10189_s27, 1  ;;  %p571_p11 = scmp.lt.s32.totalorder %s10189_s27, 3 }
  0x37   : > { %p572_p12 = pnand %p8069_p10, %p571_p11 }
  0x39   : > { %575 = sbr.rel (%p572_p12) target bundleno = 8481 (0x2121), region = 107 }
  0x3e   : > { %s10417_s28 = sand.u32 1, %s10181_s25   ;;  %v13945_v32 = vmov 0   ;;  %s14073_s2 = sld [smem:[#allocation35_spill]]  ;;  %vm802_vm0 = vcmask 523264  }
  0x3f   : > { %s8070_s21 = sshll.u32 %s10417_s28, 8  ;;  %841 = vmatprep.mubr.bf16.mxu0 %v13945_v32  ;;  %894 = vmatprep.mubr.bf16.mxu1 %v13945_v32  ;;  %s14074_s26 = sld [smem:[#allocation34_spill]] }
  0x40   : > { %9063 = vset.pattern.permute.xlu1 %v13945_v32  ;;  %9062 = vset.pattern.permute.xlu0 %v13945_v32  ;;  %s10427_s23 = scalar_lea.vmem [#allocation2], %s8070_s21  ;;  %s13942_s21 = smov 2  }
  0x41   : > { %v737_v34 = vld [vmem:[%s10427_s23 + $0xc8] sm:$0xff]  ;;  %v739_v36 = vld [vmem:[%s10427_s23 + $0xd8] sm:$0xff]  ;;  %v736_v40 = vld [vmem:[%s10427_s23 + $0xc0] sm:$0xff]  ;;  %s14076_s4 = sld [smem:[#allocation37_spill]]  ;;  %s13954_s29 = smov 4  }
  0x42   : > { %v741_v35 = vld [vmem:[%s10427_s23 + $0xe8] sm:$0xff]  ;;  %v743_v39 = vld [vmem:[%s10427_s23 + $0xf8] sm:$0xff]  ;;  %v740_v41 = vld [vmem:[%s10427_s23 + $0xe0] sm:$0xff]  ;;  %s14101_s3 = sld [smem:[#allocation36_spill]]  ;;  %s14121_s19 = smov 4  }
  0x43   : > { %v769_v38 = vpack.c.bf16 %v741_v35, %v737_v34  ;;  %v771_v42 = vpack.c.bf16 %v743_v39, %v739_v36  ;;  %v768_v43 = vpack.c.bf16 %v740_v41, %v736_v40  ;;  %v738_v44 = vld [vmem:[%s10427_s23 + $0xd0] sm:$0xff]  ;;  %v729_v46 = vld [vmem:[%s10427_s23 + $0x88] sm:$0xff]  ;;  %v731_v49 = vld [vmem:[%s10427_s23 + $0x98] sm:$0xff]  ;;  %s14102_s5 = sld [smem:[#allocation38_spill]]  ;;  %s13972_s22 = smov 8  }
  0x44   : > { %v748_v33 = vld [vmem:[%s14073_s2] sm:$0xff]  ;;  %v749_v37 = vld [vmem:[%s14073_s2 + $0x8] sm:$0xff]  ;;  %v742_v45 = vld [vmem:[%s10427_s23 + $0xf0] sm:$0xff]  ;;  %s9012_s24 = smul.u32 192, %s10417_s28  ;;  %s14231_s25 = smov 1  }
  0x45   : > { %774 = vperm.xlu1 %9063, %v748_v33   ;;  %817 = vmatprep.subr.bf16.mxu0 %v769_v38  ;;  %v770_v47 = vpack.c.bf16 %v742_v45, %v738_v44  ;;  %v733_v48 = vld [vmem:[%s10427_s23 + $0xa8] sm:$0xff]  ;;  %v735_v50 = vld [vmem:[%s10427_s23 + $0xb8] sm:$0xff]  ;;  %v728_v53 = vld [vmem:[%s10427_s23 + $0x80] sm:$0xff]  ;;  %s14075_s0 = smov %s14074_s26  ;;  %s14363_s18 = smov 16  }
  0x46   : > { %870 = vmatprep.subr.bf16.mxu1 %v771_v42  ;;  %818 = vmatpush1.bf16.msra.mxu0 %v768_v43  ;;  %v765_v51 = vpack.c.bf16 %v733_v48, %v729_v46  ;;  %v767_v52 = vpack.c.bf16 %v735_v50, %v731_v49  ;;  %v732_v54 = vld [vmem:[%s10427_s23 + $0xa0] sm:$0xff]  ;;  %v730_v55 = vld [vmem:[%s10427_s23 + $0x90] sm:$0xff]  ;;  %v721_v58 = vld [vmem:[%s10427_s23 + $0x48] sm:$0xff]  ;;  %s11723_s20 = scalar_lea.vmem [#allocation3], %s9012_s24 }
  0x47   : > { %871 = vmatpush1.bf16.msra.mxu1 %v770_v47  ;;  %v764_v56 = vpack.c.bf16 %v732_v54, %v728_v53  ;;  %v734_v57 = vld [vmem:[%s10427_s23 + $0xb0] sm:$0xff]  ;;  %v725_v59 = vld [vmem:[%s10427_s23 + $0x68] sm:$0xff]  ;;  %v723_v62 = vld [vmem:[%s10427_s23 + $0x58] sm:$0xff] }
  0x48   : > { %819 = vmatprep.subr.bf16.mxu0 %v765_v51  ;;  %872 = vmatprep.subr.bf16.mxu1 %v767_v52  ;;  %v766_v60 = vpack.c.bf16 %v734_v57, %v730_v55  ;;  %v761_v61 = vpack.c.bf16 %v725_v59, %v721_v58  ;;  %v727_v63 = vld [vmem:[%s10427_s23 + $0x78] sm:$0xff]  ;;  %v720_v0 = vld [vmem:[%s10427_s23 + $0x40] sm:$0xff]  ;;  %v722_v3 = vld [vmem:[%s10427_s23 + $0x50] sm:$0xff] }
  0x49   : > { %779 = vperm.xlu1 %9063, %v749_v37   ;;  %v763_v1 = vpack.c.bf16 %v727_v63, %v723_v62  ;;  %v724_v2 = vld [vmem:[%s10427_s23 + $0x60] sm:$0xff]  ;;  %v726_v4 = vld [vmem:[%s10427_s23 + $0x70] sm:$0xff]  ;;  %v713_v6 = vld [vmem:[%s10427_s23 + $0x8] sm:$0xff] }
  0x4a   : > { %820 = vmatpush1.bf16.msra.mxu0 %v764_v56  ;;  %v760_v5 = vpack.c.bf16 %v724_v2, %v720_v0  ;;  %v717_v7 = vld [vmem:[%s10427_s23 + $0x28] sm:$0xff]  ;;  %v715_v8 = vld [vmem:[%s10427_s23 + $0x18] sm:$0xff]  ;;  %v762_v9 = vpack.c.bf16 %v726_v4, %v722_v3  ;;  %v712_v12 = vld [vmem:[%s10427_s23] sm:$0xff] }
  0x4b   : > { %873 = vmatpush1.bf16.msra.mxu1 %v766_v60  ;;  %821 = vmatprep.subr.bf16.mxu0 %v761_v61  ;;  %v757_v10 = vpack.c.bf16 %v717_v7, %v713_v6  ;;  %v719_v11 = vld [vmem:[%s10427_s23 + $0x38] sm:$0xff]  ;;  %v716_v13 = vld [vmem:[%s10427_s23 + $0x20] sm:$0xff]  ;;  %v714_v15 = vld [vmem:[%s10427_s23 + $0x10] sm:$0xff] }
  0x4c   : > { %874 = vmatprep.subr.bf16.mxu1 %v763_v1  ;;  %v759_v14 = vpack.c.bf16 %v719_v11, %v715_v8  ;;  %v718_v16 = vld [vmem:[%s10427_s23 + $0x30] sm:$0xff]  ;;  %v751_v18 = vld [vmem:[%s14073_s2 + $0x18] sm:$0xff]  ;;  %v756_v19 = vpack.c.bf16 %v716_v13, %v712_v12  ;;  %v10024_v21 = vld [vmem:[%s14074_s26] sm:$0xff]   ;;  %s13939_s26 = smov 1   ;;  %s14104_s23 = smov 2  }
  0x4d   : > { %v750_v17 = vld [vmem:[%s14073_s2 + $0x10] sm:$0xff]  ;;  %v758_v20 = vpack.c.bf16 %v718_v16, %v714_v15  ;;  %v10025_v22 = vld [vmem:[%s14075_s0 + $0x8] sm:$0xff]   ;;  %v922_v13 = vld [vmem:[%s14076_s4 + $0x18] sm:$0xff]  ;;  %s14174_s2 = smov 8   ;;  %s13993_s0 = smov 16  }
  0x4e   : > { %784 = vperm.xlu0 %9062, %v750_v17   ;;  %822 = vmatpush1.bf16.msra.mxu0 %v760_v5  ;;  %v921_v12 = vld [vmem:[%s14076_s4 + $0x10] sm:$0xff]  ;;  %v920_v15 = vld [vmem:[%s14076_s4 + $0x8] sm:$0xff]  ;;  %v930_v17 = vld [vmem:[%s13922_s6 + $0x18] sm:$0xff] }
  0x4f   : > { %875 = vmatpush1.bf16.msra.mxu1 %v762_v9  ;;  %823 = vmatprep.subr.bf16.mxu0 %v757_v10  ;;  %v929_v16 = vld [vmem:[%s13922_s6 + $0x10] sm:$0xff] }
  0x50   : > { %876 = vmatprep.subr.bf16.mxu1 %v759_v14  ;;  %v919_v14 = vld [vmem:[%s14076_s4] sm:$0xff] }
  0x52   : > { %789 = vperm.xlu0 %9062, %v751_v18   ;;  %824 = vmatpush1.bf16.msra.mxu0 %v756_v19  ;;  %v927_v18 = vld [vmem:[%s13922_s6] sm:$0xff]  ;;  %v928_v19 = vld [vmem:[%s13922_s6 + $0x8] sm:$0xff] }
  0x53   : > { %877 = vmatpush1.bf16.msra.mxu1 %v758_v20  ;;  %v13944_v20 = vlaneseq }
  0x55   : > { %8073 = vmatmul.mubr.msk.bf16.vlgmr.msra.gmra.mxu0 %vm802_vm0, %v10024_v21 }
  0x56   : > { %8075 = vmatmul.mubr.msk.bf16.vlgmr.msra.gmra.mxu1 %vm802_vm0, %v10024_v21  ;;  %851 = vmatprep.mubr.bf16.mxu0 %v13945_v32 }
  0x57   : > { %904 = vmatprep.mubr.bf16.mxu1 %v13945_v32 }
  0x5d   : > { %8074 = vmatmul.mubr.msk.bf16.gmra.mxu0 %vm802_vm0, %v10025_v22 }
  0x5e   : > { %8076 = vmatmul.mubr.msk.bf16.gmra.mxu1 %vm802_vm0, %v10025_v22  ;;  %1170 = vmatprep.mubr.bf16.mxu0 %v13945_v32 }
  0x5f   : > { %1223 = vmatprep.mubr.bf16.mxu1 %v13945_v32 }
  0xc0   : > { %v775_v23 = vpop.permute.xlu1 %774 }
  0xc4   : > { %v780_v28 = vpop.permute.xlu1 %779 }
  0xc9   : > { %v785_v34 = vpop.permute.xlu0 %784 }
  0xcd   : > { %v790_v49 = vpop.permute.xlu0 %789 }
 0x115   : > { %v843_v24 = vpop.f32.mrf.mxu0 }
 0x116   : > { %v896_v25 = vpop.f32.mrf.mxu1  ;;  %v10484_v30 = vadd.f32 %v843_v24, %v775_v23 }
 0x117   : > { %v845_v26 = vpop.f32.mrf.mxu0  ;;  %v10496_v42 = vadd.f32 %v896_v25, %v775_v23 }
 0x118   : > { %v898_v27 = vpop.f32.mrf.mxu1  ;;  %v10488_v36 = vadd.f32 %v845_v26, %v775_v23 }
 0x119   : > { %v847_v29 = vpop.f32.mrf.mxu0  ;;  %v10503_v47 = vadd.f32 %v898_v27, %v775_v23  ;;  %v10593_v23 = vand.u32 127, %v13944_v20 }
 0x11a   : > { %v10486_v31 = vadd.f32 %v847_v29, %v780_v28  ;;  %v900_v33 = vpop.f32.mrf.mxu1 }
 0x11b   : > { %v849_v35 = vpop.f32.mrf.mxu0  ;;  %v10490_v37 = vadd.f32 %v900_v33, %v780_v28  ;;  %v634_v25 = vadd.s32 128, %v10593_v23  ;;  %v636_v29 = vadd.s32 384, %v10593_v23  ;;  %v635_v33 = vadd.s32 256, %v10593_v23 }
 0x11c   : > { %v10492_v38 = vadd.f32 %v849_v35, %v780_v28  ;;  %v902_v39 = vpop.f32.mrf.mxu1  ;;  %v9064_v40 = vpack.i.bf16 %v10486_v31, %v10484_v30  ;;  %v1093_v8 = vpack.c.bf16 %v10486_v31, %v10484_v30  ;;  %vm13957_vm1 = vcmp.lt.s32.totalorder %v10593_v23, 1 }
 0x11d   : > { %v853_v41 = vpop.f32.mrf.mxu0  ;;  %v10498_v43 = vadd.f32 %v902_v39, %v780_v28  ;;  %v9069_v50 = vpack.i.bf16 %v10490_v37, %v10496_v42  ;;  %v1095_v9 = vpack.c.bf16 %v10490_v37, %v10496_v42  ;;  %v10602_v28 = vand.u32 127, %v634_v25 }
 0x11e   : > { %v906_v44 = vpop.f32.mrf.mxu1  ;;  %9065 = vrot.lane.b32.xlu0 %v9064_v40, %s13939_s26  ;;  %v9079_v45 = vpack.i.bf16 %v10492_v38, %v10488_v36  ;;  %v10513_v55 = vadd.f32 %v853_v41, %v785_v34  ;;  %v1094_v4 = vpack.c.bf16 %v10492_v38, %v10488_v36  ;;  %v10612_v41 = vand.u32 127, %v636_v29 }
 0x11f   : > { %v855_v46 = vpop.f32.mrf.mxu0  ;;  %v10508_v52 = vadd.f32 %v906_v44, %v785_v34  ;;  %v9084_v54 = vpack.i.bf16 %v10498_v43, %v10503_v47  ;;  %v1096_v5 = vpack.c.bf16 %v10498_v43, %v10503_v47  ;;  %vm686_vm2 = vcmp.ge.s32.totalorder %v10602_v28, 1 }
 0x120   : > { %v908_v48 = vpop.f32.mrf.mxu1  ;;  %9080 = vrot.lane.b32.xlu1 %v9079_v45, %s13939_s26  ;;  %v10521_v60 = vadd.f32 %v855_v46, %v785_v34  ;;  %v10614_v44 = vand.u32 127, %v635_v33  ;;  %vm685_vm3 = vcmp.ge.s32.totalorder %v10593_v23, 1  ;;  %vm13956_vm4 = vcmp.lt.s32.totalorder %v10593_v23, 2  ;;  %vm10637_vm6 = vmpackc.low %vm686_vm2, %vm686_vm2 }
 0x121   : > { %v857_v51 = vpop.f32.mrf.mxu0  ;;  %v10515_v56 = vadd.f32 %v908_v48, %v785_v34  ;;  %vm690_vm5 = vcmp.ge.s32.totalorder %v10602_v28, 2  ;;  %vm688_vm7 = vcmp.ge.s32.totalorder %v10612_v41, 1  ;;  %vm692_vm9 = vcmp.ge.s32.totalorder %v10612_v41, 2  ;;  %vm10662_vm10 = vmpackc.low %vm685_vm3, %vm685_vm3 }
 0x122   : > { %v910_v53 = vpop.f32.mrf.mxu1  ;;  %9070 = vrot.lane.b32.xlu0 %v9069_v50, %s13939_s26  ;;  %v10517_v57 = vadd.f32 %v857_v51, %v790_v49  ;;  %vm687_vm8 = vcmp.ge.s32.totalorder %v10614_v44, 1  ;;  %vm691_vm11 = vcmp.ge.s32.totalorder %v10614_v44, 2  ;;  %vm10678_vm12 = vmpackc.low %vm688_vm7, %vm688_vm7  ;;  %v14083_v33 = vmov 0 }
 0x123   : > { %v10519_v58 = vadd.f32 %v910_v53, %v790_v49  ;;  %v859_v59 = vpop.f32.mrf.mxu0  ;;  %v14084_v33 = vsel %vm10678_vm12, 4294967295, %v14083_v33  ;;  %vm10687_vm13 = vmpackc.low %vm687_vm8, %vm687_vm8  ;;  %vm689_vm15 = vcmp.ge.s32.totalorder %v10593_v23, 2  ;;  %vm13958_vm7 = vcmask 261120  }
 0x124   : > { %v10523_v61 = vadd.f32 %v859_v59, %v790_v49  ;;  %v912_v62 = vpop.f32.mrf.mxu1  ;;  %9085 = vrot.lane.b32.xlu1 %v9084_v54, %s13939_s26  ;;  %v1097_v3 = vpack.c.bf16 %v10517_v57, %v10513_v55  ;;  %v9094_v6 = vpack.i.bf16 %v10517_v57, %v10513_v55  ;;  %14085 = vst [vmem:[#allocation14_spill] sm:$0xff] %v14084_v33  ;;  %vm10718_vm14 = vmpackc.low %vm690_vm5, %vm690_vm5  ;;  %vm13969_vm5 = vcmask 785408  }
 0x125   : > { %v10526_v63 = vadd.f32 %v912_v62, %v790_v49  ;;  %v1099_v1 = vpack.c.bf16 %v10519_v58, %v10508_v52  ;;  %v9099_v10 = vpack.i.bf16 %v10519_v58, %v10508_v52  ;;  %vm10735_vm0 = vmpackc.low %vm692_vm9, %vm692_vm9  ;;  %vm694_vm8 = vcmp.ge.s32.totalorder %v10602_v28, 4 }
 0x126   : > { %9075 = vrot.lane.b32.xlu0 %v9064_v40, %s13942_s21  ;;  %v1098_v0 = vpack.c.bf16 %v10523_v61, %v10521_v60  ;;  %v9119_v7 = vpack.i.bf16 %v10523_v61, %v10521_v60  ;;  %vm10756_vm2 = vmpackc.low %vm689_vm15, %vm689_vm15  ;;  %vm13970_vm9 = vcmp.lt.s32.totalorder %v10593_v23, 4  ;;  %vm693_vm15 = vcmp.ge.s32.totalorder %v10593_v23, 4 }
 0x127   : > { %v1100_v2 = vpack.c.bf16 %v10526_v63, %v10515_v56  ;;  %v9124_v11 = vpack.i.bf16 %v10526_v63, %v10515_v56  ;;  %vm10763_vm3 = vmpackc.low %vm691_vm11, %vm691_vm11  ;;  %vm696_vm11 = vcmp.ge.s32.totalorder %v10612_v41, 4 }
 0x128   : > { %1142 = vmatprep.subr.bf16.mxu0 %v1098_v0  ;;  %9090 = vrot.lane.b32.xlu1 %v9079_v45, %s13942_s21 }
 0x129   : > { %1195 = vmatprep.subr.bf16.mxu1 %v1100_v2  ;;  %1143 = vmatpush1.bf16.msra.mxu0 %v1097_v3 }
 0x12a   : > { %1196 = vmatpush1.bf16.msra.mxu1 %v1099_v1  ;;  %1144 = vmatprep.subr.bf16.mxu0 %v1094_v4 }
 0x12b   : > { %1197 = vmatprep.subr.bf16.mxu1 %v1096_v5  ;;  %9095 = vrot.lane.b32.xlu0 %v9094_v6, %s13939_s26  ;;  %v14077_v5 = vmov 0 }
 0x12c   : > { %9120 = vrot.lane.b32.xlu1 %v9119_v7, %s13939_s26  ;;  %v14078_v5 = vsel %vm10637_vm6, 4294967295, %v14077_v5 }
 0x12d   : > { %1145 = vmatpush1.bf16.msra.mxu0 %v1093_v8  ;;  %14079 = vst [vmem:[#allocation12_spill] sm:$0xff] %v14078_v5 }
 0x12e   : > { %1198 = vmatpush1.bf16.msra.mxu1 %v1095_v9 }
 0x12f   : > { %9100 = vrot.lane.b32.xlu0 %v9099_v10, %s13939_s26 }
 0x130   : > { %9125 = vrot.lane.b32.xlu1 %v9124_v11, %s13939_s26 }
 0x133   : > { %9105 = vrot.lane.b32.xlu0 %v9094_v6, %s13942_s21 }
 0x134   : > { %9130 = vrot.lane.b32.xlu1 %v9119_v7, %s13942_s21 }
 0x137   : > { %9110 = vrot.lane.b32.xlu0 %v9099_v10, %s13942_s21 }
 0x138   : > { %9135 = vrot.lane.b32.xlu1 %v9124_v11, %s13942_s21 }
 0x13b   : > { %9115 = vrot.lane.b32.xlu0 %v9069_v50, %s13942_s21 }
 0x13c   : > { %9140 = vrot.lane.b32.xlu1 %v9084_v54, %s13942_s21  ;;  %s7982_s21 = scalar_lea.sflag [#allocation4], %s10417_s28 }
 0x13f   : > { %1113 = vperm.xlu0 %9062, %v921_v12  }
 0x140   : > { %1118 = vperm.xlu1 %9063, %v922_v13  }
 0x143   : > { %1103 = vperm.xlu0 %9062, %v919_v14  }
 0x144   : > { %1108 = vperm.xlu1 %9063, %v920_v15  }
 0x147   : > { %1419 = vperm.xlu0 %9062, %v929_v16  }
 0x148   : > { %1424 = vperm.xlu1 %9063, %v930_v17  }
 0x14b   : > { %1409 = vperm.xlu0 %9062, %v927_v18  }
 0x14c   : > { %1414 = vperm.xlu1 %9063, %v928_v19   ;;  %v14080_v19 = vmov 0 }
 0x14d   : > { %v14081_v19 = vsel %vm10662_vm10, 4294967295, %v14080_v19 }
 0x14e   : > { %14082 = vst [vmem:[#allocation13_spill] sm:$0xff] %v14081_v19 }
 0x190   : > { %v10588_v21 = vpop.permute.xlu0 %9065 }
 0x191   : > { %v9068_v45 = vunpack.i.h.bf16 %v10588_v21  ;;  %v9067_v46 = vunpack.i.l.bf16 %v10588_v21 }
 0x192   : > { %v10590_v22 = vpop.permute.xlu1 %9080 }
 0x193   : > { %v9083_v35 = vunpack.i.h.bf16 %v10590_v22  ;;  %v9082_v39 = vunpack.i.l.bf16 %v10590_v22 }
 0x194   : > { %v10595_v24 = vpop.permute.xlu0 %9070 }
 0x195   : > { %v9073_v48 = vunpack.i.h.bf16 %v10595_v24  ;;  %v1045_v59 = vsel %vm13957_vm1, %v9067_v46, %v9082_v39  ;;  %v1046_v62 = vsel %vm13957_vm1, %v9068_v45, %v9083_v35  ;;  %v9072_v6 = vunpack.i.l.bf16 %v10595_v24 }
 0x196   : > { %v10598_v26 = vpop.permute.xlu1 %9085  ;;  %v8086_v14 = vpack.c.bf16 %v1046_v62, %v1045_v59 }
 0x197   : > { %v9088_v0 = vunpack.i.h.bf16 %v10598_v26  ;;  %v9087_v1 = vunpack.i.l.bf16 %v10598_v26  ;;  %v10647_v11 = vsel %vm13957_vm1, %v9083_v35, %v9073_v48 }
 0x198   : > { %v10600_v27 = vpop.permute.xlu0 %9075 }
 0x199   : > { %v1037_v15 = vsel %vm13957_vm1, %v9072_v6, %v9087_v1  ;;  %v1038_v16 = vsel %vm13957_vm1, %v9073_v48, %v9088_v0  ;;  %v1049_v21 = vsel %vm13957_vm1, %v9087_v1, %v9067_v46  ;;  %v1050_v1 = vsel %vm13957_vm1, %v9088_v0, %v9068_v45 }
 0x19a   : > { %v10606_v34 = vpop.permute.xlu1 %9090  ;;  %v9077_v22 = vunpack.i.l.bf16 %v10600_v27 }
 0x19d   : > { %v9096_v40 = vpop.permute.xlu0 %9095 }
 0x19e   : > { %v9121_v49 = vpop.permute.xlu1 %9120  ;;  %v9098_v50 = vunpack.i.h.bf16 %v9096_v40  ;;  %v9097_v51 = vunpack.i.l.bf16 %v9096_v40 }
 0x19f   : > { %v9123_v53 = vunpack.i.h.bf16 %v9121_v49  ;;  %v9122_v54 = vunpack.i.l.bf16 %v9121_v49 }
 0x1a1   : > { %v1047_v2 = vsel %vm13957_vm1, %v9097_v51, %v9122_v54  ;;  %v1048_v3 = vsel %vm13957_vm1, %v9098_v50, %v9123_v53  ;;  %v9101_v4 = vpop.permute.xlu0 %9100 }
 0x1a2   : > { %v9103_v7 = vunpack.i.h.bf16 %v9101_v4  ;;  %v9102_v8 = vunpack.i.l.bf16 %v9101_v4  ;;  %v9126_v9 = vpop.permute.xlu1 %9125  ;;  %v8080_v10 = vpack.c.bf16 %v1048_v3, %v1047_v2  ;;  %v9093_v2 = vunpack.i.h.bf16 %v10606_v34 }
 0x1a3   : > { %v9128_v12 = vunpack.i.h.bf16 %v9126_v9  ;;  %v9127_v13 = vunpack.i.l.bf16 %v9126_v9  ;;  %v8112_v3 = vpack.c.bf16 %v1038_v16, %v1037_v15  ;;  %v1041_v4 = vsel %vm13957_vm1, %v9082_v39, %v9072_v6 }
 0x1a4   : > { %v1044_v17 = vsel %vm13957_vm1, %v9123_v53, %v9103_v7  ;;  %v1043_v18 = vsel %vm13957_vm1, %v9122_v54, %v9102_v8  ;;  %8081 = vmatprep.subr.msk.bf16.mxu0 %vm10637_vm6, %v8080_v10  ;;  %v8089_v10 = vpack.c.bf16 %v1050_v1, %v1049_v21  ;;  %v8115_v15 = vpack.c.bf16 %v10647_v11, %v1041_v4 }
 0x1a5   : > { %v1039_v24 = vsel %vm13957_vm1, %v9102_v8, %v9127_v13  ;;  %v1040_v25 = vsel %vm13957_vm1, %v9103_v7, %v9128_v12  ;;  %v1051_v26 = vsel %vm13957_vm1, %v9127_v13, %v9097_v51  ;;  %v9106_v29 = vpop.permute.xlu0 %9105  ;;  %v8109_v35 = vpack.c.bf16 %v1044_v17, %v1043_v18 }
 0x1a6   : > { %v1052_v40 = vsel %vm13957_vm1, %v9128_v12, %v9098_v50  ;;  %v9108_v46 = vunpack.i.h.bf16 %v9106_v29  ;;  %v9131_v48 = vpop.permute.xlu1 %9130  ;;  %v8106_v49 = vpack.c.bf16 %v1040_v25, %v1039_v24  ;;  %v14086_v51 = vmov 0 }
 0x1a7   : > { %v14087_v51 = vsel %vm10687_vm13, 4294967295, %v14086_v51  ;;  %v8083_v53 = vpack.c.bf16 %v1052_v40, %v1051_v26  ;;  %v9107_v54 = vunpack.i.l.bf16 %v9106_v29  ;;  %v9133_v59 = vunpack.i.h.bf16 %v9131_v48 }
 0x1a8   : > { %14088 = vst [vmem:[#allocation15_spill] sm:$0xff] %v14087_v51  ;;  %v9132_v62 = vunpack.i.l.bf16 %v9131_v48  ;;  %v9092_v50 = vunpack.i.l.bf16 %v10606_v34  ;;  %8107 = vmatprep.subr.msk.bf16.mxu1 %vm10678_vm12, %v8106_v49  ;;  %v9078_v7 = vunpack.i.h.bf16 %v10600_v27  ;;  %v14089_v12 = vmov 0 }
 0x1a9   : > { %v975_v45 = vsel %vm13956_vm4, %v9108_v46, %v9133_v59  ;;  %v9111_v0 = vpop.permute.xlu0 %9110  ;;  %8084 = vmatpush1.bf16.msk.msra.mxu0 %vm10662_vm10, %v8083_v53  ;;  %8110 = vmatpush1.bf16.msk.msra.mxu1 %vm10687_vm13, %v8109_v35  ;;  %v14090_v12 = vsel %vm10718_vm14, 4294967295, %v14089_v12  ;;  %v14092_v21 = vmov 0  ;;  %v14095_v49 = vmov 0 }
 0x1aa   : > { %v974_v8 = vsel %vm13956_vm4, %v9107_v54, %v9132_v62  ;;  %v9113_v34 = vunpack.i.h.bf16 %v9111_v0  ;;  %v9112_v9 = vunpack.i.l.bf16 %v9111_v0  ;;  %8087 = vmatprep.subr.msk.bf16.mxu0 %vm10637_vm6, %v8086_v14  ;;  %v9136_v39 = vpop.permute.xlu1 %9135  ;;  %8113 = vmatprep.subr.msk.bf16.mxu1 %vm10678_vm12, %v8112_v3  ;;  %14091 = vst [vmem:[#allocation16_spill] sm:$0xff] %v14090_v12  ;;  %v972_v14 = vsel %vm13956_vm4, %v9077_v22, %v9092_v50 }
 0x1ab   : > { %v8092_v6 = vpack.c.bf16 %v975_v45, %v974_v8  ;;  %v9138_v13 = vunpack.i.h.bf16 %v9136_v39  ;;  %v9137_v27 = vunpack.i.l.bf16 %v9136_v39  ;;  %v973_v16 = vsel %vm13956_vm4, %v9078_v7, %v9093_v2 }
 0x1ac   : > { %v971_v17 = vsel %vm13956_vm4, %v9133_v59, %v9113_v34  ;;  %v970_v18 = vsel %vm13956_vm4, %v9132_v62, %v9112_v9  ;;  %v14093_v21 = vsel %vm10735_vm0, 4294967295, %v14092_v21  ;;  %v14096_v49 = vsel %vm10756_vm2, 4294967295, %v14095_v49 }
 0x1ad   : > { %14094 = vst [vmem:[#allocation17_spill] sm:$0xff] %v14093_v21  ;;  %v966_v11 = vsel %vm13956_vm4, %v9112_v9, %v9137_v27  ;;  %v967_v24 = vsel %vm13956_vm4, %v9113_v34, %v9138_v13  ;;  %v978_v25 = vsel %vm13956_vm4, %v9137_v27, %v9107_v54  ;;  %v9116_v26 = vpop.permute.xlu0 %9115  ;;  %8090 = vmatpush1.bf16.msk.msra.mxu0 %vm10662_vm10, %v8089_v10  ;;  %14097 = vst [vmem:[#allocation18_spill] sm:$0xff] %v14096_v49 }
 0x1ae   : > { %v979_v29 = vsel %vm13956_vm4, %v9138_v13, %v9108_v46  ;;  %v9118_v35 = vunpack.i.h.bf16 %v9116_v26  ;;  %v9117_v40 = vunpack.i.l.bf16 %v9116_v26  ;;  %8093 = vmatprep.subr.msk.bf16.mxu0 %vm10718_vm14, %v8092_v6  ;;  %8116 = vmatpush1.bf16.msk.msra.mxu1 %vm10687_vm13, %v8115_v15  ;;  %v9141_v48 = vpop.permute.xlu1 %9140  ;;  %v8118_v53 = vpack.c.bf16 %v967_v24, %v966_v11 }
 0x1af   : > { %v14098_v46 = vmov 0  ;;  %v8095_v54 = vpack.c.bf16 %v979_v29, %v978_v25  ;;  %v9143_v59 = vunpack.i.h.bf16 %v9141_v48  ;;  %v9142_v62 = vunpack.i.l.bf16 %v9141_v48 }
 0x1b0   : > { %v14099_v46 = vsel %vm10763_vm3, 4294967295, %v14098_v46  ;;  %v8121_v1 = vpack.c.bf16 %v971_v17, %v970_v18  ;;  %v969_v3 = vsel %vm13956_vm4, %v9093_v2, %v9118_v35  ;;  %8119 = vmatprep.subr.msk.bf16.mxu1 %vm10735_vm0, %v8118_v53  ;;  %v8098_v4 = vpack.c.bf16 %v973_v16, %v972_v14 }
 0x1b1   : > { %14100 = vst [vmem:[#allocation19_spill] sm:$0xff] %v14099_v46  ;;  %v968_v8 = vsel %vm13956_vm4, %v9092_v50, %v9117_v40  ;;  %v964_v45 = vsel %vm13956_vm4, %v9117_v40, %v9142_v62  ;;  %v965_v0 = vsel %vm13956_vm4, %v9118_v35, %v9143_v59  ;;  %v976_v34 = vsel %vm13956_vm4, %v9142_v62, %v9077_v22  ;;  %v10026_v22 = vld [vmem:[%s14101_s3] sm:$0xff]  }
 0x1b2   : > { %8096 = vmatpush1.bf16.msk.msra.mxu0 %vm10756_vm2, %v8095_v54  ;;  %v977_v2 = vsel %vm13956_vm4, %v9143_v59, %v9078_v7  ;;  %8122 = vmatpush1.bf16.msk.msra.mxu1 %vm10763_vm3, %v8121_v1  ;;  %v8124_v50 = vpack.c.bf16 %v965_v0, %v964_v45  ;;  %v8127_v39 = vpack.c.bf16 %v969_v3, %v968_v8  ;;  %v10027_v7 = vld [vmem:[%s14101_s3 + $0x8] sm:$0xff]   ;;  %vm695_vm1 = vcmp.ge.s32.totalorder %v10614_v44, 4 }
 0x1b3   : > { %8099 = vmatprep.subr.msk.bf16.mxu0 %vm10718_vm14, %v8098_v4  ;;  %v8101_v9 = vpack.c.bf16 %v977_v2, %v976_v34 }
 0x1b4   : > { %8125 = vmatprep.subr.msk.bf16.mxu1 %vm10735_vm0, %v8124_v50 }
 0x1b6   : > { %8102 = vmatpush1.bf16.msk.msra.mxu0 %vm10756_vm2, %v8101_v9  ;;  %8128 = vmatpush1.bf16.msk.msra.mxu1 %vm10763_vm3, %v8127_v39 }
 0x1b9   : > { %8103 = vmatmul.mubr.msk.bf16.vlgmr.msra.gmra.mxu0 %vm13969_vm5, %v10026_v22  ;;  %8129 = vmatmul.mubr.msk.bf16.vlgmr.msra.gmra.mxu1 %vm13969_vm5, %v10026_v22 }
 0x1ba   : > { %1180 = vmatprep.mubr.bf16.mxu0 %v13945_v32  ;;  %1233 = vmatprep.mubr.bf16.mxu1 %v13945_v32  ;;  %v1114_v14 = vpop.permute.xlu0 %1113 }
 0x1bb   : > { %v1119_v17 = vpop.permute.xlu1 %1118 }
 0x1be   : > { %v1104_v29 = vpop.permute.xlu0 %1103 }
 0x1bf   : > { %v1109_v40 = vpop.permute.xlu1 %1108 }
 0x1c1   : > { %8104 = vmatmul.mubr.msk.bf16.gmra.mxu0 %vm13969_vm5, %v10027_v7  ;;  %8130 = vmatmul.mubr.msk.bf16.gmra.mxu1 %vm13969_vm5, %v10027_v7 }
 0x1c2   : > { %1317 = vmatprep.mubr.bf16.mxu0 %v13945_v32  ;;  %1370 = vmatprep.mubr.bf16.mxu1 %v13945_v32 }
 0x279   : > { %v1172_v6 = vpop.f32.mrf.mxu0  ;;  %v1225_v10 = vpop.f32.mrf.mxu1 }
 0x27a   : > { %v1173_v53 = vadd.f32 %v1172_v6, %v1104_v29 }
 0x27b   : > { %v1174_v13 = vpop.f32.mrf.mxu0  ;;  %v1227_v27 = vpop.f32.mrf.mxu1 }
 0x27c   : > { %v1175_v34 = vadd.f32 %v1174_v13, %v1104_v29  ;;  %v1228_v2 = vadd.f32 %v1227_v27, %v1104_v29 }
 0x27d   : > { %v1176_v15 = vpop.f32.mrf.mxu0  ;;  %v1229_v16 = vpop.f32.mrf.mxu1 }
 0x27e   : > { %v1177_v22 = vadd.f32 %v1176_v15, %v1109_v40  ;;  %v1230_v7 = vadd.f32 %v1229_v16, %v1109_v40  ;;  %v1247_v27 = vmax.f32 %v1228_v2, 0.0 }
 0x27f   : > { %v1178_v18 = vpop.f32.mrf.mxu0  ;;  %v1231_v11 = vpop.f32.mrf.mxu1 }
 0x280   : > { %v1179_v54 = vadd.f32 %v1178_v18, %v1109_v40  ;;  %v1232_v3 = vadd.f32 %v1231_v11, %v1109_v40  ;;  %v1250_v15 = vmax.f32 %v1230_v7, 0.0  ;;  %v1244_v40 = vmax.f32 %v1173_v53, 0.0 }
 0x281   : > { %v1182_v24 = vpop.f32.mrf.mxu0  ;;  %v1235_v25 = vpop.f32.mrf.mxu1 }
 0x282   : > { %v1183_v4 = vadd.f32 %v1182_v24, %v1114_v14  ;;  %v1236_v50 = vadd.f32 %v1235_v25, %v1114_v14  ;;  %v1249_v51 = vmax.f32 %v1179_v54, 0.0 }
 0x283   : > { %v1184_v26 = vpop.f32.mrf.mxu0  ;;  %v1237_v35 = vpop.f32.mrf.mxu1 }
 0x284   : > { %v1185_v59 = vadd.f32 %v1184_v26, %v1114_v14  ;;  %v1238_v8 = vadd.f32 %v1237_v35, %v1114_v14  ;;  %v1252_v19 = vmax.f32 %v1183_v4, 0.0  ;;  %v1226_v35 = vadd.f32 %v1225_v10, %v1104_v29  ;;  %v10028_v29 = vld [vmem:[%s14102_s5] sm:$0xff]  }
 0x285   : > { %v1186_v48 = vpop.f32.mrf.mxu0  ;;  %v1239_v1 = vpop.f32.mrf.mxu1  ;;  %v1254_v33 = vmax.f32 %v1236_v50, 0.0  ;;  %v1248_v14 = vmax.f32 %v1177_v22, 0.0 }
 0x286   : > { %v1187_v62 = vadd.f32 %v1186_v48, %v1119_v17  ;;  %v1240_v45 = vadd.f32 %v1239_v1, %v1119_v17  ;;  %v1253_v6 = vmax.f32 %v1185_v59, 0.0  ;;  %v1251_v48 = vmax.f32 %v1232_v3, 0.0 }
 0x287   : > { %v1188_v0 = vpop.f32.mrf.mxu0  ;;  %v1241_v39 = vpop.f32.mrf.mxu1  ;;  %v1255_v11 = vmax.f32 %v1238_v8, 0.0  ;;  %v1245_v1 = vmax.f32 %v1175_v34, 0.0  ;;  %v1246_v59 = vmax.f32 %v1226_v35, 0.0 }
 0x288   : > { %v1189_v9 = vadd.f32 %v1188_v0, %v1119_v17  ;;  %v1256_v20 = vmax.f32 %v1187_v62, 0.0  ;;  %v1242_v32 = vadd.f32 %v1241_v39, %v1119_v17  ;;  %v1258_v18 = vmax.f32 %v1240_v45, 0.0 }
 0x289   : > { %v1261_v17 = vpack.c.bf16 %v1249_v51, %v1245_v1  ;;  %v1263_v54 = vpack.c.bf16 %v1251_v48, %v1247_v27  ;;  %v1262_v10 = vpack.c.bf16 %v1250_v15, %v1246_v59  ;;  %v1425_v51 = vpop.permute.xlu1 %1424 }
 0x28a   : > { %v1257_v26 = vmax.f32 %v1189_v9, 0.0  ;;  %v1259_v24 = vmax.f32 %v1242_v32, 0.0  ;;  %v1264_v25 = vpack.c.bf16 %v1256_v20, %v1252_v19  ;;  %v1266_v16 = vpack.c.bf16 %v1258_v18, %v1254_v33  ;;  %v10029_v19 = vld [vmem:[%s14102_s5 + $0x8] sm:$0xff]   ;;  %v1420_v33 = vpop.permute.xlu0 %1419 }
 0x28b   : > { %v1260_v32 = vpack.c.bf16 %v1248_v14, %v1244_v40  ;;  %v14103_v20 = vmov 0  }
 0x28c   : > { %v1265_v13 = vpack.c.bf16 %v1257_v26, %v1253_v6  ;;  %v1267_v0 = vpack.c.bf16 %v1259_v24, %v1255_v11 }
 0x28d   : > { %v1415_v39 = vpop.permute.xlu1 %1414 }
 0x28e   : > { %1297 = vmatprep.subr.bf16.mxu0 %v1265_v13  ;;  %1350 = vmatprep.subr.bf16.mxu1 %v1267_v0  ;;  %v1410_v34 = vpop.permute.xlu0 %1409 }
 0x28f   : > { %1298 = vmatpush1.bf16.msra.mxu0 %v1264_v25  ;;  %1351 = vmatpush1.bf16.msra.mxu1 %v1266_v16 }
 0x290   : > { %1299 = vmatprep.subr.bf16.mxu0 %v1261_v17  ;;  %1352 = vmatprep.subr.bf16.mxu1 %v1263_v54 }
 0x293   : > { %1300 = vmatpush1.bf16.msra.mxu0 %v1260_v32  ;;  %1353 = vmatpush1.bf16.msra.mxu1 %v1262_v10 }
 0x296   : > { %8133 = vmatmul.mubr.msk.bf16.vlgmr.msra.gmra.mxu0 %vm13958_vm7, %v10028_v29  ;;  %8135 = vmatmul.mubr.msk.bf16.vlgmr.msra.gmra.mxu1 %vm13958_vm7, %v10028_v29 }
 0x297   : > { %1327 = vmatprep.mubr.bf16.mxu0 %v14103_v20  ;;  %1380 = vmatprep.mubr.bf16.mxu1 %v14103_v20 }
 0x29e   : > { %8134 = vmatmul.mubr.msk.bf16.gmra.mxu0 %vm13958_vm7, %v10029_v19  ;;  %8136 = vmatmul.mubr.msk.bf16.gmra.mxu1 %vm13958_vm7, %v10029_v19  ;;  %vm11048_vm7 = vmpackc.low %vm695_vm1, %vm695_vm1  ;;  %vm14117_vm1 = vcmask 261120  }
 0x29f   : > { %1692 = vmatprep.mubr.bf16.mxu0 %v14103_v20  ;;  %1745 = vmatprep.mubr.bf16.mxu1 %v14103_v20 }
 0x356   : > { %v1319_v53 = vpop.f32.mrf.mxu0  ;;  %v1372_v62 = vpop.f32.mrf.mxu1 }
 0x357   : > { %v1391_v4 = vadd.f32 %v1319_v53, %v10484_v30  ;;  %v1393_v18 = vadd.f32 %v1372_v62, %v10496_v42 }
 0x358   : > { %v1321_v3 = vpop.f32.mrf.mxu0  ;;  %v1374_v8 = vpop.f32.mrf.mxu1 }
 0x359   : > { %v1392_v2 = vadd.f32 %v1321_v3, %v10488_v36  ;;  %v10825_v6 = vadd.f32 %v1410_v34, %v1391_v4  ;;  %v1394_v11 = vadd.f32 %v1374_v8, %v10503_v47  ;;  %v10841_v27 = vadd.f32 %v1410_v34, %v1393_v18  ;;  %v8144_v18 = vld [vmem:[%s14076_s4 + $0x38] sm:$0xff] }
 0x35a   : > { %v1323_v45 = vpop.f32.mrf.mxu0  ;;  %v1376_v9 = vpop.f32.mrf.mxu1 }
 0x35b   : > { %v1395_v50 = vadd.f32 %v1323_v45, %v10486_v31  ;;  %v1397_v22 = vadd.f32 %v1376_v9, %v10490_v37  ;;  %v10833_v31 = vadd.f32 %v1410_v34, %v1392_v2  ;;  %v10848_v25 = vadd.f32 %v1410_v34, %v1394_v11  ;;  %v8151_v11 = vld [vmem:[%s13922_s6 + $0x30] sm:$0xff] }
 0x35c   : > { %v1325_v7 = vpop.f32.mrf.mxu0  ;;  %v1378_v48 = vpop.f32.mrf.mxu1 }
 0x35d   : > { %v10828_v26 = vadd.f32 %v1415_v39, %v1395_v50  ;;  %v1396_v30 = vadd.f32 %v1325_v7, %v10492_v38  ;;  %v1398_v36 = vadd.f32 %v1378_v48, %v10498_v43  ;;  %v10835_v35 = vadd.f32 %v1415_v39, %v1397_v22  ;;  %v8143_v7 = vld [vmem:[%s14076_s4 + $0x30] sm:$0xff]  ;;  %v8142_v48 = vld [vmem:[%s14076_s4 + $0x28] sm:$0xff] }
 0x35e   : > { %v1329_v24 = vpop.f32.mrf.mxu0  ;;  %v1382_v1 = vpop.f32.mrf.mxu1 }
 0x35f   : > { %v10837_v37 = vadd.f32 %v1415_v39, %v1396_v30  ;;  %v9144_v42 = vpack.i.bf16 %v10828_v26, %v10825_v6  ;;  %v10843_v38 = vadd.f32 %v1415_v39, %v1398_v36  ;;  %v9149_v17 = vpack.i.bf16 %v10835_v35, %v10841_v27  ;;  %v8141_v30 = vld [vmem:[%s14076_s4 + $0x20] sm:$0xff]  ;;  %v8152_v36 = vld [vmem:[%s13922_s6 + $0x38] sm:$0xff] }
 0x360   : > { %v1331_v13 = vpop.f32.mrf.mxu0  ;;  %v1384_v14 = vpop.f32.mrf.mxu1  ;;  %v1399_v40 = vadd.f32 %v1329_v24, %v10513_v55  ;;  %v1401_v10 = vadd.f32 %v1382_v1, %v10508_v52  ;;  %v1616_v50 = vpack.c.bf16 %v10828_v26, %v10825_v6  ;;  %v1618_v9 = vpack.c.bf16 %v10835_v35, %v10841_v27  ;;  %v8149_v24 = vld [vmem:[%s13922_s6 + $0x20] sm:$0xff]  ;;  %v8150_v1 = vld [vmem:[%s13922_s6 + $0x28] sm:$0xff] }
 0x361   : > { %9145 = vrot.lane.b32.xlu0 %v9144_v42, %s14104_s23  ;;  %v9159_v43 = vpack.i.bf16 %v10837_v37, %v10833_v31  ;;  %v1400_v0 = vadd.f32 %v1331_v13, %v10521_v60  ;;  %v1402_v54 = vadd.f32 %v1384_v14, %v10515_v56  ;;  %v1617_v45 = vpack.c.bf16 %v10837_v37, %v10833_v31 }
 0x362   : > { %v1333_v47 = vpop.f32.mrf.mxu0  ;;  %v1386_v16 = vpop.f32.mrf.mxu1  ;;  %v10873_v52 = vadd.f32 %v1420_v33, %v1399_v40  ;;  %v10879_v3 = vadd.f32 %v1420_v33, %v1401_v10  ;;  %v1619_v34 = vpack.c.bf16 %v10843_v38, %v10848_v25 }
 0x363   : > { %v1403_v15 = vadd.f32 %v1333_v47, %v10517_v57  ;;  %9160 = vrot.lane.b32.xlu1 %v9159_v43, %s14104_s23  ;;  %v1405_v59 = vadd.f32 %v1386_v16, %v10519_v58  ;;  %v9164_v57 = vpack.i.bf16 %v10843_v38, %v10848_v25  ;;  %v10866_v55 = vadd.f32 %v1420_v33, %v1400_v0 }
 0x364   : > { %v1335_v32 = vpop.f32.mrf.mxu0  ;;  %v1388_v60 = vpop.f32.mrf.mxu1 }
 0x365   : > { %v1404_v29 = vadd.f32 %v1335_v32, %v10523_v61  ;;  %9150 = vrot.lane.b32.xlu0 %v9149_v17, %s14104_s23  ;;  %v10863_v19 = vadd.f32 %v1425_v51, %v1403_v15  ;;  %v1406_v53 = vadd.f32 %v1388_v60, %v10526_v63  ;;  %v10868_v56 = vadd.f32 %v1425_v51, %v1405_v59 }
 0x366   : > { %v10875_v61 = vadd.f32 %v1420_v33, %v1402_v54 }
 0x367   : > { %v10870_v58 = vadd.f32 %v1425_v51, %v1404_v29  ;;  %9165 = vrot.lane.b32.xlu1 %v9164_v57, %s14104_s23  ;;  %v10877_v62 = vadd.f32 %v1425_v51, %v1406_v53  ;;  %v1620_v4 = vpack.c.bf16 %v10863_v19, %v10873_v52  ;;  %v1622_v51 = vpack.c.bf16 %v10868_v56, %v10879_v3 }
 0x368   : > { %v9174_v33 = vpack.i.bf16 %v10863_v19, %v10873_v52  ;;  %v9179_v39 = vpack.i.bf16 %v10868_v56, %v10879_v3 }
 0x369   : > { %9155 = vrot.lane.b32.xlu0 %v9144_v42, %s13954_s29  ;;  %v1621_v63 = vpack.c.bf16 %v10870_v58, %v10866_v55  ;;  %v1623_v8 = vpack.c.bf16 %v10877_v62, %v10875_v61  ;;  %v9199_v2 = vpack.i.bf16 %v10870_v58, %v10866_v55  ;;  %v9204_v22 = vpack.i.bf16 %v10877_v62, %v10875_v61 }
 0x36b   : > { %9170 = vrot.lane.b32.xlu1 %v9159_v43, %s13954_s29  ;;  %1664 = vmatprep.subr.bf16.mxu0 %v1621_v63 }
 0x36c   : > { %1665 = vmatpush1.bf16.msra.mxu0 %v1620_v4  ;;  %1717 = vmatprep.subr.bf16.mxu1 %v1623_v8 }
 0x36d   : > { %1718 = vmatpush1.bf16.msra.mxu1 %v1622_v51  ;;  %9175 = vrot.lane.b32.xlu0 %v9174_v33, %s14104_s23 }
 0x36e   : > { %1666 = vmatprep.subr.bf16.mxu0 %v1617_v45  ;;  %1719 = vmatprep.subr.bf16.mxu1 %v1619_v34 }
 0x36f   : > { %9200 = vrot.lane.b32.xlu1 %v9199_v2, %s14104_s23 }
 0x370   : > { %1667 = vmatpush1.bf16.msra.mxu0 %v1616_v50 }
 0x371   : > { %1720 = vmatpush1.bf16.msra.mxu1 %v1618_v9  ;;  %9180 = vrot.lane.b32.xlu0 %v9179_v39, %s14104_s23 }
 0x373   : > { %9205 = vrot.lane.b32.xlu1 %v9204_v22, %s14104_s23 }
 0x375   : > { %9185 = vrot.lane.b32.xlu0 %v9174_v33, %s13954_s29 }
 0x377   : > { %9210 = vrot.lane.b32.xlu1 %v9199_v2, %s13954_s29 }
 0x379   : > { %9190 = vrot.lane.b32.xlu0 %v9179_v39, %s13954_s29 }
 0x37b   : > { %9215 = vrot.lane.b32.xlu1 %v9204_v22, %s13954_s29 }
 0x37d   : > { %9195 = vrot.lane.b32.xlu0 %v9149_v17, %s13954_s29 }
 0x37f   : > { %9220 = vrot.lane.b32.xlu1 %v9164_v57, %s13954_s29 }
 0x381   : > { %1636 = vperm.xlu0 %9062, %v8143_v7  }
 0x383   : > { %1641 = vperm.xlu1 %9063, %v8144_v18  }
 0x385   : > { %1626 = vperm.xlu0 %9062, %v8141_v30  }
 0x387   : > { %1631 = vperm.xlu1 %9063, %v8142_v48  }
 0x389   : > { %1940 = vperm.xlu0 %9062, %v8151_v11  }
 0x38b   : > { %1945 = vperm.xlu1 %9063, %v8152_v36  }
 0x38d   : > { %1930 = vperm.xlu0 %9062, %v8149_v24  }
 0x38f   : > { %1935 = vperm.xlu1 %9063, %v8150_v1  }
 0x3d3   : > { %v9146_v42 = vpop.permute.xlu0 %9145 }
 0x3d4   : > { %v9148_v17 = vunpack.i.h.bf16 %v9146_v42  ;;  %v9147_v40 = vunpack.i.l.bf16 %v9146_v42 }
 0x3d5   : > { %v9161_v13 = vpop.permute.xlu1 %9160 }
 0x3d6   : > { %v9163_v0 = vunpack.i.h.bf16 %v9161_v13  ;;  %v9162_v15 = vunpack.i.l.bf16 %v9161_v13 }
 0x3d7   : > { %v9151_v14 = vpop.permute.xlu0 %9150 }
 0x3d8   : > { %v1577_v59 = vsel %vm13956_vm4, %v9148_v17, %v9163_v0  ;;  %v1576_v32 = vsel %vm13956_vm4, %v9147_v40, %v9162_v15  ;;  %v9152_v63 = vunpack.i.l.bf16 %v9151_v14  ;;  %v9153_v50 = vunpack.i.h.bf16 %v9151_v14 }
 0x3d9   : > { %v9166_v43 = vpop.permute.xlu1 %9165  ;;  %v8162_v22 = vpack.c.bf16 %v1577_v59, %v1576_v32 }
 0x3da   : > { %v9168_v4 = vunpack.i.h.bf16 %v9166_v43  ;;  %v9167_v8 = vunpack.i.l.bf16 %v9166_v43  ;;  %v1572_v11 = vsel %vm13956_vm4, %v9162_v15, %v9152_v63 }
 0x3db   : > { %v10941_v47 = vpop.permute.xlu0 %9155 }
 0x3dc   : > { %v1569_v36 = vsel %vm13956_vm4, %v9153_v50, %v9168_v4  ;;  %v1581_v24 = vsel %vm13956_vm4, %v9168_v4, %v9148_v17  ;;  %v1568_v1 = vsel %vm13956_vm4, %v9152_v63, %v9167_v8  ;;  %v1580_v17 = vsel %vm13956_vm4, %v9167_v8, %v9147_v40 }
 0x3dd   : > { %v10943_v16 = vpop.permute.xlu1 %9170  ;;  %v8188_v40 = vpack.c.bf16 %v1569_v36, %v1568_v1 }
 0x3df   : > { %v9176_v54 = vpop.permute.xlu0 %9175 }
 0x3e0   : > { %v9178_v29 = vunpack.i.h.bf16 %v9176_v54  ;;  %v9177_v60 = vunpack.i.l.bf16 %v9176_v54 }
 0x3e1   : > { %v9201_v10 = vpop.permute.xlu1 %9200 }
 0x3e2   : > { %v9203_v57 = vunpack.i.h.bf16 %v9201_v10  ;;  %v9202_v53 = vunpack.i.l.bf16 %v9201_v10 }
 0x3e3   : > { %v9181_v51 = vpop.permute.xlu0 %9180 }
 0x3e4   : > { %v1579_v33 = vsel %vm13956_vm4, %v9178_v29, %v9203_v57  ;;  %v1578_v45 = vsel %vm13956_vm4, %v9177_v60, %v9202_v53  ;;  %v9183_v34 = vunpack.i.h.bf16 %v9181_v51  ;;  %v9182_v2 = vunpack.i.l.bf16 %v9181_v51 }
 0x3e5   : > { %v9206_v9 = vpop.permute.xlu1 %9205  ;;  %v8156_v39 = vpack.c.bf16 %v1579_v33, %v1578_v45  ;;  %v9173_v51 = vunpack.i.h.bf16 %v10943_v16  ;;  %v9172_v33 = vunpack.i.l.bf16 %v10943_v16  ;;  %v14105_v16 = vmov 0 }
 0x3e6   : > { %v1574_v7 = vsel %vm13956_vm4, %v9202_v53, %v9182_v2  ;;  %v1575_v18 = vsel %vm13956_vm4, %v9203_v57, %v9183_v34  ;;  %v9208_v30 = vunpack.i.h.bf16 %v9206_v9  ;;  %v9207_v48 = vunpack.i.l.bf16 %v9206_v9 }
 0x3e7   : > { %v9186_v42 = vpop.permute.xlu0 %9185  ;;  %8157 = vmatprep.subr.msk.bf16.mxu0 %vm10718_vm14, %v8156_v39  ;;  %v8185_v54 = vpack.c.bf16 %v1575_v18, %v1574_v7  ;;  %v9157_v9 = vunpack.i.l.bf16 %v10941_v47 }
 0x3e8   : > { %v1571_v13 = vsel %vm13956_vm4, %v9183_v34, %v9208_v30  ;;  %v1583_v14 = vsel %vm13956_vm4, %v9208_v30, %v9178_v29  ;;  %v1570_v43 = vsel %vm13956_vm4, %v9182_v2, %v9207_v48  ;;  %v1582_v15 = vsel %vm13956_vm4, %v9207_v48, %v9177_v60 }
 0x3e9   : > { %v8159_v59 = vpack.c.bf16 %v1583_v14, %v1582_v15  ;;  %v9211_v32 = vpop.permute.xlu1 %9210  ;;  %v8182_v10 = vpack.c.bf16 %v1571_v13, %v1570_v43  ;;  %v9188_v57 = vunpack.i.h.bf16 %v9186_v42  ;;  %v9187_v53 = vunpack.i.l.bf16 %v9186_v42 }
 0x3ea   : > { %v9213_v63 = vunpack.i.h.bf16 %v9211_v32  ;;  %v9212_v4 = vunpack.i.l.bf16 %v9211_v32  ;;  %v1573_v29 = vsel %vm13956_vm4, %v9163_v0, %v9153_v50  ;;  %vm11000_vm4 = vmpackc.low %vm694_vm8, %vm694_vm8  ;;  %v8165_v2 = vpack.c.bf16 %v1581_v24, %v1580_v17 }
 0x3eb   : > { %v9191_v45 = vpop.permute.xlu0 %9190  ;;  %8160 = vmatpush1.bf16.msk.msra.mxu0 %vm10756_vm2, %v8159_v59  ;;  %8183 = vmatprep.subr.msk.bf16.mxu1 %vm10735_vm0, %v8182_v10  ;;  %v14106_v16 = vsel %vm11000_vm4, 4294967295, %v14105_v16  ;;  %v9158_v50 = vunpack.i.h.bf16 %v10941_v47  ;;  %v8191_v7 = vpack.c.bf16 %v1573_v29, %v1572_v11  ;;  %vm11012_vm8 = vmpackc.low %vm696_vm11, %vm696_vm11  ;;  %v14108_v48 = vmov 0 }
 0x3ec   : > { %v1507_v60 = vsel %vm13970_vm9, %v9188_v57, %v9213_v63  ;;  %v1506_v8 = vsel %vm13970_vm9, %v9187_v53, %v9212_v4  ;;  %v9193_v34 = vunpack.i.h.bf16 %v9191_v45  ;;  %v9192_v0 = vunpack.i.l.bf16 %v9191_v45  ;;  %8163 = vmatprep.subr.msk.bf16.mxu0 %vm10718_vm14, %v8162_v22  ;;  %8186 = vmatpush1.bf16.msk.msra.mxu1 %vm10763_vm3, %v8185_v54  ;;  %14107 = vst [vmem:[#allocation20_spill] sm:$0xff] %v14106_v16  ;;  %vm11039_vm11 = vmpackc.low %vm693_vm15, %vm693_vm15 }
 0x3ed   : > { %v9216_v39 = vpop.permute.xlu1 %9215  ;;  %8189 = vmatprep.subr.msk.bf16.mxu1 %vm10735_vm0, %v8188_v40  ;;  %v8168_v22 = vpack.c.bf16 %v1507_v60, %v1506_v8  ;;  %v14109_v48 = vsel %vm11012_vm8, 4294967295, %v14108_v48  ;;  %v1505_v47 = vsel %vm13970_vm9, %v9158_v50, %v9173_v51  ;;  %v1504_v36 = vsel %vm13970_vm9, %v9157_v9, %v9172_v33  ;;  %vm14118_vm15 = vmmov %vm14117_vm1 }
 0x3ee   : > { %v9218_v18 = vunpack.i.h.bf16 %v9216_v39  ;;  %v9217_v30 = vunpack.i.l.bf16 %v9216_v39  ;;  %14110 = vst [vmem:[#allocation21_spill] sm:$0xff] %v14109_v48  ;;  %v1502_v24 = vsel %vm13970_vm9, %v9212_v4, %v9192_v0  ;;  %v1503_v11 = vsel %vm13970_vm9, %v9213_v63, %v9193_v34 }
 0x3ef   : > { %v9196_v1 = vpop.permute.xlu0 %9195  ;;  %8166 = vmatpush1.bf16.msk.msra.mxu0 %vm10756_vm2, %v8165_v2  ;;  %v14111_v15 = vmov 0  ;;  %v8174_v4 = vpack.c.bf16 %v1505_v47, %v1504_v36  ;;  %v8197_v29 = vpack.c.bf16 %v1503_v11, %v1502_v24 }
 0x3f0   : > { %v1499_v42 = vsel %vm13970_vm9, %v9193_v34, %v9218_v18  ;;  %v1511_v13 = vsel %vm13970_vm9, %v9218_v18, %v9188_v57  ;;  %v1498_v14 = vsel %vm13970_vm9, %v9192_v0, %v9217_v30  ;;  %v1510_v43 = vsel %vm13970_vm9, %v9217_v30, %v9187_v53  ;;  %8169 = vmatprep.subr.msk.bf16.mxu0 %vm11000_vm4, %v8168_v22 }
 0x3f1   : > { %v14112_v15 = vsel %vm11039_vm11, 4294967295, %v14111_v15  ;;  %v8171_v17 = vpack.c.bf16 %v1511_v13, %v1510_v43  ;;  %v9198_v54 = vunpack.i.h.bf16 %v9196_v1  ;;  %v9197_v59 = vunpack.i.l.bf16 %v9196_v1  ;;  %8192 = vmatpush1.bf16.msk.msra.mxu1 %vm10763_vm3, %v8191_v7  ;;  %v9221_v32 = vpop.permute.xlu1 %9220 }
 0x3f2   : > { %14113 = vst [vmem:[#allocation22_spill] sm:$0xff] %v14112_v15  ;;  %v8194_v10 = vpack.c.bf16 %v1499_v42, %v1498_v14  ;;  %v14114_v57 = vmov 0  ;;  %v9223_v53 = vunpack.i.h.bf16 %v9221_v32  ;;  %v9222_v63 = vunpack.i.l.bf16 %v9221_v32 }
 0x3f3   : > { %v14115_v57 = vsel %vm11048_vm7, 4294967295, %v14114_v57  ;;  %v1501_v45 = vsel %vm13970_vm9, %v9173_v51, %v9198_v54  ;;  %8172 = vmatpush1.bf16.msk.msra.mxu0 %vm11039_vm11, %v8171_v17  ;;  %v1500_v40 = vsel %vm13970_vm9, %v9172_v33, %v9197_v59 }
 0x3f4   : > { %14116 = vst [vmem:[#allocation23_spill] sm:$0xff] %v14115_v57  ;;  %8195 = vmatprep.subr.msk.bf16.mxu1 %vm11012_vm8, %v8194_v10  ;;  %v1497_v60 = vsel %vm13970_vm9, %v9198_v54, %v9223_v53  ;;  %v1509_v8 = vsel %vm13970_vm9, %v9223_v53, %v9158_v50  ;;  %v1496_v34 = vsel %vm13970_vm9, %v9197_v59, %v9222_v63  ;;  %v10030_v50 = vld [vmem:[%s14101_s3 + $0x10] sm:$0xff]  }
 0x3f5   : > { %8175 = vmatprep.subr.msk.bf16.mxu0 %vm11000_vm4, %v8174_v4  ;;  %v1508_v51 = vsel %vm13970_vm9, %v9222_v63, %v9157_v9  ;;  %8198 = vmatpush1.bf16.msk.msra.mxu1 %vm11048_vm7, %v8197_v29  ;;  %v8200_v0 = vpack.c.bf16 %v1497_v60, %v1496_v34  ;;  %v8203_v2 = vpack.c.bf16 %v1501_v45, %v1500_v40  ;;  %v10031_v9 = vld [vmem:[%s14101_s3 + $0x18] sm:$0xff]   ;;  %vm14120_vm9 = vmmov %vm14117_vm1 }
 0x3f6   : > { %v8177_v33 = vpack.c.bf16 %v1509_v8, %v1508_v51 }
 0x3f7   : > { %8201 = vmatprep.subr.msk.bf16.mxu1 %vm11012_vm8, %v8200_v0 }
 0x3f8   : > { %8178 = vmatpush1.bf16.msk.msra.mxu0 %vm11039_vm11, %v8177_v33 }
 0x3f9   : > { %8204 = vmatpush1.bf16.msk.msra.mxu1 %vm11048_vm7, %v8203_v2 }
 0x3fb   : > { %8179 = vmatmul.mubr.msk.bf16.vlgmr.msra.gmra.mxu0 %vm13969_vm5, %v10030_v50 }
 0x3fc   : > { %8205 = vmatmul.mubr.msk.bf16.vlgmr.msra.gmra.mxu1 %vm13969_vm5, %v10030_v50  ;;  %1702 = vmatprep.mubr.bf16.mxu0 %v14103_v20  ;;  %v1637_v47 = vpop.permute.xlu0 %1636 }
 0x3fd   : > { %1755 = vmatprep.mubr.bf16.mxu1 %v14103_v20 }
 0x3fe   : > { %v1642_v24 = vpop.permute.xlu1 %1641 }
 0x400   : > { %v1627_v43 = vpop.permute.xlu0 %1626 }
 0x402   : > { %v1632_v54 = vpop.permute.xlu1 %1631 }
 0x403   : > { %8180 = vmatmul.mubr.msk.bf16.gmra.mxu0 %vm13969_vm5, %v10031_v9 }
 0x404   : > { %8206 = vmatmul.mubr.msk.bf16.gmra.mxu1 %vm13969_vm5, %v10031_v9  ;;  %1838 = vmatprep.mubr.bf16.mxu0 %v14103_v20  ;;  %vm14119_vm5 = vmmov %vm14117_vm1 }
 0x405   : > { %1891 = vmatprep.mubr.bf16.mxu1 %v14103_v20 }
 0x4bb   : > { %v1694_v39 = vpop.f32.mrf.mxu0 }
 0x4bc   : > { %v1747_v22 = vpop.f32.mrf.mxu1  ;;  %v1695_v32 = vadd.f32 %v1694_v39, %v1627_v43 }
 0x4bd   : > { %v1696_v7 = vpop.f32.mrf.mxu0 }
 0x4be   : > { %v1749_v18 = vpop.f32.mrf.mxu1  ;;  %v1697_v34 = vadd.f32 %v1696_v7, %v1627_v43 }
 0x4bf   : > { %v1698_v30 = vpop.f32.mrf.mxu0  ;;  %v1750_v51 = vadd.f32 %v1749_v18, %v1627_v43 }
 0x4c0   : > { %v1751_v36 = vpop.f32.mrf.mxu1  ;;  %v1699_v50 = vadd.f32 %v1698_v30, %v1632_v54 }
 0x4c1   : > { %v1700_v11 = vpop.f32.mrf.mxu0  ;;  %v1752_v9 = vadd.f32 %v1751_v36, %v1632_v54  ;;  %v1769_v18 = vmax.f32 %v1750_v51, 0.0 }
 0x4c2   : > { %v1753_v1 = vpop.f32.mrf.mxu1  ;;  %v1701_v10 = vadd.f32 %v1700_v11, %v1632_v54 }
 0x4c3   : > { %v1704_v42 = vpop.f32.mrf.mxu0  ;;  %v1754_v29 = vadd.f32 %v1753_v1, %v1632_v54  ;;  %v1772_v30 = vmax.f32 %v1752_v9, 0.0  ;;  %v1766_v54 = vmax.f32 %v1695_v32, 0.0 }
 0x4c4   : > { %v1757_v13 = vpop.f32.mrf.mxu1  ;;  %v1705_v45 = vadd.f32 %v1704_v42, %v1637_v47  ;;  %v1771_v21 = vmax.f32 %v1701_v10, 0.0 }
 0x4c5   : > { %v1706_v14 = vpop.f32.mrf.mxu0  ;;  %v1758_v0 = vadd.f32 %v1757_v13, %v1637_v47 }
 0x4c6   : > { %v1759_v17 = vpop.f32.mrf.mxu1  ;;  %v1707_v53 = vadd.f32 %v1706_v14, %v1637_v47  ;;  %v1774_v12 = vmax.f32 %v1705_v45, 0.0 }
 0x4c7   : > { %v1708_v59 = vpop.f32.mrf.mxu0  ;;  %v1760_v40 = vadd.f32 %v1759_v17, %v1637_v47  ;;  %v1748_v17 = vadd.f32 %v1747_v22, %v1627_v43  ;;  %v1776_v5 = vmax.f32 %v1758_v0, 0.0  ;;  %v1770_v47 = vmax.f32 %v1699_v50, 0.0  ;;  %v10032_v43 = vld [vmem:[%s14102_s5 + $0x10] sm:$0xff]  }
 0x4c8   : > { %v1709_v63 = vadd.f32 %v1708_v59, %v1642_v24  ;;  %v1761_v4 = vpop.f32.mrf.mxu1  ;;  %v1775_v39 = vmax.f32 %v1707_v53, 0.0  ;;  %v1773_v59 = vmax.f32 %v1754_v29, 0.0 }
 0x4c9   : > { %v1762_v60 = vadd.f32 %v1761_v4, %v1642_v24  ;;  %v1710_v8 = vpop.f32.mrf.mxu0  ;;  %v1777_v1 = vmax.f32 %v1760_v40, 0.0  ;;  %v1767_v4 = vmax.f32 %v1697_v34, 0.0  ;;  %v1768_v53 = vmax.f32 %v1748_v17, 0.0 }
 0x4ca   : > { %v1711_v33 = vadd.f32 %v1710_v8, %v1642_v24  ;;  %v1763_v2 = vpop.f32.mrf.mxu1  ;;  %v1778_v46 = vmax.f32 %v1709_v63, 0.0  ;;  %v1785_v10 = vpack.c.bf16 %v1773_v59, %v1769_v18 }
 0x4cb   : > { %v1764_v49 = vadd.f32 %v1763_v2, %v1642_v24  ;;  %v1780_v11 = vmax.f32 %v1762_v60, 0.0  ;;  %v1783_v24 = vpack.c.bf16 %v1771_v21, %v1767_v4  ;;  %v1784_v22 = vpack.c.bf16 %v1772_v30, %v1768_v53  ;;  %v1946_v21 = vpop.permute.xlu1 %1945 }
 0x4cc   : > { %v1779_v14 = vmax.f32 %v1711_v33, 0.0  ;;  %v1786_v13 = vpack.c.bf16 %v1778_v46, %v1774_v12  ;;  %v1941_v12 = vpop.permute.xlu0 %1940 }
 0x4cd   : > { %v1781_v42 = vmax.f32 %v1764_v49, 0.0  ;;  %v1788_v36 = vpack.c.bf16 %v1780_v11, %v1776_v5  ;;  %v1782_v49 = vpack.c.bf16 %v1770_v47, %v1766_v54  ;;  %v10033_v5 = vld [vmem:[%s14102_s5 + $0x18] sm:$0xff]  }
 0x4ce   : > { %v1787_v7 = vpack.c.bf16 %v1779_v14, %v1775_v39 }
 0x4cf   : > { %v1789_v8 = vpack.c.bf16 %v1781_v42, %v1777_v1  ;;  %v1936_v33 = vpop.permute.xlu1 %1935 }
 0x4d0   : > { %1818 = vmatprep.subr.bf16.mxu0 %v1787_v7  ;;  %v1931_v60 = vpop.permute.xlu0 %1930 }
 0x4d1   : > { %1819 = vmatpush1.bf16.msra.mxu0 %v1786_v13  ;;  %1871 = vmatprep.subr.bf16.mxu1 %v1789_v8 }
 0x4d2   : > { %1820 = vmatprep.subr.bf16.mxu0 %v1783_v24  ;;  %1872 = vmatpush1.bf16.msra.mxu1 %v1788_v36 }
 0x4d3   : > { %1873 = vmatprep.subr.bf16.mxu1 %v1785_v10 }
 0x4d5   : > { %1821 = vmatpush1.bf16.msra.mxu0 %v1782_v49 }
 0x4d6   : > { %1874 = vmatpush1.bf16.msra.mxu1 %v1784_v22 }
 0x4d8   : > { %8209 = vmatmul.mubr.msk.bf16.vlgmr.msra.gmra.mxu0 %vm14117_vm1, %v10032_v43 }
 0x4d9   : > { %8211 = vmatmul.mubr.msk.bf16.vlgmr.msra.gmra.mxu1 %vm14118_vm15, %v10032_v43  ;;  %1848 = vmatprep.mubr.bf16.mxu0 %v14103_v20 }
 0x4da   : > { %1901 = vmatprep.mubr.bf16.mxu1 %v14103_v20 }
 0x4e0   : > { %8210 = vmatmul.mubr.msk.bf16.gmra.mxu0 %vm14119_vm5, %v10033_v5  ;;  %vm14122_vm5 = vcmp.lt.s32.totalorder %v10593_v23, 4 }
 0x4e1   : > { %8212 = vmatmul.mubr.msk.bf16.gmra.mxu1 %vm14120_vm9, %v10033_v5  ;;  %2213 = vmatprep.mubr.bf16.mxu0 %v14103_v20  ;;  %vm14123_vm9 = vmmov %vm14122_vm5 }
 0x4e2   : > { %2266 = vmatprep.mubr.bf16.mxu1 %v14103_v20  ;;  %vm14125_vm15 = vmmov %vm14122_vm5 }
 0x4e3   : > { %vm14126_vm2 = vmmov %vm14122_vm5 }
 0x4e4   : > { %vm14129_vm3 = vmmov %vm14126_vm2 }
 0x4e5   : > { %vm14130_vm0 = vmmov %vm14126_vm2 }
 0x598   : > { %v1840_v46 = vpop.f32.mrf.mxu0 }
 0x599   : > { %v1893_v32 = vpop.f32.mrf.mxu1  ;;  %v1912_v29 = vadd.f32 %v1840_v46, %v10825_v6 }
 0x59a   : > { %v1842_v63 = vpop.f32.mrf.mxu0  ;;  %v1914_v39 = vadd.f32 %v1893_v32, %v10841_v27 }
 0x59b   : > { %v1895_v45 = vpop.f32.mrf.mxu1  ;;  %v1913_v34 = vadd.f32 %v1842_v63, %v10833_v31  ;;  %v11110_v9 = vadd.f32 %v1931_v60, %v1912_v29 }
 0x59c   : > { %v1844_v40 = vpop.f32.mrf.mxu0  ;;  %v1915_v59 = vadd.f32 %v1895_v45, %v10848_v25  ;;  %v11126_v7 = vadd.f32 %v1931_v60, %v1914_v39  ;;  %v8217_v39 = vld [vmem:[%s14076_s4 + $0x40] sm:$0xff] }
 0x59d   : > { %v1916_v51 = vadd.f32 %v1844_v40, %v10828_v26  ;;  %v1897_v0 = vpop.f32.mrf.mxu1  ;;  %v11118_v26 = vadd.f32 %v1931_v60, %v1913_v34 }
 0x59e   : > { %v1918_v2 = vadd.f32 %v1897_v0, %v10835_v35  ;;  %v1846_v50 = vpop.f32.mrf.mxu0  ;;  %v11133_v47 = vadd.f32 %v1931_v60, %v1915_v59  ;;  %v8228_v59 = vld [vmem:[%s13922_s6 + $0x58] sm:$0xff] }
 0x59f   : > { %v11113_v11 = vadd.f32 %v1936_v33, %v1916_v51  ;;  %v1917_v6 = vadd.f32 %v1846_v50, %v10837_v37  ;;  %v1899_v14 = vpop.f32.mrf.mxu1  ;;  %v8220_v50 = vld [vmem:[%s14076_s4 + $0x58] sm:$0xff] }
 0x5a0   : > { %v1919_v31 = vadd.f32 %v1899_v14, %v10843_v38  ;;  %v1850_v1 = vpop.f32.mrf.mxu0  ;;  %v11120_v42 = vadd.f32 %v1936_v33, %v1918_v2  ;;  %v8219_v2 = vld [vmem:[%s14076_s4 + $0x50] sm:$0xff] }
 0x5a1   : > { %v11122_v35 = vadd.f32 %v1936_v33, %v1917_v6  ;;  %v1903_v17 = vpop.f32.mrf.mxu1  ;;  %v9224_v27 = vpack.i.bf16 %v11113_v11, %v11110_v9  ;;  %v1920_v24 = vadd.f32 %v1850_v1, %v10873_v52  ;;  %v2137_v34 = vpack.c.bf16 %v11113_v11, %v11110_v9  ;;  %v8218_v6 = vld [vmem:[%s14076_s4 + $0x48] sm:$0xff]  ;;  %v8227_v14 = vld [vmem:[%s13922_s6 + $0x50] sm:$0xff] }
 0x5a2   : > { %v1852_v4 = vpop.f32.mrf.mxu0  ;;  %v11128_v37 = vadd.f32 %v1936_v33, %v1919_v31  ;;  %v9229_v36 = vpack.i.bf16 %v11120_v42, %v11126_v7  ;;  %v1922_v49 = vadd.f32 %v1903_v17, %v10879_v3  ;;  %v2139_v51 = vpack.c.bf16 %v11120_v42, %v11126_v7  ;;  %v8225_v31 = vld [vmem:[%s13922_s6 + $0x40] sm:$0xff]  ;;  %v8226_v1 = vld [vmem:[%s13922_s6 + $0x48] sm:$0xff] }
 0x5a3   : > { %v1905_v18 = vpop.f32.mrf.mxu1  ;;  %9225 = vrot.lane.b32.xlu0 %v9224_v27, %s14121_s19  ;;  %v9239_v38 = vpack.i.bf16 %v11122_v35, %v11118_v26  ;;  %v1921_v13 = vadd.f32 %v1852_v4, %v10866_v55  ;;  %v11158_v3 = vadd.f32 %v1941_v12, %v1920_v24  ;;  %v2138_v45 = vpack.c.bf16 %v11122_v35, %v11118_v26 }
 0x5a4   : > { %v1854_v25 = vpop.f32.mrf.mxu0  ;;  %v1923_v54 = vadd.f32 %v1905_v18, %v10875_v61  ;;  %v11164_v32 = vadd.f32 %v1941_v12, %v1922_v49  ;;  %v2140_v40 = vpack.c.bf16 %v11128_v37, %v11133_v47 }
 0x5a5   : > { %v1924_v8 = vadd.f32 %v1854_v25, %v10863_v19  ;;  %v1907_v30 = vpop.f32.mrf.mxu1  ;;  %9240 = vrot.lane.b32.xlu1 %v9239_v38, %s14121_s19  ;;  %v9244_v19 = vpack.i.bf16 %v11128_v37, %v11133_v47  ;;  %v11151_v52 = vadd.f32 %v1941_v12, %v1921_v13 }
 0x5a6   : > { %v1926_v10 = vadd.f32 %v1907_v30, %v10868_v56  ;;  %v1856_v53 = vpop.f32.mrf.mxu0 }
 0x5a7   : > { %v1925_v22 = vadd.f32 %v1856_v53, %v10870_v58  ;;  %v1909_v55 = vpop.f32.mrf.mxu1  ;;  %9230 = vrot.lane.b32.xlu0 %v9229_v36, %s14121_s19  ;;  %v11148_v43 = vadd.f32 %v1946_v21, %v1924_v8  ;;  %v11160_v58 = vadd.f32 %v1941_v12, %v1923_v54 }
 0x5a8   : > { %v1927_v5 = vadd.f32 %v1909_v55, %v10877_v62  ;;  %v11153_v61 = vadd.f32 %v1946_v21, %v1926_v10 }
 0x5a9   : > { %v11155_v56 = vadd.f32 %v1946_v21, %v1925_v22  ;;  %9245 = vrot.lane.b32.xlu1 %v9244_v19, %s14121_s19  ;;  %v2141_v63 = vpack.c.bf16 %v11148_v43, %v11158_v3  ;;  %v9254_v12 = vpack.i.bf16 %v11148_v43, %v11158_v3 }
 0x5aa   : > { %v11162_v46 = vadd.f32 %v1946_v21, %v1927_v5  ;;  %v2143_v21 = vpack.c.bf16 %v11153_v61, %v11164_v32  ;;  %v9259_v0 = vpack.i.bf16 %v11153_v61, %v11164_v32 }
 0x5ab   : > { %9235 = vrot.lane.b32.xlu0 %v9224_v27, %s13972_s22  ;;  %v2142_v62 = vpack.c.bf16 %v11155_v56, %v11151_v52  ;;  %v9279_v60 = vpack.i.bf16 %v11155_v56, %v11151_v52 }
 0x5ac   : > { %v2144_v29 = vpack.c.bf16 %v11162_v46, %v11160_v58  ;;  %v9284_v33 = vpack.i.bf16 %v11162_v46, %v11160_v58 }
 0x5ad   : > { %9250 = vrot.lane.b32.xlu1 %v9239_v38, %s13972_s22  ;;  %2185 = vmatprep.subr.bf16.mxu0 %v2142_v62 }
 0x5ae   : > { %2186 = vmatpush1.bf16.msra.mxu0 %v2141_v63  ;;  %2238 = vmatprep.subr.bf16.mxu1 %v2144_v29 }
 0x5af   : > { %2239 = vmatpush1.bf16.msra.mxu1 %v2143_v21  ;;  %9255 = vrot.lane.b32.xlu0 %v9254_v12, %s14121_s19 }
 0x5b0   : > { %2187 = vmatprep.subr.bf16.mxu0 %v2138_v45  ;;  %2240 = vmatprep.subr.bf16.mxu1 %v2140_v40 }
 0x5b1   : > { %9280 = vrot.lane.b32.xlu1 %v9279_v60, %s14121_s19 }
 0x5b2   : > { %2188 = vmatpush1.bf16.msra.mxu0 %v2137_v34 }
 0x5b3   : > { %2241 = vmatpush1.bf16.msra.mxu1 %v2139_v51  ;;  %9260 = vrot.lane.b32.xlu0 %v9259_v0, %s14121_s19 }
 0x5b5   : > { %9285 = vrot.lane.b32.xlu1 %v9284_v33, %s14121_s19 }
 0x5b7   : > { %9265 = vrot.lane.b32.xlu0 %v9254_v12, %s13972_s22 }
 0x5b9   : > { %9290 = vrot.lane.b32.xlu1 %v9279_v60, %s13972_s22 }
 0x5bb   : > { %9270 = vrot.lane.b32.xlu0 %v9259_v0, %s13972_s22 }
 0x5bd   : > { %9295 = vrot.lane.b32.xlu1 %v9284_v33, %s13972_s22 }
 0x5bf   : > { %9275 = vrot.lane.b32.xlu0 %v9229_v36, %s13972_s22 }
 0x5c1   : > { %9300 = vrot.lane.b32.xlu1 %v9244_v19, %s13972_s22  ;;  %s14596_s22 = sadd.s32 4294967295, %s10189_s27  }
 0x5c3   : > { %2157 = vperm.xlu0 %9062, %v8219_v2  }
 0x5c5   : > { %2162 = vperm.xlu1 %9063, %v8220_v50  }
 0x5c7   : > { %2147 = vperm.xlu0 %9062, %v8217_v39  }
 0x5c9   : > { %2152 = vperm.xlu1 %9063, %v8218_v6  }
 0x5cb   : > { %2461 = vperm.xlu0 %9062, %v8227_v14  }
 0x5cd   : > { %2466 = vperm.xlu1 %9063, %v8228_v59  }
 0x5cf   : > { %2451 = vperm.xlu0 %9062, %v8225_v31  }
 0x5d1   : > { %2456 = vperm.xlu1 %9063, %v8226_v1  }
 0x615   : > { %v9226_v17 = vpop.permute.xlu0 %9225 }
 0x616   : > { %v9228_v30 = vunpack.i.h.bf16 %v9226_v17  ;;  %v9227_v36 = vunpack.i.l.bf16 %v9226_v17 }
 0x617   : > { %v9241_v27 = vpop.permute.xlu1 %9240 }
 0x618   : > { %v9243_v25 = vunpack.i.h.bf16 %v9241_v27  ;;  %v9242_v13 = vunpack.i.l.bf16 %v9241_v27 }
 0x619   : > { %v9231_v4 = vpop.permute.xlu0 %9230 }
 0x61a   : > { %v2098_v54 = vsel %vm14122_vm5, %v9228_v30, %v9243_v25  ;;  %v2097_v10 = vsel %vm14123_vm9, %v9227_v36, %v9242_v13  ;;  %v9232_v5 = vunpack.i.l.bf16 %v9231_v4  ;;  %vm14124_vm9 = vmmov %vm14122_vm5  ;;  %v9233_v60 = vunpack.i.h.bf16 %v9231_v4 }
 0x61b   : > { %v9246_v18 = vpop.permute.xlu1 %9245  ;;  %v8238_v0 = vpack.c.bf16 %v2098_v54, %v2097_v10 }
 0x61c   : > { %v9248_v62 = vunpack.i.h.bf16 %v9246_v18  ;;  %v9247_v63 = vunpack.i.l.bf16 %v9246_v18 }
 0x61d   : > { %v11226_v38 = vpop.permute.xlu0 %9235 }
 0x61e   : > { %v2102_v59 = vsel %vm14129_vm3, %v9248_v62, %v9228_v30  ;;  %v2089_v31 = vsel %vm14130_vm0, %v9232_v5, %v9247_v63  ;;  %vm14135_vm3 = vmmov %vm14130_vm0 }
 0x61f   : > { %v11228_v8 = vpop.permute.xlu1 %9250 }
 0x621   : > { %v9256_v24 = vpop.permute.xlu0 %9255 }
 0x622   : > { %v9258_v49 = vunpack.i.h.bf16 %v9256_v24  ;;  %v9257_v22 = vunpack.i.l.bf16 %v9256_v24 }
 0x623   : > { %v9281_v53 = vpop.permute.xlu1 %9280 }
 0x624   : > { %v9283_v55 = vunpack.i.h.bf16 %v9281_v53  ;;  %v9282_v19 = vunpack.i.l.bf16 %v9281_v53 }
 0x625   : > { %v9261_v29 = vpop.permute.xlu0 %9260 }
 0x626   : > { %v2100_v21 = vsel %vm14122_vm5, %v9258_v49, %v9283_v55  ;;  %v2099_v12 = vsel %vm14124_vm9, %v9257_v22, %v9282_v19  ;;  %v9263_v45 = vunpack.i.h.bf16 %v9261_v29  ;;  %v9262_v40 = vunpack.i.l.bf16 %v9261_v29  ;;  %vm14127_vm5 = vmmov %vm14126_vm2 }
 0x627   : > { %v9286_v34 = vpop.permute.xlu1 %9285  ;;  %v8232_v51 = vpack.c.bf16 %v2100_v21, %v2099_v12  ;;  %v2093_v6 = vsel %vm14127_vm5, %v9242_v13, %v9232_v5  ;;  %vm14128_vm9 = vmmov %vm14126_vm2  ;;  %v2101_v13 = vsel %vm14135_vm3, %v9247_v63, %v9227_v36  ;;  %v9252_v29 = vunpack.i.l.bf16 %v11228_v8 }
 0x628   : > { %v2095_v33 = vsel %vm14125_vm15, %v9282_v19, %v9262_v40  ;;  %v2096_v2 = vsel %vm14126_vm2, %v9283_v55, %v9263_v45  ;;  %v9288_v50 = vunpack.i.h.bf16 %v9286_v34  ;;  %v9287_v39 = vunpack.i.l.bf16 %v9286_v34  ;;  %vm14131_vm2 = vmmov %vm14130_vm0 }
 0x629   : > { %v2090_v14 = vsel %vm14128_vm9, %v9233_v60, %v9248_v62  ;;  %v9266_v1 = vpop.permute.xlu0 %9265  ;;  %8233 = vmatprep.subr.msk.bf16.mxu0 %vm11000_vm4, %v8232_v51  ;;  %vm14132_vm15 = vmmov %vm14130_vm0  ;;  %v8261_v30 = vpack.c.bf16 %v2096_v2, %v2095_v33  ;;  %v9253_v62 = vunpack.i.h.bf16 %v11228_v8  ;;  %v14139_v8 = vmov 0 }
 0x62a   : > { %v2092_v17 = vsel %vm14131_vm2, %v9263_v45, %v9288_v50  ;;  %v2104_v27 = vsel %vm14132_vm15, %v9288_v50, %v9258_v49  ;;  %vm14133_vm5 = vmmov %vm14130_vm0  ;;  %v9268_v53 = vunpack.i.h.bf16 %v9266_v1  ;;  %v9267_v55 = vunpack.i.l.bf16 %v9266_v1 }
 0x62b   : > { %v2091_v4 = vsel %vm14133_vm5, %v9262_v40, %v9287_v39  ;;  %vm14134_vm9 = vmmov %vm14130_vm0  ;;  %v9291_v54 = vpop.permute.xlu1 %9290  ;;  %v2094_v49 = vsel %vm14130_vm0, %v9243_v25, %v9233_v60  ;;  %v8264_v36 = vpack.c.bf16 %v2090_v14, %v2089_v31  ;;  %vm14136_vm2 = vcmp.lt.s32.totalorder %v10593_v23, 8 }
 0x62c   : > { %v2103_v18 = vsel %vm14134_vm9, %v9287_v39, %v9257_v22  ;;  %v8258_v10 = vpack.c.bf16 %v2092_v17, %v2091_v4  ;;  %v9293_v19 = vunpack.i.h.bf16 %v9291_v54  ;;  %v9292_v5 = vunpack.i.l.bf16 %v9291_v54  ;;  %vm14137_vm15 = vmmov %vm14136_vm2 }
 0x62d   : > { %v8235_v24 = vpack.c.bf16 %v2104_v27, %v2103_v18  ;;  %v9271_v21 = vpop.permute.xlu0 %9270  ;;  %vm14138_vm5 = vcmp.ge.s32.totalorder %v10602_v28, 8  ;;  %v8241_v45 = vpack.c.bf16 %v2102_v59, %v2101_v13  ;;  %v9238_v40 = vunpack.i.h.bf16 %v11226_v38 }
 0x62e   : > { %8259 = vmatprep.subr.msk.bf16.mxu1 %vm11012_vm8, %v8258_v10  ;;  %v2028_v22 = vsel %vm14136_vm2, %v9268_v53, %v9293_v19  ;;  %v2027_v63 = vsel %vm14137_vm15, %v9267_v55, %v9292_v5  ;;  %v9273_v12 = vunpack.i.h.bf16 %v9271_v21  ;;  %v9272_v25 = vunpack.i.l.bf16 %v9271_v21  ;;  %vm11285_vm9 = vmpackc.low %vm14138_vm5, %vm14138_vm5 }
 0x62f   : > { %8236 = vmatpush1.bf16.msk.msra.mxu0 %vm11039_vm11, %v8235_v24  ;;  %8262 = vmatpush1.bf16.msk.msra.mxu1 %vm11048_vm7, %v8261_v30  ;;  %v14140_v8 = vsel %vm11285_vm9, 4294967295, %v14139_v8  ;;  %v9237_v60 = vunpack.i.l.bf16 %v11226_v38  ;;  %v9296_v34 = vpop.permute.xlu1 %9295  ;;  %v8244_v51 = vpack.c.bf16 %v2028_v22, %v2027_v63  ;;  %vm14142_vm0 = vcmp.ge.s32.totalorder %v10612_v41, 8  ;;  %vm14146_vm5 = vmmov %vm14137_vm15 }
 0x630   : > { %8239 = vmatprep.subr.msk.bf16.mxu0 %vm11000_vm4, %v8238_v0  ;;  %14141 = vst [vmem:[#allocation24_spill] sm:$0xff] %v14140_v8  ;;  %8265 = vmatprep.subr.msk.bf16.mxu1 %vm11012_vm8, %v8264_v36  ;;  %v8267_v0 = vpack.c.bf16 %v2094_v49, %v2093_v6  ;;  %v9298_v33 = vunpack.i.h.bf16 %v9296_v34  ;;  %v9297_v2 = vunpack.i.l.bf16 %v9296_v34  ;;  %vm11297_vm2 = vmpackc.low %vm14142_vm0, %vm14142_vm0  ;;  %v14143_v50 = vmov 0 }
 0x631   : > { %v14144_v50 = vsel %vm11297_vm2, 4294967295, %v14143_v50  ;;  %v2026_v38 = vsel %vm14137_vm15, %v9238_v40, %v9253_v62  ;;  %v2025_v39 = vsel %vm14146_vm5, %v9237_v60, %v9252_v29  ;;  %vm14147_vm1 = vmmov %vm14146_vm5  ;;  %v9276_v59 = vpop.permute.xlu0 %9275  ;;  %v14154_v4 = vmov 0 }
 0x632   : > { %14145 = vst [vmem:[#allocation25_spill] sm:$0xff] %v14144_v50  ;;  %v2023_v14 = vsel %vm14147_vm1, %v9292_v5, %v9272_v25  ;;  %vm14148_vm3 = vmmov %vm14147_vm1  ;;  %v9278_v13 = vunpack.i.h.bf16 %v9276_v59  ;;  %v9277_v30 = vunpack.i.l.bf16 %v9276_v59  ;;  %v14158_v10 = vmov 0 }
 0x633   : > { %v2024_v6 = vsel %vm14148_vm3, %v9293_v19, %v9273_v12  ;;  %8242 = vmatpush1.bf16.msk.msra.mxu0 %vm11039_vm11, %v8241_v45  ;;  %vm14149_vm0 = vmmov %vm14147_vm1  ;;  %vm14153_vm1 = vcmp.ge.s32.totalorder %v10593_v23, 8  ;;  %8268 = vmatpush1.bf16.msk.msra.mxu1 %vm11048_vm7, %v8267_v0  ;;  %v9301_v24 = vpop.permute.xlu1 %9300  ;;  %v8250_v19 = vpack.c.bf16 %v2026_v38, %v2025_v39  ;;  %v10034_v45 = vld [vmem:[%s14101_s3 + $0x20] sm:$0xff]  }
 0x634   : > { %v2020_v31 = vsel %vm14149_vm0, %v9273_v12, %v9298_v33  ;;  %vm14150_vm8 = vmmov %vm14149_vm0  ;;  %8245 = vmatprep.subr.msk.bf16.mxu0 %vm11285_vm9, %v8244_v51  ;;  %v8273_v5 = vpack.c.bf16 %v2024_v6, %v2023_v14 }
 0x635   : > { %v2032_v1 = vsel %vm14150_vm8, %v9298_v33, %v9268_v53  ;;  %vm14151_vm15 = vmmov %vm14149_vm0  ;;  %vm14157_vm8 = vcmp.ge.s32.totalorder %v10614_v44, 8  ;;  %v9303_v53 = vunpack.i.h.bf16 %v9301_v24 }
 0x636   : > { %v2019_v17 = vsel %vm14151_vm15, %v9272_v25, %v9297_v2  ;;  %vm14152_vm5 = vmmov %vm14149_vm0 }
 0x637   : > { %v2031_v27 = vsel %vm14152_vm5, %v9297_v2, %v9267_v55  ;;  %vm11324_vm3 = vmpackc.low %vm14153_vm1, %vm14153_vm1  ;;  %v8270_v54 = vpack.c.bf16 %v2020_v31, %v2019_v17  ;;  %v9302_v55 = vunpack.i.l.bf16 %v9301_v24  ;;  %v2021_v21 = vsel %vm14152_vm5, %v9252_v29, %v9277_v30 }
 0x638   : > { %v14155_v4 = vsel %vm11324_vm3, 4294967295, %v14154_v4  ;;  %v8247_v18 = vpack.c.bf16 %v2032_v1, %v2031_v27  ;;  %vm11333_vm0 = vmpackc.low %vm14157_vm8, %vm14157_vm8 }
 0x639   : > { %14156 = vst [vmem:[#allocation26_spill] sm:$0xff] %v14155_v4  ;;  %v14159_v10 = vsel %vm11333_vm0, 4294967295, %v14158_v10  ;;  %vm14161_vm15 = vmmov %vm14152_vm5  ;;  %8271 = vmatprep.subr.msk.bf16.mxu1 %vm11297_vm2, %v8270_v54 }
 0x63a   : > { %14160 = vst [vmem:[#allocation27_spill] sm:$0xff] %v14159_v10  ;;  %v2022_v49 = vsel %vm14161_vm15, %v9253_v62, %v9278_v13  ;;  %8248 = vmatpush1.bf16.msk.msra.mxu0 %vm11324_vm3, %v8247_v18  ;;  %vm14162_vm1 = vmmov %vm14152_vm5  ;;  %8274 = vmatpush1.bf16.msk.msra.mxu1 %vm11333_vm0, %v8273_v5 }
 0x63b   : > { %v2018_v36 = vsel %vm14162_vm1, %v9278_v13, %v9303_v53  ;;  %vm14163_vm8 = vmmov %vm14162_vm1  ;;  %8251 = vmatprep.subr.msk.bf16.mxu0 %vm11285_vm9, %v8250_v19  ;;  %v8279_v25 = vpack.c.bf16 %v2022_v49, %v2021_v21 }
 0x63c   : > { %v2030_v22 = vsel %vm14163_vm8, %v9303_v53, %v9238_v40  ;;  %vm14164_vm7 = vmmov %vm14162_vm1  ;;  %v10035_v40 = vld [vmem:[%s14101_s3 + $0x28] sm:$0xff]  }
 0x63d   : > { %v2017_v63 = vsel %vm14164_vm7, %v9277_v30, %v9302_v55  ;;  %vm14165_vm15 = vmmov %vm14162_vm1  ;;  %vm14166_vm7 = vcmask 785408  }
 0x63e   : > { %v2029_v62 = vsel %vm14165_vm15, %v9302_v55, %v9237_v60  ;;  %v8276_v12 = vpack.c.bf16 %v2018_v36, %v2017_v63  ;;  %vm14167_vm5 = vmmov %vm14166_vm7  ;;  %v2158_v2 = vpop.permute.xlu0 %2157  ;;  %vm14170_vm15 = vcmask 261120  }
 0x63f   : > { %v8253_v29 = vpack.c.bf16 %v2030_v22, %v2029_v62  ;;  %vm14168_vm1 = vmmov %vm14167_vm5 }
 0x640   : > { %8277 = vmatprep.subr.msk.bf16.mxu1 %vm11297_vm2, %v8276_v12  ;;  %vm14169_vm8 = vmmov %vm14168_vm1  ;;  %v2163_v39 = vpop.permute.xlu1 %2162 }
 0x641   : > { %8254 = vmatpush1.bf16.msk.msra.mxu0 %vm11324_vm3, %v8253_v29  ;;  %8280 = vmatpush1.bf16.msk.msra.mxu1 %vm11333_vm0, %v8279_v25 }
 0x642   : > { %v2148_v17 = vpop.permute.xlu0 %2147 }
 0x644   : > { %8255 = vmatmul.mubr.msk.bf16.vlgmr.msra.gmra.mxu0 %vm14166_vm7, %v10034_v45  ;;  %8281 = vmatmul.mubr.msk.bf16.vlgmr.msra.gmra.mxu1 %vm14167_vm5, %v10034_v45  ;;  %v2153_v18 = vpop.permute.xlu1 %2152  ;;  %vm14171_vm7 = vmmov %vm14170_vm15 }
 0x645   : > { %2223 = vmatprep.mubr.bf16.mxu0 %v14103_v20  ;;  %2276 = vmatprep.mubr.bf16.mxu1 %v14103_v20  ;;  %vm14172_vm5 = vmmov %vm14171_vm7 }
 0x64c   : > { %8256 = vmatmul.mubr.msk.bf16.gmra.mxu0 %vm14168_vm1, %v10035_v40  ;;  %8282 = vmatmul.mubr.msk.bf16.gmra.mxu1 %vm14169_vm8, %v10035_v40  ;;  %vm14173_vm1 = vmmov %vm14172_vm5  ;;  %vm14175_vm8 = vcmp.lt.s32.totalorder %v10593_v23, 8 }
 0x64d   : > { %2359 = vmatprep.mubr.bf16.mxu0 %v14103_v20  ;;  %2412 = vmatprep.mubr.bf16.mxu1 %v14103_v20 }
 0x704   : > { %v2215_v60 = vpop.f32.mrf.mxu0  ;;  %v2268_v34 = vpop.f32.mrf.mxu1 }
 0x705   : > { %v2216_v30 = vadd.f32 %v2215_v60, %v2148_v17 }
 0x706   : > { %v2217_v51 = vpop.f32.mrf.mxu0  ;;  %v2270_v0 = vpop.f32.mrf.mxu1 }
 0x707   : > { %v2218_v22 = vadd.f32 %v2217_v51, %v2148_v17  ;;  %v2271_v63 = vadd.f32 %v2270_v0, %v2148_v17 }
 0x708   : > { %v2219_v33 = vpop.f32.mrf.mxu0  ;;  %v2272_v38 = vpop.f32.mrf.mxu1 }
 0x709   : > { %v2220_v25 = vadd.f32 %v2219_v33, %v2153_v18  ;;  %v2273_v45 = vadd.f32 %v2272_v38, %v2153_v18  ;;  %v2290_v0 = vmax.f32 %v2271_v63, 0.0 }
 0x70a   : > { %v2221_v14 = vpop.f32.mrf.mxu0  ;;  %v2274_v6 = vpop.f32.mrf.mxu1 }
 0x70b   : > { %v2222_v24 = vadd.f32 %v2221_v14, %v2153_v18  ;;  %v2275_v19 = vadd.f32 %v2274_v6, %v2153_v18  ;;  %v2293_v33 = vmax.f32 %v2273_v45, 0.0  ;;  %v2287_v18 = vmax.f32 %v2216_v30, 0.0 }
 0x70c   : > { %v2225_v59 = vpop.f32.mrf.mxu0  ;;  %v2278_v31 = vpop.f32.mrf.mxu1 }
 0x70d   : > { %v2226_v5 = vadd.f32 %v2225_v59, %v2158_v2  ;;  %v2279_v62 = vadd.f32 %v2278_v31, %v2158_v2  ;;  %v2292_v48 = vmax.f32 %v2222_v24, 0.0 }
 0x70e   : > { %v2227_v1 = vpop.f32.mrf.mxu0  ;;  %v2280_v27 = vpop.f32.mrf.mxu1 }
 0x70f   : > { %v2228_v54 = vadd.f32 %v2227_v1, %v2158_v2  ;;  %v2281_v49 = vadd.f32 %v2280_v27, %v2158_v2  ;;  %v2295_v15 = vmax.f32 %v2226_v5, 0.0  ;;  %v2269_v27 = vadd.f32 %v2268_v34, %v2148_v17  ;;  %v10036_v17 = vld [vmem:[%s14102_s5 + $0x20] sm:$0xff]  }
 0x710   : > { %v2229_v13 = vpop.f32.mrf.mxu0  ;;  %v2282_v55 = vpop.f32.mrf.mxu1  ;;  %v2297_v16 = vmax.f32 %v2279_v62, 0.0  ;;  %v2291_v2 = vmax.f32 %v2220_v25, 0.0 }
 0x711   : > { %v2230_v53 = vadd.f32 %v2229_v13, %v2163_v39  ;;  %v2283_v21 = vadd.f32 %v2282_v55, %v2163_v39  ;;  %v2296_v60 = vmax.f32 %v2228_v54, 0.0  ;;  %v2294_v13 = vmax.f32 %v2275_v19, 0.0 }
 0x712   : > { %v2231_v36 = vpop.f32.mrf.mxu0  ;;  %v2284_v29 = vpop.f32.mrf.mxu1  ;;  %v2298_v6 = vmax.f32 %v2281_v49, 0.0  ;;  %v2288_v55 = vmax.f32 %v2218_v22, 0.0  ;;  %v2289_v54 = vmax.f32 %v2269_v27, 0.0 }
 0x713   : > { %v2232_v12 = vadd.f32 %v2231_v36, %v2163_v39  ;;  %v2299_v40 = vmax.f32 %v2230_v53, 0.0  ;;  %v2285_v57 = vadd.f32 %v2284_v29, %v2163_v39  ;;  %v2301_v14 = vmax.f32 %v2283_v21, 0.0 }
 0x714   : > { %v2304_v39 = vpack.c.bf16 %v2292_v48, %v2288_v55  ;;  %v2306_v24 = vpack.c.bf16 %v2294_v13, %v2290_v0  ;;  %v2305_v34 = vpack.c.bf16 %v2293_v33, %v2289_v54  ;;  %v2462_v48 = vpop.permute.xlu0 %2461 }
 0x715   : > { %v2300_v1 = vmax.f32 %v2232_v12, 0.0  ;;  %v2302_v59 = vmax.f32 %v2285_v57, 0.0  ;;  %v2307_v31 = vpack.c.bf16 %v2299_v40, %v2295_v15  ;;  %v2309_v38 = vpack.c.bf16 %v2301_v14, %v2297_v16  ;;  %v10037_v16 = vld [vmem:[%s14102_s5 + $0x28] sm:$0xff]   ;;  %v2467_v15 = vpop.permute.xlu1 %2466 }
 0x716   : > { %v2303_v57 = vpack.c.bf16 %v2291_v2, %v2287_v18 }
 0x717   : > { %v2308_v51 = vpack.c.bf16 %v2300_v1, %v2296_v60  ;;  %v2310_v36 = vpack.c.bf16 %v2302_v59, %v2298_v6 }
 0x718   : > { %v2452_v22 = vpop.permute.xlu0 %2451 }
 0x719   : > { %2339 = vmatprep.subr.bf16.mxu0 %v2308_v51  ;;  %2392 = vmatprep.subr.bf16.mxu1 %v2310_v36  ;;  %v2457_v29 = vpop.permute.xlu1 %2456 }
 0x71a   : > { %2340 = vmatpush1.bf16.msra.mxu0 %v2307_v31  ;;  %2393 = vmatpush1.bf16.msra.mxu1 %v2309_v38 }
 0x71b   : > { %2341 = vmatprep.subr.bf16.mxu0 %v2304_v39  ;;  %2394 = vmatprep.subr.bf16.mxu1 %v2306_v24 }
 0x71e   : > { %2342 = vmatpush1.bf16.msra.mxu0 %v2303_v57  ;;  %2395 = vmatpush1.bf16.msra.mxu1 %v2305_v34 }
 0x721   : > { %8285 = vmatmul.mubr.msk.bf16.vlgmr.msra.gmra.mxu0 %vm14170_vm15, %v10036_v17  ;;  %8287 = vmatmul.mubr.msk.bf16.vlgmr.msra.gmra.mxu1 %vm14171_vm7, %v10036_v17  ;;  %vm14176_vm15 = vmmov %vm14175_vm8  ;;  %vm14199_vm7 = vcmp.ge.s32.totalorder %v10593_v23, 16 }
 0x722   : > { %2369 = vmatprep.mubr.bf16.mxu0 %v14103_v20  ;;  %2422 = vmatprep.mubr.bf16.mxu1 %v14103_v20 }
 0x729   : > { %8286 = vmatmul.mubr.msk.bf16.gmra.mxu0 %vm14172_vm5, %v10037_v16  ;;  %8288 = vmatmul.mubr.msk.bf16.gmra.mxu1 %vm14173_vm1, %v10037_v16  ;;  %vm14177_vm1 = vmmov %vm14175_vm8 }
 0x72a   : > { %2734 = vmatprep.mubr.bf16.mxu0 %v14103_v20  ;;  %2787 = vmatprep.mubr.bf16.mxu1 %v14103_v20  ;;  %vm14179_vm11 = vmmov %vm14177_vm1 }
 0x72b   : > { %vm14180_vm5 = vmmov %vm14177_vm1 }
 0x72c   : > { %vm14183_vm4 = vmmov %vm14177_vm1 }
 0x7e1   : > { %v2361_v30 = vpop.f32.mrf.mxu0  ;;  %v2414_v53 = vpop.f32.mrf.mxu1 }
 0x7e2   : > { %v2433_v5 = vadd.f32 %v2361_v30, %v11110_v9  ;;  %v2435_v60 = vadd.f32 %v2414_v53, %v11126_v7 }
 0x7e3   : > { %v2363_v19 = vpop.f32.mrf.mxu0  ;;  %v2416_v49 = vpop.f32.mrf.mxu1 }
 0x7e4   : > { %v2434_v63 = vadd.f32 %v2363_v19, %v11118_v26  ;;  %v11395_v40 = vadd.f32 %v2452_v22, %v2433_v5  ;;  %v2436_v13 = vadd.f32 %v2416_v49, %v11133_v47  ;;  %v11411_v51 = vadd.f32 %v2452_v22, %v2435_v60  ;;  %v8293_v60 = vld [vmem:[%s14076_s4 + $0x60] sm:$0xff] }
 0x7e5   : > { %v2365_v21 = vpop.f32.mrf.mxu0  ;;  %v2418_v12 = vpop.f32.mrf.mxu1 }
 0x7e6   : > { %v2437_v62 = vadd.f32 %v2365_v21, %v11113_v11  ;;  %v2439_v25 = vadd.f32 %v2418_v12, %v11120_v42  ;;  %v11403_v11 = vadd.f32 %v2452_v22, %v2434_v63  ;;  %v11418_v2 = vadd.f32 %v2452_v22, %v2436_v13  ;;  %v8304_v13 = vld [vmem:[%s13922_s6 + $0x78] sm:$0xff] }
 0x7e7   : > { %v2367_v45 = vpop.f32.mrf.mxu0  ;;  %v2420_v1 = vpop.f32.mrf.mxu1 }
 0x7e8   : > { %v11398_v14 = vadd.f32 %v2457_v29, %v2437_v62  ;;  %v2438_v9 = vadd.f32 %v2367_v45, %v11122_v35  ;;  %v2440_v26 = vadd.f32 %v2420_v1, %v11128_v37  ;;  %v11405_v59 = vadd.f32 %v2457_v29, %v2439_v25  ;;  %v8295_v25 = vld [vmem:[%s14076_s4 + $0x70] sm:$0xff]  ;;  %v8296_v45 = vld [vmem:[%s14076_s4 + $0x78] sm:$0xff] }
 0x7e9   : > { %v2371_v6 = vpop.f32.mrf.mxu0  ;;  %v2424_v27 = vpop.f32.mrf.mxu1  ;;  %v8303_v1 = vld [vmem:[%s13922_s6 + $0x70] sm:$0xff] }
 0x7ea   : > { %v11407_v42 = vadd.f32 %v2457_v29, %v2438_v9  ;;  %v9304_v7 = vpack.i.bf16 %v11398_v14, %v11395_v40  ;;  %v11413_v35 = vadd.f32 %v2457_v29, %v2440_v26  ;;  %v9309_v38 = vpack.i.bf16 %v11405_v59, %v11411_v51  ;;  %v8294_v9 = vld [vmem:[%s14076_s4 + $0x68] sm:$0xff]  ;;  %v8301_v26 = vld [vmem:[%s13922_s6 + $0x60] sm:$0xff]  ;;  %s7995_s4 = sshll.u32 %s11723_s20, 4  ;;  %s13870_s4 = int_to_ptr.vmem [resolvable:$true] %s7995_s4 }
 0x7eb   : > { %v2373_v55 = vpop.f32.mrf.mxu0  ;;  %v2426_v0 = vpop.f32.mrf.mxu1  ;;  %v2441_v39 = vadd.f32 %v2371_v6, %v11158_v3  ;;  %v2443_v57 = vadd.f32 %v2424_v27, %v11164_v32  ;;  %v2658_v63 = vpack.c.bf16 %v11398_v14, %v11395_v40  ;;  %v2660_v62 = vpack.c.bf16 %v11405_v59, %v11411_v51  ;;  %v8302_v6 = vld [vmem:[%s13922_s6 + $0x68] sm:$0xff] }
 0x7ec   : > { %9305 = vrot.lane.b32.xlu0 %v9304_v7, %s14174_s2  ;;  %v9319_v37 = vpack.i.bf16 %v11407_v42, %v11403_v11  ;;  %v2442_v31 = vadd.f32 %v2373_v55, %v11151_v52  ;;  %v2444_v18 = vadd.f32 %v2426_v0, %v11160_v58  ;;  %v2659_v49 = vpack.c.bf16 %v11407_v42, %v11403_v11  ;;  %v755_v27 = vld [vmem:[%s13924_s8 + $0x8] sm:$0xff]  ;;  %v3232_v55 = vld [vmem:[%s13926_s10 + $0x10] sm:$0xff]  ;;  %v3233_v0 = vld [vmem:[%s13926_s10 + $0x18] sm:$0xff] }
 0x7ed   : > { %v2375_v47 = vpop.f32.mrf.mxu0  ;;  %v2428_v33 = vpop.f32.mrf.mxu1  ;;  %v11443_v32 = vadd.f32 %v2462_v48, %v2441_v39  ;;  %v11449_v53 = vadd.f32 %v2462_v48, %v2443_v57  ;;  %v2661_v21 = vpack.c.bf16 %v11413_v35, %v11418_v2 }
 0x7ee   : > { %v2445_v36 = vadd.f32 %v2375_v47, %v11148_v43  ;;  %9320 = vrot.lane.b32.xlu1 %v9319_v37, %s14174_s2  ;;  %v2447_v24 = vadd.f32 %v2428_v33, %v11153_v61  ;;  %v9324_v43 = vpack.i.bf16 %v11413_v35, %v11418_v2  ;;  %v11436_v3 = vadd.f32 %v2462_v48, %v2442_v31  ;;  %v3231_v47 = vld [vmem:[%s13926_s10 + $0x8] sm:$0xff] }
 0x7ef   : > { %v2377_v54 = vpop.f32.mrf.mxu0  ;;  %v2430_v52 = vpop.f32.mrf.mxu1 }
 0x7f0   : > { %v2446_v34 = vadd.f32 %v2377_v54, %v11155_v56  ;;  %9310 = vrot.lane.b32.xlu0 %v9309_v38, %s14174_s2  ;;  %v11433_v17 = vadd.f32 %v2467_v15, %v2445_v36  ;;  %v2448_v16 = vadd.f32 %v2430_v52, %v11162_v46  ;;  %v11438_v58 = vadd.f32 %v2467_v15, %v2447_v24 }
 0x7f1   : > { %v11445_v56 = vadd.f32 %v2462_v48, %v2444_v18 }
 0x7f2   : > { %v11440_v61 = vadd.f32 %v2467_v15, %v2446_v34  ;;  %9325 = vrot.lane.b32.xlu1 %v9324_v43, %s14174_s2  ;;  %v11447_v30 = vadd.f32 %v2467_v15, %v2448_v16  ;;  %v2662_v19 = vpack.c.bf16 %v11433_v17, %v11443_v32  ;;  %v2664_v15 = vpack.c.bf16 %v11438_v58, %v11449_v53 }
 0x7f3   : > { %v9334_v48 = vpack.i.bf16 %v11433_v17, %v11443_v32  ;;  %v9339_v12 = vpack.i.bf16 %v11438_v58, %v11449_v53 }
 0x7f4   : > { %9315 = vrot.lane.b32.xlu0 %v9304_v7, %s13993_s0  ;;  %v2663_v46 = vpack.c.bf16 %v11440_v61, %v11436_v3  ;;  %v2665_v5 = vpack.c.bf16 %v11447_v30, %v11445_v56  ;;  %v9359_v22 = vpack.i.bf16 %v11440_v61, %v11436_v3  ;;  %v9364_v29 = vpack.i.bf16 %v11447_v30, %v11445_v56  ;;  %v754_v7 = vld [vmem:[%s13924_s8] sm:$0xff] }
 0x7f6   : > { %9330 = vrot.lane.b32.xlu1 %v9319_v37, %s13993_s0  ;;  %2706 = vmatprep.subr.bf16.mxu0 %v2663_v46  ;;  %v3230_v37 = vld [vmem:[%s13926_s10] sm:$0xff] }
 0x7f7   : > { %2707 = vmatpush1.bf16.msra.mxu0 %v2662_v19  ;;  %2759 = vmatprep.subr.bf16.mxu1 %v2665_v5 }
 0x7f8   : > { %2760 = vmatpush1.bf16.msra.mxu1 %v2664_v15  ;;  %9335 = vrot.lane.b32.xlu0 %v9334_v48, %s14174_s2 }
 0x7f9   : > { %2708 = vmatprep.subr.bf16.mxu0 %v2659_v49  ;;  %2761 = vmatprep.subr.bf16.mxu1 %v2661_v21 }
 0x7fa   : > { %9360 = vrot.lane.b32.xlu1 %v9359_v22, %s14174_s2 }
 0x7fb   : > { %2709 = vmatpush1.bf16.msra.mxu0 %v2658_v63 }
 0x7fc   : > { %2762 = vmatpush1.bf16.msra.mxu1 %v2660_v62  ;;  %9340 = vrot.lane.b32.xlu0 %v9339_v12, %s14174_s2 }
 0x7fe   : > { %9365 = vrot.lane.b32.xlu1 %v9364_v29, %s14174_s2 }
 0x800   : > { %9345 = vrot.lane.b32.xlu0 %v9334_v48, %s13993_s0 }
 0x802   : > { %9370 = vrot.lane.b32.xlu1 %v9359_v22, %s13993_s0 }
 0x804   : > { %9350 = vrot.lane.b32.xlu0 %v9339_v12, %s13993_s0 }
 0x806   : > { %9375 = vrot.lane.b32.xlu1 %v9364_v29, %s13993_s0 }
 0x808   : > { %9355 = vrot.lane.b32.xlu0 %v9309_v38, %s13993_s0 }
 0x80a   : > { %9380 = vrot.lane.b32.xlu1 %v9324_v43, %s13993_s0 }
 0x80c   : > { %2678 = vperm.xlu0 %9062, %v8295_v25  }
 0x80e   : > { %2683 = vperm.xlu1 %9063, %v8296_v45  }
 0x810   : > { %2668 = vperm.xlu0 %9062, %v8293_v60  }
 0x812   : > { %2673 = vperm.xlu1 %9063, %v8294_v9  }
 0x814   : > { %2982 = vperm.xlu0 %9062, %v8303_v1  }
 0x816   : > { %2987 = vperm.xlu1 %9063, %v8304_v13  }
 0x818   : > { %2972 = vperm.xlu0 %9062, %v8301_v26  }
 0x81a   : > { %2977 = vperm.xlu1 %9063, %v8302_v6  }
 0x81c   : > { %3021 = vperm.xlu0 %9062, %v755_v27  }
 0x81e   : > { %3016 = vperm.xlu1 %9063, %v754_v7  }
 0x820   : > { %3254 = vperm.xlu0 %9062, %v3232_v55  }
 0x822   : > { %3259 = vperm.xlu1 %9063, %v3233_v0  }
 0x824   : > { %3244 = vperm.xlu0 %9062, %v3230_v37  }
 0x826   : > { %3249 = vperm.xlu1 %9063, %v3231_v47  }
 0x85e   : > { %v9306_v31 = vpop.permute.xlu0 %9305 }
 0x85f   : > { %v9308_v57 = vunpack.i.h.bf16 %v9306_v31  ;;  %v9307_v34 = vunpack.i.l.bf16 %v9306_v31 }
 0x860   : > { %v9321_v36 = vpop.permute.xlu1 %9320 }
 0x861   : > { %v9323_v18 = vunpack.i.h.bf16 %v9321_v36  ;;  %v9322_v24 = vunpack.i.l.bf16 %v9321_v36 }
 0x862   : > { %v9311_v33 = vpop.permute.xlu0 %9310 }
 0x863   : > { %v2619_v43 = vsel %vm14175_vm8, %v9308_v57, %v9323_v18  ;;  %v2618_v16 = vsel %vm14176_vm15, %v9307_v34, %v9322_v24  ;;  %v9312_v49 = vunpack.i.l.bf16 %v9311_v33  ;;  %vm14178_vm8 = vmmov %vm14177_vm1  ;;  %v9313_v45 = vunpack.i.h.bf16 %v9311_v33 }
 0x864   : > { %v9326_v38 = vpop.permute.xlu1 %9325  ;;  %v8314_v1 = vpack.c.bf16 %v2619_v43, %v2618_v16  ;;  %vm14182_vm15 = vmmov %vm14177_vm1 }
 0x865   : > { %v9328_v21 = vunpack.i.h.bf16 %v9326_v38  ;;  %v9327_v22 = vunpack.i.l.bf16 %v9326_v38  ;;  %v2614_v7 = vsel %vm14177_vm1, %v9322_v24, %v9312_v49 }
 0x866   : > { %v11529_v39 = vpop.permute.xlu0 %9315 }
 0x867   : > { %v2623_v0 = vsel %vm14182_vm15, %v9328_v21, %v9308_v57  ;;  %v2610_v37 = vsel %vm14183_vm4, %v9312_v49, %v9327_v22  ;;  %vm14187_vm15 = vmmov %vm14177_vm1 }
 0x868   : > { %v11531_v54 = vpop.permute.xlu1 %9330  ;;  %v2622_v24 = vsel %vm14187_vm15, %v9327_v22, %v9307_v34  ;;  %vm14188_vm4 = vmmov %vm14177_vm1 }
 0x869   : > { %vm11610_vm15 = vmpackc.low %vm14199_vm7, %vm14199_vm7  ;;  %vm14206_vm7 = vcmp.ge.s32.totalorder %v10612_v41, 16  ;;  %v14211_v41 = vmov 0 }
 0x86a   : > { %v9336_v52 = vpop.permute.xlu0 %9335 }
 0x86b   : > { %v9338_v19 = vunpack.i.h.bf16 %v9336_v52  ;;  %v9337_v5 = vunpack.i.l.bf16 %v9336_v52 }
 0x86c   : > { %v9361_v46 = vpop.permute.xlu1 %9360 }
 0x86d   : > { %v9363_v15 = vunpack.i.h.bf16 %v9361_v46  ;;  %v9362_v48 = vunpack.i.l.bf16 %v9361_v46 }
 0x86e   : > { %v9341_v63 = vpop.permute.xlu0 %9340 }
 0x86f   : > { %v2621_v62 = vsel %vm14177_vm1, %v9338_v19, %v9363_v15  ;;  %v2620_v12 = vsel %vm14178_vm8, %v9337_v5, %v9362_v48  ;;  %v9343_v29 = vunpack.i.h.bf16 %v9341_v63  ;;  %v9342_v25 = vunpack.i.l.bf16 %v9341_v63  ;;  %vm14181_vm8 = vmmov %vm14177_vm1 }
 0x870   : > { %v9366_v60 = vpop.permute.xlu1 %9365  ;;  %v8308_v9 = vpack.c.bf16 %v2621_v62, %v2620_v12  ;;  %v2611_v55 = vsel %vm14181_vm8, %v9313_v45, %v9328_v21  ;;  %vm14186_vm8 = vmmov %vm14177_vm1  ;;  %v9333_v21 = vunpack.i.h.bf16 %v11531_v54  ;;  %v9332_v63 = vunpack.i.l.bf16 %v11531_v54 }
 0x871   : > { %v2616_v13 = vsel %vm14179_vm11, %v9362_v48, %v9342_v25  ;;  %v2617_v26 = vsel %vm14180_vm5, %v9363_v15, %v9343_v29  ;;  %v9368_v6 = vunpack.i.h.bf16 %v9366_v60  ;;  %v9367_v27 = vunpack.i.l.bf16 %v9366_v60  ;;  %vm14184_vm11 = vmmov %vm14177_vm1 }
 0x872   : > { %v9346_v47 = vpop.permute.xlu0 %9345  ;;  %8309 = vmatprep.subr.msk.bf16.mxu0 %vm11285_vm9, %v8308_v9  ;;  %vm14185_vm5 = vmmov %vm14177_vm1  ;;  %v8337_v57 = vpack.c.bf16 %v2617_v26, %v2616_v13  ;;  %v8340_v34 = vpack.c.bf16 %v2611_v55, %v2610_v37  ;;  %v8317_v54 = vpack.c.bf16 %v2623_v0, %v2622_v24  ;;  %v14192_v60 = vmov 0 }
 0x873   : > { %v2613_v31 = vsel %vm14184_vm11, %v9343_v29, %v9368_v6  ;;  %v2625_v36 = vsel %vm14185_vm5, %v9368_v6, %v9338_v19  ;;  %v2612_v33 = vsel %vm14177_vm1, %v9342_v25, %v9367_v27  ;;  %v2624_v38 = vsel %vm14186_vm8, %v9367_v27, %v9337_v5 }
 0x874   : > { %v8311_v52 = vpack.c.bf16 %v2625_v36, %v2624_v38  ;;  %v9371_v43 = vpop.permute.xlu1 %9370  ;;  %v8334_v16 = vpack.c.bf16 %v2613_v31, %v2612_v33  ;;  %v9348_v46 = vunpack.i.h.bf16 %v9346_v47  ;;  %v9347_v15 = vunpack.i.l.bf16 %v9346_v47 }
 0x875   : > { %v9373_v48 = vunpack.i.h.bf16 %v9371_v43  ;;  %v9372_v49 = vunpack.i.l.bf16 %v9371_v43  ;;  %v2615_v19 = vsel %vm14188_vm4, %v9323_v18, %v9313_v45  ;;  %vm14189_vm11 = vcmp.lt.s32.totalorder %v10593_v23, 16 }
 0x876   : > { %v9351_v62 = vpop.permute.xlu0 %9350  ;;  %8312 = vmatpush1.bf16.msk.msra.mxu0 %vm11324_vm3, %v8311_v52  ;;  %8335 = vmatprep.subr.msk.bf16.mxu1 %vm11297_vm2, %v8334_v16  ;;  %vm14190_vm5 = vmmov %vm14189_vm11  ;;  %v9318_v29 = vunpack.i.h.bf16 %v11529_v39  ;;  %v9317_v25 = vunpack.i.l.bf16 %v11529_v39  ;;  %vm14191_vm1 = vcmp.ge.s32.totalorder %v10602_v28, 16  ;;  %v14207_v36 = vmov 0 }
 0x877   : > { %v2549_v5 = vsel %vm14189_vm11, %v9348_v46, %v9373_v48  ;;  %v2548_v22 = vsel %vm14190_vm5, %v9347_v15, %v9372_v49  ;;  %v9353_v12 = vunpack.i.h.bf16 %v9351_v62  ;;  %v9352_v18 = vunpack.i.l.bf16 %v9351_v62  ;;  %8315 = vmatprep.subr.msk.bf16.mxu0 %vm11285_vm9, %v8314_v1  ;;  %8338 = vmatpush1.bf16.msk.msra.mxu1 %vm11333_vm0, %v8337_v57  ;;  %vm11592_vm8 = vmpackc.low %vm14191_vm1, %vm14191_vm1 }
 0x878   : > { %v9376_v45 = vpop.permute.xlu1 %9375  ;;  %8341 = vmatprep.subr.msk.bf16.mxu1 %vm11297_vm2, %v8340_v34  ;;  %v14193_v60 = vsel %vm11592_vm8, 4294967295, %v14192_v60  ;;  %v8320_v9 = vpack.c.bf16 %v2549_v5, %v2548_v22  ;;  %v8343_v1 = vpack.c.bf16 %v2615_v19, %v2614_v7  ;;  %vm14195_vm4 = vmmov %vm14190_vm5  ;;  %v14200_v7 = vmov 0  ;;  %v10038_v22 = vld [vmem:[%s14101_s3 + $0x30] sm:$0xff]  }
 0x879   : > { %14194 = vst [vmem:[#allocation28_spill] sm:$0xff] %v14193_v60  ;;  %v9378_v13 = vunpack.i.h.bf16 %v9376_v45  ;;  %v9377_v26 = vunpack.i.l.bf16 %v9376_v45  ;;  %v2547_v39 = vsel %vm14195_vm4, %v9318_v29, %v9333_v21  ;;  %vm14196_vm11 = vmmov %vm14195_vm4  ;;  %v14201_v7 = vsel %vm11610_vm15, 4294967295, %v14200_v7 }
 0x87a   : > { %v2546_v6 = vsel %vm14196_vm11, %v9317_v25, %v9332_v63  ;;  %vm14197_vm5 = vmmov %vm14195_vm4  ;;  %v9356_v55 = vpop.permute.xlu0 %9355  ;;  %8318 = vmatpush1.bf16.msk.msra.mxu0 %vm11324_vm3, %v8317_v54  ;;  %14202 = vst [vmem:[#allocation29_spill] sm:$0xff] %v14201_v7 }
 0x87b   : > { %v2544_v28 = vsel %vm14197_vm5, %v9372_v49, %v9352_v18  ;;  %vm14198_vm1 = vmmov %vm14195_vm4  ;;  %8321 = vmatprep.subr.msk.bf16.mxu0 %vm11592_vm8, %v8320_v9  ;;  %v9358_v38 = vunpack.i.h.bf16 %v9356_v55  ;;  %v9357_v24 = vunpack.i.l.bf16 %v9356_v55  ;;  %8344 = vmatpush1.bf16.msk.msra.mxu1 %vm11333_vm0, %v8343_v1 }
 0x87c   : > { %v2545_v27 = vsel %vm14198_vm1, %v9373_v48, %v9353_v12  ;;  %vm14203_vm4 = vmmov %vm14198_vm1  ;;  %v2552_v31 = vsel %vm14198_vm1, %v9377_v26, %v9347_v15  ;;  %v9381_v57 = vpop.permute.xlu1 %9380 }
 0x87d   : > { %v2541_v0 = vsel %vm14203_vm4, %v9353_v12, %v9378_v13  ;;  %vm14204_vm11 = vmmov %vm14198_vm1  ;;  %v9383_v43 = vunpack.i.h.bf16 %v9381_v57  ;;  %v9382_v16 = vunpack.i.l.bf16 %v9381_v57  ;;  %vm14210_vm4 = vcmp.ge.s32.totalorder %v10614_v44, 16  ;;  %v10039_v12 = vld [vmem:[%s14101_s3 + $0x38] sm:$0xff]   ;;  %s9011_s3 = sshll.u32 %s14596_s22, 9 }
 0x87e   : > { %v2553_v37 = vsel %vm14204_vm11, %v9378_v13, %v9348_v46  ;;  %vm14205_vm5 = vmmov %vm14198_vm1  ;;  %v8326_v46 = vpack.c.bf16 %v2547_v39, %v2546_v6  ;;  %v8349_v15 = vpack.c.bf16 %v2545_v27, %v2544_v28  ;;  %v2542_v49 = vsel %vm14198_vm1, %v9332_v63, %v9357_v24 }
 0x87f   : > { %v2540_v47 = vsel %vm14205_vm5, %v9352_v18, %v9377_v26  ;;  %vm11627_vm2 = vmpackc.low %vm14206_vm7, %vm14206_vm7  ;;  %v8323_v33 = vpack.c.bf16 %v2553_v37, %v2552_v31 }
 0x880   : > { %v14208_v36 = vsel %vm11627_vm2, 4294967295, %v14207_v36  ;;  %v8346_v52 = vpack.c.bf16 %v2541_v0, %v2540_v47  ;;  %vm11636_vm11 = vmpackc.low %vm14210_vm4, %vm14210_vm4 }
 0x881   : > { %14209 = vst [vmem:[#allocation30_spill] sm:$0xff] %v14208_v36  ;;  %v14212_v41 = vsel %vm11636_vm11, 4294967295, %v14211_v41  ;;  %vm14214_vm5 = vmmov %vm14198_vm1  ;;  %8324 = vmatpush1.bf16.msk.msra.mxu0 %vm11610_vm15, %v8323_v33 }
 0x882   : > { %14213 = vst [vmem:[#allocation31_spill] sm:$0xff] %v14212_v41  ;;  %v2543_v48 = vsel %vm14214_vm5, %v9333_v21, %v9358_v38  ;;  %8347 = vmatprep.subr.msk.bf16.mxu1 %vm11627_vm2, %v8346_v52  ;;  %vm14215_vm7 = vmmov %vm14198_vm1  ;;  %8327 = vmatprep.subr.msk.bf16.mxu0 %vm11592_vm8, %v8326_v46 }
 0x883   : > { %v2539_v44 = vsel %vm14215_vm7, %v9358_v38, %v9383_v43  ;;  %vm14216_vm4 = vmmov %vm14198_vm1  ;;  %8350 = vmatpush1.bf16.msk.msra.mxu1 %vm11636_vm11, %v8349_v15  ;;  %v8355_v5 = vpack.c.bf16 %v2543_v48, %v2542_v49 }
 0x884   : > { %v2551_v19 = vsel %vm14216_vm4, %v9383_v43, %v9318_v29  ;;  %vm14217_vm0 = vmmov %vm14198_vm1 }
 0x885   : > { %v2538_v62 = vsel %vm14217_vm0, %v9357_v24, %v9382_v16  ;;  %vm14218_vm5 = vmmov %vm14217_vm0  ;;  %vm14219_vm0 = vcmask 785408  }
 0x886   : > { %v2550_v21 = vsel %vm14218_vm5, %v9382_v16, %v9317_v25  ;;  %v8352_v34 = vpack.c.bf16 %v2539_v44, %v2538_v62  ;;  %vm14220_vm1 = vmmov %vm14219_vm0  ;;  %vm14223_vm5 = vcmask 261120  }
 0x887   : > { %v8329_v63 = vpack.c.bf16 %v2551_v19, %v2550_v21  ;;  %vm14221_vm7 = vmmov %vm14219_vm0  ;;  %v2679_v9 = vpop.permute.xlu0 %2678 }
 0x888   : > { %8353 = vmatprep.subr.msk.bf16.mxu1 %vm11627_vm2, %v8352_v34  ;;  %vm14222_vm4 = vmmov %vm14219_vm0 }
 0x889   : > { %8330 = vmatpush1.bf16.msk.msra.mxu0 %vm11610_vm15, %v8329_v63  ;;  %8356 = vmatpush1.bf16.msk.msra.mxu1 %vm11636_vm11, %v8355_v5  ;;  %v2684_v13 = vpop.permute.xlu1 %2683 }
 0x88b   : > { %v2669_v55 = vpop.permute.xlu0 %2668 }
 0x88c   : > { %8331 = vmatmul.mubr.msk.bf16.vlgmr.msra.gmra.mxu0 %vm14219_vm0, %v10038_v22  ;;  %8357 = vmatmul.mubr.msk.bf16.vlgmr.msra.gmra.mxu1 %vm14220_vm1, %v10038_v22  ;;  %vm14224_vm0 = vmmov %vm14223_vm5 }
 0x88d   : > { %2744 = vmatprep.mubr.bf16.mxu0 %v14103_v20  ;;  %2797 = vmatprep.mubr.bf16.mxu1 %v14103_v20  ;;  %v2674_v37 = vpop.permute.xlu1 %2673  ;;  %vm14225_vm1 = vmmov %vm14224_vm0 }
 0x894   : > { %8332 = vmatmul.mubr.msk.bf16.gmra.mxu0 %vm14221_vm7, %v10039_v12  ;;  %8358 = vmatmul.mubr.msk.bf16.gmra.mxu1 %vm14222_vm4, %v10039_v12  ;;  %vm14226_vm7 = vmmov %vm14224_vm0 }
 0x895   : > { %2880 = vmatprep.mubr.bf16.mxu0 %v14103_v20  ;;  %2933 = vmatprep.mubr.bf16.mxu1 %v14103_v20  ;;  %vm14227_vm4 = vmmov %vm14224_vm0 }
 0x94c   : > { %v2736_v18 = vpop.f32.mrf.mxu0  ;;  %v2789_v54 = vpop.f32.mrf.mxu1 }
 0x94d   : > { %v2737_v31 = vadd.f32 %v2736_v18, %v2669_v55 }
 0x94e   : > { %v2738_v29 = vpop.f32.mrf.mxu0  ;;  %v2791_v25 = vpop.f32.mrf.mxu1 }
 0x94f   : > { %v2739_v48 = vadd.f32 %v2738_v29, %v2669_v55  ;;  %v2792_v49 = vadd.f32 %v2791_v25, %v2669_v55 }
 0x950   : > { %v2740_v45 = vpop.f32.mrf.mxu0  ;;  %v2793_v1 = vpop.f32.mrf.mxu1 }
 0x951   : > { %v2741_v21 = vadd.f32 %v2740_v45, %v2674_v37  ;;  %v2794_v34 = vadd.f32 %v2793_v1, %v2674_v37  ;;  %v2811_v25 = vmax.f32 %v2792_v49, 0.0 }
 0x952   : > { %v2742_v26 = vpop.f32.mrf.mxu0  ;;  %v2795_v39 = vpop.f32.mrf.mxu1 }
 0x953   : > { %v2743_v33 = vadd.f32 %v2742_v26, %v2674_v37  ;;  %v2796_v52 = vadd.f32 %v2795_v39, %v2674_v37  ;;  %v2814_v45 = vmax.f32 %v2794_v34, 0.0  ;;  %v2808_v37 = vmax.f32 %v2737_v31, 0.0 }
 0x954   : > { %v2746_v6 = vpop.f32.mrf.mxu0  ;;  %v2799_v28 = vpop.f32.mrf.mxu1 }
 0x955   : > { %v2747_v43 = vadd.f32 %v2746_v6, %v2679_v9  ;;  %v2800_v44 = vadd.f32 %v2799_v28, %v2679_v9  ;;  %v2813_v22 = vmax.f32 %v2743_v33, 0.0 }
 0x956   : > { %v2748_v27 = vpop.f32.mrf.mxu0  ;;  %v2801_v0 = vpop.f32.mrf.mxu1 }
 0x957   : > { %v2749_v38 = vadd.f32 %v2748_v27, %v2679_v9  ;;  %v2802_v16 = vadd.f32 %v2801_v0, %v2679_v9  ;;  %v2815_v27 = vmax.f32 %v2796_v52, 0.0  ;;  %v2790_v0 = vadd.f32 %v2789_v54, %v2669_v55  ;;  %v10040_v55 = vld [vmem:[%s14102_s5 + $0x30] sm:$0xff]  }
 0x958   : > { %v2750_v47 = vpop.f32.mrf.mxu0  ;;  %v2803_v57 = vpop.f32.mrf.mxu1  ;;  %v2818_v41 = vmax.f32 %v2800_v44, 0.0  ;;  %v2812_v9 = vmax.f32 %v2741_v21, 0.0 }
 0x959   : > { %v2751_v24 = vadd.f32 %v2750_v47, %v2684_v13  ;;  %v2804_v46 = vadd.f32 %v2803_v57, %v2684_v13  ;;  %v2817_v12 = vmax.f32 %v2749_v38, 0.0  ;;  %v2816_v47 = vmax.f32 %v2747_v43, 0.0  ;;  %v2988_v21 = vpop.permute.xlu1 %2987 }
 0x95a   : > { %v2752_v15 = vpop.f32.mrf.mxu0  ;;  %v2805_v62 = vpop.f32.mrf.mxu1  ;;  %v2819_v39 = vmax.f32 %v2802_v16, 0.0  ;;  %v2809_v57 = vmax.f32 %v2739_v48, 0.0  ;;  %v2827_v33 = vpack.c.bf16 %v2815_v27, %v2811_v25  ;;  %v2810_v38 = vmax.f32 %v2790_v0, 0.0 }
 0x95b   : > { %v2753_v19 = vadd.f32 %v2752_v15, %v2684_v13  ;;  %v2820_v63 = vmax.f32 %v2751_v24, 0.0  ;;  %v2806_v5 = vadd.f32 %v2805_v62, %v2684_v13  ;;  %v2822_v18 = vmax.f32 %v2804_v46, 0.0 }
 0x95c   : > { %v2825_v13 = vpack.c.bf16 %v2813_v22, %v2809_v57  ;;  %v2824_v24 = vpack.c.bf16 %v2812_v9, %v2808_v37  ;;  %v2826_v54 = vpack.c.bf16 %v2814_v45, %v2810_v38 }
 0x95d   : > { %v2821_v26 = vmax.f32 %v2753_v19, 0.0  ;;  %v2823_v6 = vmax.f32 %v2806_v5, 0.0  ;;  %v2828_v28 = vpack.c.bf16 %v2820_v63, %v2816_v47  ;;  %v2830_v1 = vpack.c.bf16 %v2822_v18, %v2818_v41  ;;  %v10041_v41 = vld [vmem:[%s14102_s5 + $0x38] sm:$0xff]   ;;  %v2983_v5 = vpop.permute.xlu0 %2982 }
 0x95f   : > { %v2829_v29 = vpack.c.bf16 %v2821_v26, %v2817_v12  ;;  %v2831_v15 = vpack.c.bf16 %v2823_v6, %v2819_v39 }
 0x961   : > { %2860 = vmatprep.subr.bf16.mxu0 %v2829_v29  ;;  %2913 = vmatprep.subr.bf16.mxu1 %v2831_v15 }
 0x962   : > { %2861 = vmatpush1.bf16.msra.mxu0 %v2828_v28  ;;  %2914 = vmatpush1.bf16.msra.mxu1 %v2830_v1 }
 0x963   : > { %2862 = vmatprep.subr.bf16.mxu0 %v2825_v13  ;;  %2915 = vmatprep.subr.bf16.mxu1 %v2827_v33 }
 0x966   : > { %2863 = vmatpush1.bf16.msra.mxu0 %v2824_v24  ;;  %2916 = vmatpush1.bf16.msra.mxu1 %v2826_v54 }
 0x969   : > { %8361 = vmatmul.mubr.msk.bf16.vlgmr.msra.gmra.mxu0 %vm14223_vm5, %v10040_v55  ;;  %8363 = vmatmul.mubr.msk.bf16.vlgmr.msra.gmra.mxu1 %vm14224_vm0, %v10040_v55  ;;  %vm14228_vm5 = vmmov %vm14224_vm0 }
 0x96a   : > { %2890 = vmatprep.mubr.bf16.mxu0 %v14103_v20  ;;  %2943 = vmatprep.mubr.bf16.mxu1 %v14103_v20 }
 0x971   : > { %8362 = vmatmul.mubr.msk.bf16.gmra.mxu0 %vm14225_vm1, %v10041_v41  ;;  %8364 = vmatmul.mubr.msk.bf16.gmra.mxu1 %vm14226_vm7, %v10041_v41  ;;  %vm14005_vm1 = vcmask 130048   ;;  %vm14232_vm7 = vcmp.lt.s32.totalorder %v10593_v23, 1 }
 0x972   : > { %3064 = vmatprep.mubr.bf16.mxu0 %v14103_v20  ;;  %3107 = vmatprep.mubr.bf16.mxu1 %v14103_v20 }
 0xa29   : > { %v2882_v31 = vpop.f32.mrf.mxu0  ;;  %v2935_v52 = vpop.f32.mrf.mxu1 }
 0xa2a   : > { %v2954_v12 = vadd.f32 %v2882_v31, %v11395_v40 }
 0xa2b   : > { %v2884_v43 = vpop.f32.mrf.mxu0  ;;  %v2937_v16 = vpop.f32.mrf.mxu1 }
 0xa2c   : > { %v2955_v25 = vadd.f32 %v2884_v43, %v11403_v11  ;;  %v2957_v40 = vadd.f32 %v2937_v16, %v11418_v2  ;;  %v2973_v11 = vpop.permute.xlu0 %2972 }
 0xa2d   : > { %v2886_v46 = vpop.f32.mrf.mxu0  ;;  %v2939_v48 = vpop.f32.mrf.mxu1  ;;  %v2990_v43 = vadd.f32 %v2973_v11, %v2954_v12 }
 0xa2e   : > { %v2958_v28 = vadd.f32 %v2886_v46, %v11398_v14  ;;  %v2991_v33 = vadd.f32 %v2973_v11, %v2955_v25  ;;  %v2993_v14 = vadd.f32 %v2973_v11, %v2957_v40 }
 0xa2f   : > { %v2888_v49 = vpop.f32.mrf.mxu0  ;;  %v2941_v44 = vpop.f32.mrf.mxu1 }
 0xa30   : > { %v2959_v18 = vadd.f32 %v2888_v49, %v11407_v42  ;;  %v2961_v39 = vadd.f32 %v2941_v44, %v11413_v35  ;;  %v2960_v35 = vadd.f32 %v2939_v48, %v11405_v59  ;;  %v10042_v48 = vld [vmem:[%s13923_s7] sm:$0xff]   ;;  %v14229_v49 = vlaneseq }
 0xa31   : > { %v2892_v19 = vpop.f32.mrf.mxu0  ;;  %v2945_v62 = vpop.f32.mrf.mxu1 }
 0xa32   : > { %v2962_v6 = vadd.f32 %v2892_v19, %v11443_v32  ;;  %v2964_v42 = vadd.f32 %v2945_v62, %v11449_v53  ;;  %v706_v44 = vshrl.u32 %v14229_v49, 7 }
 0xa33   : > { %v2894_v34 = vpop.f32.mrf.mxu0  ;;  %v2947_v63 = vpop.f32.mrf.mxu1 }
 0xa34   : > { %v2963_v26 = vadd.f32 %v2894_v34, %v11436_v3  ;;  %v2965_v0 = vadd.f32 %v2947_v63, %v11445_v56  ;;  %v2998_v2 = vadd.f32 %v2983_v5, %v2962_v6  ;;  %v3000_v38 = vadd.f32 %v2983_v5, %v2964_v42 }
 0xa35   : > { %v2896_v22 = vpop.f32.mrf.mxu0  ;;  %v2949_v47 = vpop.f32.mrf.mxu1  ;;  %v707_v19 = vadd.s32 8, %v706_v44 }
 0xa36   : > { %v2966_v27 = vadd.f32 %v2896_v22, %v11433_v17  ;;  %v2968_v57 = vadd.f32 %v2949_v47, %v11438_v58  ;;  %v2978_v17 = vpop.permute.xlu1 %2977  ;;  %v2999_v58 = vadd.f32 %v2983_v5, %v2963_v26  ;;  %v3001_v37 = vadd.f32 %v2983_v5, %v2965_v0  ;;  %v3022_v26 = vpop.permute.xlu0 %3021 }
 0xa37   : > { %v2898_v29 = vpop.f32.mrf.mxu0  ;;  %v2951_v9 = vpop.f32.mrf.mxu1  ;;  %v2995_v15 = vadd.f32 %v2978_v17, %v2959_v18  ;;  %v2997_v13 = vadd.f32 %v2978_v17, %v2961_v39  ;;  %v2994_v54 = vadd.f32 %v2978_v17, %v2958_v28  ;;  %v2996_v41 = vadd.f32 %v2978_v17, %v2960_v35 }
 0xa38   : > { %v2967_v3 = vadd.f32 %v2898_v29, %v11440_v61  ;;  %v3002_v32 = vadd.f32 %v2988_v21, %v2966_v27  ;;  %v2969_v56 = vadd.f32 %v2951_v9, %v11447_v30  ;;  %v3004_v45 = vadd.f32 %v2988_v21, %v2968_v57 }
 0xa39   : > { %v2956_v61 = vadd.f32 %v2935_v52, %v11411_v51  ;;  %v3007_v31 = vpack.c.bf16 %v2995_v15, %v2991_v33  ;;  %v3009_v16 = vpack.c.bf16 %v2997_v13, %v2993_v14  ;;  %v3006_v51 = vpack.c.bf16 %v2994_v54, %v2990_v43 }
 0xa3a   : > { %v3003_v1 = vadd.f32 %v2988_v21, %v2967_v3  ;;  %v3005_v53 = vadd.f32 %v2988_v21, %v2969_v56  ;;  %v3010_v59 = vpack.c.bf16 %v3002_v32, %v2998_v2  ;;  %v3012_v30 = vpack.c.bf16 %v3004_v45, %v3000_v38  ;;  %v3017_v62 = vpop.permute.xlu1 %3016 }
 0xa3b   : > { %v2992_v46 = vadd.f32 %v2973_v11, %v2956_v61  ;;  %vm709_vm0 = vcmp.lt.s32.totalorder %v707_v19, 10  ;;  %v10197_v47 = vmov -1e+30  }
 0xa3c   : > { %v3011_v24 = vpack.c.bf16 %v3003_v1, %v2999_v58  ;;  %v3013_v55 = vpack.c.bf16 %v3005_v53, %v3001_v37  ;;  %v11733_v39 = vsel %vm709_vm0, 0.0, %v10197_v47 }
 0xa3d   : > { %v3008_v52 = vpack.c.bf16 %v2996_v41, %v2992_v46  ;;  %14230 = vst [vmem:[#allocation32_spill] sm:$0xff] %v11733_v39 }
 0xa3e   : > { %3044 = vmatprep.subr.bf16.mxu0 %v3011_v24  ;;  %3087 = vmatprep.subr.bf16.mxu1 %v3013_v55 }
 0xa3f   : > { %3045 = vmatpush1.bf16.msra.mxu0 %v3010_v59  ;;  %3088 = vmatpush1.bf16.msra.mxu1 %v3012_v30 }
 0xa40   : > { %3046 = vmatprep.subr.bf16.mxu0 %v3007_v31  ;;  %3089 = vmatprep.subr.bf16.mxu1 %v3009_v16 }
 0xa43   : > { %3047 = vmatpush1.bf16.msra.mxu0 %v3006_v51  ;;  %3090 = vmatpush1.bf16.msra.mxu1 %v3008_v52 }
 0xa46   : > { %8366 = vmatmul.mubr.msk.bf16.vlgmr.msra.gmra.mxu0 %vm14227_vm4, %v10042_v48  ;;  %8367 = vmatmul.mubr.msk.bf16.vlgmr.msra.gmra.mxu1 %vm14228_vm5, %v10042_v48  ;;  %vm14233_vm4 = vmmov %vm14232_vm7 }
 0xa47   : > { %3311 = vmatprep.mubr.bf16.mxu0 %v14103_v20  ;;  %3364 = vmatprep.mubr.bf16.mxu1 %v14103_v20  ;;  %vm14234_vm5 = vmmov %vm14233_vm4 }
 0xa48   : > { %vm14235_vm0 = vmmov %vm14233_vm4 }
 0xa49   : > { %vm14242_vm11 = vmmov %vm14235_vm0 }
 0xb06   : > { %v3066_v21 = vpop.f32.mrf.mxu0  ;;  %v3109_v63 = vpop.f32.mrf.mxu1 }
 0xb07   : > { %v11719_v34 = vadd.f32 %v3066_v21, %v3017_v62  ;;  %v11721_v5 = vadd.f32 %v3109_v63, %v3017_v62 }
 0xb08   : > { %v3068_v22 = vpop.f32.mrf.mxu0  ;;  %v3111_v18 = vpop.f32.mrf.mxu1 }
 0xb09   : > { %3118 = vst [vmem:[%s11723_s20] sm:$0xff] %v11719_v34  ;;  %v11727_v12 = vadd.f32 %v3068_v22, %v3017_v62  ;;  %3120 = vst [vmem:[%s11723_s20 + $0x10] sm:$0xff] %v11721_v5  ;;  %v11731_v27 = vadd.f32 %v3111_v18, %v3017_v62 }
 0xb0a   : > { %v3070_v6 = vpop.f32.mrf.mxu0  ;;  %v3113_v57 = vpop.f32.mrf.mxu1 }
 0xb0b   : > { %3119 = vst [vmem:[%s11723_s20 + $0x8] sm:$0xff] %v11727_v12  ;;  %v3071_v0 = vadd.f32 %v3070_v6, %v3022_v26  ;;  %3121 = vst [vmem:[%s11723_s20 + $0x18] sm:$0xff] %v11731_v27  ;;  %v3114_v29 = vadd.f32 %v3113_v57, %v3022_v26 }
 0xb0c   : > { %v3072_v25 = vpop.f32.mrf.mxu0  ;;  %v3115_v3 = vpop.f32.mrf.mxu1 }
 0xb0d   : > { %3122 = vst [vmem:[%s11723_s20 + $0x20] sm:$0xff] %v3071_v0  ;;  %v3130_v40 = vadd.f32 %v3071_v0, %v11733_v39  ;;  %v3073_v42 = vadd.f32 %v3072_v25, %v3022_v26  ;;  %3124 = vst [vmem:[%s11723_s20 + $0x30] sm:$0xff] %v3114_v29  ;;  %v3132_v9 = vadd.f32 %v3114_v29, %v11733_v39 }
 0xb0e   : > { %v3116_v17 = vadd.f32 %v3115_v3, %v3022_v26 }
 0xb0f   : > { %v3134_v28 = vmax.f32 %v11719_v34, %v3130_v40  ;;  %3123 = vst [vmem:[%s11723_s20 + $0x28] sm:$0xff] %v3073_v42  ;;  %v3131_v35 = vadd.f32 %v3073_v42, %v11733_v39  ;;  %v3148_v32 = vmax.f32 %v11721_v5, %v3132_v9 }
 0xb10   : > { %3125 = vst [vmem:[%s11723_s20 + $0x38] sm:$0xff] %v3116_v17  ;;  %v3133_v56 = vadd.f32 %v3116_v17, %v11733_v39 }
 0xb11   : > { %v3135_v15 = vrot.slane %v3134_v28, 4  ;;  %v3141_v58 = vmax.f32 %v11727_v12, %v3131_v35  ;;  %v3149_v45 = vrot.slane %v3148_v32, 4 }
 0xb12   : > { %v3155_v1 = vmax.f32 %v11731_v27, %v3133_v56 }
 0xb13   : > { %v3136_v11 = vmax.f32 %v3134_v28, %v3135_v15  ;;  %v3142_v13 = vrot.slane %v3141_v58, 4  ;;  %v3150_v2 = vmax.f32 %v3148_v32, %v3149_v45 }
 0xb14   : > { %v3156_v37 = vrot.slane %v3155_v1, 4 }
 0xb15   : > { %v3137_v53 = vrot.slane %v3136_v11, 2  ;;  %v3143_v61 = vmax.f32 %v3141_v58, %v3142_v13  ;;  %v3151_v33 = vrot.slane %v3150_v2, 2 }
 0xb16   : > { %v3157_v38 = vmax.f32 %v3155_v1, %v3156_v37 }
 0xb17   : > { %v3138_v24 = vmax.f32 %v3136_v11, %v3137_v53  ;;  %v3144_v14 = vrot.slane %v3143_v61, 2  ;;  %v3152_v54 = vmax.f32 %v3150_v2, %v3151_v33 }
 0xb18   : > { %v3158_v59 = vrot.slane %v3157_v38, 2 }
 0xb19   : > { %v3139_v55 = vrot.slane %v3138_v24, 1  ;;  %v3145_v41 = vmax.f32 %v3143_v61, %v3144_v14  ;;  %v3153_v30 = vrot.slane %v3152_v54, 1 }
 0xb1a   : > { %v3159_v31 = vmax.f32 %v3157_v38, %v3158_v59 }
 0xb1b   : > { %v3140_v43 = vmax.f32 %v3138_v24, %v3139_v55  ;;  %v3146_v16 = vrot.slane %v3145_v41, 1  ;;  %v3154_v46 = vmax.f32 %v3152_v54, %v3153_v30 }
 0xb1c   : > { %v3160_v51 = vrot.slane %v3159_v31, 1 }
 0xb1d   : > { %v3162_v52 = vsub.f32 %v11719_v34, %v3140_v43  ;;  %v3166_v48 = vsub.f32 %v3130_v40, %v3140_v43  ;;  %v3147_v49 = vmax.f32 %v3145_v41, %v3146_v16  ;;  %v3164_v44 = vsub.f32 %v11721_v5, %v3154_v46 }
 0xb1e   : > { %v3168_v19 = vsub.f32 %v3132_v9, %v3154_v46  ;;  %v3161_v62 = vmax.f32 %v3159_v31, %v3160_v51 }
 0xb1f   : > { %v3170_v21 = vmul.f32 1.442695, %v3162_v52  ;;  %v3178_v63 = vmul.f32 1.442695, %v3166_v48  ;;  %v3163_v22 = vsub.f32 %v11727_v12, %v3147_v49  ;;  %v3167_v18 = vsub.f32 %v3131_v35, %v3147_v49 }
 0xb20   : > { %v3174_v26 = vmul.f32 1.442695, %v3164_v44  ;;  %v3182_v47 = vmul.f32 1.442695, %v3168_v19  ;;  %v3165_v6 = vsub.f32 %v11731_v27, %v3161_v62  ;;  %v3169_v0 = vsub.f32 %v3133_v56, %v3161_v62 }
 0xb21   : > { %10081 = vpow2.f32 %v3170_v21  ;;  %v3172_v57 = vmul.f32 1.442695, %v3163_v22  ;;  %v3180_v34 = vmul.f32 1.442695, %v3167_v18 }
 0xb22   : > { %10083 = vpow2.f32 %v3178_v63  ;;  %v3176_v29 = vmul.f32 1.442695, %v3165_v6  ;;  %v3184_v5 = vmul.f32 1.442695, %v3169_v0 }
 0xb23   : > { %10085 = vpow2.f32 %v3174_v26 }
 0xb24   : > { %10087 = vpow2.f32 %v3182_v47 }
 0xb25   : > { %10089 = vpow2.f32 %v3172_v57 }
 0xb26   : > { %10091 = vpow2.f32 %v3180_v34  ;;  %v10043_v34 = vld [vmem:[%s13925_s9] sm:$0xff]  }
 0xb27   : > { %10093 = vpow2.f32 %v3176_v29 }
 0xb28   : > { %10095 = vpow2.f32 %v3184_v5  ;;  %v10044_v5 = vld [vmem:[%s13925_s9 + $0x8] sm:$0xff]  }
 0xb2e   : > { %v10082_v25 = vpop.eup %10081 }
 0xb2f   : > { %v10084_v12 = vpop.eup %10083 }
 0xb30   : > { %v10086_v40 = vpop.eup %10085  ;;  %v3186_v42 = vadd.f32 %v10084_v12, %v10082_v25 }
 0xb31   : > { %v10088_v3 = vpop.eup %10087 }
 0xb32   : > { %v10090_v9 = vpop.eup %10089  ;;  %v3187_v27 = vrot.slane %v3186_v42, 4  ;;  %v3200_v17 = vadd.f32 %v10088_v3, %v10086_v40 }
 0xb33   : > { %v10092_v28 = vpop.eup %10091 }
 0xb34   : > { %v10094_v35 = vpop.eup %10093  ;;  %v3188_v32 = vadd.f32 %v3187_v27, %v3186_v42  ;;  %v3201_v56 = vrot.slane %v3200_v17, 4  ;;  %v3193_v15 = vadd.f32 %v10092_v28, %v10090_v9 }
 0xb35   : > { %v10096_v58 = vpop.eup %10095 }
 0xb36   : > { %v3189_v45 = vrot.slane %v3188_v32, 2  ;;  %v3202_v1 = vadd.f32 %v3201_v56, %v3200_v17  ;;  %v3194_v11 = vrot.slane %v3193_v15, 4  ;;  %v3207_v13 = vadd.f32 %v10096_v58, %v10094_v35 }
 0xb38   : > { %v3190_v2 = vadd.f32 %v3189_v45, %v3188_v32  ;;  %v3203_v37 = vrot.slane %v3202_v1, 2  ;;  %v3195_v53 = vadd.f32 %v3194_v11, %v3193_v15  ;;  %v3208_v61 = vrot.slane %v3207_v13, 4 }
 0xb3a   : > { %v3191_v33 = vrot.slane %v3190_v2, 1  ;;  %v3204_v38 = vadd.f32 %v3203_v37, %v3202_v1  ;;  %v3209_v24 = vadd.f32 %v3208_v61, %v3207_v13  ;;  %v3196_v14 = vrot.slane %v3195_v53, 2 }
 0xb3c   : > { %v3205_v54 = vrot.slane %v3204_v38, 1  ;;  %v3197_v59 = vadd.f32 %v3196_v14, %v3195_v53  ;;  %v3192_v55 = vadd.f32 %v3191_v33, %v3190_v2  ;;  %v3210_v41 = vrot.slane %v3209_v24, 2 }
 0xb3e   : > { %v3198_v30 = vrot.slane %v3197_v59, 1  ;;  %v3211_v31 = vadd.f32 %v3210_v41, %v3209_v24  ;;  %v3206_v43 = vadd.f32 %v3205_v54, %v3204_v38  ;;  %10097 = vrcp.f32 %v3192_v55 }
 0xb40   : > { %v3199_v16 = vadd.f32 %v3198_v30, %v3197_v59  ;;  %v3212_v46 = vrot.slane %v3211_v31, 1  ;;  %10099 = vrcp.f32 %v3206_v43 }
 0xb42   : > { %10101 = vrcp.f32 %v3199_v16  ;;  %v3213_v51 = vadd.f32 %v3212_v46, %v3211_v31 }
 0xb44   : > { %10103 = vrcp.f32 %v3213_v51 }
 0xb4b   : > { %v10098_v52 = vpop.eup %10097 }
 0xb4c   : > { %v3218_v44 = vmul.f32 %v10098_v52, %v10082_v25  ;;  %v3222_v19 = vmul.f32 %v10098_v52, %v10084_v12  ;;  %v3255_v25 = vpop.permute.xlu0 %3254  ;;  %v3260_v12 = vpop.permute.xlu1 %3259 }
 0xb4d   : > { %v10100_v48 = vpop.eup %10099 }
 0xb4e   : > { %v3220_v22 = vmul.f32 %v10100_v48, %v10086_v40  ;;  %v3224_v18 = vmul.f32 %v10100_v48, %v10088_v3  ;;  %v3238_v0 = vpack.c.bf16 %v3222_v19, %v3218_v44 }
 0xb4f   : > { %v10102_v49 = vpop.eup %10101 }
 0xb50   : > { %v3219_v62 = vmul.f32 %v10102_v49, %v10090_v9  ;;  %v3223_v21 = vmul.f32 %v10102_v49, %v10092_v28  ;;  %v3240_v29 = vpack.c.bf16 %v3224_v18, %v3220_v22  ;;  %v3245_v9 = vpop.permute.xlu0 %3244  ;;  %v3250_v27 = vpop.permute.xlu1 %3249 }
 0xb51   : > { %v10104_v63 = vpop.eup %10103 }
 0xb52   : > { %v3239_v26 = vpack.c.bf16 %v3223_v21, %v3219_v62  ;;  %v3221_v47 = vmul.f32 %v10104_v63, %v10094_v35  ;;  %v3225_v6 = vmul.f32 %v10104_v63, %v10096_v58 }
 0xb54   : > { %3293 = vmatprep.subr.bf16.mxu0 %v3239_v26  ;;  %v3241_v57 = vpack.c.bf16 %v3225_v6, %v3221_v47 }
 0xb55   : > { %3294 = vmatpush1.bf16.msra.mxu0 %v3238_v0 }
 0xb56   : > { %3346 = vmatprep.subr.bf16.mxu1 %v3241_v57 }
 0xb57   : > { %3347 = vmatpush1.bf16.msra.mxu1 %v3240_v29  ;;  %v3391_v29 = vld [vmem:[%s13928_s12 + $0x10] sm:$0xff] }
 0xb58   : > { %8370 = vmatmul.mubr.msk.bf16.vlgmr.msra.gmra.mxu0 %vm14005_vm1, %v10043_v34 }
 0xb59   : > { %3321 = vmatprep.mubr.bf16.mxu0 %v14103_v20 }
 0xb5a   : > { %8372 = vmatmul.mubr.msk.bf16.vlgmr.msra.gmra.mxu1 %vm14005_vm1, %v10043_v34 }
 0xb5b   : > { %3374 = vmatprep.mubr.bf16.mxu1 %v14103_v20 }
 0xb60   : > { %8371 = vmatmul.mubr.msk.bf16.gmra.mxu0 %vm14005_vm1, %v10044_v5 }
 0xb61   : > { %3621 = vmatprep.mubr.bf16.mxu0 %v14103_v20 }
 0xb62   : > { %8373 = vmatmul.mubr.msk.bf16.gmra.mxu1 %vm14005_vm1, %v10044_v5  ;;  %v3392_v5 = vld [vmem:[%s13928_s12 + $0x18] sm:$0xff]  ;;  %vm14236_vm1 = vmmov %vm14235_vm0 }
 0xb63   : > { %3674 = vmatprep.mubr.bf16.mxu1 %v14103_v20 }
 0xc18   : > { %v3313_v40 = vpop.f32.mrf.mxu0 }
 0xc19   : > { %v11769_v35 = vadd.f32 %v3313_v40, %v3245_v9  ;;  %v3399_v40 = vld [vmem:[%s13930_s14 + $0x10] sm:$0xff] }
 0xc1a   : > { %v3366_v42 = vpop.f32.mrf.mxu1  ;;  %v3315_v3 = vpop.f32.mrf.mxu0 }
 0xc1b   : > { %v11773_v58 = vadd.f32 %v3315_v3, %v3245_v9  ;;  %v11781_v37 = vadd.f32 %v3366_v42, %v3245_v9  ;;  %v3400_v42 = vld [vmem:[%s13930_s14 + $0x18] sm:$0xff]  ;;  %v3397_v3 = vld [vmem:[%s13930_s14] sm:$0xff] }
 0xc1c   : > { %v3368_v17 = vpop.f32.mrf.mxu1  ;;  %v3317_v28 = vpop.f32.mrf.mxu0 }
 0xc1d   : > { %v11771_v32 = vadd.f32 %v3317_v28, %v3250_v27  ;;  %v11788_v24 = vadd.f32 %v3368_v17, %v3245_v9  ;;  %v3398_v9 = vld [vmem:[%s13930_s14 + $0x8] sm:$0xff] }
 0xc1e   : > { %v3370_v56 = vpop.f32.mrf.mxu1  ;;  %v3319_v15 = vpop.f32.mrf.mxu0 }
 0xc1f   : > { %v11775_v45 = vadd.f32 %v3370_v56, %v3250_v27  ;;  %v11777_v1 = vadd.f32 %v3319_v15, %v3250_v27  ;;  %v9384_v11 = vpack.i.bf16 %v11771_v32, %v11769_v35  ;;  %v3545_v6 = vpack.c.bf16 %v11771_v32, %v11769_v35 }
 0xc20   : > { %v3372_v13 = vpop.f32.mrf.mxu1  ;;  %v3323_v2 = vpop.f32.mrf.mxu0 }
 0xc21   : > { %v11783_v53 = vadd.f32 %v3372_v13, %v3250_v27  ;;  %9385 = vrot.lane.b32.xlu0 %v9384_v11, %s14231_s25  ;;  %v9399_v61 = vpack.i.bf16 %v11777_v1, %v11773_v58  ;;  %v9389_v14 = vpack.i.bf16 %v11775_v45, %v11781_v37  ;;  %v11803_v46 = vadd.f32 %v3323_v2, %v3255_v25 }
 0xc22   : > { %v3376_v33 = vpop.f32.mrf.mxu1  ;;  %v3325_v38 = vpop.f32.mrf.mxu0  ;;  %v3546_v63 = vpack.c.bf16 %v11777_v1, %v11773_v58  ;;  %v3547_v0 = vpack.c.bf16 %v11775_v45, %v11781_v37 }
 0xc23   : > { %9400 = vrot.lane.b32.xlu1 %v9399_v61, %s14231_s25  ;;  %v9404_v55 = vpack.i.bf16 %v11783_v53, %v11788_v24  ;;  %v11798_v43 = vadd.f32 %v3325_v38, %v3255_v25  ;;  %v11814_v19 = vadd.f32 %v3376_v33, %v3255_v25  ;;  %v3548_v26 = vpack.c.bf16 %v11783_v53, %v11788_v24 }
 0xc24   : > { %v3378_v54 = vpop.f32.mrf.mxu1  ;;  %v3327_v59 = vpop.f32.mrf.mxu0 }
 0xc25   : > { %9390 = vrot.lane.b32.xlu0 %v9389_v14, %s14231_s25  ;;  %v11796_v41 = vadd.f32 %v3327_v59, %v3260_v12  ;;  %v11807_v48 = vadd.f32 %v3378_v54, %v3255_v25  ;;  %v3389_v25 = vld [vmem:[%s13928_s12] sm:$0xff] }
 0xc26   : > { %v3380_v30 = vpop.f32.mrf.mxu1  ;;  %v3329_v31 = vpop.f32.mrf.mxu0 }
 0xc27   : > { %v11800_v16 = vadd.f32 %v3329_v31, %v3260_v12  ;;  %9405 = vrot.lane.b32.xlu1 %v9404_v55, %s14231_s25  ;;  %v11805_v51 = vadd.f32 %v3380_v30, %v3260_v12  ;;  %v3549_v62 = vpack.c.bf16 %v11796_v41, %v11803_v46  ;;  %v9414_v18 = vpack.i.bf16 %v11796_v41, %v11803_v46 }
 0xc28   : > { %v3382_v52 = vpop.f32.mrf.mxu1 }
 0xc29   : > { %v11809_v49 = vadd.f32 %v3382_v52, %v3260_v12  ;;  %9395 = vrot.lane.b32.xlu0 %v9384_v11, %s14104_s23  ;;  %v3550_v44 = vpack.c.bf16 %v11800_v16, %v11798_v43  ;;  %v3551_v22 = vpack.c.bf16 %v11805_v51, %v11814_v19  ;;  %v9439_v47 = vpack.i.bf16 %v11800_v16, %v11798_v43  ;;  %v3390_v12 = vld [vmem:[%s13928_s12 + $0x8] sm:$0xff] }
 0xc2a   : > { %v9419_v57 = vpack.i.bf16 %v11805_v51, %v11814_v19 }
 0xc2b   : > { %3593 = vmatprep.subr.bf16.mxu0 %v3550_v44  ;;  %9410 = vrot.lane.b32.xlu1 %v9399_v61, %s14104_s23  ;;  %v3552_v21 = vpack.c.bf16 %v11809_v49, %v11807_v48  ;;  %v9444_v34 = vpack.i.bf16 %v11809_v49, %v11807_v48 }
 0xc2c   : > { %3594 = vmatpush1.bf16.msra.mxu0 %v3549_v62 }
 0xc2d   : > { %3646 = vmatprep.subr.bf16.mxu1 %v3552_v21  ;;  %3595 = vmatprep.subr.bf16.mxu0 %v3546_v63 }
 0xc2e   : > { %3647 = vmatpush1.bf16.msra.mxu1 %v3551_v22  ;;  %9415 = vrot.lane.b32.xlu0 %v9414_v18, %s14231_s25 }
 0xc2f   : > { %3648 = vmatprep.subr.bf16.mxu1 %v3548_v26  ;;  %9440 = vrot.lane.b32.xlu1 %v9439_v47, %s14231_s25 }
 0xc30   : > { %3596 = vmatpush1.bf16.msra.mxu0 %v3545_v6 }
 0xc32   : > { %3649 = vmatpush1.bf16.msra.mxu1 %v3547_v0  ;;  %9420 = vrot.lane.b32.xlu0 %v9419_v57, %s14231_s25 }
 0xc33   : > { %9445 = vrot.lane.b32.xlu1 %v9444_v34, %s14231_s25 }
 0xc36   : > { %9425 = vrot.lane.b32.xlu0 %v9414_v18, %s14104_s23 }
 0xc37   : > { %9450 = vrot.lane.b32.xlu1 %v9439_v47, %s14104_s23 }
 0xc3a   : > { %9430 = vrot.lane.b32.xlu0 %v9419_v57, %s14104_s23 }
 0xc3b   : > { %9455 = vrot.lane.b32.xlu1 %v9444_v34, %s14104_s23 }
 0xc3e   : > { %9435 = vrot.lane.b32.xlu0 %v9389_v14, %s14104_s23 }
 0xc3f   : > { %9460 = vrot.lane.b32.xlu1 %v9404_v55, %s14104_s23 }
 0xc42   : > { %3565 = vperm.xlu0 %9062, %v3391_v29  }
 0xc43   : > { %3570 = vperm.xlu1 %9063, %v3392_v5  }
 0xc46   : > { %3555 = vperm.xlu0 %9062, %v3389_v25  }
 0xc47   : > { %3560 = vperm.xlu1 %9063, %v3390_v12  }
 0xc4a   : > { %3869 = vperm.xlu0 %9062, %v3399_v40  }
 0xc4b   : > { %3874 = vperm.xlu1 %9063, %v3400_v42  }
 0xc4e   : > { %3859 = vperm.xlu0 %9062, %v3397_v3  }
 0xc4f   : > { %3864 = vperm.xlu1 %9063, %v3398_v9  }
 0xc93   : > { %v9386_v27 = vpop.permute.xlu0 %9385 }
 0xc94   : > { %v9388_v33 = vunpack.i.h.bf16 %v9386_v27  ;;  %v9387_v38 = vunpack.i.l.bf16 %v9386_v27 }
 0xc95   : > { %v9401_v17 = vpop.permute.xlu1 %9400 }
 0xc96   : > { %v9403_v13 = vunpack.i.h.bf16 %v9401_v17  ;;  %v9402_v2 = vunpack.i.l.bf16 %v9401_v17 }
 0xc97   : > { %v9391_v28 = vpop.permute.xlu0 %9390 }
 0xc98   : > { %v9393_v14 = vunpack.i.h.bf16 %v9391_v28  ;;  %v3505_v52 = vsel %vm14232_vm7, %v9387_v38, %v9402_v2  ;;  %v3506_v44 = vsel %vm14233_vm4, %v9388_v33, %v9403_v13  ;;  %v9392_v26 = vunpack.i.l.bf16 %v9391_v28  ;;  %vm14237_vm7 = vmmov %vm14235_vm0 }
 0xc99   : > { %v9406_v56 = vpop.permute.xlu1 %9405  ;;  %v8383_v25 = vpack.c.bf16 %v3506_v44, %v3505_v52  ;;  %vm14238_vm4 = vmmov %vm14235_vm0 }
 0xc9a   : > { %v9408_v62 = vunpack.i.h.bf16 %v9406_v56  ;;  %v9407_v21 = vunpack.i.l.bf16 %v9406_v56  ;;  %v3502_v34 = vsel %vm14236_vm1, %v9403_v13, %v9393_v14  ;;  %vm14241_vm1 = vmmov %vm14235_vm0 }
 0xc9b   : > { %v11873_v15 = vpop.permute.xlu0 %9395 }
 0xc9c   : > { %v3497_v12 = vsel %vm14237_vm7, %v9392_v26, %v9407_v21  ;;  %v3498_v40 = vsel %vm14238_vm4, %v9393_v14, %v9408_v62  ;;  %v3509_v27 = vsel %vm14241_vm1, %v9407_v21, %v9387_v38  ;;  %vm14243_vm7 = vmmov %vm14235_vm0  ;;  %vm14248_vm1 = vcmp.lt.s32.totalorder %v10593_v23, 2 }
 0xc9d   : > { %v11875_v11 = vpop.permute.xlu1 %9410  ;;  %vm14244_vm4 = vmmov %vm14235_vm0 }
 0xca0   : > { %v9416_v61 = vpop.permute.xlu0 %9415 }
 0xca1   : > { %v9441_v54 = vpop.permute.xlu1 %9440  ;;  %v9418_v59 = vunpack.i.h.bf16 %v9416_v61  ;;  %v9417_v55 = vunpack.i.l.bf16 %v9416_v61 }
 0xca2   : > { %v9443_v30 = vunpack.i.h.bf16 %v9441_v54  ;;  %v9442_v31 = vunpack.i.l.bf16 %v9441_v54 }
 0xca4   : > { %v3507_v63 = vsel %vm14234_vm5, %v9417_v55, %v9442_v31  ;;  %v3508_v22 = vsel %vm14235_vm0, %v9418_v59, %v9443_v30  ;;  %v9421_v18 = vpop.permute.xlu0 %9420  ;;  %vm14239_vm5 = vmmov %vm14235_vm0 }
 0xca5   : > { %v9423_v47 = vunpack.i.h.bf16 %v9421_v18  ;;  %v9422_v6 = vunpack.i.l.bf16 %v9421_v18  ;;  %v9446_v0 = vpop.permute.xlu1 %9445  ;;  %v8377_v57 = vpack.c.bf16 %v3508_v22, %v3507_v63  ;;  %v9413_v22 = vunpack.i.h.bf16 %v11875_v11 }
 0xca6   : > { %v9448_v29 = vunpack.i.h.bf16 %v9446_v0  ;;  %v9447_v5 = vunpack.i.l.bf16 %v9446_v0  ;;  %v9412_v18 = vunpack.i.l.bf16 %v11875_v11 }
 0xca7   : > { %v3504_v42 = vsel %vm14239_vm5, %v9443_v30, %v9423_v47  ;;  %v3503_v3 = vsel %vm14235_vm0, %v9442_v31, %v9422_v6  ;;  %8378 = vmatprep.subr.msk.bf16.mxu0 %vm10637_vm6, %v8377_v57  ;;  %vm14245_vm5 = vmmov %vm14235_vm0 }
 0xca8   : > { %v3499_v17 = vsel %vm14242_vm11, %v9422_v6, %v9447_v5  ;;  %v3500_v28 = vsel %vm14243_vm7, %v9423_v47, %v9448_v29  ;;  %v3511_v56 = vsel %vm14244_vm4, %v9447_v5, %v9417_v55  ;;  %v9426_v13 = vpop.permute.xlu0 %9425  ;;  %v8406_v61 = vpack.c.bf16 %v3504_v42, %v3503_v3  ;;  %vm14246_vm11 = vmmov %vm14235_vm0 }
 0xca9   : > { %v3512_v14 = vsel %vm14245_vm5, %v9448_v29, %v9418_v59  ;;  %v9428_v54 = vunpack.i.h.bf16 %v9426_v13  ;;  %v9451_v30 = vpop.permute.xlu1 %9450  ;;  %v8403_v31 = vpack.c.bf16 %v3500_v28, %v3499_v17  ;;  %v9427_v44 = vunpack.i.l.bf16 %v9426_v13  ;;  %vm14249_vm7 = vmmov %vm14248_vm1 }
 0xcaa   : > { %v8380_v52 = vpack.c.bf16 %v3512_v14, %v3511_v56  ;;  %v9453_v38 = vunpack.i.h.bf16 %v9451_v30  ;;  %v9452_v21 = vunpack.i.l.bf16 %v9451_v30  ;;  %v3510_v63 = vsel %vm14246_vm11, %v9408_v62, %v9388_v33  ;;  %vm14252_vm4 = vmmov %vm14248_vm1 }
 0xcab   : > { %8404 = vmatprep.subr.msk.bf16.mxu1 %vm10678_vm12, %v8403_v31  ;;  %v8409_v47 = vpack.c.bf16 %v3498_v40, %v3497_v12  ;;  %v3501_v59 = vsel %vm14235_vm0, %v9402_v2, %v9392_v26  ;;  %v9398_v6 = vunpack.i.h.bf16 %v11873_v15  ;;  %v9397_v29 = vunpack.i.l.bf16 %v11873_v15  ;;  %vm14253_vm5 = vmmov %vm14248_vm1 }
 0xcac   : > { %v3443_v0 = vsel %vm14248_vm1, %v9427_v44, %v9452_v21  ;;  %v3444_v57 = vsel %vm14249_vm7, %v9428_v54, %v9453_v38  ;;  %v9431_v33 = vpop.permute.xlu0 %9430  ;;  %8381 = vmatpush1.bf16.msk.msra.mxu0 %vm10662_vm10, %v8380_v52  ;;  %8407 = vmatpush1.bf16.msk.msra.mxu1 %vm10687_vm13, %v8406_v61  ;;  %v8386_v40 = vpack.c.bf16 %v3510_v63, %v3509_v27  ;;  %vm14254_vm11 = vmmov %vm14248_vm1 }
 0xcad   : > { %v9433_v5 = vunpack.i.h.bf16 %v9431_v33  ;;  %v9432_v12 = vunpack.i.l.bf16 %v9431_v33  ;;  %8384 = vmatprep.subr.msk.bf16.mxu0 %vm10637_vm6, %v8383_v25  ;;  %v9456_v2 = vpop.permute.xlu1 %9455  ;;  %8410 = vmatprep.subr.msk.bf16.mxu1 %vm10678_vm12, %v8409_v47  ;;  %v8389_v26 = vpack.c.bf16 %v3444_v57, %v3443_v0  ;;  %v8412_v17 = vpack.c.bf16 %v3502_v34, %v3501_v59  ;;  %vm14255_vm0 = vmmov %vm14248_vm1  ;;  %v14262_v57 = vld [vmem:[#allocation17_spill] sm:$0xff] }
 0xcae   : > { %v9458_v42 = vunpack.i.h.bf16 %v9456_v2  ;;  %v9457_v3 = vunpack.i.l.bf16 %v9456_v2  ;;  %v3441_v28 = vsel %vm14252_vm4, %v9397_v29, %v9412_v18  ;;  %v3442_v15 = vsel %vm14253_vm5, %v9398_v6, %v9413_v22  ;;  %vm14256_vm1 = vmmov %vm14255_vm0 }
 0xcaf   : > { %v3440_v56 = vsel %vm14254_vm11, %v9453_v38, %v9433_v5  ;;  %v3439_v25 = vsel %vm14255_vm0, %v9452_v21, %v9432_v12  ;;  %vm14257_vm7 = vmmov %vm14255_vm0  ;;  %vm14263_vm5 = vnez %v14262_v57 }
 0xcb0   : > { %v3435_v13 = vsel %vm14256_vm1, %v9432_v12, %v9457_v3  ;;  %v3436_v27 = vsel %vm14257_vm7, %v9433_v5, %v9458_v42  ;;  %vm14258_vm12 = vmmov %vm14255_vm0  ;;  %v9436_v61 = vpop.permute.xlu0 %9435  ;;  %8387 = vmatpush1.bf16.msk.msra.mxu0 %vm10662_vm10, %v8386_v40  ;;  %8413 = vmatpush1.bf16.msk.msra.mxu1 %vm10687_vm13, %v8412_v17  ;;  %v8418_v59 = vpack.c.bf16 %v3440_v56, %v3439_v25  ;;  %v14270_v40 = vld [vmem:[#allocation19_spill] sm:$0xff] }
 0xcb1   : > { %v3447_v34 = vsel %vm14258_vm12, %v9457_v3, %v9427_v44  ;;  %vm14259_vm4 = vmmov %vm14255_vm0  ;;  %v9438_v30 = vunpack.i.h.bf16 %v9436_v61  ;;  %v9437_v31 = vunpack.i.l.bf16 %v9436_v61  ;;  %8390 = vmatprep.subr.msk.bf16.mxu0 %vm10718_vm14, %v8389_v26  ;;  %v9461_v38 = vpop.permute.xlu1 %9460  ;;  %v8415_v21 = vpack.c.bf16 %v3436_v27, %v3435_v13  ;;  %v14267_v26 = vld [vmem:[#allocation18_spill] sm:$0xff] }
 0xcb2   : > { %v3448_v14 = vsel %vm14259_vm4, %v9458_v42, %v9428_v54  ;;  %v9463_v47 = vunpack.i.h.bf16 %v9461_v38  ;;  %v9462_v44 = vunpack.i.l.bf16 %v9461_v38  ;;  %vm14261_vm12 = vmmov %vm14255_vm0  ;;  %v8395_v54 = vpack.c.bf16 %v3442_v15, %v3441_v28 }
 0xcb3   : > { %v8392_v63 = vpack.c.bf16 %v3448_v14, %v3447_v34  ;;  %v3438_v0 = vsel %vm14261_vm12, %v9413_v22, %v9438_v30  ;;  %8416 = vmatprep.subr.msk.bf16.mxu1 %vm14263_vm5, %v8415_v21  ;;  %vm14264_vm11 = vmmov %vm14255_vm0  ;;  %vm14268_vm4 = vnez %v14267_v26 }
 0xcb4   : > { %v3437_v33 = vsel %vm14264_vm11, %v9412_v18, %v9437_v31  ;;  %v3433_v5 = vsel %vm14255_vm0, %v9437_v31, %v9462_v44  ;;  %vm14265_vm1 = vmmov %vm14255_vm0  ;;  %vm14271_vm11 = vnez %v14270_v40 }
 0xcb5   : > { %v3434_v12 = vsel %vm14265_vm1, %v9438_v30, %v9463_v47  ;;  %vm14266_vm7 = vmmov %vm14255_vm0  ;;  %8393 = vmatpush1.bf16.msk.msra.mxu0 %vm14268_vm4, %v8392_v63  ;;  %8419 = vmatpush1.bf16.msk.msra.mxu1 %vm14271_vm11, %v8418_v59  ;;  %v8424_v3 = vpack.c.bf16 %v3438_v0, %v3437_v33 }
 0xcb6   : > { %v3445_v2 = vsel %vm14266_vm7, %v9462_v44, %v9397_v29  ;;  %vm14269_vm12 = vmmov %vm14255_vm0  ;;  %8396 = vmatprep.subr.msk.bf16.mxu0 %vm10718_vm14, %v8395_v54  ;;  %v8421_v18 = vpack.c.bf16 %v3434_v12, %v3433_v5  ;;  %v10045_v29 = vld [vmem:[%s13927_s11] sm:$0xff]   ;;  %vm14272_vm0 = vcmask 785408  }
 0xcb7   : > { %v3446_v22 = vsel %vm14269_vm12, %v9463_v47, %v9398_v6  ;;  %vm14273_vm1 = vmmov %vm14272_vm0  ;;  %v10046_v6 = vld [vmem:[%s13927_s11 + $0x8] sm:$0xff]  }
 0xcb8   : > { %v8398_v42 = vpack.c.bf16 %v3446_v22, %v3445_v2  ;;  %8422 = vmatprep.subr.msk.bf16.mxu1 %vm14263_vm5, %v8421_v18  ;;  %vm14274_vm7 = vmmov %vm14272_vm0 }
 0xcb9   : > { %8425 = vmatpush1.bf16.msk.msra.mxu1 %vm14271_vm11, %v8424_v3  ;;  %vm14275_vm12 = vmmov %vm14272_vm0 }
 0xcba   : > { %8399 = vmatpush1.bf16.msk.msra.mxu0 %vm14268_vm4, %v8398_v42 }
 0xcbc   : > { %8426 = vmatmul.mubr.msk.bf16.vlgmr.msra.gmra.mxu1 %vm14273_vm1, %v10045_v29 }
 0xcbd   : > { %8400 = vmatmul.mubr.msk.bf16.vlgmr.msra.gmra.mxu0 %vm14272_vm0, %v10045_v29  ;;  %3684 = vmatprep.mubr.bf16.mxu1 %v14103_v20  ;;  %v3566_v13 = vpop.permute.xlu0 %3565  ;;  %vm14276_vm0 = vcmask 261120  }
 0xcbe   : > { %3631 = vmatprep.mubr.bf16.mxu0 %v14103_v20  ;;  %v3571_v34 = vpop.permute.xlu1 %3570  ;;  %vm14277_vm1 = vmmov %vm14276_vm0 }
 0xcc1   : > { %v3556_v21 = vpop.permute.xlu0 %3555 }
 0xcc2   : > { %v3561_v47 = vpop.permute.xlu1 %3560 }
 0xcc4   : > { %8427 = vmatmul.mubr.msk.bf16.gmra.mxu1 %vm14275_vm12, %v10046_v6  ;;  %vm14279_vm12 = vmmov %vm14276_vm0 }
 0xcc5   : > { %8401 = vmatmul.mubr.msk.bf16.gmra.mxu0 %vm14274_vm7, %v10046_v6  ;;  %3820 = vmatprep.mubr.bf16.mxu1 %v14103_v20  ;;  %vm14278_vm7 = vmmov %vm14276_vm0 }
 0xcc6   : > { %3767 = vmatprep.mubr.bf16.mxu0 %v14103_v20 }
 0xd7c   : > { %v3676_v28 = vpop.f32.mrf.mxu1 }
 0xd7d   : > { %v3623_v17 = vpop.f32.mrf.mxu0 }
 0xd7e   : > { %v3678_v56 = vpop.f32.mrf.mxu1  ;;  %v3624_v59 = vadd.f32 %v3623_v17, %v3556_v21 }
 0xd7f   : > { %v3625_v15 = vpop.f32.mrf.mxu0  ;;  %v3679_v29 = vadd.f32 %v3678_v56, %v3556_v21 }
 0xd80   : > { %v3680_v27 = vpop.f32.mrf.mxu1  ;;  %v3626_v3 = vadd.f32 %v3625_v15, %v3556_v21 }
 0xd81   : > { %v3627_v25 = vpop.f32.mrf.mxu0  ;;  %v3681_v9 = vadd.f32 %v3680_v27, %v3561_v47  ;;  %v3698_v56 = vmax.f32 %v3679_v29, 0.0 }
 0xd82   : > { %v3682_v14 = vpop.f32.mrf.mxu1  ;;  %v3628_v55 = vadd.f32 %v3627_v25, %v3561_v47 }
 0xd83   : > { %v3629_v61 = vpop.f32.mrf.mxu0  ;;  %v3683_v12 = vadd.f32 %v3682_v14, %v3561_v47  ;;  %v3701_v25 = vmax.f32 %v3681_v9, 0.0 }
 0xd84   : > { %v3686_v31 = vpop.f32.mrf.mxu1  ;;  %v3630_v0 = vadd.f32 %v3629_v61, %v3561_v47 }
 0xd85   : > { %v3633_v30 = vpop.f32.mrf.mxu0  ;;  %v3687_v6 = vadd.f32 %v3686_v31, %v3566_v13 }
 0xd86   : > { %v3688_v63 = vpop.f32.mrf.mxu1  ;;  %v3634_v2 = vadd.f32 %v3633_v30, %v3566_v13  ;;  %v3700_v7 = vmax.f32 %v3630_v0, 0.0 }
 0xd87   : > { %v3635_v38 = vpop.f32.mrf.mxu0  ;;  %v3689_v22 = vadd.f32 %v3688_v63, %v3566_v13  ;;  %v3677_v63 = vadd.f32 %v3676_v28, %v3556_v21  ;;  %v3705_v10 = vmax.f32 %v3687_v6, 0.0 }
 0xd88   : > { %v3636_v54 = vadd.f32 %v3635_v38, %v3566_v13  ;;  %v3690_v5 = vpop.f32.mrf.mxu1  ;;  %v3703_v60 = vmax.f32 %v3634_v2, 0.0  ;;  %v3699_v13 = vmax.f32 %v3628_v55, 0.0  ;;  %v10047_v55 = vld [vmem:[%s13929_s13] sm:$0xff]  }
 0xd89   : > { %v3637_v44 = vpop.f32.mrf.mxu0  ;;  %v3691_v18 = vadd.f32 %v3690_v5, %v3571_v34  ;;  %v3706_v14 = vmax.f32 %v3689_v22, 0.0  ;;  %v3696_v5 = vmax.f32 %v3626_v3, 0.0  ;;  %v3697_v47 = vmax.f32 %v3677_v63, 0.0 }
 0xd8a   : > { %v3638_v33 = vadd.f32 %v3637_v44, %v3571_v34  ;;  %v3692_v62 = vpop.f32.mrf.mxu1  ;;  %v3704_v17 = vmax.f32 %v3636_v54, 0.0  ;;  %v3702_v44 = vmax.f32 %v3683_v12, 0.0 }
 0xd8b   : > { %v3639_v42 = vpop.f32.mrf.mxu0  ;;  %v3693_v36 = vadd.f32 %v3692_v62, %v3571_v34  ;;  %v3709_v61 = vmax.f32 %v3691_v18, 0.0  ;;  %v3712_v62 = vpack.c.bf16 %v3700_v7, %v3696_v5  ;;  %v3713_v28 = vpack.c.bf16 %v3701_v25, %v3697_v47  ;;  %v3875_v7 = vpop.permute.xlu1 %3874 }
 0xd8c   : > { %v3640_v11 = vadd.f32 %v3639_v42, %v3571_v34  ;;  %v3707_v39 = vmax.f32 %v3638_v33, 0.0  ;;  %v3695_v34 = vmax.f32 %v3624_v59, 0.0 }
 0xd8d   : > { %v3710_v30 = vmax.f32 %v3693_v36, 0.0  ;;  %v3717_v27 = vpack.c.bf16 %v3709_v61, %v3705_v10  ;;  %v10048_v10 = vld [vmem:[%s13929_s13 + $0x8] sm:$0xff]  }
 0xd8e   : > { %v3708_v38 = vmax.f32 %v3640_v11, 0.0  ;;  %v3715_v31 = vpack.c.bf16 %v3707_v39, %v3703_v60  ;;  %v3714_v11 = vpack.c.bf16 %v3702_v44, %v3698_v56  ;;  %v3711_v36 = vpack.c.bf16 %v3699_v13, %v3695_v34  ;;  %v3870_v60 = vpop.permute.xlu0 %3869 }
 0xd8f   : > { %v3718_v42 = vpack.c.bf16 %v3710_v30, %v3706_v14  ;;  %v3865_v18 = vpop.permute.xlu1 %3864 }
 0xd90   : > { %v3716_v15 = vpack.c.bf16 %v3708_v38, %v3704_v17 }
 0xd91   : > { %3800 = vmatprep.subr.bf16.mxu1 %v3718_v42 }
 0xd92   : > { %3747 = vmatprep.subr.bf16.mxu0 %v3716_v15  ;;  %3801 = vmatpush1.bf16.msra.mxu1 %v3717_v27  ;;  %v3860_v33 = vpop.permute.xlu0 %3859 }
 0xd93   : > { %3748 = vmatpush1.bf16.msra.mxu0 %v3715_v31  ;;  %3802 = vmatprep.subr.bf16.mxu1 %v3714_v11 }
 0xd94   : > { %3749 = vmatprep.subr.bf16.mxu0 %v3712_v62 }
 0xd96   : > { %3803 = vmatpush1.bf16.msra.mxu1 %v3713_v28 }
 0xd97   : > { %3750 = vmatpush1.bf16.msra.mxu0 %v3711_v36 }
 0xd99   : > { %8432 = vmatmul.mubr.msk.bf16.vlgmr.msra.gmra.mxu1 %vm14277_vm1, %v10047_v55 }
 0xd9a   : > { %8430 = vmatmul.mubr.msk.bf16.vlgmr.msra.gmra.mxu0 %vm14276_vm0, %v10047_v55  ;;  %3830 = vmatprep.mubr.bf16.mxu1 %v14103_v20  ;;  %vm14280_vm0 = vcmp.lt.s32.totalorder %v10593_v23, 2 }
 0xd9b   : > { %3777 = vmatprep.mubr.bf16.mxu0 %v14103_v20  ;;  %vm14281_vm1 = vmmov %vm14280_vm0 }
 0xd9c   : > { %vm14285_vm13 = vmmov %vm14280_vm0 }
 0xd9d   : > { %vm14288_vm10 = vmmov %vm14280_vm0 }
 0xda1   : > { %8433 = vmatmul.mubr.msk.bf16.gmra.mxu1 %vm14279_vm12, %v10048_v10  ;;  %vm14283_vm12 = vmmov %vm14280_vm0 }
 0xda2   : > { %8431 = vmatmul.mubr.msk.bf16.gmra.mxu0 %vm14278_vm7, %v10048_v10  ;;  %4186 = vmatprep.mubr.bf16.mxu1 %v14103_v20  ;;  %vm14282_vm7 = vmmov %vm14280_vm0 }
 0xda3   : > { %4133 = vmatprep.mubr.bf16.mxu0 %v14103_v20 }
 0xe59   : > { %v3822_v9 = vpop.f32.mrf.mxu1 }
 0xe5a   : > { %v3769_v39 = vpop.f32.mrf.mxu0  ;;  %v3843_v17 = vadd.f32 %v3822_v9, %v11781_v37 }
 0xe5b   : > { %v3841_v59 = vadd.f32 %v3769_v39, %v11769_v35  ;;  %v3824_v0 = vpop.f32.mrf.mxu1 }
 0xe5c   : > { %v3771_v21 = vpop.f32.mrf.mxu0  ;;  %v3844_v44 = vadd.f32 %v3824_v0, %v11788_v24  ;;  %v12025_v15 = vadd.f32 %v3860_v33, %v3843_v17  ;;  %v8438_v17 = vld [vmem:[%s13928_s12 + $0x20] sm:$0xff] }
 0xe5d   : > { %v3842_v12 = vadd.f32 %v3771_v21, %v11773_v58  ;;  %v3826_v22 = vpop.f32.mrf.mxu1  ;;  %v12009_v6 = vadd.f32 %v3860_v33, %v3841_v59 }
 0xe5e   : > { %v3773_v54 = vpop.f32.mrf.mxu0  ;;  %v3847_v3 = vadd.f32 %v3826_v22, %v11775_v45  ;;  %v12032_v13 = vadd.f32 %v3860_v33, %v3844_v44  ;;  %v8449_v44 = vld [vmem:[%s13930_s14 + $0x38] sm:$0xff] }
 0xe5f   : > { %v3845_v2 = vadd.f32 %v3773_v54, %v11771_v32  ;;  %v3828_v38 = vpop.f32.mrf.mxu1  ;;  %v12017_v32 = vadd.f32 %v3860_v33, %v3842_v12 }
 0xe60   : > { %v3775_v29 = vpop.f32.mrf.mxu0  ;;  %v3848_v58 = vadd.f32 %v3828_v38, %v11783_v53  ;;  %v12019_v30 = vadd.f32 %v3865_v18, %v3847_v3  ;;  %v8440_v3 = vld [vmem:[%s13928_s12 + $0x30] sm:$0xff] }
 0xe61   : > { %v12012_v61 = vadd.f32 %v3865_v18, %v3845_v2  ;;  %v3846_v35 = vadd.f32 %v3775_v29, %v11777_v1  ;;  %v3832_v63 = vpop.f32.mrf.mxu1  ;;  %v8441_v29 = vld [vmem:[%s13928_s12 + $0x38] sm:$0xff]  ;;  %v8448_v38 = vld [vmem:[%s13930_s14 + $0x30] sm:$0xff] }
 0xe62   : > { %v3779_v14 = vpop.f32.mrf.mxu0  ;;  %v12027_v1 = vadd.f32 %v3865_v18, %v3848_v58  ;;  %v9469_v27 = vpack.i.bf16 %v12019_v30, %v12025_v15  ;;  %v3851_v36 = vadd.f32 %v3832_v63, %v11814_v19  ;;  %v4059_v2 = vpack.c.bf16 %v12019_v30, %v12025_v15  ;;  %v8446_v58 = vld [vmem:[%s13930_s14 + $0x20] sm:$0xff] }
 0xe63   : > { %v12021_v45 = vadd.f32 %v3865_v18, %v3846_v35  ;;  %v9464_v37 = vpack.i.bf16 %v12012_v61, %v12009_v6  ;;  %v3834_v56 = vpop.f32.mrf.mxu1  ;;  %v3849_v62 = vadd.f32 %v3779_v14, %v11803_v46  ;;  %v4057_v12 = vpack.c.bf16 %v12012_v61, %v12009_v6  ;;  %v8439_v35 = vld [vmem:[%s13928_s12 + $0x28] sm:$0xff] }
 0xe64   : > { %v3781_v5 = vpop.f32.mrf.mxu0  ;;  %v3852_v34 = vadd.f32 %v3834_v56, %v11807_v48  ;;  %v12063_v9 = vadd.f32 %v3870_v60, %v3851_v36  ;;  %v4060_v54 = vpack.c.bf16 %v12027_v1, %v12032_v13  ;;  %v8447_v14 = vld [vmem:[%s13930_s14 + $0x28] sm:$0xff] }
 0xe65   : > { %9465 = vrot.lane.b32.xlu0 %v9464_v37, %s14104_s23  ;;  %v9479_v53 = vpack.i.bf16 %v12021_v45, %v12017_v32  ;;  %v3850_v31 = vadd.f32 %v3781_v5, %v11798_v43  ;;  %v3836_v25 = vpop.f32.mrf.mxu1  ;;  %v12057_v19 = vadd.f32 %v3870_v60, %v3849_v62  ;;  %v4058_v0 = vpack.c.bf16 %v12021_v45, %v12017_v32 }
 0xe66   : > { %v3783_v24 = vpop.f32.mrf.mxu0  ;;  %v3855_v11 = vadd.f32 %v3836_v25, %v11805_v51 }
 0xe67   : > { %v3853_v42 = vadd.f32 %v3783_v24, %v11796_v41  ;;  %9480 = vrot.lane.b32.xlu1 %v9479_v53, %s14104_s23  ;;  %v3838_v43 = vpop.f32.mrf.mxu1  ;;  %v9484_v41 = vpack.i.bf16 %v12027_v1, %v12032_v13  ;;  %v12050_v46 = vadd.f32 %v3870_v60, %v3850_v31 }
 0xe68   : > { %v3785_v47 = vpop.f32.mrf.mxu0  ;;  %v3856_v10 = vadd.f32 %v3838_v43, %v11809_v49  ;;  %v12052_v48 = vadd.f32 %v3875_v7, %v3855_v11 }
 0xe69   : > { %v3854_v28 = vadd.f32 %v3785_v47, %v11800_v16  ;;  %9470 = vrot.lane.b32.xlu0 %v9469_v27, %s14104_s23  ;;  %v12047_v55 = vadd.f32 %v3875_v7, %v3853_v42  ;;  %v12059_v16 = vadd.f32 %v3870_v60, %v3852_v34 }
 0xe6a   : > { %v12061_v39 = vadd.f32 %v3875_v7, %v3856_v10  ;;  %v9499_v22 = vpack.i.bf16 %v12052_v48, %v12063_v9 }
 0xe6b   : > { %v12054_v51 = vadd.f32 %v3875_v7, %v3854_v28  ;;  %9485 = vrot.lane.b32.xlu1 %v9484_v41, %s14104_s23  ;;  %v4061_v21 = vpack.c.bf16 %v12047_v55, %v12057_v19  ;;  %v4063_v7 = vpack.c.bf16 %v12052_v48, %v12063_v9  ;;  %v9494_v60 = vpack.i.bf16 %v12047_v55, %v12057_v19 }
 0xe6c   : > { %v4064_v59 = vpack.c.bf16 %v12061_v39, %v12059_v16  ;;  %v9524_v18 = vpack.i.bf16 %v12061_v39, %v12059_v16 }
 0xe6d   : > { %9475 = vrot.lane.b32.xlu0 %v9464_v37, %s14121_s19  ;;  %v4062_v49 = vpack.c.bf16 %v12054_v51, %v12050_v46  ;;  %v9519_v33 = vpack.i.bf16 %v12054_v51, %v12050_v46 }
 0xe6e   : > { %4158 = vmatprep.subr.bf16.mxu1 %v4064_v59 }
 0xe6f   : > { %9490 = vrot.lane.b32.xlu1 %v9479_v53, %s14121_s19  ;;  %4105 = vmatprep.subr.bf16.mxu0 %v4062_v49 }
 0xe70   : > { %4106 = vmatpush1.bf16.msra.mxu0 %v4061_v21  ;;  %4159 = vmatpush1.bf16.msra.mxu1 %v4063_v7 }
 0xe71   : > { %9495 = vrot.lane.b32.xlu0 %v9494_v60, %s14104_s23  ;;  %4107 = vmatprep.subr.bf16.mxu0 %v4058_v0 }
 0xe72   : > { %4160 = vmatprep.subr.bf16.mxu1 %v4060_v54 }
 0xe73   : > { %9520 = vrot.lane.b32.xlu1 %v9519_v33, %s14104_s23 }
 0xe74   : > { %4108 = vmatpush1.bf16.msra.mxu0 %v4057_v12  ;;  %4161 = vmatpush1.bf16.msra.mxu1 %v4059_v2 }
 0xe75   : > { %9500 = vrot.lane.b32.xlu0 %v9499_v22, %s14104_s23 }
 0xe77   : > { %9525 = vrot.lane.b32.xlu1 %v9524_v18, %s14104_s23 }
 0xe79   : > { %9505 = vrot.lane.b32.xlu0 %v9494_v60, %s14121_s19 }
 0xe7b   : > { %9530 = vrot.lane.b32.xlu1 %v9519_v33, %s14121_s19 }
 0xe7d   : > { %9510 = vrot.lane.b32.xlu0 %v9499_v22, %s14121_s19 }
 0xe7f   : > { %9535 = vrot.lane.b32.xlu1 %v9524_v18, %s14121_s19 }
 0xe81   : > { %9515 = vrot.lane.b32.xlu0 %v9469_v27, %s14121_s19 }
 0xe83   : > { %9540 = vrot.lane.b32.xlu1 %v9484_v41, %s14121_s19 }
 0xe85   : > { %4077 = vperm.xlu0 %9062, %v8440_v3  }
 0xe87   : > { %4082 = vperm.xlu1 %9063, %v8441_v29  }
 0xe89   : > { %4067 = vperm.xlu0 %9062, %v8438_v17  }
 0xe8b   : > { %4072 = vperm.xlu1 %9063, %v8439_v35  }
 0xe8d   : > { %4381 = vperm.xlu0 %9062, %v8448_v38  }
 0xe8f   : > { %4386 = vperm.xlu1 %9063, %v8449_v44  }
 0xe91   : > { %4371 = vperm.xlu0 %9062, %v8446_v58  }
 0xe93   : > { %4376 = vperm.xlu1 %9063, %v8447_v14  }
 0xed7   : > { %v9466_v63 = vpop.permute.xlu0 %9465 }
 0xed8   : > { %v9468_v25 = vunpack.i.h.bf16 %v9466_v63  ;;  %v9467_v27 = vunpack.i.l.bf16 %v9466_v63 }
 0xed9   : > { %v9481_v37 = vpop.permute.xlu1 %9480 }
 0xeda   : > { %v9483_v24 = vunpack.i.h.bf16 %v9481_v37  ;;  %v9482_v31 = vunpack.i.l.bf16 %v9481_v37 }
 0xedb   : > { %v9471_v5 = vpop.permute.xlu0 %9470 }
 0xedc   : > { %v4018_v34 = vsel %vm14280_vm0, %v9468_v25, %v9483_v24  ;;  %v4017_v11 = vsel %vm14281_vm1, %v9467_v27, %v9482_v31  ;;  %v9472_v10 = vunpack.i.l.bf16 %v9471_v5  ;;  %v9473_v33 = vunpack.i.h.bf16 %v9471_v5  ;;  %vm14284_vm1 = vmmov %vm14280_vm0 }
 0xedd   : > { %v9486_v56 = vpop.permute.xlu1 %9485  ;;  %v8459_v22 = vpack.c.bf16 %v4018_v34, %v4017_v11 }
 0xede   : > { %v9488_v49 = vunpack.i.h.bf16 %v9486_v56  ;;  %v9487_v21 = vunpack.i.l.bf16 %v9486_v56  ;;  %v4013_v35 = vsel %vm14285_vm13, %v9482_v31, %v9472_v10  ;;  %vm14290_vm13 = vmmov %vm14280_vm0 }
 0xedf   : > { %v12125_v53 = vpop.permute.xlu0 %9475 }
 0xee0   : > { %v4009_v58 = vsel %vm14288_vm10, %v9472_v10, %v9487_v21  ;;  %vm14293_vm10 = vmmov %vm14280_vm0 }
 0xee1   : > { %v12127_v42 = vpop.permute.xlu1 %9490 }
 0xee3   : > { %v9496_v62 = vpop.permute.xlu0 %9495 }
 0xee4   : > { %v9498_v36 = vunpack.i.h.bf16 %v9496_v62  ;;  %v9497_v28 = vunpack.i.l.bf16 %v9496_v62 }
 0xee5   : > { %v9521_v47 = vpop.permute.xlu1 %9520 }
 0xee6   : > { %v9523_v43 = vunpack.i.h.bf16 %v9521_v47  ;;  %v9522_v41 = vunpack.i.l.bf16 %v9521_v47 }
 0xee7   : > { %v9501_v59 = vpop.permute.xlu0 %9500 }
 0xee8   : > { %v4020_v7 = vsel %vm14282_vm7, %v9498_v36, %v9523_v43  ;;  %v4019_v60 = vsel %vm14283_vm12, %v9497_v28, %v9522_v41  ;;  %v9503_v0 = vunpack.i.h.bf16 %v9501_v59  ;;  %v9502_v54 = vunpack.i.l.bf16 %v9501_v59  ;;  %vm14286_vm7 = vmmov %vm14280_vm0 }
 0xee9   : > { %v9526_v12 = vpop.permute.xlu1 %9525  ;;  %v8453_v2 = vpack.c.bf16 %v4020_v7, %v4019_v60  ;;  %v4010_v38 = vsel %vm14286_vm7, %v9473_v33, %v9488_v49  ;;  %vm14287_vm12 = vmmov %vm14280_vm0  ;;  %v9492_v59 = vunpack.i.l.bf16 %v12127_v42 }
 0xeea   : > { %v4015_v18 = vsel %vm14280_vm0, %v9522_v41, %v9502_v54  ;;  %v4016_v3 = vsel %vm14284_vm1, %v9523_v43, %v9503_v0  ;;  %v9528_v29 = vunpack.i.h.bf16 %v9526_v12  ;;  %v9527_v17 = vunpack.i.l.bf16 %v9526_v12  ;;  %vm14289_vm1 = vmmov %vm14280_vm0 }
 0xeeb   : > { %v4022_v44 = vsel %vm14287_vm12, %v9488_v49, %v9468_v25  ;;  %v9506_v14 = vpop.permute.xlu0 %9505  ;;  %8454 = vmatprep.subr.msk.bf16.mxu0 %vm10718_vm14, %v8453_v2  ;;  %vm14291_vm7 = vmmov %vm14280_vm0  ;;  %v8482_v25 = vpack.c.bf16 %v4016_v3, %v4015_v18  ;;  %v9493_v49 = vunpack.i.h.bf16 %v12127_v42 }
 0xeec   : > { %v4012_v63 = vsel %vm14280_vm0, %v9503_v0, %v9528_v29  ;;  %v4024_v37 = vsel %vm14289_vm1, %v9528_v29, %v9498_v36  ;;  %v4011_v5 = vsel %vm14290_vm13, %v9502_v54, %v9527_v17  ;;  %v4023_v56 = vsel %vm14291_vm7, %v9527_v17, %v9497_v28  ;;  %vm14292_vm12 = vmmov %vm14280_vm0 }
 0xeed   : > { %v4021_v31 = vsel %vm14292_vm12, %v9487_v21, %v9467_v27  ;;  %v8456_v62 = vpack.c.bf16 %v4024_v37, %v4023_v56  ;;  %v9531_v34 = vpop.permute.xlu1 %9530  ;;  %v8479_v11 = vpack.c.bf16 %v4012_v63, %v4011_v5  ;;  %v9508_v47 = vunpack.i.h.bf16 %v9506_v14  ;;  %v14303_v63 = vld [vmem:[#allocation20_spill] sm:$0xff] }
 0xeee   : > { %v9507_v43 = vunpack.i.l.bf16 %v9506_v14  ;;  %v9533_v41 = vunpack.i.h.bf16 %v9531_v34  ;;  %v9532_v10 = vunpack.i.l.bf16 %v9531_v34  ;;  %v4014_v36 = vsel %vm14293_vm10, %v9483_v24, %v9473_v33 }
 0xeef   : > { %v9511_v7 = vpop.permute.xlu0 %9510  ;;  %8457 = vmatpush1.bf16.msk.msra.mxu0 %vm14268_vm4, %v8456_v62  ;;  %8480 = vmatprep.subr.msk.bf16.mxu1 %vm14263_vm5, %v8479_v11  ;;  %v8485_v27 = vpack.c.bf16 %v4010_v38, %v4009_v58  ;;  %vm14294_vm0 = vcmp.lt.s32.totalorder %v10593_v23, 4  ;;  %v8462_v42 = vpack.c.bf16 %v4022_v44, %v4021_v31  ;;  %v9478_v0 = vunpack.i.h.bf16 %v12125_v53 }
 0xef0   : > { %v3956_v28 = vsel %vm14294_vm0, %v9508_v47, %v9533_v41  ;;  %vm14295_vm1 = vmmov %vm14294_vm0  ;;  %v9513_v60 = vunpack.i.h.bf16 %v9511_v7  ;;  %v9512_v24 = vunpack.i.l.bf16 %v9511_v7  ;;  %8460 = vmatprep.subr.msk.bf16.mxu0 %vm10718_vm14, %v8459_v22  ;;  %8483 = vmatpush1.bf16.msk.msra.mxu1 %vm14271_vm11, %v8482_v25  ;;  %v9477_v54 = vunpack.i.l.bf16 %v12125_v53 }
 0xef1   : > { %v3955_v21 = vsel %vm14295_vm1, %v9507_v43, %v9532_v10  ;;  %v9536_v33 = vpop.permute.xlu1 %9535  ;;  %8486 = vmatprep.subr.msk.bf16.mxu1 %vm14263_vm5, %v8485_v27  ;;  %v8488_v2 = vpack.c.bf16 %v4014_v36, %v4013_v35  ;;  %vm14296_vm13 = vmmov %vm14294_vm0 }
 0xef2   : > { %v8465_v12 = vpack.c.bf16 %v3956_v28, %v3955_v21  ;;  %v9538_v18 = vunpack.i.h.bf16 %v9536_v33  ;;  %v9537_v3 = vunpack.i.l.bf16 %v9536_v33  ;;  %v3954_v29 = vsel %vm14296_vm13, %v9478_v0, %v9493_v49  ;;  %vm14297_vm7 = vmmov %vm14294_vm0  ;;  %v14314_v21 = vld [vmem:[#allocation23_spill] sm:$0xff] }
 0xef3   : > { %v3953_v22 = vsel %vm14297_vm7, %v9477_v54, %v9492_v59  ;;  %vm14298_vm12 = vmmov %vm14294_vm0  ;;  %v9516_v38 = vpop.permute.xlu0 %9515  ;;  %8463 = vmatpush1.bf16.msk.msra.mxu0 %vm14268_vm4, %v8462_v42  ;;  %vm14315_vm5 = vnez %v14314_v21  ;;  %v10049_v42 = vld [vmem:[%s13927_s11 + $0x10] sm:$0xff]  }
 0xef4   : > { %v3951_v17 = vsel %vm14298_vm12, %v9532_v10, %v9512_v24  ;;  %vm14299_vm10 = vmmov %vm14294_vm0  ;;  %v3948_v35 = vsel %vm14294_vm0, %v9513_v60, %v9538_v18  ;;  %vm14304_vm12 = vnez %v14303_v63  ;;  %v9518_v5 = vunpack.i.h.bf16 %v9516_v38  ;;  %8489 = vmatpush1.bf16.msk.msra.mxu1 %vm14271_vm11, %v8488_v2  ;;  %v14306_v10 = vld [vmem:[#allocation22_spill] sm:$0xff] }
 0xef5   : > { %v3952_v53 = vsel %vm14299_vm10, %v9533_v41, %v9513_v60  ;;  %vm14300_vm1 = vmmov %vm14294_vm0  ;;  %8466 = vmatprep.subr.msk.bf16.mxu0 %vm14304_vm12, %v8465_v12  ;;  %v9517_v56 = vunpack.i.l.bf16 %v9516_v38  ;;  %v9541_v31 = vpop.permute.xlu1 %9540  ;;  %v8471_v11 = vpack.c.bf16 %v3954_v29, %v3953_v22 }
 0xef6   : > { %v3960_v44 = vsel %vm14300_vm1, %v9538_v18, %v9508_v47  ;;  %vm14301_vm13 = vmmov %vm14294_vm0  ;;  %v9543_v62 = vunpack.i.h.bf16 %v9541_v31  ;;  %v9542_v34 = vunpack.i.l.bf16 %v9541_v31  ;;  %v8494_v47 = vpack.c.bf16 %v3952_v53, %v3951_v17 }
 0xef7   : > { %v3947_v58 = vsel %vm14301_vm13, %v9512_v24, %v9537_v3  ;;  %vm14302_vm7 = vmmov %vm14294_vm0 }
 0xef8   : > { %v3959_v14 = vsel %vm14302_vm7, %v9537_v3, %v9507_v43  ;;  %v8491_v25 = vpack.c.bf16 %v3948_v35, %v3947_v58  ;;  %vm14305_vm10 = vmmov %vm14294_vm0  ;;  %vm14307_vm0 = vnez %v14306_v10  ;;  %v14308_v43 = vld [vmem:[#allocation21_spill] sm:$0xff]  ;;  %v3946_v7 = vsel %vm14302_vm7, %v9518_v5, %v9543_v62 }
 0xef9   : > { %v8468_v37 = vpack.c.bf16 %v3960_v44, %v3959_v14  ;;  %v3950_v41 = vsel %vm14305_vm10, %v9493_v49, %v9518_v5  ;;  %vm14309_vm1 = vnez %v14308_v43  ;;  %vm14310_vm13 = vmmov %vm14302_vm7 }
 0xefa   : > { %8492 = vmatprep.subr.msk.bf16.mxu1 %vm14309_vm1, %v8491_v25  ;;  %v3949_v36 = vsel %vm14310_vm13, %v9492_v59, %v9517_v56  ;;  %vm14311_vm11 = vmmov %vm14302_vm7 }
 0xefb   : > { %8469 = vmatpush1.bf16.msk.msra.mxu0 %vm14307_vm0, %v8468_v37  ;;  %v3958_v27 = vsel %vm14311_vm11, %v9543_v62, %v9478_v0  ;;  %vm14312_vm4 = vmmov %vm14302_vm7  ;;  %8495 = vmatpush1.bf16.msk.msra.mxu1 %vm14315_vm5, %v8494_v47  ;;  %v8500_v24 = vpack.c.bf16 %v3950_v41, %v3949_v36  ;;  %v10050_v0 = vld [vmem:[%s13927_s11 + $0x18] sm:$0xff]  }
 0xefc   : > { %v3945_v28 = vsel %vm14312_vm4, %v9517_v56, %v9542_v34  ;;  %8472 = vmatprep.subr.msk.bf16.mxu0 %vm14304_vm12, %v8471_v11  ;;  %vm14313_vm10 = vmmov %vm14312_vm4  ;;  %vm14316_vm4 = vcmask 785408  }
 0xefd   : > { %v3957_v49 = vsel %vm14313_vm10, %v9542_v34, %v9477_v54  ;;  %v8497_v60 = vpack.c.bf16 %v3946_v7, %v3945_v28  ;;  %vm14317_vm11 = vmmov %vm14316_vm4  ;;  %vm14320_vm10 = vcmask 261120  }
 0xefe   : > { %v8474_v59 = vpack.c.bf16 %v3958_v27, %v3957_v49  ;;  %vm14318_vm13 = vmmov %vm14316_vm4 }
 0xeff   : > { %8498 = vmatprep.subr.msk.bf16.mxu1 %vm14309_vm1, %v8497_v60  ;;  %vm14319_vm7 = vmmov %vm14316_vm4 }
 0xf00   : > { %8475 = vmatpush1.bf16.msk.msra.mxu0 %vm14307_vm0, %v8474_v59  ;;  %8501 = vmatpush1.bf16.msk.msra.mxu1 %vm14315_vm5, %v8500_v24  ;;  %v4078_v3 = vpop.permute.xlu0 %4077 }
 0xf02   : > { %v4083_v22 = vpop.permute.xlu1 %4082 }
 0xf03   : > { %8476 = vmatmul.mubr.msk.bf16.vlgmr.msra.gmra.mxu0 %vm14316_vm4, %v10049_v42  ;;  %8502 = vmatmul.mubr.msk.bf16.vlgmr.msra.gmra.mxu1 %vm14317_vm11, %v10049_v42  ;;  %vm14321_vm4 = vmmov %vm14320_vm10 }
 0xf04   : > { %4143 = vmatprep.mubr.bf16.mxu0 %v14103_v20  ;;  %4196 = vmatprep.mubr.bf16.mxu1 %v14103_v20  ;;  %v4068_v58 = vpop.permute.xlu0 %4067  ;;  %vm14322_vm11 = vmmov %vm14321_vm4 }
 0xf06   : > { %v4073_v37 = vpop.permute.xlu1 %4072 }
 0xf0b   : > { %8477 = vmatmul.mubr.msk.bf16.gmra.mxu0 %vm14318_vm13, %v10050_v0  ;;  %8503 = vmatmul.mubr.msk.bf16.gmra.mxu1 %vm14319_vm7, %v10050_v0  ;;  %vm14323_vm13 = vmmov %vm14321_vm4  ;;  %vm14324_vm7 = vcmp.lt.s32.totalorder %v10593_v23, 4 }
 0xf0c   : > { %4279 = vmatprep.mubr.bf16.mxu0 %v14103_v20  ;;  %4332 = vmatprep.mubr.bf16.mxu1 %v14103_v20 }
 0xfc3   : > { %v4135_v54 = vpop.f32.mrf.mxu0  ;;  %v4188_v33 = vpop.f32.mrf.mxu1 }
 0xfc4   : > { %v4136_v56 = vadd.f32 %v4135_v54, %v4068_v58 }
 0xfc5   : > { %v4137_v12 = vpop.f32.mrf.mxu0  ;;  %v4190_v2 = vpop.f32.mrf.mxu1 }
 0xfc6   : > { %v4138_v27 = vadd.f32 %v4137_v12, %v4068_v58  ;;  %v4191_v28 = vadd.f32 %v4190_v2, %v4068_v58 }
 0xfc7   : > { %v4139_v18 = vpop.f32.mrf.mxu0  ;;  %v4192_v29 = vpop.f32.mrf.mxu1 }
 0xfc8   : > { %v4140_v24 = vadd.f32 %v4139_v18, %v4073_v37  ;;  %v4193_v42 = vadd.f32 %v4192_v29, %v4073_v37  ;;  %v4210_v2 = vmax.f32 %v4191_v28, 0.0 }
 0xfc9   : > { %v4141_v17 = vpop.f32.mrf.mxu0  ;;  %v4194_v53 = vpop.f32.mrf.mxu1 }
 0xfca   : > { %v4142_v31 = vadd.f32 %v4141_v17, %v4073_v37  ;;  %v4195_v11 = vadd.f32 %v4194_v53, %v4073_v37  ;;  %v4213_v18 = vmax.f32 %v4193_v42, 0.0  ;;  %v4207_v37 = vmax.f32 %v4136_v56, 0.0 }
 0xfcb   : > { %v4145_v38 = vpop.f32.mrf.mxu0  ;;  %v4198_v35 = vpop.f32.mrf.mxu1 }
 0xfcc   : > { %v4146_v47 = vadd.f32 %v4145_v38, %v4078_v3  ;;  %v4199_v49 = vadd.f32 %v4198_v35, %v4078_v3  ;;  %v4212_v26 = vmax.f32 %v4142_v31, 0.0 }
 0xfcd   : > { %v4147_v44 = vpop.f32.mrf.mxu0  ;;  %v4200_v14 = vpop.f32.mrf.mxu1 }
 0xfce   : > { %v4148_v25 = vadd.f32 %v4147_v44, %v4078_v3  ;;  %v4201_v41 = vadd.f32 %v4200_v14, %v4078_v3  ;;  %v4215_v57 = vmax.f32 %v4146_v47, 0.0  ;;  %v4189_v14 = vadd.f32 %v4188_v33, %v4068_v58  ;;  %v10051_v58 = vld [vmem:[%s13929_s13 + $0x10] sm:$0xff]  }
 0xfcf   : > { %v4149_v5 = vpop.f32.mrf.mxu0  ;;  %v4202_v34 = vpop.f32.mrf.mxu1  ;;  %v4217_v52 = vmax.f32 %v4199_v49, 0.0  ;;  %v4211_v3 = vmax.f32 %v4140_v24, 0.0 }
 0xfd0   : > { %v4150_v62 = vadd.f32 %v4149_v5, %v4083_v22  ;;  %v4203_v36 = vadd.f32 %v4202_v34, %v4083_v22  ;;  %v4216_v54 = vmax.f32 %v4148_v25, 0.0  ;;  %v4214_v5 = vmax.f32 %v4195_v11, 0.0 }
 0xfd1   : > { %v4151_v7 = vpop.f32.mrf.mxu0  ;;  %v4204_v59 = vpop.f32.mrf.mxu1  ;;  %v4218_v53 = vmax.f32 %v4201_v41, 0.0  ;;  %v4208_v34 = vmax.f32 %v4138_v27, 0.0  ;;  %v4209_v25 = vmax.f32 %v4189_v14, 0.0 }
 0xfd2   : > { %v4152_v60 = vadd.f32 %v4151_v7, %v4083_v22  ;;  %v4219_v0 = vmax.f32 %v4150_v62, 0.0  ;;  %v4205_v40 = vadd.f32 %v4204_v59, %v4083_v22  ;;  %v4221_v17 = vmax.f32 %v4203_v36, 0.0 }
 0xfd3   : > { %v4224_v22 = vpack.c.bf16 %v4212_v26, %v4208_v34  ;;  %v4226_v31 = vpack.c.bf16 %v4214_v5, %v4210_v2  ;;  %v4225_v33 = vpack.c.bf16 %v4213_v18, %v4209_v25  ;;  %v4387_v26 = vpop.permute.xlu1 %4386 }
 0xfd4   : > { %v4220_v44 = vmax.f32 %v4152_v60, 0.0  ;;  %v4222_v38 = vmax.f32 %v4205_v40, 0.0  ;;  %v4227_v35 = vpack.c.bf16 %v4219_v0, %v4215_v57  ;;  %v4229_v29 = vpack.c.bf16 %v4221_v17, %v4217_v52  ;;  %v10052_v52 = vld [vmem:[%s13929_s13 + $0x18] sm:$0xff]   ;;  %v4382_v57 = vpop.permute.xlu0 %4381 }
 0xfd5   : > { %v4223_v40 = vpack.c.bf16 %v4211_v3, %v4207_v37 }
 0xfd6   : > { %v4228_v12 = vpack.c.bf16 %v4220_v44, %v4216_v54  ;;  %v4230_v7 = vpack.c.bf16 %v4222_v38, %v4218_v53 }
 0xfd7   : > { %v4377_v59 = vpop.permute.xlu1 %4376 }
 0xfd8   : > { %4259 = vmatprep.subr.bf16.mxu0 %v4228_v12  ;;  %4312 = vmatprep.subr.bf16.mxu1 %v4230_v7  ;;  %v4372_v27 = vpop.permute.xlu0 %4371 }
 0xfd9   : > { %4260 = vmatpush1.bf16.msra.mxu0 %v4227_v35  ;;  %4313 = vmatpush1.bf16.msra.mxu1 %v4229_v29 }
 0xfda   : > { %4261 = vmatprep.subr.bf16.mxu0 %v4224_v22  ;;  %4314 = vmatprep.subr.bf16.mxu1 %v4226_v31 }
 0xfdd   : > { %4262 = vmatpush1.bf16.msra.mxu0 %v4223_v40  ;;  %4315 = vmatpush1.bf16.msra.mxu1 %v4225_v33 }
 0xfe0   : > { %8506 = vmatmul.mubr.msk.bf16.vlgmr.msra.gmra.mxu0 %vm14320_vm10, %v10051_v58  ;;  %8508 = vmatmul.mubr.msk.bf16.vlgmr.msra.gmra.mxu1 %vm14321_vm4, %v10051_v58  ;;  %vm14325_vm10 = vmmov %vm14324_vm7 }
 0xfe1   : > { %4289 = vmatprep.mubr.bf16.mxu0 %v14103_v20  ;;  %4342 = vmatprep.mubr.bf16.mxu1 %v14103_v20  ;;  %vm14326_vm4 = vmmov %vm14324_vm7 }
 0xfe2   : > { %vm14332_vm14 = vmmov %vm14326_vm4 }
 0xfe8   : > { %8507 = vmatmul.mubr.msk.bf16.gmra.mxu0 %vm14322_vm11, %v10052_v52  ;;  %8509 = vmatmul.mubr.msk.bf16.gmra.mxu1 %vm14323_vm13, %v10052_v52  ;;  %vm14327_vm11 = vmmov %vm14326_vm4 }
 0xfe9   : > { %4645 = vmatprep.mubr.bf16.mxu0 %v14103_v20  ;;  %4698 = vmatprep.mubr.bf16.mxu1 %v14103_v20  ;;  %vm14328_vm13 = vmmov %vm14326_vm4 }
0x10a0   : > { %v4281_v56 = vpop.f32.mrf.mxu0  ;;  %v4334_v62 = vpop.f32.mrf.mxu1 }
0x10a1   : > { %v4353_v47 = vadd.f32 %v4281_v56, %v12009_v6  ;;  %v4355_v54 = vadd.f32 %v4334_v62, %v12025_v15 }
0x10a2   : > { %v4283_v11 = vpop.f32.mrf.mxu0  ;;  %v4336_v41 = vpop.f32.mrf.mxu1 }
0x10a3   : > { %v4354_v28 = vadd.f32 %v4283_v11, %v12017_v32  ;;  %v12261_v0 = vadd.f32 %v4372_v27, %v4353_v47  ;;  %v4356_v5 = vadd.f32 %v4336_v41, %v12032_v13  ;;  %v12277_v12 = vadd.f32 %v4372_v27, %v4355_v54  ;;  %v8514_v54 = vld [vmem:[%s13928_s12 + $0x40] sm:$0xff] }
0x10a4   : > { %v4285_v36 = vpop.f32.mrf.mxu0  ;;  %v4338_v60 = vpop.f32.mrf.mxu1 }
0x10a5   : > { %v4357_v49 = vadd.f32 %v4285_v36, %v12012_v61  ;;  %v4359_v24 = vadd.f32 %v4338_v60, %v12019_v30  ;;  %v12269_v61 = vadd.f32 %v4372_v27, %v4354_v28  ;;  %v12284_v3 = vadd.f32 %v4372_v27, %v4356_v5  ;;  %v8525_v5 = vld [vmem:[%s13930_s14 + $0x58] sm:$0xff] }
0x10a6   : > { %v4287_v42 = vpop.f32.mrf.mxu0  ;;  %v4340_v44 = vpop.f32.mrf.mxu1 }
0x10a7   : > { %v12264_v17 = vadd.f32 %v4377_v59, %v4357_v49  ;;  %v4358_v6 = vadd.f32 %v4287_v42, %v12021_v45  ;;  %v4360_v32 = vadd.f32 %v4340_v44, %v12027_v1  ;;  %v12271_v38 = vadd.f32 %v4377_v59, %v4359_v24  ;;  %v8516_v24 = vld [vmem:[%s13928_s12 + $0x50] sm:$0xff]  ;;  %v8517_v42 = vld [vmem:[%s13928_s12 + $0x58] sm:$0xff] }
0x10a8   : > { %v4291_v53 = vpop.f32.mrf.mxu0  ;;  %v4344_v14 = vpop.f32.mrf.mxu1  ;;  %v8524_v44 = vld [vmem:[%s13930_s14 + $0x50] sm:$0xff] }
0x10a9   : > { %v12273_v30 = vadd.f32 %v4377_v59, %v4358_v6  ;;  %v9544_v15 = vpack.i.bf16 %v12264_v17, %v12261_v0  ;;  %v12279_v45 = vadd.f32 %v4377_v59, %v4360_v32  ;;  %v9549_v29 = vpack.i.bf16 %v12271_v38, %v12277_v12  ;;  %v8515_v6 = vld [vmem:[%s13928_s12 + $0x48] sm:$0xff]  ;;  %v8522_v32 = vld [vmem:[%s13930_s14 + $0x40] sm:$0xff] }
0x10aa   : > { %v4293_v34 = vpop.f32.mrf.mxu0  ;;  %v4346_v2 = vpop.f32.mrf.mxu1  ;;  %v4361_v22 = vadd.f32 %v4291_v53, %v12057_v19  ;;  %v4363_v40 = vadd.f32 %v4344_v14, %v12063_v9  ;;  %v4569_v28 = vpack.c.bf16 %v12264_v17, %v12261_v0  ;;  %v4571_v49 = vpack.c.bf16 %v12271_v38, %v12277_v12  ;;  %v8523_v53 = vld [vmem:[%s13930_s14 + $0x48] sm:$0xff] }
0x10ab   : > { %9545 = vrot.lane.b32.xlu0 %v9544_v15, %s14121_s19  ;;  %v9559_v1 = vpack.i.bf16 %v12273_v30, %v12269_v61  ;;  %v4362_v35 = vadd.f32 %v4293_v34, %v12050_v46  ;;  %v4364_v37 = vadd.f32 %v4346_v2, %v12059_v16  ;;  %v4570_v41 = vpack.c.bf16 %v12273_v30, %v12269_v61 }
0x10ac   : > { %v4295_v13 = vpop.f32.mrf.mxu0  ;;  %v4348_v18 = vpop.f32.mrf.mxu1  ;;  %v12309_v9 = vadd.f32 %v4382_v57, %v4361_v22  ;;  %v12315_v62 = vadd.f32 %v4382_v57, %v4363_v40  ;;  %v4572_v36 = vpack.c.bf16 %v12279_v45, %v12284_v3 }
0x10ad   : > { %v4365_v7 = vadd.f32 %v4295_v13, %v12047_v55  ;;  %9560 = vrot.lane.b32.xlu1 %v9559_v1, %s14121_s19  ;;  %v4367_v31 = vadd.f32 %v4348_v18, %v12052_v48  ;;  %v9564_v55 = vpack.i.bf16 %v12279_v45, %v12284_v3  ;;  %v12302_v19 = vadd.f32 %v4382_v57, %v4362_v35 }
0x10ae   : > { %v4297_v25 = vpop.f32.mrf.mxu0  ;;  %v4350_v46 = vpop.f32.mrf.mxu1 }
0x10af   : > { %v4366_v33 = vadd.f32 %v4297_v25, %v12054_v51  ;;  %9550 = vrot.lane.b32.xlu0 %v9549_v29, %s14121_s19  ;;  %v12299_v58 = vadd.f32 %v4387_v26, %v4365_v7  ;;  %v4368_v52 = vadd.f32 %v4350_v46, %v12061_v39  ;;  %v12304_v16 = vadd.f32 %v4387_v26, %v4367_v31 }
0x10b0   : > { %v12311_v51 = vadd.f32 %v4382_v57, %v4364_v37 }
0x10b1   : > { %v12306_v48 = vadd.f32 %v4387_v26, %v4366_v33  ;;  %9565 = vrot.lane.b32.xlu1 %v9564_v55, %s14121_s19  ;;  %v12313_v56 = vadd.f32 %v4387_v26, %v4368_v52  ;;  %v4573_v11 = vpack.c.bf16 %v12299_v58, %v12309_v9  ;;  %v4575_v26 = vpack.c.bf16 %v12304_v16, %v12315_v62 }
0x10b2   : > { %v9574_v57 = vpack.i.bf16 %v12299_v58, %v12309_v9  ;;  %v9579_v60 = vpack.i.bf16 %v12304_v16, %v12315_v62 }
0x10b3   : > { %9555 = vrot.lane.b32.xlu0 %v9544_v15, %s14174_s2  ;;  %v4574_v39 = vpack.c.bf16 %v12306_v48, %v12302_v19  ;;  %v4576_v47 = vpack.c.bf16 %v12313_v56, %v12311_v51  ;;  %v9599_v27 = vpack.i.bf16 %v12306_v48, %v12302_v19  ;;  %v9604_v59 = vpack.i.bf16 %v12313_v56, %v12311_v51 }
0x10b5   : > { %9570 = vrot.lane.b32.xlu1 %v9559_v1, %s14174_s2  ;;  %4617 = vmatprep.subr.bf16.mxu0 %v4574_v39 }
0x10b6   : > { %4618 = vmatpush1.bf16.msra.mxu0 %v4573_v11  ;;  %4670 = vmatprep.subr.bf16.mxu1 %v4576_v47 }
0x10b7   : > { %4671 = vmatpush1.bf16.msra.mxu1 %v4575_v26  ;;  %9575 = vrot.lane.b32.xlu0 %v9574_v57, %s14121_s19 }
0x10b8   : > { %4619 = vmatprep.subr.bf16.mxu0 %v4570_v41  ;;  %4672 = vmatprep.subr.bf16.mxu1 %v4572_v36 }
0x10b9   : > { %9600 = vrot.lane.b32.xlu1 %v9599_v27, %s14121_s19 }
0x10ba   : > { %4620 = vmatpush1.bf16.msra.mxu0 %v4569_v28 }
0x10bb   : > { %4673 = vmatpush1.bf16.msra.mxu1 %v4571_v49  ;;  %9580 = vrot.lane.b32.xlu0 %v9579_v60, %s14121_s19 }
0x10bd   : > { %9605 = vrot.lane.b32.xlu1 %v9604_v59, %s14121_s19 }
0x10bf   : > { %9585 = vrot.lane.b32.xlu0 %v9574_v57, %s14174_s2 }
0x10c1   : > { %9610 = vrot.lane.b32.xlu1 %v9599_v27, %s14174_s2 }
0x10c3   : > { %9590 = vrot.lane.b32.xlu0 %v9579_v60, %s14174_s2 }
0x10c5   : > { %9615 = vrot.lane.b32.xlu1 %v9604_v59, %s14174_s2 }
0x10c7   : > { %9595 = vrot.lane.b32.xlu0 %v9549_v29, %s14174_s2 }
0x10c9   : > { %9620 = vrot.lane.b32.xlu1 %v9564_v55, %s14174_s2 }
0x10cb   : > { %4589 = vperm.xlu0 %9062, %v8516_v24  }
0x10cd   : > { %4594 = vperm.xlu1 %9063, %v8517_v42  }
0x10cf   : > { %4579 = vperm.xlu0 %9062, %v8514_v54  }
0x10d1   : > { %4584 = vperm.xlu1 %9063, %v8515_v6  }
0x10d3   : > { %4893 = vperm.xlu0 %9062, %v8524_v44  }
0x10d5   : > { %4898 = vperm.xlu1 %9063, %v8525_v5  }
0x10d7   : > { %4883 = vperm.xlu0 %9062, %v8522_v32  }
0x10d9   : > { %4888 = vperm.xlu1 %9063, %v8523_v53  }
0x111d   : > { %v9546_v14 = vpop.permute.xlu0 %9545 }
0x111e   : > { %v9548_v18 = vunpack.i.h.bf16 %v9546_v14  ;;  %v9547_v29 = vunpack.i.l.bf16 %v9546_v14 }
0x111f   : > { %v9561_v15 = vpop.permute.xlu1 %9560 }
0x1120   : > { %v9563_v13 = vunpack.i.h.bf16 %v9561_v15  ;;  %v9562_v35 = vunpack.i.l.bf16 %v9561_v15 }
0x1121   : > { %v9551_v34 = vpop.permute.xlu0 %9550 }
0x1122   : > { %v4530_v37 = vsel %vm14324_vm7, %v9548_v18, %v9563_v13  ;;  %v4529_v31 = vsel %vm14325_vm10, %v9547_v29, %v9562_v35  ;;  %v9552_v52 = vunpack.i.l.bf16 %v9551_v34  ;;  %v9553_v27 = vunpack.i.h.bf16 %v9551_v34  ;;  %vm14329_vm7 = vmmov %vm14326_vm4 }
0x1123   : > { %v9566_v2 = vpop.permute.xlu1 %9565  ;;  %v8535_v60 = vpack.c.bf16 %v4530_v37, %v4529_v31  ;;  %vm14330_vm10 = vmmov %vm14326_vm4 }
0x1124   : > { %v9568_v39 = vunpack.i.h.bf16 %v9566_v2  ;;  %v9567_v11 = vunpack.i.l.bf16 %v9566_v2  ;;  %v4525_v6 = vsel %vm14330_vm10, %v9562_v35, %v9552_v52  ;;  %vm14335_vm10 = vmmov %vm14326_vm4 }
0x1125   : > { %v12377_v1 = vpop.permute.xlu0 %9555 }
0x1126   : > { %v4522_v44 = vsel %vm14326_vm4, %v9553_v27, %v9568_v39  ;;  %v4521_v32 = vsel %vm14332_vm14, %v9552_v52, %v9567_v11  ;;  %vm14337_vm14 = vmmov %vm14326_vm4 }
0x1127   : > { %v12379_v7 = vpop.permute.xlu1 %9570 }
0x1129   : > { %v9576_v22 = vpop.permute.xlu0 %9575 }
0x112a   : > { %v9578_v40 = vunpack.i.h.bf16 %v9576_v22  ;;  %v9577_v33 = vunpack.i.l.bf16 %v9576_v22 }
0x112b   : > { %v9601_v25 = vpop.permute.xlu1 %9600 }
0x112c   : > { %v9603_v46 = vunpack.i.h.bf16 %v9601_v25  ;;  %v9602_v55 = vunpack.i.l.bf16 %v9601_v25 }
0x112d   : > { %v9581_v47 = vpop.permute.xlu0 %9580 }
0x112e   : > { %v4532_v26 = vsel %vm14326_vm4, %v9578_v40, %v9603_v46  ;;  %v4531_v57 = vsel %vm14327_vm11, %v9577_v33, %v9602_v55  ;;  %v9583_v41 = vunpack.i.h.bf16 %v9581_v47  ;;  %v9582_v36 = vunpack.i.l.bf16 %v9581_v47  ;;  %vm14331_vm11 = vmmov %vm14326_vm4 }
0x112f   : > { %v9606_v28 = vpop.permute.xlu1 %9605  ;;  %v8529_v49 = vpack.c.bf16 %v4532_v26, %v4531_v57  ;;  %v4534_v5 = vsel %vm14331_vm11, %v9568_v39, %v9548_v18  ;;  %vm14336_vm11 = vmmov %vm14326_vm4  ;;  %v9573_v39 = vunpack.i.h.bf16 %v12379_v7  ;;  %v9572_v47 = vunpack.i.l.bf16 %v12379_v7 }
0x1130   : > { %v4527_v59 = vsel %vm14328_vm13, %v9602_v55, %v9582_v36  ;;  %v4528_v24 = vsel %vm14329_vm7, %v9603_v46, %v9583_v41  ;;  %v9608_v42 = vunpack.i.h.bf16 %v9606_v28  ;;  %v9607_v54 = vunpack.i.l.bf16 %v9606_v28  ;;  %vm14333_vm13 = vmmov %vm14326_vm4 }
0x1131   : > { %v9586_v53 = vpop.permute.xlu0 %9585  ;;  %8530 = vmatprep.subr.msk.bf16.mxu0 %vm14304_vm12, %v8529_v49  ;;  %vm14334_vm7 = vmmov %vm14326_vm4  ;;  %v4533_v35 = vsel %vm14336_vm11, %v9567_v11, %v9547_v29  ;;  %v8558_v18 = vpack.c.bf16 %v4528_v24, %v4527_v59  ;;  %v8561_v29 = vpack.c.bf16 %v4522_v44, %v4521_v32 }
0x1132   : > { %v4524_v14 = vsel %vm14333_vm13, %v9583_v41, %v9608_v42  ;;  %v4536_v15 = vsel %vm14334_vm7, %v9608_v42, %v9578_v40  ;;  %v4523_v34 = vsel %vm14335_vm10, %v9582_v36, %v9607_v54  ;;  %v4535_v2 = vsel %vm14326_vm4, %v9607_v54, %v9577_v33 }
0x1133   : > { %v8532_v22 = vpack.c.bf16 %v4536_v15, %v4535_v2  ;;  %v9611_v37 = vpop.permute.xlu1 %9610  ;;  %v8555_v31 = vpack.c.bf16 %v4524_v14, %v4523_v34  ;;  %v9588_v25 = vunpack.i.h.bf16 %v9586_v53  ;;  %v9587_v46 = vunpack.i.l.bf16 %v9586_v53 }
0x1134   : > { %v9613_v55 = vunpack.i.h.bf16 %v9611_v37  ;;  %v9612_v52 = vunpack.i.l.bf16 %v9611_v37  ;;  %v4526_v40 = vsel %vm14337_vm14, %v9563_v13, %v9553_v27  ;;  %vm14338_vm13 = vcmp.lt.s32.totalorder %v10593_v23, 8 }
0x1135   : > { %v9591_v26 = vpop.permute.xlu0 %9590  ;;  %8533 = vmatpush1.bf16.msk.msra.mxu0 %vm14307_vm0, %v8532_v22  ;;  %8556 = vmatprep.subr.msk.bf16.mxu1 %vm14309_vm1, %v8555_v31  ;;  %vm14339_vm7 = vmmov %vm14338_vm13  ;;  %v8538_v7 = vpack.c.bf16 %v4534_v5, %v4533_v35  ;;  %v9558_v41 = vunpack.i.h.bf16 %v12377_v1  ;;  %v9557_v36 = vunpack.i.l.bf16 %v12377_v1  ;;  %v8564_v49 = vpack.c.bf16 %v4526_v40, %v4525_v6 }
0x1136   : > { %v4468_v33 = vsel %vm14338_vm13, %v9588_v25, %v9613_v55  ;;  %v4467_v11 = vsel %vm14339_vm7, %v9587_v46, %v9612_v52  ;;  %v9593_v57 = vunpack.i.h.bf16 %v9591_v26  ;;  %v9592_v13 = vunpack.i.l.bf16 %v9591_v26  ;;  %8536 = vmatprep.subr.msk.bf16.mxu0 %vm14304_vm12, %v8535_v60  ;;  %8559 = vmatpush1.bf16.msk.msra.mxu1 %vm14315_vm5, %v8558_v18  ;;  %vm14340_vm10 = vmmov %vm14339_vm7  ;;  %v14353_v26 = vld [vmem:[#allocation27_spill] sm:$0xff] }
0x1137   : > { %v9616_v27 = vpop.permute.xlu1 %9615  ;;  %8562 = vmatprep.subr.msk.bf16.mxu1 %vm14309_vm1, %v8561_v29  ;;  %v8541_v28 = vpack.c.bf16 %v4468_v33, %v4467_v11  ;;  %v4466_v42 = vsel %vm14340_vm10, %v9558_v41, %v9573_v39  ;;  %vm14341_vm4 = vmmov %vm14339_vm7  ;;  %v10053_v11 = vld [vmem:[%s13927_s11 + $0x20] sm:$0xff]  }
0x1138   : > { %v9618_v59 = vunpack.i.h.bf16 %v9616_v27  ;;  %v9617_v24 = vunpack.i.l.bf16 %v9616_v27  ;;  %v4465_v60 = vsel %vm14341_vm4, %v9557_v36, %v9572_v47  ;;  %vm14342_vm11 = vmmov %vm14341_vm4 }
0x1139   : > { %v4463_v54 = vsel %vm14342_vm11, %v9612_v52, %v9592_v13  ;;  %vm14343_vm14 = vmmov %vm14341_vm4  ;;  %v9596_v44 = vpop.permute.xlu0 %9595  ;;  %8539 = vmatpush1.bf16.msk.msra.mxu0 %vm14307_vm0, %v8538_v7  ;;  %v8547_v37 = vpack.c.bf16 %v4466_v42, %v4465_v60 }
0x113a   : > { %v4464_v1 = vsel %vm14343_vm14, %v9613_v55, %v9593_v57  ;;  %vm14344_vm13 = vmmov %vm14341_vm4  ;;  %v4471_v53 = vsel %vm14341_vm4, %v9617_v24, %v9587_v46  ;;  %8542 = vmatprep.subr.msk.bf16.mxu0 %vm11285_vm9, %v8541_v28  ;;  %v9598_v15 = vunpack.i.h.bf16 %v9596_v44  ;;  %v9597_v34 = vunpack.i.l.bf16 %v9596_v44  ;;  %8565 = vmatpush1.bf16.msk.msra.mxu1 %vm14315_vm5, %v8564_v49 }
0x113b   : > { %v4460_v6 = vsel %vm14344_vm13, %v9593_v57, %v9618_v59  ;;  %vm14345_vm7 = vmmov %vm14341_vm4  ;;  %v9621_v2 = vpop.permute.xlu1 %9620  ;;  %v8570_v31 = vpack.c.bf16 %v4464_v1, %v4463_v54  ;;  %vm14348_vm14 = vnez %v14144_v50  ;;  %vm14354_vm5 = vnez %v14353_v26  ;;  %v10054_v57 = vld [vmem:[%s13927_s11 + $0x28] sm:$0xff]  }
0x113c   : > { %v4472_v5 = vsel %vm14345_vm7, %v9618_v59, %v9588_v25  ;;  %vm14346_vm10 = vmmov %vm14341_vm4  ;;  %v9623_v18 = vunpack.i.h.bf16 %v9621_v2  ;;  %v9622_v22 = vunpack.i.l.bf16 %v9621_v2 }
0x113d   : > { %v4459_v32 = vsel %vm14346_vm10, %v9592_v13, %v9617_v24  ;;  %v8544_v14 = vpack.c.bf16 %v4472_v5, %v4471_v53  ;;  %vm14347_vm11 = vmmov %vm14341_vm4 }
0x113e   : > { %v8567_v35 = vpack.c.bf16 %v4460_v6, %v4459_v32  ;;  %v4462_v25 = vsel %vm14347_vm11, %v9573_v39, %v9598_v15  ;;  %vm14349_vm13 = vmmov %vm14341_vm4  ;;  %v4457_v40 = vsel %vm14341_vm4, %v9597_v34, %v9622_v22 }
0x113f   : > { %8545 = vmatpush1.bf16.msk.msra.mxu0 %vm11324_vm3, %v8544_v14  ;;  %v4461_v46 = vsel %vm14349_vm13, %v9572_v47, %v9597_v34  ;;  %vm14350_vm7 = vmmov %vm14341_vm4  ;;  %vm14355_vm13 = vcmask 785408  }
0x1140   : > { %8568 = vmatprep.subr.msk.bf16.mxu1 %vm14348_vm14, %v8567_v35  ;;  %v4458_v55 = vsel %vm14350_vm7, %v9598_v15, %v9623_v18  ;;  %vm14351_vm10 = vmmov %vm14341_vm4  ;;  %8548 = vmatprep.subr.msk.bf16.mxu0 %vm11285_vm9, %v8547_v37  ;;  %v8576_v33 = vpack.c.bf16 %v4462_v25, %v4461_v46 }
0x1141   : > { %v4470_v52 = vsel %vm14351_vm10, %v9623_v18, %v9558_v41  ;;  %vm14352_vm11 = vmmov %vm14341_vm4  ;;  %8571 = vmatpush1.bf16.msk.msra.mxu1 %vm14354_vm5, %v8570_v31  ;;  %v8573_v29 = vpack.c.bf16 %v4458_v55, %v4457_v40 }
0x1142   : > { %v4469_v39 = vsel %vm14352_vm11, %v9622_v22, %v9557_v36  ;;  %vm14356_vm7 = vmmov %vm14355_vm13  ;;  %vm14359_vm11 = vcmask 261120  }
0x1143   : > { %v8550_v47 = vpack.c.bf16 %v4470_v52, %v4469_v39  ;;  %8574 = vmatprep.subr.msk.bf16.mxu1 %vm14348_vm14, %v8573_v29  ;;  %vm14357_vm10 = vmmov %vm14356_vm7 }
0x1144   : > { %vm14358_vm4 = vmmov %vm14356_vm7 }
0x1145   : > { %8551 = vmatpush1.bf16.msk.msra.mxu0 %vm11324_vm3, %v8550_v47  ;;  %8577 = vmatpush1.bf16.msk.msra.mxu1 %vm14354_vm5, %v8576_v33 }
0x1146   : > { %v4590_v28 = vpop.permute.xlu0 %4589 }
0x1148   : > { %8552 = vmatmul.mubr.msk.bf16.vlgmr.msra.gmra.mxu0 %vm14355_vm13, %v10053_v11  ;;  %8578 = vmatmul.mubr.msk.bf16.vlgmr.msra.gmra.mxu1 %vm14356_vm7, %v10053_v11  ;;  %v4595_v59 = vpop.permute.xlu1 %4594  ;;  %vm14360_vm13 = vmmov %vm14359_vm11 }
0x1149   : > { %4655 = vmatprep.mubr.bf16.mxu0 %v14103_v20  ;;  %4708 = vmatprep.mubr.bf16.mxu1 %v14103_v20  ;;  %vm14361_vm7 = vmmov %vm14359_vm11 }
0x114a   : > { %v4580_v44 = vpop.permute.xlu0 %4579 }
0x114c   : > { %v4585_v5 = vpop.permute.xlu1 %4584 }
0x1150   : > { %8553 = vmatmul.mubr.msk.bf16.gmra.mxu0 %vm14357_vm10, %v10054_v57  ;;  %8579 = vmatmul.mubr.msk.bf16.gmra.mxu1 %vm14358_vm4, %v10054_v57  ;;  %vm14362_vm10 = vmmov %vm14361_vm7  ;;  %vm14364_vm4 = vcmp.lt.s32.totalorder %v10593_v23, 8 }
0x1151   : > { %4791 = vmatprep.mubr.bf16.mxu0 %v14103_v20  ;;  %4844 = vmatprep.mubr.bf16.mxu1 %v14103_v20  ;;  %vm14372_vm1 = vmmov %vm14364_vm4 }
0x1208   : > { %v4647_v13 = vpop.f32.mrf.mxu0  ;;  %v4700_v7 = vpop.f32.mrf.mxu1 }
0x1209   : > { %v4648_v53 = vadd.f32 %v4647_v13, %v4580_v44 }
0x120a   : > { %v4649_v41 = vpop.f32.mrf.mxu0  ;;  %v4702_v36 = vpop.f32.mrf.mxu1 }
0x120b   : > { %v4650_v25 = vadd.f32 %v4649_v41, %v4580_v44  ;;  %v4703_v46 = vadd.f32 %v4702_v36, %v4580_v44 }
0x120c   : > { %v4651_v27 = vpop.f32.mrf.mxu0  ;;  %v4704_v49 = vpop.f32.mrf.mxu1 }
0x120d   : > { %v4652_v39 = vadd.f32 %v4651_v27, %v4585_v5  ;;  %v4705_v29 = vadd.f32 %v4704_v49, %v4585_v5  ;;  %v4722_v36 = vmax.f32 %v4703_v46, 0.0 }
0x120e   : > { %v4653_v24 = vpop.f32.mrf.mxu0  ;;  %v4706_v42 = vpop.f32.mrf.mxu1 }
0x120f   : > { %v4654_v14 = vadd.f32 %v4653_v24, %v4585_v5  ;;  %v4707_v35 = vadd.f32 %v4706_v42, %v4585_v5  ;;  %v4725_v27 = vmax.f32 %v4705_v29, 0.0 }
0x1210   : > { %v4657_v60 = vpop.f32.mrf.mxu0  ;;  %v4710_v54 = vpop.f32.mrf.mxu1 }
0x1211   : > { %v4658_v18 = vadd.f32 %v4657_v60, %v4590_v28  ;;  %v4711_v55 = vadd.f32 %v4710_v54, %v4590_v28  ;;  %v4724_v11 = vmax.f32 %v4654_v14, 0.0 }
0x1212   : > { %v4659_v1 = vpop.f32.mrf.mxu0  ;;  %v4712_v6 = vpop.f32.mrf.mxu1 }
0x1213   : > { %v4660_v15 = vadd.f32 %v4659_v1, %v4590_v28  ;;  %v4713_v22 = vadd.f32 %v4712_v6, %v4590_v28  ;;  %v4726_v1 = vmax.f32 %v4707_v35, 0.0  ;;  %v4701_v6 = vadd.f32 %v4700_v7, %v4580_v44  ;;  %v10055_v44 = vld [vmem:[%s13929_s13 + $0x20] sm:$0xff]   ;;  %v4899_v35 = vpop.permute.xlu1 %4898 }
0x1214   : > { %v4661_v32 = vpop.f32.mrf.mxu0  ;;  %v4714_v2 = vpop.f32.mrf.mxu1  ;;  %v4729_v21 = vmax.f32 %v4711_v55, 0.0  ;;  %v4723_v28 = vmax.f32 %v4652_v39, 0.0 }
0x1215   : > { %v4662_v34 = vadd.f32 %v4661_v32, %v4595_v59  ;;  %v4715_v37 = vadd.f32 %v4714_v2, %v4595_v59  ;;  %v4728_v57 = vmax.f32 %v4660_v15, 0.0  ;;  %v4727_v32 = vmax.f32 %v4658_v18, 0.0 }
0x1216   : > { %v4663_v31 = vpop.f32.mrf.mxu0  ;;  %v4716_v40 = vpop.f32.mrf.mxu1  ;;  %v4730_v42 = vmax.f32 %v4713_v22, 0.0  ;;  %v4720_v2 = vmax.f32 %v4650_v25, 0.0  ;;  %v4738_v14 = vpack.c.bf16 %v4726_v1, %v4722_v36  ;;  %v4721_v15 = vmax.f32 %v4701_v6, 0.0 }
0x1217   : > { %v4664_v52 = vadd.f32 %v4663_v31, %v4595_v59  ;;  %v4731_v47 = vmax.f32 %v4662_v34, 0.0  ;;  %v4717_v33 = vadd.f32 %v4716_v40, %v4595_v59  ;;  %v4733_v13 = vmax.f32 %v4715_v37, 0.0 }
0x1218   : > { %v4736_v49 = vpack.c.bf16 %v4724_v11, %v4720_v2  ;;  %v4719_v59 = vmax.f32 %v4648_v53, 0.0  ;;  %v4737_v7 = vpack.c.bf16 %v4725_v27, %v4721_v15  ;;  %v4894_v53 = vpop.permute.xlu0 %4893 }
0x1219   : > { %v4732_v24 = vmax.f32 %v4664_v52, 0.0  ;;  %v4734_v60 = vmax.f32 %v4717_v33, 0.0  ;;  %v4739_v54 = vpack.c.bf16 %v4731_v47, %v4727_v32  ;;  %v4741_v5 = vpack.c.bf16 %v4733_v13, %v4729_v21  ;;  %v10056_v21 = vld [vmem:[%s13929_s13 + $0x28] sm:$0xff]   ;;  %v4889_v47 = vpop.permute.xlu1 %4888 }
0x121a   : > { %v4735_v34 = vpack.c.bf16 %v4723_v28, %v4719_v59 }
0x121b   : > { %v4740_v41 = vpack.c.bf16 %v4732_v24, %v4728_v57  ;;  %v4742_v31 = vpack.c.bf16 %v4734_v60, %v4730_v42 }
0x121c   : > { %v4884_v52 = vpop.permute.xlu0 %4883 }
0x121d   : > { %4771 = vmatprep.subr.bf16.mxu0 %v4740_v41  ;;  %4824 = vmatprep.subr.bf16.mxu1 %v4742_v31 }
0x121e   : > { %4772 = vmatpush1.bf16.msra.mxu0 %v4739_v54  ;;  %4825 = vmatpush1.bf16.msra.mxu1 %v4741_v5 }
0x121f   : > { %4773 = vmatprep.subr.bf16.mxu0 %v4736_v49  ;;  %4826 = vmatprep.subr.bf16.mxu1 %v4738_v14 }
0x1222   : > { %4774 = vmatpush1.bf16.msra.mxu0 %v4735_v34  ;;  %4827 = vmatpush1.bf16.msra.mxu1 %v4737_v7 }
0x1225   : > { %8582 = vmatmul.mubr.msk.bf16.vlgmr.msra.gmra.mxu0 %vm14359_vm11, %v10055_v44  ;;  %8584 = vmatmul.mubr.msk.bf16.vlgmr.msra.gmra.mxu1 %vm14360_vm13, %v10055_v44  ;;  %vm14365_vm11 = vmmov %vm14364_vm4 }
0x1226   : > { %4801 = vmatprep.mubr.bf16.mxu0 %v14103_v20  ;;  %4854 = vmatprep.mubr.bf16.mxu1 %v14103_v20  ;;  %vm14366_vm13 = vmmov %vm14364_vm4 }
0x122d   : > { %8583 = vmatmul.mubr.msk.bf16.gmra.mxu0 %vm14361_vm7, %v10056_v21  ;;  %8585 = vmatmul.mubr.msk.bf16.gmra.mxu1 %vm14362_vm10, %v10056_v21  ;;  %vm14367_vm7 = vmmov %vm14364_vm4 }
0x122e   : > { %5157 = vmatprep.mubr.bf16.mxu0 %v14103_v20  ;;  %5210 = vmatprep.mubr.bf16.mxu1 %v14103_v20  ;;  %vm14368_vm10 = vmmov %vm14364_vm4 }
0x12e5   : > { %v4793_v18 = vpop.f32.mrf.mxu0  ;;  %v4846_v22 = vpop.f32.mrf.mxu1 }
0x12e6   : > { %v4865_v25 = vadd.f32 %v4793_v18, %v12261_v0  ;;  %v4867_v13 = vadd.f32 %v4846_v22, %v12277_v12 }
0x12e7   : > { %v4795_v37 = vpop.f32.mrf.mxu0  ;;  %v4848_v46 = vpop.f32.mrf.mxu1 }
0x12e8   : > { %v4866_v40 = vadd.f32 %v4795_v37, %v12269_v61  ;;  %v12513_v57 = vadd.f32 %v4884_v52, %v4865_v25  ;;  %v4868_v32 = vadd.f32 %v4848_v46, %v12284_v3  ;;  %v12529_v41 = vadd.f32 %v4884_v52, %v4867_v13  ;;  %v8590_v13 = vld [vmem:[%s13928_s12 + $0x60] sm:$0xff] }
0x12e9   : > { %v4797_v55 = vpop.f32.mrf.mxu0  ;;  %v4850_v29 = vpop.f32.mrf.mxu1 }
0x12ea   : > { %v4869_v39 = vadd.f32 %v4797_v55, %v12264_v17  ;;  %v4871_v33 = vadd.f32 %v4850_v29, %v12271_v38  ;;  %v12521_v17 = vadd.f32 %v4884_v52, %v4866_v40  ;;  %v12536_v28 = vadd.f32 %v4884_v52, %v4868_v32  ;;  %v8601_v32 = vld [vmem:[%s13930_s14 + $0x78] sm:$0xff] }
0x12eb   : > { %v4799_v11 = vpop.f32.mrf.mxu0  ;;  %v4852_v1 = vpop.f32.mrf.mxu1 }
0x12ec   : > { %v12516_v24 = vadd.f32 %v4889_v47, %v4869_v39  ;;  %v4870_v0 = vadd.f32 %v4799_v11, %v12273_v30  ;;  %v4872_v61 = vadd.f32 %v4852_v1, %v12279_v45  ;;  %v12523_v60 = vadd.f32 %v4889_v47, %v4871_v33  ;;  %v8592_v33 = vld [vmem:[%s13928_s12 + $0x70] sm:$0xff]  ;;  %v8593_v11 = vld [vmem:[%s13928_s12 + $0x78] sm:$0xff] }
0x12ed   : > { %v4803_v42 = vpop.f32.mrf.mxu0  ;;  %v4856_v6 = vpop.f32.mrf.mxu1  ;;  %v8600_v1 = vld [vmem:[%s13930_s14 + $0x70] sm:$0xff] }
0x12ee   : > { %v12525_v38 = vadd.f32 %v4889_v47, %v4870_v0  ;;  %v9624_v12 = vpack.i.bf16 %v12516_v24, %v12513_v57  ;;  %v12531_v30 = vadd.f32 %v4889_v47, %v4872_v61  ;;  %v9629_v49 = vpack.i.bf16 %v12523_v60, %v12529_v41  ;;  %v8591_v0 = vld [vmem:[%s13928_s12 + $0x68] sm:$0xff]  ;;  %v8598_v61 = vld [vmem:[%s13930_s14 + $0x60] sm:$0xff] }
0x12ef   : > { %v4805_v2 = vpop.f32.mrf.mxu0  ;;  %v4858_v36 = vpop.f32.mrf.mxu1  ;;  %v4873_v5 = vadd.f32 %v4803_v42, %v12309_v9  ;;  %v4875_v34 = vadd.f32 %v4856_v6, %v12315_v62  ;;  %v5081_v40 = vpack.c.bf16 %v12516_v24, %v12513_v57  ;;  %v5083_v39 = vpack.c.bf16 %v12523_v60, %v12529_v41  ;;  %v8599_v42 = vld [vmem:[%s13930_s14 + $0x68] sm:$0xff] }
0x12f0   : > { %9625 = vrot.lane.b32.xlu0 %v9624_v12, %s14174_s2  ;;  %v9639_v45 = vpack.i.bf16 %v12525_v38, %v12521_v17  ;;  %v4874_v54 = vadd.f32 %v4805_v2, %v12302_v19  ;;  %v4876_v59 = vadd.f32 %v4858_v36, %v12311_v51  ;;  %v5082_v46 = vpack.c.bf16 %v12525_v38, %v12521_v17  ;;  %v3237_v6 = vld [vmem:[%s13932_s16 + $0x8] sm:$0xff]  ;;  %v8679_v2 = vld [vmem:[%s13926_s10 + $0x30] sm:$0xff]  ;;  %v8680_v36 = vld [vmem:[%s13926_s10 + $0x38] sm:$0xff] }
0x12f1   : > { %v4807_v3 = vpop.f32.mrf.mxu0  ;;  %v4860_v27 = vpop.f32.mrf.mxu1  ;;  %v12561_v62 = vadd.f32 %v4894_v53, %v4873_v5  ;;  %v12567_v22 = vadd.f32 %v4894_v53, %v4875_v34  ;;  %v5084_v55 = vpack.c.bf16 %v12531_v30, %v12536_v28 }
0x12f2   : > { %v4877_v31 = vadd.f32 %v4807_v3, %v12299_v58  ;;  %9640 = vrot.lane.b32.xlu1 %v9639_v45, %s14174_s2  ;;  %v4879_v14 = vadd.f32 %v4860_v27, %v12304_v16  ;;  %v9644_v58 = vpack.i.bf16 %v12531_v30, %v12536_v28  ;;  %v12554_v9 = vadd.f32 %v4894_v53, %v4874_v54  ;;  %v8678_v3 = vld [vmem:[%s13926_s10 + $0x28] sm:$0xff] }
0x12f3   : > { %v4809_v15 = vpop.f32.mrf.mxu0  ;;  %v4862_v19 = vpop.f32.mrf.mxu1 }
0x12f4   : > { %v4878_v7 = vadd.f32 %v4809_v15, %v12306_v48  ;;  %9630 = vrot.lane.b32.xlu0 %v9629_v49, %s14174_s2  ;;  %v12551_v44 = vadd.f32 %v4899_v35, %v4877_v31  ;;  %v4880_v21 = vadd.f32 %v4862_v19, %v12313_v56  ;;  %v12556_v51 = vadd.f32 %v4899_v35, %v4879_v14 }
0x12f5   : > { %v12563_v48 = vadd.f32 %v4894_v53, %v4876_v59 }
0x12f6   : > { %v12558_v16 = vadd.f32 %v4899_v35, %v4878_v7  ;;  %9645 = vrot.lane.b32.xlu1 %v9644_v58, %s14174_s2  ;;  %v12565_v18 = vadd.f32 %v4899_v35, %v4880_v21  ;;  %v5085_v37 = vpack.c.bf16 %v12551_v44, %v12561_v62  ;;  %v5087_v35 = vpack.c.bf16 %v12556_v51, %v12567_v22 }
0x12f7   : > { %v9654_v53 = vpack.i.bf16 %v12551_v44, %v12561_v62  ;;  %v9659_v29 = vpack.i.bf16 %v12556_v51, %v12567_v22 }
0x12f8   : > { %9635 = vrot.lane.b32.xlu0 %v9624_v12, %s14363_s18  ;;  %v5086_v56 = vpack.c.bf16 %v12558_v16, %v12554_v9  ;;  %v5088_v25 = vpack.c.bf16 %v12565_v18, %v12563_v48  ;;  %v9679_v52 = vpack.i.bf16 %v12558_v16, %v12554_v9  ;;  %v9684_v47 = vpack.i.bf16 %v12565_v18, %v12563_v48  ;;  %v3236_v12 = vld [vmem:[%s13932_s16] sm:$0xff] }
0x12fa   : > { %9650 = vrot.lane.b32.xlu1 %v9639_v45, %s14363_s18  ;;  %5129 = vmatprep.subr.bf16.mxu0 %v5086_v56  ;;  %v8677_v45 = vld [vmem:[%s13926_s10 + $0x20] sm:$0xff] }
0x12fb   : > { %5130 = vmatpush1.bf16.msra.mxu0 %v5085_v37  ;;  %5182 = vmatprep.subr.bf16.mxu1 %v5088_v25 }
0x12fc   : > { %5183 = vmatpush1.bf16.msra.mxu1 %v5087_v35  ;;  %9655 = vrot.lane.b32.xlu0 %v9654_v53, %s14174_s2 }
0x12fd   : > { %5131 = vmatprep.subr.bf16.mxu0 %v5082_v46  ;;  %5184 = vmatprep.subr.bf16.mxu1 %v5084_v55 }
0x12fe   : > { %9680 = vrot.lane.b32.xlu1 %v9679_v52, %s14174_s2 }
0x12ff   : > { %5132 = vmatpush1.bf16.msra.mxu0 %v5081_v40 }
0x1300   : > { %5185 = vmatpush1.bf16.msra.mxu1 %v5083_v39  ;;  %9660 = vrot.lane.b32.xlu0 %v9659_v29, %s14174_s2 }
0x1302   : > { %9685 = vrot.lane.b32.xlu1 %v9684_v47, %s14174_s2 }
0x1304   : > { %9665 = vrot.lane.b32.xlu0 %v9654_v53, %s14363_s18 }
0x1306   : > { %9690 = vrot.lane.b32.xlu1 %v9679_v52, %s14363_s18 }
0x1308   : > { %9670 = vrot.lane.b32.xlu0 %v9659_v29, %s14363_s18 }
0x130a   : > { %9695 = vrot.lane.b32.xlu1 %v9684_v47, %s14363_s18 }
0x130c   : > { %9675 = vrot.lane.b32.xlu0 %v9629_v49, %s14363_s18 }
0x130e   : > { %9700 = vrot.lane.b32.xlu1 %v9644_v58, %s14363_s18 }
0x1310   : > { %5101 = vperm.xlu0 %9062, %v8592_v33  }
0x1312   : > { %5106 = vperm.xlu1 %9063, %v8593_v11  }
0x1314   : > { %5091 = vperm.xlu0 %9062, %v8590_v13  }
0x1316   : > { %5096 = vperm.xlu1 %9063, %v8591_v0  }
0x1318   : > { %5405 = vperm.xlu0 %9062, %v8600_v1  }
0x131a   : > { %5410 = vperm.xlu1 %9063, %v8601_v32  }
0x131c   : > { %5395 = vperm.xlu0 %9062, %v8598_v61  }
0x131e   : > { %5400 = vperm.xlu1 %9063, %v8599_v42  }
0x1320   : > { %5444 = vperm.xlu0 %9062, %v3237_v6  }
0x1322   : > { %5439 = vperm.xlu1 %9063, %v3236_v12  }
0x1324   : > { %5682 = vperm.xlu0 %9062, %v8679_v2  }
0x1326   : > { %5687 = vperm.xlu1 %9063, %v8680_v36  }
0x1328   : > { %5672 = vperm.xlu0 %9062, %v8677_v45  }
0x132a   : > { %5677 = vperm.xlu1 %9063, %v8678_v3  }
0x1362   : > { %v9626_v54 = vpop.permute.xlu0 %9625 }
0x1363   : > { %v9628_v34 = vunpack.i.h.bf16 %v9626_v54  ;;  %v9627_v7 = vunpack.i.l.bf16 %v9626_v54 }
0x1364   : > { %v9641_v31 = vpop.permute.xlu1 %9640 }
0x1365   : > { %v9643_v59 = vunpack.i.h.bf16 %v9641_v31  ;;  %v9642_v14 = vunpack.i.l.bf16 %v9641_v31 }
0x1366   : > { %v9631_v27 = vpop.permute.xlu0 %9630 }
0x1367   : > { %v5042_v58 = vsel %vm14364_vm4, %v9628_v34, %v9643_v59  ;;  %v5041_v21 = vsel %vm14365_vm11, %v9627_v7, %v9642_v14  ;;  %v9632_v46 = vunpack.i.l.bf16 %v9631_v27  ;;  %v9633_v11 = vunpack.i.h.bf16 %v9631_v27  ;;  %vm14369_vm11 = vmmov %vm14364_vm4 }
0x1368   : > { %v9646_v49 = vpop.permute.xlu1 %9645  ;;  %v8611_v1 = vpack.c.bf16 %v5042_v58, %v5041_v21 }
0x1369   : > { %v9648_v55 = vunpack.i.h.bf16 %v9646_v49  ;;  %v9647_v52 = vunpack.i.l.bf16 %v9646_v49  ;;  %v5037_v12 = vsel %vm14369_vm11, %v9642_v14, %v9632_v46  ;;  %vm14375_vm11 = vmmov %vm14372_vm1 }
0x136a   : > { %v12647_v5 = vpop.permute.xlu0 %9635 }
0x136b   : > { %v5033_v45 = vsel %vm14372_vm1, %v9632_v46, %v9647_v52 }
0x136c   : > { %v12649_v15 = vpop.permute.xlu1 %9650 }
0x136e   : > { %v9656_v19 = vpop.permute.xlu0 %9655 }
0x136f   : > { %v9658_v37 = vunpack.i.h.bf16 %v9656_v19  ;;  %v9657_v25 = vunpack.i.l.bf16 %v9656_v19 }
0x1370   : > { %v9681_v56 = vpop.permute.xlu1 %9680 }
0x1371   : > { %v9683_v35 = vunpack.i.h.bf16 %v9681_v56  ;;  %v9682_v53 = vunpack.i.l.bf16 %v9681_v56 }
0x1372   : > { %v9661_v40 = vpop.permute.xlu0 %9660 }
0x1373   : > { %v5044_v39 = vsel %vm14366_vm13, %v9658_v37, %v9683_v35  ;;  %v5043_v29 = vsel %vm14367_vm7, %v9657_v25, %v9682_v53  ;;  %v9663_v47 = vunpack.i.h.bf16 %v9661_v40  ;;  %v9662_v33 = vunpack.i.l.bf16 %v9661_v40  ;;  %vm14370_vm13 = vmmov %vm14364_vm4 }
0x1374   : > { %v9686_v13 = vpop.permute.xlu1 %9685  ;;  %v8605_v0 = vpack.c.bf16 %v5044_v39, %v5043_v29  ;;  %v5034_v2 = vsel %vm14370_vm13, %v9633_v11, %v9648_v55  ;;  %vm14371_vm7 = vmmov %vm14364_vm4  ;;  %v9652_v40 = vunpack.i.l.bf16 %v12649_v15 }
0x1375   : > { %v5039_v32 = vsel %vm14368_vm10, %v9682_v53, %v9662_v33  ;;  %v5040_v61 = vsel %vm14364_vm4, %v9683_v35, %v9663_v47  ;;  %v9688_v42 = vunpack.i.h.bf16 %v9686_v13  ;;  %v9687_v6 = vunpack.i.l.bf16 %v9686_v13  ;;  %vm14373_vm10 = vmmov %vm14372_vm1 }
0x1376   : > { %v5046_v36 = vsel %vm14371_vm7, %v9648_v55, %v9628_v34  ;;  %v9666_v3 = vpop.permute.xlu0 %9665  ;;  %8606 = vmatprep.subr.msk.bf16.mxu0 %vm11285_vm9, %v8605_v0  ;;  %vm14374_vm4 = vmmov %vm14372_vm1  ;;  %v8634_v34 = vpack.c.bf16 %v5040_v61, %v5039_v32  ;;  %v9653_v55 = vunpack.i.h.bf16 %v12649_v15 }
0x1377   : > { %v5036_v54 = vsel %vm14373_vm10, %v9663_v47, %v9688_v42  ;;  %v5048_v31 = vsel %vm14374_vm4, %v9688_v42, %v9658_v37  ;;  %v5035_v27 = vsel %vm14375_vm11, %v9662_v33, %v9687_v6  ;;  %vm14376_vm13 = vmmov %vm14372_vm1  ;;  %v9668_v56 = vunpack.i.h.bf16 %v9666_v3 }
0x1378   : > { %v5047_v49 = vsel %vm14376_vm13, %v9687_v6, %v9657_v25  ;;  %vm14377_vm7 = vmmov %vm14372_vm1  ;;  %v9691_v58 = vpop.permute.xlu1 %9690  ;;  %v8631_v21 = vpack.c.bf16 %v5036_v54, %v5035_v27  ;;  %v9667_v35 = vunpack.i.l.bf16 %v9666_v3  ;;  %v5038_v37 = vsel %vm14372_vm1, %v9643_v59, %v9633_v11 }
0x1379   : > { %v5045_v14 = vsel %vm14377_vm7, %v9647_v52, %v9627_v7  ;;  %v8608_v19 = vpack.c.bf16 %v5048_v31, %v5047_v49  ;;  %v9693_v53 = vunpack.i.h.bf16 %v9691_v58  ;;  %v9692_v46 = vunpack.i.l.bf16 %v9691_v58 }
0x137a   : > { %v9671_v39 = vpop.permute.xlu0 %9670  ;;  %8632 = vmatprep.subr.msk.bf16.mxu1 %vm14348_vm14, %v8631_v21  ;;  %v8637_v7 = vpack.c.bf16 %v5034_v2, %v5033_v45  ;;  %vm14378_vm10 = vcmp.lt.s32.totalorder %v10593_v23, 16  ;;  %v8614_v15 = vpack.c.bf16 %v5046_v36, %v5045_v14  ;;  %v9638_v47 = vunpack.i.h.bf16 %v12647_v5 }
0x137b   : > { %8609 = vmatpush1.bf16.msk.msra.mxu0 %vm11324_vm3, %v8608_v19  ;;  %v4980_v25 = vsel %vm14378_vm10, %v9668_v56, %v9693_v53  ;;  %vm14379_vm4 = vmmov %vm14378_vm10  ;;  %v9673_v29 = vunpack.i.h.bf16 %v9671_v39  ;;  %v9672_v59 = vunpack.i.l.bf16 %v9671_v39  ;;  %8635 = vmatpush1.bf16.msk.msra.mxu1 %vm14354_vm5, %v8634_v34  ;;  %v9637_v33 = vunpack.i.l.bf16 %v12647_v5 }
0x137c   : > { %v4979_v52 = vsel %vm14379_vm4, %v9667_v35, %v9692_v46  ;;  %8612 = vmatprep.subr.msk.bf16.mxu0 %vm11285_vm9, %v8611_v1  ;;  %v9696_v11 = vpop.permute.xlu1 %9695  ;;  %8638 = vmatprep.subr.msk.bf16.mxu1 %vm14348_vm14, %v8637_v7  ;;  %v8640_v0 = vpack.c.bf16 %v5038_v37, %v5037_v12  ;;  %vm14380_vm11 = vmmov %vm14379_vm4 }
0x137d   : > { %v8617_v13 = vpack.c.bf16 %v4980_v25, %v4979_v52  ;;  %v9698_v32 = vunpack.i.h.bf16 %v9696_v11  ;;  %v9697_v61 = vunpack.i.l.bf16 %v9696_v11  ;;  %v4978_v42 = vsel %vm14380_vm11, %v9638_v47, %v9653_v55  ;;  %vm14381_vm13 = vmmov %vm14379_vm4  ;;  %v14396_v52 = vld [vmem:[#allocation31_spill] sm:$0xff] }
0x137e   : > { %v4977_v1 = vsel %vm14381_vm13, %v9637_v33, %v9652_v40  ;;  %vm14382_vm7 = vmmov %vm14379_vm4  ;;  %v9676_v2 = vpop.permute.xlu0 %9675 }
0x137f   : > { %v4975_v6 = vsel %vm14382_vm7, %v9692_v46, %v9672_v59  ;;  %vm14383_vm1 = vmmov %vm14379_vm4  ;;  %8615 = vmatpush1.bf16.msk.msra.mxu0 %vm11324_vm3, %v8614_v15  ;;  %v9678_v27 = vunpack.i.h.bf16 %v9676_v2  ;;  %v9677_v49 = vunpack.i.l.bf16 %v9676_v2  ;;  %8641 = vmatpush1.bf16.msk.msra.mxu1 %vm14354_vm5, %v8640_v0  ;;  %v8623_v21 = vpack.c.bf16 %v4978_v42, %v4977_v1  ;;  %v10057_v15 = vld [vmem:[%s13927_s11 + $0x30] sm:$0xff]  }
0x1380   : > { %v4976_v5 = vsel %vm14383_vm1, %v9693_v53, %v9673_v29  ;;  %vm14384_vm10 = vmmov %vm14383_vm1  ;;  %8618 = vmatprep.subr.msk.bf16.mxu0 %vm11592_vm8, %v8617_v13  ;;  %v9701_v14 = vpop.permute.xlu1 %9700 }
0x1381   : > { %v4972_v12 = vsel %vm14384_vm10, %v9673_v29, %v9698_v32  ;;  %vm14385_vm4 = vmmov %vm14383_vm1  ;;  %v9703_v19 = vunpack.i.h.bf16 %v9701_v14  ;;  %v9702_v58 = vunpack.i.l.bf16 %v9701_v14  ;;  %v4973_v37 = vsel %vm14383_vm1, %v9652_v40, %v9677_v49 }
0x1382   : > { %v4984_v36 = vsel %vm14385_vm4, %v9698_v32, %v9668_v56  ;;  %vm14386_vm11 = vmmov %vm14383_vm1  ;;  %v8646_v56 = vpack.c.bf16 %v4976_v5, %v4975_v6 }
0x1383   : > { %v4971_v45 = vsel %vm14386_vm11, %v9672_v59, %v9697_v61  ;;  %vm14387_vm13 = vmmov %vm14383_vm1 }
0x1384   : > { %v4983_v3 = vsel %vm14387_vm13, %v9697_v61, %v9667_v35  ;;  %v8643_v34 = vpack.c.bf16 %v4972_v12, %v4971_v45  ;;  %vm14389_vm7 = vmmov %vm14383_vm1 }
0x1385   : > { %v8620_v31 = vpack.c.bf16 %v4984_v36, %v4983_v3  ;;  %v4974_v53 = vsel %vm14389_vm7, %v9653_v55, %v9678_v27  ;;  %vm14392_vm10 = vmmov %vm14383_vm1  ;;  %vm14397_vm7 = vnez %v14396_v52 }
0x1386   : > { %8644 = vmatprep.subr.msk.bf16.mxu1 %vm11627_vm2, %v8643_v34  ;;  %v4970_v39 = vsel %vm14392_vm10, %v9678_v27, %v9703_v19  ;;  %vm14393_vm4 = vmmov %vm14383_vm1  ;;  %v8652_v59 = vpack.c.bf16 %v4974_v53, %v4973_v37 }
0x1387   : > { %8621 = vmatpush1.bf16.msk.msra.mxu0 %vm11610_vm15, %v8620_v31  ;;  %v4982_v7 = vsel %vm14393_vm4, %v9703_v19, %v9638_v47  ;;  %vm14394_vm11 = vmmov %vm14383_vm1  ;;  %8647 = vmatpush1.bf16.msk.msra.mxu1 %vm14397_vm7, %v8646_v56  ;;  %v10058_v47 = vld [vmem:[%s13927_s11 + $0x38] sm:$0xff]  }
0x1388   : > { %v4969_v25 = vsel %vm14394_vm11, %v9677_v49, %v9702_v58  ;;  %8624 = vmatprep.subr.msk.bf16.mxu0 %vm11592_vm8, %v8623_v21  ;;  %vm14395_vm13 = vmmov %vm14383_vm1  ;;  %vm14398_vm1 = vcmask 785408  }
0x1389   : > { %v4981_v55 = vsel %vm14395_vm13, %v9702_v58, %v9637_v33  ;;  %v8649_v29 = vpack.c.bf16 %v4970_v39, %v4969_v25  ;;  %vm14399_vm10 = vmmov %vm14398_vm1  ;;  %vm14402_vm13 = vcmask 261120  }
0x138a   : > { %v8626_v40 = vpack.c.bf16 %v4982_v7, %v4981_v55  ;;  %vm14400_vm4 = vmmov %vm14398_vm1 }
0x138b   : > { %8650 = vmatprep.subr.msk.bf16.mxu1 %vm11627_vm2, %v8649_v29  ;;  %vm14401_vm11 = vmmov %vm14398_vm1  ;;  %v5102_v61 = vpop.permute.xlu0 %5101 }
0x138c   : > { %8627 = vmatpush1.bf16.msk.msra.mxu0 %vm11610_vm15, %v8626_v40  ;;  %8653 = vmatpush1.bf16.msk.msra.mxu1 %vm14397_vm7, %v8652_v59 }
0x138d   : > { %v5107_v1 = vpop.permute.xlu1 %5106 }
0x138f   : > { %8628 = vmatmul.mubr.msk.bf16.vlgmr.msra.gmra.mxu0 %vm14398_vm1, %v10057_v15  ;;  %8654 = vmatmul.mubr.msk.bf16.vlgmr.msra.gmra.mxu1 %vm14399_vm10, %v10057_v15  ;;  %v5092_v45 = vpop.permute.xlu0 %5091  ;;  %vm14403_vm1 = vmmov %vm14402_vm13 }
0x1390   : > { %5167 = vmatprep.mubr.bf16.mxu0 %v14103_v20  ;;  %5220 = vmatprep.mubr.bf16.mxu1 %v14103_v20  ;;  %vm14404_vm10 = vmmov %vm14403_vm1 }
0x1391   : > { %v5097_v31 = vpop.permute.xlu1 %5096 }
0x1397   : > { %8629 = vmatmul.mubr.msk.bf16.gmra.mxu0 %vm14400_vm4, %v10058_v47  ;;  %8655 = vmatmul.mubr.msk.bf16.gmra.mxu1 %vm14401_vm11, %v10058_v47  ;;  %vm14405_vm4 = vmmov %vm14403_vm1 }
0x1398   : > { %5303 = vmatprep.mubr.bf16.mxu0 %v14103_v20  ;;  %5356 = vmatprep.mubr.bf16.mxu1 %v14103_v20  ;;  %vm14406_vm11 = vmmov %vm14403_vm1 }
0x144f   : > { %v5159_v33 = vpop.f32.mrf.mxu0  ;;  %v5212_v11 = vpop.f32.mrf.mxu1 }
0x1450   : > { %v5160_v49 = vadd.f32 %v5159_v33, %v5092_v45 }
0x1451   : > { %v5161_v13 = vpop.f32.mrf.mxu0  ;;  %v5214_v0 = vpop.f32.mrf.mxu1 }
0x1452   : > { %v5162_v7 = vadd.f32 %v5161_v13, %v5092_v45  ;;  %v5215_v25 = vadd.f32 %v5214_v0, %v5092_v45 }
0x1453   : > { %v5163_v32 = vpop.f32.mrf.mxu0  ;;  %v5216_v42 = vpop.f32.mrf.mxu1 }
0x1454   : > { %v5164_v59 = vadd.f32 %v5163_v32, %v5097_v31  ;;  %v5217_v15 = vadd.f32 %v5216_v42, %v5097_v31  ;;  %v5234_v0 = vmax.f32 %v5215_v25, 0.0 }
0x1455   : > { %v5165_v6 = vpop.f32.mrf.mxu0  ;;  %v5218_v5 = vpop.f32.mrf.mxu1 }
0x1456   : > { %v5166_v14 = vadd.f32 %v5165_v6, %v5097_v31  ;;  %v5219_v21 = vadd.f32 %v5218_v5, %v5097_v31  ;;  %v5237_v32 = vmax.f32 %v5217_v15, 0.0 }
0x1457   : > { %v5169_v2 = vpop.f32.mrf.mxu0  ;;  %v5222_v12 = vpop.f32.mrf.mxu1 }
0x1458   : > { %v5170_v56 = vadd.f32 %v5169_v2, %v5102_v61  ;;  %v5223_v55 = vadd.f32 %v5222_v12, %v5102_v61  ;;  %v5236_v35 = vmax.f32 %v5166_v14, 0.0 }
0x1459   : > { %v5171_v36 = vpop.f32.mrf.mxu0  ;;  %v5224_v3 = vpop.f32.mrf.mxu1 }
0x145a   : > { %v5172_v34 = vadd.f32 %v5171_v36, %v5102_v61  ;;  %v5225_v53 = vadd.f32 %v5224_v3, %v5102_v61  ;;  %v5239_v46 = vmax.f32 %v5170_v56, 0.0  ;;  %v5213_v3 = vadd.f32 %v5212_v11, %v5092_v45  ;;  %v10059_v45 = vld [vmem:[%s13929_s13 + $0x30] sm:$0xff]  }
0x145b   : > { %v5173_v27 = vpop.f32.mrf.mxu0  ;;  %v5226_v58 = vpop.f32.mrf.mxu1  ;;  %v5241_v54 = vmax.f32 %v5223_v55, 0.0  ;;  %v5235_v61 = vmax.f32 %v5164_v59, 0.0 }
0x145c   : > { %v5174_v19 = vadd.f32 %v5173_v27, %v5107_v1  ;;  %v5227_v37 = vadd.f32 %v5226_v58, %v5107_v1  ;;  %v5240_v33 = vmax.f32 %v5172_v34, 0.0  ;;  %v5238_v27 = vmax.f32 %v5219_v21, 0.0  ;;  %v5411_v55 = vpop.permute.xlu1 %5410  ;;  %v5406_v59 = vpop.permute.xlu0 %5405 }
0x145d   : > { %v5175_v39 = vpop.f32.mrf.mxu0  ;;  %v5228_v40 = vpop.f32.mrf.mxu1  ;;  %v5242_v5 = vmax.f32 %v5225_v53, 0.0  ;;  %v5232_v58 = vmax.f32 %v5162_v7, 0.0  ;;  %v5233_v34 = vmax.f32 %v5213_v3, 0.0 }
0x145e   : > { %v5176_v29 = vadd.f32 %v5175_v39, %v5107_v1  ;;  %v5243_v47 = vmax.f32 %v5174_v19, 0.0  ;;  %v5229_v52 = vadd.f32 %v5228_v40, %v5107_v1  ;;  %v5245_v6 = vmax.f32 %v5227_v37, 0.0 }
0x145f   : > { %v5248_v42 = vpack.c.bf16 %v5236_v35, %v5232_v58  ;;  %v5231_v1 = vmax.f32 %v5160_v49, 0.0  ;;  %v5250_v14 = vpack.c.bf16 %v5238_v27, %v5234_v0  ;;  %v5249_v11 = vpack.c.bf16 %v5237_v32, %v5233_v34 }
0x1460   : > { %v5244_v36 = vmax.f32 %v5176_v29, 0.0  ;;  %v5246_v2 = vmax.f32 %v5229_v52, 0.0  ;;  %v5251_v12 = vpack.c.bf16 %v5243_v47, %v5239_v46  ;;  %v5253_v31 = vpack.c.bf16 %v5245_v6, %v5241_v54  ;;  %v10060_v54 = vld [vmem:[%s13929_s13 + $0x38] sm:$0xff]  }
0x1461   : > { %v5247_v52 = vpack.c.bf16 %v5235_v61, %v5231_v1 }
0x1462   : > { %v5252_v13 = vpack.c.bf16 %v5244_v36, %v5240_v33  ;;  %v5254_v39 = vpack.c.bf16 %v5246_v2, %v5242_v5 }
0x1464   : > { %5283 = vmatprep.subr.bf16.mxu0 %v5252_v13  ;;  %5336 = vmatprep.subr.bf16.mxu1 %v5254_v39 }
0x1465   : > { %5284 = vmatpush1.bf16.msra.mxu0 %v5251_v12  ;;  %5337 = vmatpush1.bf16.msra.mxu1 %v5253_v31 }
0x1466   : > { %5285 = vmatprep.subr.bf16.mxu0 %v5248_v42  ;;  %5338 = vmatprep.subr.bf16.mxu1 %v5250_v14 }
0x1469   : > { %5286 = vmatpush1.bf16.msra.mxu0 %v5247_v52  ;;  %5339 = vmatpush1.bf16.msra.mxu1 %v5249_v11 }
0x146c   : > { %8658 = vmatmul.mubr.msk.bf16.vlgmr.msra.gmra.mxu0 %vm14402_vm13, %v10059_v45  ;;  %8660 = vmatmul.mubr.msk.bf16.vlgmr.msra.gmra.mxu1 %vm14403_vm1, %v10059_v45  ;;  %vm14407_vm13 = vmmov %vm14403_vm1  ;;  %vm14409_vm1 = vcmask 130048  }
0x146d   : > { %5313 = vmatprep.mubr.bf16.mxu0 %v14103_v20  ;;  %5366 = vmatprep.mubr.bf16.mxu1 %v14103_v20 }
0x1474   : > { %8659 = vmatmul.mubr.msk.bf16.gmra.mxu0 %vm14404_vm10, %v10060_v54  ;;  %8661 = vmatmul.mubr.msk.bf16.gmra.mxu1 %vm14405_vm4, %v10060_v54  ;;  %vm14410_vm10 = vmmov %vm14409_vm1 }
0x1475   : > { %5487 = vmatprep.mubr.bf16.mxu0 %v14103_v20  ;;  %5530 = vmatprep.mubr.bf16.mxu1 %v14103_v20  ;;  %vm14411_vm4 = vmmov %vm14409_vm1 }
0x152c   : > { %v5305_v46 = vpop.f32.mrf.mxu0  ;;  %v5358_v35 = vpop.f32.mrf.mxu1 }
0x152d   : > { %v5377_v47 = vadd.f32 %v5305_v46, %v12513_v57 }
0x152e   : > { %v5307_v49 = vpop.f32.mrf.mxu0  ;;  %v5360_v19 = vpop.f32.mrf.mxu1 }
0x152f   : > { %v5378_v0 = vadd.f32 %v5307_v49, %v12521_v17  ;;  %v5380_v57 = vadd.f32 %v5360_v19, %v12536_v28  ;;  %v5396_v17 = vpop.permute.xlu0 %5395 }
0x1530   : > { %v5309_v21 = vpop.f32.mrf.mxu0  ;;  %v5362_v56 = vpop.f32.mrf.mxu1  ;;  %v5413_v49 = vadd.f32 %v5396_v17, %v5377_v47 }
0x1531   : > { %v5381_v12 = vadd.f32 %v5309_v21, %v12516_v24  ;;  %v5414_v14 = vadd.f32 %v5396_v17, %v5378_v0  ;;  %v5416_v24 = vadd.f32 %v5396_v17, %v5380_v57 }
0x1532   : > { %v5311_v53 = vpop.f32.mrf.mxu0  ;;  %v5364_v37 = vpop.f32.mrf.mxu1 }
0x1533   : > { %v5382_v33 = vadd.f32 %v5311_v53, %v12525_v38  ;;  %v5384_v5 = vadd.f32 %v5364_v37, %v12531_v30  ;;  %v5383_v30 = vadd.f32 %v5362_v56, %v12523_v60 }
0x1534   : > { %v5315_v7 = vpop.f32.mrf.mxu0  ;;  %v5368_v25 = vpop.f32.mrf.mxu1 }
0x1535   : > { %v5385_v2 = vadd.f32 %v5315_v7, %v12561_v62  ;;  %v5387_v38 = vadd.f32 %v5368_v25, %v12567_v22 }
0x1536   : > { %v5317_v29 = vpop.f32.mrf.mxu0  ;;  %v5370_v40 = vpop.f32.mrf.mxu1 }
0x1537   : > { %v5386_v6 = vadd.f32 %v5317_v29, %v12554_v9  ;;  %v5388_v3 = vadd.f32 %v5370_v40, %v12563_v48  ;;  %v5421_v28 = vadd.f32 %v5406_v59, %v5385_v2  ;;  %v5423_v34 = vadd.f32 %v5406_v59, %v5387_v38  ;;  %v14408_v2 = vld [vmem:[#allocation32_spill] sm:$0xff] }
0x1538   : > { %v5319_v15 = vpop.f32.mrf.mxu0  ;;  %v5372_v27 = vpop.f32.mrf.mxu1 }
0x1539   : > { %v5389_v36 = vadd.f32 %v5319_v15, %v12551_v44  ;;  %v5391_v58 = vadd.f32 %v5372_v27, %v12556_v51  ;;  %v5401_v44 = vpop.permute.xlu1 %5400  ;;  %v5422_v51 = vadd.f32 %v5406_v59, %v5386_v6  ;;  %v5424_v1 = vadd.f32 %v5406_v59, %v5388_v3  ;;  %v5445_v15 = vpop.permute.xlu0 %5444 }
0x153a   : > { %v5321_v13 = vpop.f32.mrf.mxu0  ;;  %v5374_v61 = vpop.f32.mrf.mxu1  ;;  %v5418_v39 = vadd.f32 %v5401_v44, %v5382_v33  ;;  %v5420_v31 = vadd.f32 %v5401_v44, %v5384_v5  ;;  %v5417_v11 = vadd.f32 %v5401_v44, %v5381_v12  ;;  %v5419_v54 = vadd.f32 %v5401_v44, %v5383_v30 }
0x153b   : > { %v5390_v9 = vadd.f32 %v5321_v13, %v12558_v16  ;;  %v5425_v62 = vadd.f32 %v5411_v55, %v5389_v36  ;;  %v5392_v48 = vadd.f32 %v5374_v61, %v12565_v18  ;;  %v5427_v32 = vadd.f32 %v5411_v55, %v5391_v58 }
0x153c   : > { %v5379_v16 = vadd.f32 %v5358_v35, %v12529_v41  ;;  %v5430_v46 = vpack.c.bf16 %v5418_v39, %v5414_v14  ;;  %v5432_v19 = vpack.c.bf16 %v5420_v31, %v5416_v24  ;;  %v5429_v56 = vpack.c.bf16 %v5417_v11, %v5413_v49  ;;  %v10061_v35 = vld [vmem:[%s13931_s15] sm:$0xff]  }
0x153d   : > { %v5426_v42 = vadd.f32 %v5411_v55, %v5390_v9  ;;  %v5428_v22 = vadd.f32 %v5411_v55, %v5392_v48  ;;  %v5433_v60 = vpack.c.bf16 %v5425_v62, %v5421_v28  ;;  %v5435_v18 = vpack.c.bf16 %v5427_v32, %v5423_v34  ;;  %v5440_v53 = vpop.permute.xlu1 %5439 }
0x153e   : > { %v5415_v21 = vadd.f32 %v5396_v17, %v5379_v16 }
0x153f   : > { %v5434_v52 = vpack.c.bf16 %v5426_v42, %v5422_v51  ;;  %v5436_v45 = vpack.c.bf16 %v5428_v22, %v5424_v1 }
0x1540   : > { %v5431_v41 = vpack.c.bf16 %v5419_v54, %v5415_v21 }
0x1541   : > { %5467 = vmatprep.subr.bf16.mxu0 %v5434_v52  ;;  %5510 = vmatprep.subr.bf16.mxu1 %v5436_v45 }
0x1542   : > { %5468 = vmatpush1.bf16.msra.mxu0 %v5433_v60  ;;  %5511 = vmatpush1.bf16.msra.mxu1 %v5435_v18 }
0x1543   : > { %5469 = vmatprep.subr.bf16.mxu0 %v5430_v46  ;;  %5512 = vmatprep.subr.bf16.mxu1 %v5432_v19 }
0x1546   : > { %5470 = vmatpush1.bf16.msra.mxu0 %v5429_v56  ;;  %5513 = vmatpush1.bf16.msra.mxu1 %v5431_v41 }
0x1549   : > { %8663 = vmatmul.mubr.msk.bf16.vlgmr.msra.gmra.mxu0 %vm14406_vm11, %v10061_v35  ;;  %8664 = vmatmul.mubr.msk.bf16.vlgmr.msra.gmra.mxu1 %vm14407_vm13, %v10061_v35  ;;  %vm14412_vm11 = vmmov %vm14409_vm1  ;;  %vm14413_vm13 = vcmp.lt.s32.totalorder %v10593_v23, 1 }
0x154a   : > { %5738 = vmatprep.mubr.bf16.mxu0 %v14103_v20  ;;  %5791 = vmatprep.mubr.bf16.mxu1 %v14103_v20 }
0x1609   : > { %v5489_v37 = vpop.f32.mrf.mxu0  ;;  %v5532_v25 = vpop.f32.mrf.mxu1 }
0x160a   : > { %v5490_v7 = vadd.f32 %v5489_v37, %v5440_v53  ;;  %v5533_v55 = vadd.f32 %v5532_v25, %v5440_v53 }
0x160b   : > { %v5491_v29 = vpop.f32.mrf.mxu0  ;;  %v5534_v59 = vpop.f32.mrf.mxu1 }
0x160c   : > { %8665 = vst [vmem:[%s11723_s20 + $0x40] sm:$0xff] %v5490_v7  ;;  %v12803_v40 = vadd.f32 %v5491_v29, %v5440_v53  ;;  %8667 = vst [vmem:[%s11723_s20 + $0x50] sm:$0xff] %v5533_v55  ;;  %v12806_v47 = vadd.f32 %v5534_v59, %v5440_v53 }
0x160d   : > { %v5493_v33 = vpop.f32.mrf.mxu0  ;;  %v5536_v36 = vpop.f32.mrf.mxu1 }
0x160e   : > { %8666 = vst [vmem:[%s11723_s20 + $0x48] sm:$0xff] %v12803_v40  ;;  %v5494_v6 = vadd.f32 %v5493_v33, %v5445_v15  ;;  %8668 = vst [vmem:[%s11723_s20 + $0x58] sm:$0xff] %v12806_v47  ;;  %v5537_v27 = vadd.f32 %v5536_v36, %v5445_v15 }
0x160f   : > { %v5495_v5 = vpop.f32.mrf.mxu0  ;;  %v5538_v13 = vpop.f32.mrf.mxu1 }
0x1610   : > { %8669 = vst [vmem:[%s11723_s20 + $0x60] sm:$0xff] %v5494_v6  ;;  %v5554_v3 = vadd.f32 %v5494_v6, %v14408_v2  ;;  %v5496_v58 = vadd.f32 %v5495_v5, %v5445_v15  ;;  %8671 = vst [vmem:[%s11723_s20 + $0x70] sm:$0xff] %v5537_v27  ;;  %v5556_v0 = vadd.f32 %v5537_v27, %v14408_v2 }
0x1611   : > { %v5539_v57 = vadd.f32 %v5538_v13, %v5445_v15 }
0x1612   : > { %v5558_v38 = vmax.f32 %v5490_v7, %v5554_v3  ;;  %8670 = vst [vmem:[%s11723_s20 + $0x68] sm:$0xff] %v5496_v58  ;;  %v5555_v9 = vadd.f32 %v5496_v58, %v14408_v2  ;;  %v5572_v61 = vmax.f32 %v5533_v55, %v5556_v0 }
0x1613   : > { %8672 = vst [vmem:[%s11723_s20 + $0x78] sm:$0xff] %v5539_v57  ;;  %v5557_v44 = vadd.f32 %v5539_v57, %v14408_v2 }
0x1614   : > { %v5559_v12 = vrot.slane %v5558_v38, 4  ;;  %v5565_v30 = vmax.f32 %v12803_v40, %v5555_v9  ;;  %v5573_v62 = vrot.slane %v5572_v61, 4 }
0x1615   : > { %v5579_v48 = vmax.f32 %v12806_v47, %v5557_v44 }
0x1616   : > { %v5560_v39 = vmax.f32 %v5558_v38, %v5559_v12  ;;  %v5566_v51 = vrot.slane %v5565_v30, 4  ;;  %v5574_v32 = vmax.f32 %v5572_v61, %v5573_v62 }
0x1617   : > { %v5580_v42 = vrot.slane %v5579_v48, 4 }
0x1618   : > { %v5561_v17 = vrot.slane %v5560_v39, 2  ;;  %v5567_v31 = vmax.f32 %v5565_v30, %v5566_v51  ;;  %v5575_v28 = vrot.slane %v5574_v32, 2 }
0x1619   : > { %v5581_v1 = vmax.f32 %v5579_v48, %v5580_v42 }
0x161a   : > { %v5562_v22 = vmax.f32 %v5560_v39, %v5561_v17  ;;  %v5568_v16 = vrot.slane %v5567_v31, 2  ;;  %v5576_v14 = vmax.f32 %v5574_v32, %v5575_v28 }
0x161b   : > { %v5582_v34 = vrot.slane %v5581_v1, 2 }
0x161c   : > { %v5563_v52 = vrot.slane %v5562_v22, 1  ;;  %v5569_v24 = vmax.f32 %v5567_v31, %v5568_v16  ;;  %v5577_v11 = vrot.slane %v5576_v14, 1 }
0x161d   : > { %v5583_v60 = vmax.f32 %v5581_v1, %v5582_v34 }
0x161e   : > { %v5564_v45 = vmax.f32 %v5562_v22, %v5563_v52  ;;  %v5570_v54 = vrot.slane %v5569_v24, 1  ;;  %v5578_v18 = vmax.f32 %v5576_v14, %v5577_v11 }
0x161f   : > { %v5584_v46 = vrot.slane %v5583_v60, 1 }
0x1620   : > { %v5586_v49 = vsub.f32 %v5490_v7, %v5564_v45  ;;  %v5590_v19 = vsub.f32 %v5554_v3, %v5564_v45  ;;  %v5571_v21 = vmax.f32 %v5569_v24, %v5570_v54  ;;  %v5588_v56 = vsub.f32 %v5533_v55, %v5578_v18 }
0x1621   : > { %v5592_v41 = vsub.f32 %v5556_v0, %v5578_v18  ;;  %v5585_v35 = vmax.f32 %v5583_v60, %v5584_v46 }
0x1622   : > { %v5594_v53 = vmul.f32 1.442695, %v5586_v49  ;;  %v5602_v37 = vmul.f32 1.442695, %v5590_v19  ;;  %v5587_v25 = vsub.f32 %v12803_v40, %v5571_v21  ;;  %v5591_v29 = vsub.f32 %v5555_v9, %v5571_v21 }
0x1623   : > { %v5598_v59 = vmul.f32 1.442695, %v5588_v56  ;;  %v5606_v15 = vmul.f32 1.442695, %v5592_v41  ;;  %v5589_v33 = vsub.f32 %v12806_v47, %v5585_v35  ;;  %v5593_v6 = vsub.f32 %v5557_v44, %v5585_v35 }
0x1624   : > { %10105 = vpow2.f32 %v5594_v53  ;;  %v5596_v36 = vmul.f32 1.442695, %v5587_v25  ;;  %v5604_v27 = vmul.f32 1.442695, %v5591_v29 }
0x1625   : > { %10107 = vpow2.f32 %v5602_v37  ;;  %v5600_v7 = vmul.f32 1.442695, %v5589_v33  ;;  %v5608_v55 = vmul.f32 1.442695, %v5593_v6 }
0x1626   : > { %10109 = vpow2.f32 %v5598_v59 }
0x1627   : > { %10111 = vpow2.f32 %v5606_v15 }
0x1628   : > { %10113 = vpow2.f32 %v5596_v36  ;;  %v10062_v36 = vld [vmem:[%s13925_s9 + $0x10] sm:$0xff]  }
0x1629   : > { %10115 = vpow2.f32 %v5604_v27 }
0x162a   : > { %10117 = vpow2.f32 %v5600_v7  ;;  %v10063_v7 = vld [vmem:[%s13925_s9 + $0x18] sm:$0xff]  }
0x162b   : > { %10119 = vpow2.f32 %v5608_v55  ;;  %v5683_v55 = vpop.permute.xlu0 %5682 }
0x1631   : > { %v10106_v5 = vpop.eup %10105 }
0x1632   : > { %v10108_v40 = vpop.eup %10107 }
0x1633   : > { %v10110_v2 = vpop.eup %10109  ;;  %v5610_v3 = vadd.f32 %v10108_v40, %v10106_v5 }
0x1634   : > { %v10112_v58 = vpop.eup %10111 }
0x1635   : > { %v10114_v13 = vpop.eup %10113  ;;  %v5611_v47 = vrot.slane %v5610_v3, 4  ;;  %v5624_v0 = vadd.f32 %v10112_v58, %v10110_v2 }
0x1636   : > { %v10116_v57 = vpop.eup %10115 }
0x1637   : > { %v10118_v38 = vpop.eup %10117  ;;  %v5612_v9 = vadd.f32 %v5611_v47, %v5610_v3  ;;  %v5625_v61 = vrot.slane %v5624_v0, 4  ;;  %v5617_v44 = vadd.f32 %v10116_v57, %v10114_v13 }
0x1638   : > { %v10120_v12 = vpop.eup %10119 }
0x1639   : > { %v5613_v30 = vrot.slane %v5612_v9, 2  ;;  %v5626_v62 = vadd.f32 %v5625_v61, %v5624_v0  ;;  %v5618_v48 = vrot.slane %v5617_v44, 4  ;;  %v5631_v39 = vadd.f32 %v10120_v12, %v10118_v38 }
0x163b   : > { %v5614_v51 = vadd.f32 %v5613_v30, %v5612_v9  ;;  %v5627_v32 = vrot.slane %v5626_v62, 2  ;;  %v5619_v42 = vadd.f32 %v5618_v48, %v5617_v44  ;;  %v5632_v17 = vrot.slane %v5631_v39, 4 }
0x163d   : > { %v5615_v31 = vrot.slane %v5614_v51, 1  ;;  %v5628_v28 = vadd.f32 %v5627_v32, %v5626_v62  ;;  %v5620_v1 = vrot.slane %v5619_v42, 2  ;;  %v5633_v22 = vadd.f32 %v5632_v17, %v5631_v39 }
0x163f   : > { %v5629_v16 = vrot.slane %v5628_v28, 1  ;;  %v5634_v14 = vrot.slane %v5633_v22, 2  ;;  %v5621_v34 = vadd.f32 %v5620_v1, %v5619_v42  ;;  %v5616_v52 = vadd.f32 %v5615_v31, %v5614_v51 }
0x1641   : > { %v5622_v24 = vrot.slane %v5621_v34, 1  ;;  %v5635_v11 = vadd.f32 %v5634_v14, %v5633_v22  ;;  %v5630_v60 = vadd.f32 %v5629_v16, %v5628_v28  ;;  %10121 = vrcp.f32 %v5616_v52 }
0x1643   : > { %v5623_v45 = vadd.f32 %v5622_v24, %v5621_v34  ;;  %v5636_v54 = vrot.slane %v5635_v11, 1  ;;  %10123 = vrcp.f32 %v5630_v60 }
0x1645   : > { %10125 = vrcp.f32 %v5623_v45  ;;  %v5637_v18 = vadd.f32 %v5636_v54, %v5635_v11 }
0x1647   : > { %10127 = vrcp.f32 %v5637_v18 }
0x164e   : > { %v10122_v46 = vpop.eup %10121 }
0x164f   : > { %v5642_v21 = vmul.f32 %v10122_v46, %v10106_v5  ;;  %v5646_v56 = vmul.f32 %v10122_v46, %v10108_v40  ;;  %v5688_v5 = vpop.permute.xlu1 %5687 }
0x1650   : > { %v10124_v49 = vpop.eup %10123 }
0x1651   : > { %v5644_v37 = vmul.f32 %v10124_v49, %v10110_v2  ;;  %v5648_v25 = vmul.f32 %v10124_v49, %v10112_v58  ;;  %v5666_v33 = vpack.c.bf16 %v5646_v56, %v5642_v21  ;;  %v5673_v58 = vpop.permute.xlu0 %5672 }
0x1652   : > { %v10126_v19 = vpop.eup %10125 }
0x1653   : > { %v5643_v41 = vmul.f32 %v10126_v19, %v10114_v13  ;;  %v5647_v35 = vmul.f32 %v10126_v19, %v10116_v57  ;;  %v5668_v27 = vpack.c.bf16 %v5648_v25, %v5644_v37  ;;  %v5678_v13 = vpop.permute.xlu1 %5677 }
0x1654   : > { %v10128_v53 = vpop.eup %10127 }
0x1655   : > { %v5667_v29 = vpack.c.bf16 %v5647_v35, %v5643_v41  ;;  %v5645_v59 = vmul.f32 %v10128_v53, %v10118_v38  ;;  %v5649_v15 = vmul.f32 %v10128_v53, %v10120_v12 }
0x1657   : > { %5720 = vmatprep.subr.bf16.mxu0 %v5667_v29  ;;  %v5669_v6 = vpack.c.bf16 %v5649_v15, %v5645_v59 }
0x1658   : > { %5721 = vmatpush1.bf16.msra.mxu0 %v5666_v33 }
0x1659   : > { %5773 = vmatprep.subr.bf16.mxu1 %v5669_v6 }
0x165a   : > { %5774 = vmatpush1.bf16.msra.mxu1 %v5668_v27  ;;  %v8698_v27 = vld [vmem:[%s13928_s12 + $0x98] sm:$0xff] }
0x165b   : > { %8687 = vmatmul.mubr.msk.bf16.vlgmr.msra.gmra.mxu0 %vm14409_vm1, %v10062_v36  ;;  %vm14414_vm1 = vmmov %vm14413_vm13 }
0x165c   : > { %5748 = vmatprep.mubr.bf16.mxu0 %v14103_v20  ;;  %vm14422_vm7 = vmmov %vm14414_vm1 }
0x165d   : > { %8689 = vmatmul.mubr.msk.bf16.vlgmr.msra.gmra.mxu1 %vm14410_vm10, %v10062_v36  ;;  %v8697_v36 = vld [vmem:[%s13928_s12 + $0x90] sm:$0xff]  ;;  %vm14415_vm10 = vmmov %vm14414_vm1 }
0x165e   : > { %5801 = vmatprep.mubr.bf16.mxu1 %v14103_v20 }
0x1663   : > { %8688 = vmatmul.mubr.msk.bf16.gmra.mxu0 %vm14411_vm4, %v10063_v7  ;;  %vm14416_vm4 = vmmov %vm14414_vm1 }
0x1664   : > { %6052 = vmatprep.mubr.bf16.mxu0 %v14103_v20 }
0x1665   : > { %8690 = vmatmul.mubr.msk.bf16.gmra.mxu1 %vm14412_vm11, %v10063_v7  ;;  %v8695_v7 = vld [vmem:[%s13928_s12 + $0x80] sm:$0xff]  ;;  %vm14417_vm11 = vmmov %vm14414_vm1 }
0x1666   : > { %6105 = vmatprep.mubr.bf16.mxu1 %v14103_v20 }
0x171b   : > { %v5740_v40 = vpop.f32.mrf.mxu0 }
0x171c   : > { %v12838_v57 = vadd.f32 %v5740_v40, %v5673_v58  ;;  %v8706_v40 = vld [vmem:[%s13930_s14 + $0x98] sm:$0xff] }
0x171d   : > { %v5793_v2 = vpop.f32.mrf.mxu1  ;;  %v5742_v3 = vpop.f32.mrf.mxu0 }
0x171e   : > { %v12842_v44 = vadd.f32 %v5742_v3, %v5673_v58  ;;  %v12850_v51 = vadd.f32 %v5793_v2, %v5673_v58  ;;  %v8703_v2 = vld [vmem:[%s13930_s14 + $0x80] sm:$0xff]  ;;  %v8704_v3 = vld [vmem:[%s13930_s14 + $0x88] sm:$0xff] }
0x171f   : > { %v5795_v47 = vpop.f32.mrf.mxu1  ;;  %v5744_v0 = vpop.f32.mrf.mxu0 }
0x1720   : > { %v12840_v38 = vadd.f32 %v5744_v0, %v5678_v13  ;;  %v12857_v28 = vadd.f32 %v5795_v47, %v5673_v58 }
0x1721   : > { %v5797_v9 = vpop.f32.mrf.mxu1  ;;  %v5746_v61 = vpop.f32.mrf.mxu0 }
0x1722   : > { %v12844_v12 = vadd.f32 %v5797_v9, %v5678_v13  ;;  %v12846_v30 = vadd.f32 %v5746_v61, %v5678_v13  ;;  %v9704_v62 = vpack.i.bf16 %v12840_v38, %v12838_v57  ;;  %v5976_v59 = vpack.c.bf16 %v12840_v38, %v12838_v57 }
0x1723   : > { %v5799_v48 = vpop.f32.mrf.mxu1  ;;  %v5750_v39 = vpop.f32.mrf.mxu0 }
0x1724   : > { %v12852_v32 = vadd.f32 %v5799_v48, %v5678_v13  ;;  %9705 = vrot.lane.b32.xlu0 %v9704_v62, %s14231_s25  ;;  %v9719_v42 = vpack.i.bf16 %v12846_v30, %v12842_v44  ;;  %v9709_v1 = vpack.i.bf16 %v12844_v12, %v12850_v51  ;;  %v12872_v45 = vadd.f32 %v5750_v39, %v5683_v55 }
0x1725   : > { %v5803_v17 = vpop.f32.mrf.mxu1  ;;  %v5752_v31 = vpop.f32.mrf.mxu0  ;;  %v5977_v35 = vpack.c.bf16 %v12846_v30, %v12842_v44  ;;  %v5978_v15 = vpack.c.bf16 %v12844_v12, %v12850_v51 }
0x1726   : > { %9720 = vrot.lane.b32.xlu1 %v9719_v42, %s14231_s25  ;;  %v9724_v14 = vpack.i.bf16 %v12852_v32, %v12857_v28  ;;  %v12867_v11 = vadd.f32 %v5752_v31, %v5683_v55  ;;  %v12883_v21 = vadd.f32 %v5803_v17, %v5683_v55  ;;  %v5979_v25 = vpack.c.bf16 %v12852_v32, %v12857_v28 }
0x1727   : > { %v5805_v22 = vpop.f32.mrf.mxu1  ;;  %v5754_v16 = vpop.f32.mrf.mxu0 }
0x1728   : > { %9710 = vrot.lane.b32.xlu0 %v9709_v1, %s14231_s25  ;;  %v12865_v34 = vadd.f32 %v5754_v16, %v5688_v5  ;;  %v12876_v46 = vadd.f32 %v5805_v22, %v5683_v55  ;;  %v8696_v55 = vld [vmem:[%s13928_s12 + $0x88] sm:$0xff] }
0x1729   : > { %v5807_v52 = vpop.f32.mrf.mxu1  ;;  %v5756_v24 = vpop.f32.mrf.mxu0 }
0x172a   : > { %v12869_v60 = vadd.f32 %v5756_v24, %v5688_v5  ;;  %9725 = vrot.lane.b32.xlu1 %v9724_v14, %s14231_s25  ;;  %v12874_v54 = vadd.f32 %v5807_v52, %v5688_v5  ;;  %v5980_v56 = vpack.c.bf16 %v12865_v34, %v12872_v45  ;;  %v9734_v37 = vpack.i.bf16 %v12865_v34, %v12872_v45 }
0x172b   : > { %v5809_v18 = vpop.f32.mrf.mxu1 }
0x172c   : > { %v12878_v49 = vadd.f32 %v5809_v18, %v5688_v5  ;;  %9715 = vrot.lane.b32.xlu0 %v9704_v62, %s14104_s23  ;;  %v5981_v19 = vpack.c.bf16 %v12869_v60, %v12867_v11  ;;  %v5982_v53 = vpack.c.bf16 %v12874_v54, %v12883_v21  ;;  %v9759_v29 = vpack.i.bf16 %v12869_v60, %v12867_v11  ;;  %v8705_v5 = vld [vmem:[%s13930_s14 + $0x90] sm:$0xff] }
0x172d   : > { %v9739_v33 = vpack.i.bf16 %v12874_v54, %v12883_v21 }
0x172e   : > { %6024 = vmatprep.subr.bf16.mxu0 %v5981_v19  ;;  %9730 = vrot.lane.b32.xlu1 %v9719_v42, %s14104_s23  ;;  %v5983_v41 = vpack.c.bf16 %v12878_v49, %v12876_v46  ;;  %v9764_v6 = vpack.i.bf16 %v12878_v49, %v12876_v46 }
0x172f   : > { %6025 = vmatpush1.bf16.msra.mxu0 %v5980_v56 }
0x1730   : > { %6077 = vmatprep.subr.bf16.mxu1 %v5983_v41  ;;  %6026 = vmatprep.subr.bf16.mxu0 %v5977_v35 }
0x1731   : > { %6078 = vmatpush1.bf16.msra.mxu1 %v5982_v53  ;;  %9735 = vrot.lane.b32.xlu0 %v9734_v37, %s14231_s25 }
0x1732   : > { %6079 = vmatprep.subr.bf16.mxu1 %v5979_v25  ;;  %9760 = vrot.lane.b32.xlu1 %v9759_v29, %s14231_s25 }
0x1733   : > { %6027 = vmatpush1.bf16.msra.mxu0 %v5976_v59 }
0x1735   : > { %6080 = vmatpush1.bf16.msra.mxu1 %v5978_v15  ;;  %9740 = vrot.lane.b32.xlu0 %v9739_v33, %s14231_s25 }
0x1736   : > { %9765 = vrot.lane.b32.xlu1 %v9764_v6, %s14231_s25  ;;  %s13867_s25 = scalar_lea.hbm %s13933_s17, %s9011_s3 }
0x1739   : > { %9745 = vrot.lane.b32.xlu0 %v9734_v37, %s14104_s23 }
0x173a   : > { %9770 = vrot.lane.b32.xlu1 %v9759_v29, %s14104_s23 }
0x173d   : > { %9750 = vrot.lane.b32.xlu0 %v9739_v33, %s14104_s23 }
0x173e   : > { %9775 = vrot.lane.b32.xlu1 %v9764_v6, %s14104_s23 }
0x1741   : > { %9755 = vrot.lane.b32.xlu0 %v9709_v1, %s14104_s23 }
0x1742   : > { %9780 = vrot.lane.b32.xlu1 %v9724_v14, %s14104_s23 }
0x1745   : > { %5996 = vperm.xlu0 %9062, %v8697_v36  }
0x1746   : > { %6001 = vperm.xlu1 %9063, %v8698_v27  }
0x1749   : > { %5986 = vperm.xlu0 %9062, %v8695_v7  }
0x174a   : > { %5991 = vperm.xlu1 %9063, %v8696_v55  }
0x174d   : > { %6300 = vperm.xlu0 %9062, %v8705_v5  }
0x174e   : > { %6305 = vperm.xlu1 %9063, %v8706_v40  }
0x1751   : > { %6290 = vperm.xlu0 %9062, %v8703_v2  }
0x1752   : > { %6295 = vperm.xlu1 %9063, %v8704_v3  }
0x1796   : > { %v9706_v58 = vpop.permute.xlu0 %9705 }
0x1797   : > { %v9708_v42 = vunpack.i.h.bf16 %v9706_v58  ;;  %v9707_v17 = vunpack.i.l.bf16 %v9706_v58 }
0x1798   : > { %v9721_v13 = vpop.permute.xlu1 %9720 }
0x1799   : > { %v9723_v62 = vunpack.i.h.bf16 %v9721_v13  ;;  %v9722_v48 = vunpack.i.l.bf16 %v9721_v13 }
0x179a   : > { %v9711_v47 = vpop.permute.xlu0 %9710 }
0x179b   : > { %v9713_v31 = vunpack.i.h.bf16 %v9711_v47  ;;  %v5936_v24 = vsel %vm14413_vm13, %v9707_v17, %v9722_v48  ;;  %v5937_v18 = vsel %vm14414_vm1, %v9708_v42, %v9723_v62  ;;  %v9712_v37 = vunpack.i.l.bf16 %v9711_v47  ;;  %vm14418_vm13 = vmmov %vm14414_vm1 }
0x179c   : > { %v9726_v0 = vpop.permute.xlu1 %9725  ;;  %v8716_v33 = vpack.c.bf16 %v5937_v18, %v5936_v24 }
0x179d   : > { %v9728_v19 = vunpack.i.h.bf16 %v9726_v0  ;;  %v9727_v56 = vunpack.i.l.bf16 %v9726_v0  ;;  %v5933_v6 = vsel %vm14417_vm11, %v9723_v62, %v9713_v31  ;;  %vm14423_vm11 = vmmov %vm14414_vm1 }
0x179e   : > { %v12942_v9 = vpop.permute.xlu0 %9715 }
0x179f   : > { %v5928_v7 = vsel %vm14418_vm13, %v9712_v37, %v9727_v56  ;;  %v5929_v55 = vsel %vm14414_vm1, %v9713_v31, %v9728_v19  ;;  %v5940_v3 = vsel %vm14422_vm7, %v9727_v56, %v9707_v17  ;;  %vm14424_vm13 = vmmov %vm14414_vm1 }
0x17a0   : > { %v12944_v61 = vpop.permute.xlu1 %9730  ;;  %vm14426_vm7 = vmmov %vm14414_vm1 }
0x17a1   : > { %v5941_v56 = vsel %vm14426_vm7, %v9728_v19, %v9708_v42  ;;  %v14432_v19 = vld [vmem:[#allocation13_spill] sm:$0xff] }
0x17a3   : > { %v9736_v39 = vpop.permute.xlu0 %9735 }
0x17a4   : > { %v9761_v1 = vpop.permute.xlu1 %9760  ;;  %v9738_v22 = vunpack.i.h.bf16 %v9736_v39  ;;  %v9737_v16 = vunpack.i.l.bf16 %v9736_v39 }
0x17a5   : > { %v9763_v14 = vunpack.i.h.bf16 %v9761_v1  ;;  %v9762_v52 = vunpack.i.l.bf16 %v9761_v1 }
0x17a7   : > { %v5938_v41 = vsel %vm14415_vm10, %v9737_v16, %v9762_v52  ;;  %v5939_v35 = vsel %vm14416_vm4, %v9738_v22, %v9763_v14  ;;  %v9741_v53 = vpop.permute.xlu0 %9740  ;;  %vm14419_vm10 = vmmov %vm14414_vm1 }
0x17a8   : > { %v8710_v25 = vpack.c.bf16 %v5939_v35, %v5938_v41  ;;  %v9743_v29 = vunpack.i.h.bf16 %v9741_v53  ;;  %v9742_v59 = vunpack.i.l.bf16 %v9741_v53  ;;  %v9766_v15 = vpop.permute.xlu1 %9765  ;;  %vm14420_vm4 = vmmov %vm14414_vm1  ;;  %v8742_v41 = vpack.c.bf16 %v5929_v55, %v5928_v7  ;;  %v14427_v53 = vld [vmem:[#allocation14_spill] sm:$0xff] }
0x17a9   : > { %v9768_v36 = vunpack.i.h.bf16 %v9766_v15  ;;  %v9767_v27 = vunpack.i.l.bf16 %v9766_v15  ;;  %v9733_v35 = vunpack.i.h.bf16 %v12944_v61  ;;  %v14434_v15 = vld [vmem:[#allocation15_spill] sm:$0xff]  ;;  %v8719_v7 = vpack.c.bf16 %v5941_v56, %v5940_v3 }
0x17aa   : > { %v5935_v5 = vsel %vm14419_vm10, %v9763_v14, %v9743_v29  ;;  %v5934_v40 = vsel %vm14420_vm4, %v9762_v52, %v9742_v59  ;;  %8711 = vmatprep.subr.msk.bf16.mxu0 %vm10637_vm6, %v8710_v25  ;;  %vm14425_vm10 = vmmov %vm14414_vm1  ;;  %vm14428_vm4 = vnez %v14427_v53  ;;  %v9718_v25 = vunpack.i.h.bf16 %v12942_v9 }
0x17ab   : > { %v5930_v58 = vsel %vm14423_vm11, %v9742_v59, %v9767_v27  ;;  %v5931_v13 = vsel %vm14424_vm13, %v9743_v29, %v9768_v36  ;;  %v5942_v47 = vsel %vm14414_vm1, %v9767_v27, %v9737_v16  ;;  %v9746_v0 = vpop.permute.xlu0 %9745  ;;  %v8739_v62 = vpack.c.bf16 %v5935_v5, %v5934_v40  ;;  %vm14429_vm11 = vmmov %vm14414_vm1 }
0x17ac   : > { %v5943_v39 = vsel %vm14425_vm10, %v9768_v36, %v9738_v22  ;;  %v8736_v31 = vpack.c.bf16 %v5931_v13, %v5930_v58  ;;  %v9748_v1 = vunpack.i.h.bf16 %v9746_v0  ;;  %v9771_v14 = vpop.permute.xlu1 %9770  ;;  %v9747_v24 = vunpack.i.l.bf16 %v9746_v0 }
0x17ad   : > { %v8713_v52 = vpack.c.bf16 %v5943_v39, %v5942_v47  ;;  %v9773_v17 = vunpack.i.h.bf16 %v9771_v14  ;;  %v9772_v18 = vunpack.i.l.bf16 %v9771_v14  ;;  %v9732_v16 = vunpack.i.l.bf16 %v12944_v61  ;;  %v14443_v14 = vld [vmem:[#allocation16_spill] sm:$0xff] }
0x17ae   : > { %8737 = vmatprep.subr.msk.bf16.mxu1 %vm14428_vm4, %v8736_v31  ;;  %v5932_v22 = vsel %vm14429_vm11, %v9722_v48, %v9712_v37  ;;  %vm14430_vm13 = vcmp.lt.s32.totalorder %v10593_v23, 2  ;;  %vm14433_vm10 = vnez %v14432_v19  ;;  %vm14435_vm7 = vnez %v14434_v15  ;;  %v14451_v19 = vld [vmem:[#allocation18_spill] sm:$0xff] }
0x17af   : > { %v5874_v29 = vsel %vm14430_vm13, %v9747_v24, %v9772_v18  ;;  %vm14431_vm1 = vmmov %vm14430_vm13  ;;  %v9751_v42 = vpop.permute.xlu0 %9750  ;;  %8714 = vmatpush1.bf16.msk.msra.mxu0 %vm14433_vm10, %v8713_v52  ;;  %8740 = vmatpush1.bf16.msk.msra.mxu1 %vm14435_vm7, %v8739_v62  ;;  %v9717_v61 = vunpack.i.l.bf16 %v12942_v9  ;;  %v8745_v40 = vpack.c.bf16 %v5933_v6, %v5932_v22  ;;  %v14446_v22 = vld [vmem:[#allocation17_spill] sm:$0xff] }
0x17b0   : > { %v5875_v59 = vsel %vm14431_vm1, %v9748_v1, %v9773_v17  ;;  %v9753_v27 = vunpack.i.h.bf16 %v9751_v42  ;;  %v9752_v48 = vunpack.i.l.bf16 %v9751_v42  ;;  %8717 = vmatprep.subr.msk.bf16.mxu0 %vm10637_vm6, %v8716_v33  ;;  %v9776_v37 = vpop.permute.xlu1 %9775  ;;  %8743 = vmatprep.subr.msk.bf16.mxu1 %vm14428_vm4, %v8742_v41  ;;  %vm14436_vm11 = vmmov %vm14431_vm1 }
0x17b1   : > { %v8722_v36 = vpack.c.bf16 %v5875_v59, %v5874_v29  ;;  %v9778_v55 = vunpack.i.h.bf16 %v9776_v37  ;;  %v9777_v5 = vunpack.i.l.bf16 %v9776_v37  ;;  %v5872_v58 = vsel %vm14436_vm11, %v9717_v61, %v9732_v16  ;;  %vm14437_vm13 = vmmov %vm14431_vm1 }
0x17b2   : > { %v5873_v9 = vsel %vm14437_vm13, %v9718_v25, %v9733_v35  ;;  %v5871_v13 = vsel %vm14431_vm1, %v9773_v17, %v9753_v27  ;;  %vm14438_vm2 = vmmov %vm14431_vm1 }
0x17b3   : > { %v5870_v33 = vsel %vm14438_vm2, %v9772_v18, %v9752_v48  ;;  %vm14439_vm6 = vmmov %vm14431_vm1  ;;  %v9756_v47 = vpop.permute.xlu0 %9755  ;;  %8720 = vmatpush1.bf16.msk.msra.mxu0 %vm14433_vm10, %v8719_v7  ;;  %vm14444_vm2 = vnez %v14443_v14  ;;  %8746 = vmatpush1.bf16.msk.msra.mxu1 %vm14435_vm7, %v8745_v40  ;;  %v8728_v56 = vpack.c.bf16 %v5873_v9, %v5872_v58  ;;  %vm14447_vm10 = vnez %v14446_v22 }
0x17b4   : > { %v5866_v2 = vsel %vm14439_vm6, %v9752_v48, %v9777_v5  ;;  %vm14440_vm4 = vmmov %vm14431_vm1  ;;  %v9758_v39 = vunpack.i.h.bf16 %v9756_v47  ;;  %v9757_v31 = vunpack.i.l.bf16 %v9756_v47  ;;  %8723 = vmatprep.subr.msk.bf16.mxu0 %vm14444_vm2, %v8722_v36  ;;  %v9781_v52 = vpop.permute.xlu1 %9780  ;;  %v8751_v41 = vpack.c.bf16 %v5871_v13, %v5870_v33 }
0x17b5   : > { %v5867_v3 = vsel %vm14440_vm4, %v9753_v27, %v9778_v55  ;;  %vm14441_vm15 = vmmov %vm14431_vm1  ;;  %v9783_v18 = vunpack.i.h.bf16 %v9781_v52  ;;  %vm14452_vm4 = vnez %v14451_v19 }
0x17b6   : > { %v5878_v6 = vsel %vm14441_vm15, %v9777_v5, %v9747_v24  ;;  %vm14442_vm11 = vmmov %vm14431_vm1  ;;  %v8748_v62 = vpack.c.bf16 %v5867_v3, %v5866_v2  ;;  %v9782_v24 = vunpack.i.l.bf16 %v9781_v52 }
0x17b7   : > { %v5879_v0 = vsel %vm14442_vm11, %v9778_v55, %v9748_v1  ;;  %vm14445_vm15 = vmmov %vm14431_vm1 }
0x17b8   : > { %v8725_v17 = vpack.c.bf16 %v5879_v0, %v5878_v6  ;;  %v5869_v53 = vsel %vm14445_vm15, %v9733_v35, %v9758_v39  ;;  %8749 = vmatprep.subr.msk.bf16.mxu1 %vm14447_vm10, %v8748_v62  ;;  %vm14448_vm13 = vmmov %vm14431_vm1  ;;  %v5864_v29 = vsel %vm14431_vm1, %v9757_v31, %v9782_v24 }
0x17b9   : > { %v5868_v1 = vsel %vm14448_vm13, %v9732_v16, %v9757_v31  ;;  %vm14449_vm7 = vmmov %vm14431_vm1  ;;  %v14454_v16 = vld [vmem:[#allocation19_spill] sm:$0xff]  ;;  %vm14456_vm13 = vcmask 785408  }
0x17ba   : > { %v5865_v59 = vsel %vm14449_vm7, %v9758_v39, %v9783_v18  ;;  %vm14450_vm6 = vmmov %vm14431_vm1  ;;  %8726 = vmatpush1.bf16.msk.msra.mxu0 %vm14452_vm4, %v8725_v17  ;;  %vm14455_vm15 = vnez %v14454_v16  ;;  %v8757_v27 = vpack.c.bf16 %v5869_v53, %v5868_v1 }
0x17bb   : > { %v5876_v42 = vsel %vm14450_vm6, %v9782_v24, %v9717_v61  ;;  %vm14453_vm11 = vmmov %vm14431_vm1  ;;  %v8754_v15 = vpack.c.bf16 %v5865_v59, %v5864_v29  ;;  %8729 = vmatprep.subr.msk.bf16.mxu0 %vm14444_vm2, %v8728_v56  ;;  %8752 = vmatpush1.bf16.msk.msra.mxu1 %vm14455_vm15, %v8751_v41  ;;  %v10064_v61 = vld [vmem:[%s13927_s11 + $0x40] sm:$0xff]  }
0x17bc   : > { %v5877_v35 = vsel %vm14453_vm11, %v9783_v18, %v9718_v25  ;;  %vm14457_vm1 = vmmov %vm14456_vm13  ;;  %v10065_v25 = vld [vmem:[%s13927_s11 + $0x48] sm:$0xff]   ;;  %vm14460_vm11 = vcmask 261120  }
0x17bd   : > { %v8731_v36 = vpack.c.bf16 %v5877_v35, %v5876_v42  ;;  %8755 = vmatprep.subr.msk.bf16.mxu1 %vm14447_vm10, %v8754_v15  ;;  %vm14458_vm7 = vmmov %vm14457_vm1 }
0x17be   : > { %vm14459_vm6 = vmmov %vm14457_vm1 }
0x17bf   : > { %8732 = vmatpush1.bf16.msk.msra.mxu0 %vm14452_vm4, %v8731_v36  ;;  %8758 = vmatpush1.bf16.msk.msra.mxu1 %vm14455_vm15, %v8757_v27 }
0x17c0   : > { %v5997_v40 = vpop.permute.xlu0 %5996 }
0x17c1   : > { %v6002_v9 = vpop.permute.xlu1 %6001 }
0x17c2   : > { %8733 = vmatmul.mubr.msk.bf16.vlgmr.msra.gmra.mxu0 %vm14456_vm13, %v10064_v61  ;;  %8759 = vmatmul.mubr.msk.bf16.vlgmr.msra.gmra.mxu1 %vm14457_vm1, %v10064_v61  ;;  %vm14461_vm13 = vmmov %vm14460_vm11 }
0x17c3   : > { %6062 = vmatprep.mubr.bf16.mxu0 %v14103_v20  ;;  %6115 = vmatprep.mubr.bf16.mxu1 %v14103_v20  ;;  %vm14462_vm1 = vmmov %vm14460_vm11 }
0x17c4   : > { %v5987_v47 = vpop.permute.xlu0 %5986 }
0x17c5   : > { %v5992_v62 = vpop.permute.xlu1 %5991 }
0x17ca   : > { %8734 = vmatmul.mubr.msk.bf16.gmra.mxu0 %vm14458_vm7, %v10065_v25  ;;  %8760 = vmatmul.mubr.msk.bf16.gmra.mxu1 %vm14459_vm6, %v10065_v25  ;;  %vm14463_vm7 = vmmov %vm14462_vm1  ;;  %vm14464_vm6 = vcmp.lt.s32.totalorder %v10593_v23, 2 }
0x17cb   : > { %6198 = vmatprep.mubr.bf16.mxu0 %v14103_v20  ;;  %6251 = vmatprep.mubr.bf16.mxu1 %v14103_v20 }
0x1882   : > { %v6054_v48 = vpop.f32.mrf.mxu0  ;;  %v6107_v37 = vpop.f32.mrf.mxu1 }
0x1883   : > { %v6055_v31 = vadd.f32 %v6054_v48, %v5987_v47 }
0x1884   : > { %v6056_v7 = vpop.f32.mrf.mxu0  ;;  %v6109_v55 = vpop.f32.mrf.mxu1 }
0x1885   : > { %v6057_v59 = vadd.f32 %v6056_v7, %v5987_v47  ;;  %v6110_v42 = vadd.f32 %v6109_v55, %v5987_v47 }
0x1886   : > { %v6058_v5 = vpop.f32.mrf.mxu0  ;;  %v6111_v58 = vpop.f32.mrf.mxu1 }
0x1887   : > { %v6059_v27 = vadd.f32 %v6058_v5, %v5992_v62  ;;  %v6112_v61 = vadd.f32 %v6111_v58, %v5992_v62  ;;  %v6129_v55 = vmax.f32 %v6110_v42, 0.0 }
0x1888   : > { %v6060_v13 = vpop.f32.mrf.mxu0  ;;  %v6113_v33 = vpop.f32.mrf.mxu1 }
0x1889   : > { %v6061_v52 = vadd.f32 %v6060_v13, %v5992_v62  ;;  %v6114_v56 = vadd.f32 %v6113_v33, %v5992_v62  ;;  %v6132_v5 = vmax.f32 %v6112_v61, 0.0 }
0x188a   : > { %v6064_v2 = vpop.f32.mrf.mxu0  ;;  %v6117_v3 = vpop.f32.mrf.mxu1 }
0x188b   : > { %v6065_v41 = vadd.f32 %v6064_v2, %v5997_v40  ;;  %v6118_v35 = vadd.f32 %v6117_v3, %v5997_v40  ;;  %v6131_v50 = vmax.f32 %v6061_v52, 0.0 }
0x188c   : > { %v6066_v6 = vpop.f32.mrf.mxu0  ;;  %v6119_v0 = vpop.f32.mrf.mxu1 }
0x188d   : > { %v6067_v17 = vadd.f32 %v6066_v6, %v5997_v40  ;;  %v6120_v53 = vadd.f32 %v6119_v0, %v5997_v40  ;;  %v6134_v4 = vmax.f32 %v6065_v41, 0.0  ;;  %v6108_v0 = vadd.f32 %v6107_v37, %v5987_v47  ;;  %v10066_v47 = vld [vmem:[%s13929_s13 + $0x40] sm:$0xff]  }
0x188e   : > { %v6068_v39 = vpop.f32.mrf.mxu0  ;;  %v6121_v24 = vpop.f32.mrf.mxu1  ;;  %v6136_v8 = vmax.f32 %v6118_v35, 0.0  ;;  %v6130_v40 = vmax.f32 %v6059_v27, 0.0 }
0x188f   : > { %v6069_v18 = vadd.f32 %v6068_v39, %v6002_v9  ;;  %v6122_v1 = vadd.f32 %v6121_v24, %v6002_v9  ;;  %v6135_v48 = vmax.f32 %v6067_v17, 0.0  ;;  %v6133_v39 = vmax.f32 %v6114_v56, 0.0 }
0x1890   : > { %v6070_v29 = vpop.f32.mrf.mxu0  ;;  %v6123_v36 = vpop.f32.mrf.mxu1  ;;  %v6137_v33 = vmax.f32 %v6120_v53, 0.0  ;;  %v6127_v24 = vmax.f32 %v6057_v59, 0.0  ;;  %v6128_v17 = vmax.f32 %v6108_v0, 0.0 }
0x1891   : > { %v6071_v15 = vadd.f32 %v6070_v29, %v6002_v9  ;;  %v6138_v25 = vmax.f32 %v6069_v18, 0.0  ;;  %v6124_v26 = vadd.f32 %v6123_v36, %v6002_v9  ;;  %v6140_v13 = vmax.f32 %v6122_v1, 0.0 }
0x1892   : > { %v6143_v58 = vpack.c.bf16 %v6131_v50, %v6127_v24  ;;  %v6126_v9 = vmax.f32 %v6055_v31, 0.0  ;;  %v6145_v52 = vpack.c.bf16 %v6133_v39, %v6129_v55  ;;  %v6144_v37 = vpack.c.bf16 %v6132_v5, %v6128_v17  ;;  %v6301_v50 = vpop.permute.xlu0 %6300 }
0x1893   : > { %v6139_v6 = vmax.f32 %v6071_v15, 0.0  ;;  %v6141_v2 = vmax.f32 %v6124_v26, 0.0  ;;  %v6146_v3 = vpack.c.bf16 %v6138_v25, %v6134_v4  ;;  %v6148_v62 = vpack.c.bf16 %v6140_v13, %v6136_v8  ;;  %v10067_v8 = vld [vmem:[%s13929_s13 + $0x48] sm:$0xff]   ;;  %v6306_v4 = vpop.permute.xlu1 %6305 }
0x1894   : > { %v6142_v26 = vpack.c.bf16 %v6130_v40, %v6126_v9 }
0x1895   : > { %v6147_v7 = vpack.c.bf16 %v6139_v6, %v6135_v48  ;;  %v6149_v29 = vpack.c.bf16 %v6141_v2, %v6137_v33 }
0x1896   : > { %v6291_v59 = vpop.permute.xlu0 %6290 }
0x1897   : > { %6178 = vmatprep.subr.bf16.mxu0 %v6147_v7  ;;  %6231 = vmatprep.subr.bf16.mxu1 %v6149_v29  ;;  %v6296_v36 = vpop.permute.xlu1 %6295 }
0x1898   : > { %6179 = vmatpush1.bf16.msra.mxu0 %v6146_v3  ;;  %6232 = vmatpush1.bf16.msra.mxu1 %v6148_v62 }
0x1899   : > { %6180 = vmatprep.subr.bf16.mxu0 %v6143_v58  ;;  %6233 = vmatprep.subr.bf16.mxu1 %v6145_v52 }
0x189c   : > { %6181 = vmatpush1.bf16.msra.mxu0 %v6142_v26  ;;  %6234 = vmatpush1.bf16.msra.mxu1 %v6144_v37 }
0x189f   : > { %8763 = vmatmul.mubr.msk.bf16.vlgmr.msra.gmra.mxu0 %vm14460_vm11, %v10066_v47  ;;  %8765 = vmatmul.mubr.msk.bf16.vlgmr.msra.gmra.mxu1 %vm14461_vm13, %v10066_v47  ;;  %vm14465_vm11 = vmmov %vm14464_vm6 }
0x18a0   : > { %6208 = vmatprep.mubr.bf16.mxu0 %v14103_v20  ;;  %6261 = vmatprep.mubr.bf16.mxu1 %v14103_v20  ;;  %vm14466_vm13 = vmmov %vm14464_vm6 }
0x18a7   : > { %8764 = vmatmul.mubr.msk.bf16.gmra.mxu0 %vm14462_vm1, %v10067_v8  ;;  %8766 = vmatmul.mubr.msk.bf16.gmra.mxu1 %vm14463_vm7, %v10067_v8  ;;  %vm14467_vm1 = vmmov %vm14464_vm6 }
0x18a8   : > { %6564 = vmatprep.mubr.bf16.mxu0 %v14103_v20  ;;  %6617 = vmatprep.mubr.bf16.mxu1 %v14103_v20  ;;  %vm14468_vm7 = vmmov %vm14467_vm1 }
0x18a9   : > { %vm14472_vm8 = vmmov %vm14467_vm1 }
0x195f   : > { %v6200_v31 = vpop.f32.mrf.mxu0  ;;  %v6253_v18 = vpop.f32.mrf.mxu1 }
0x1960   : > { %v6272_v41 = vadd.f32 %v6200_v31, %v12838_v57  ;;  %v6274_v48 = vadd.f32 %v6253_v18, %v12850_v51 }
0x1961   : > { %v6202_v56 = vpop.f32.mrf.mxu0  ;;  %v6255_v53 = vpop.f32.mrf.mxu1 }
0x1962   : > { %v6273_v42 = vadd.f32 %v6202_v56, %v12842_v44  ;;  %v13078_v25 = vadd.f32 %v6291_v59, %v6272_v41  ;;  %v6275_v39 = vadd.f32 %v6255_v53, %v12857_v28  ;;  %v13094_v7 = vadd.f32 %v6291_v59, %v6274_v48  ;;  %v8771_v48 = vld [vmem:[%s13928_s12 + $0xa0] sm:$0xff] }
0x1963   : > { %v6204_v1 = vpop.f32.mrf.mxu0  ;;  %v6257_v15 = vpop.f32.mrf.mxu1 }
0x1964   : > { %v6276_v35 = vadd.f32 %v6204_v1, %v12840_v38  ;;  %v6278_v27 = vadd.f32 %v6257_v15, %v12844_v12  ;;  %v13086_v38 = vadd.f32 %v6291_v59, %v6273_v42  ;;  %v13101_v40 = vadd.f32 %v6291_v59, %v6275_v39  ;;  %v8782_v39 = vld [vmem:[%s13930_s14 + $0xb8] sm:$0xff] }
0x1965   : > { %v6206_v61 = vpop.f32.mrf.mxu0  ;;  %v6259_v6 = vpop.f32.mrf.mxu1 }
0x1966   : > { %v13081_v13 = vadd.f32 %v6296_v36, %v6276_v35  ;;  %v6277_v57 = vadd.f32 %v6206_v61, %v12846_v30  ;;  %v6279_v44 = vadd.f32 %v6259_v6, %v12852_v32  ;;  %v13088_v2 = vadd.f32 %v6296_v36, %v6278_v27  ;;  %v8773_v27 = vld [vmem:[%s13928_s12 + $0xb0] sm:$0xff]  ;;  %v8774_v61 = vld [vmem:[%s13928_s12 + $0xb8] sm:$0xff] }
0x1967   : > { %v6210_v33 = vpop.f32.mrf.mxu0  ;;  %v6263_v0 = vpop.f32.mrf.mxu1  ;;  %v8781_v6 = vld [vmem:[%s13930_s14 + $0xb0] sm:$0xff] }
0x1968   : > { %v13090_v12 = vadd.f32 %v6296_v36, %v6277_v57  ;;  %v9784_v51 = vpack.i.bf16 %v13081_v13, %v13078_v25  ;;  %v13096_v30 = vadd.f32 %v6296_v36, %v6279_v44  ;;  %v9789_v58 = vpack.i.bf16 %v13088_v2, %v13094_v7  ;;  %v8772_v57 = vld [vmem:[%s13928_s12 + $0xa8] sm:$0xff]  ;;  %v8779_v44 = vld [vmem:[%s13930_s14 + $0xa0] sm:$0xff] }
0x1969   : > { %v6212_v24 = vpop.f32.mrf.mxu0  ;;  %v6265_v55 = vpop.f32.mrf.mxu1  ;;  %v6280_v62 = vadd.f32 %v6210_v33, %v12872_v45  ;;  %v6282_v26 = vadd.f32 %v6263_v0, %v12883_v21  ;;  %v6488_v42 = vpack.c.bf16 %v13081_v13, %v13078_v25  ;;  %v6490_v35 = vpack.c.bf16 %v13088_v2, %v13094_v7  ;;  %v8780_v33 = vld [vmem:[%s13930_s14 + $0xa8] sm:$0xff] }
0x196a   : > { %9785 = vrot.lane.b32.xlu0 %v9784_v51, %s14104_s23  ;;  %v9799_v32 = vpack.i.bf16 %v13090_v12, %v13086_v38  ;;  %v6281_v3 = vadd.f32 %v6212_v24, %v12867_v11  ;;  %v6283_v9 = vadd.f32 %v6265_v55, %v12876_v46  ;;  %v6489_v53 = vpack.c.bf16 %v13090_v12, %v13086_v38 }
0x196b   : > { %v6214_v28 = vpop.f32.mrf.mxu0  ;;  %v6267_v5 = vpop.f32.mrf.mxu1  ;;  %v13126_v21 = vadd.f32 %v6301_v50, %v6280_v62  ;;  %v13132_v18 = vadd.f32 %v6301_v50, %v6282_v26  ;;  %v6491_v1 = vpack.c.bf16 %v13096_v30, %v13101_v40 }
0x196c   : > { %v6284_v29 = vadd.f32 %v6214_v28, %v12865_v34  ;;  %9800 = vrot.lane.b32.xlu1 %v9799_v32, %s14104_s23  ;;  %v6286_v52 = vadd.f32 %v6267_v5, %v12874_v54  ;;  %v9804_v34 = vpack.i.bf16 %v13096_v30, %v13101_v40  ;;  %v13119_v45 = vadd.f32 %v6301_v50, %v6281_v3 }
0x196d   : > { %v6216_v17 = vpop.f32.mrf.mxu0  ;;  %v6269_v11 = vpop.f32.mrf.mxu1 }
0x196e   : > { %v6285_v37 = vadd.f32 %v6216_v17, %v12869_v60  ;;  %9790 = vrot.lane.b32.xlu0 %v9789_v58, %s14104_s23  ;;  %v13116_v47 = vadd.f32 %v6306_v4, %v6284_v29  ;;  %v6287_v8 = vadd.f32 %v6269_v11, %v12878_v49  ;;  %v13121_v46 = vadd.f32 %v6306_v4, %v6286_v52 }
0x196f   : > { %v13128_v60 = vadd.f32 %v6301_v50, %v6283_v9 }
0x1970   : > { %v13123_v54 = vadd.f32 %v6306_v4, %v6285_v37  ;;  %9805 = vrot.lane.b32.xlu1 %v9804_v34, %s14104_s23  ;;  %v13130_v31 = vadd.f32 %v6306_v4, %v6287_v8  ;;  %v6492_v56 = vpack.c.bf16 %v13116_v47, %v13126_v21  ;;  %v6494_v4 = vpack.c.bf16 %v13121_v46, %v13132_v18 }
0x1971   : > { %v9814_v50 = vpack.i.bf16 %v13116_v47, %v13126_v21  ;;  %v9819_v15 = vpack.i.bf16 %v13121_v46, %v13132_v18 }
0x1972   : > { %9795 = vrot.lane.b32.xlu0 %v9784_v51, %s14121_s19  ;;  %v6493_v49 = vpack.c.bf16 %v13123_v54, %v13119_v45  ;;  %v6495_v41 = vpack.c.bf16 %v13130_v31, %v13128_v60  ;;  %v9839_v59 = vpack.i.bf16 %v13123_v54, %v13119_v45  ;;  %v9844_v36 = vpack.i.bf16 %v13130_v31, %v13128_v60 }
0x1974   : > { %9810 = vrot.lane.b32.xlu1 %v9799_v32, %s14121_s19  ;;  %6536 = vmatprep.subr.bf16.mxu0 %v6493_v49 }
0x1975   : > { %6537 = vmatpush1.bf16.msra.mxu0 %v6492_v56  ;;  %6589 = vmatprep.subr.bf16.mxu1 %v6495_v41 }
0x1976   : > { %6590 = vmatpush1.bf16.msra.mxu1 %v6494_v4  ;;  %9815 = vrot.lane.b32.xlu0 %v9814_v50, %s14104_s23 }
0x1977   : > { %6538 = vmatprep.subr.bf16.mxu0 %v6489_v53  ;;  %6591 = vmatprep.subr.bf16.mxu1 %v6491_v1 }
0x1978   : > { %9840 = vrot.lane.b32.xlu1 %v9839_v59, %s14104_s23 }
0x1979   : > { %6539 = vmatpush1.bf16.msra.mxu0 %v6488_v42 }
0x197a   : > { %6592 = vmatpush1.bf16.msra.mxu1 %v6490_v35  ;;  %9820 = vrot.lane.b32.xlu0 %v9819_v15, %s14104_s23 }
0x197c   : > { %9845 = vrot.lane.b32.xlu1 %v9844_v36, %s14104_s23  ;;  %s10198_s23 = smov [#allocation3]  }
0x197d   : > { %s10133_s29 = sshll.u32 %s10198_s23, 4  ;;  %s10134_s29 = int_to_ptr.vmem [resolvable:$false] %s10133_s29 }
0x197e   : > { %9825 = vrot.lane.b32.xlu0 %v9814_v50, %s14121_s19  ;;  %p10136_p2 = scmp.lt.s32.totalorder %s13870_s4, %s10134_s29 }
0x1980   : > { %9850 = vrot.lane.b32.xlu1 %v9839_v59, %s14121_s19 }
0x1982   : > { %9830 = vrot.lane.b32.xlu0 %v9819_v15, %s14121_s19 }
0x1984   : > { %9855 = vrot.lane.b32.xlu1 %v9844_v36, %s14121_s19 }
0x1986   : > { %9835 = vrot.lane.b32.xlu0 %v9789_v58, %s14121_s19 }
0x1988   : > { %9860 = vrot.lane.b32.xlu1 %v9804_v34, %s14121_s19 }
0x198a   : > { %6508 = vperm.xlu0 %9062, %v8773_v27  }
0x198c   : > { %6513 = vperm.xlu1 %9063, %v8774_v61  }
0x198e   : > { %6498 = vperm.xlu0 %9062, %v8771_v48  }
0x1990   : > { %6503 = vperm.xlu1 %9063, %v8772_v57  }
0x1992   : > { %6812 = vperm.xlu0 %9062, %v8781_v6  }
0x1994   : > { %6817 = vperm.xlu1 %9063, %v8782_v39  }
0x1996   : > { %6802 = vperm.xlu0 %9062, %v8779_v44  }
0x1998   : > { %6807 = vperm.xlu1 %9063, %v8780_v33  }
0x19dc   : > { %v9786_v0 = vpop.permute.xlu0 %9785 }
0x19dd   : > { %v9788_v5 = vunpack.i.h.bf16 %v9786_v0  ;;  %v9787_v58 = vunpack.i.l.bf16 %v9786_v0 }
0x19de   : > { %v9801_v51 = vpop.permute.xlu1 %9800 }
0x19df   : > { %v9803_v28 = vunpack.i.h.bf16 %v9801_v51  ;;  %v9802_v3 = vunpack.i.l.bf16 %v9801_v51 }
0x19e0   : > { %v9791_v24 = vpop.permute.xlu0 %9790 }
0x19e1   : > { %v6449_v9 = vsel %vm14464_vm6, %v9788_v5, %v9803_v28  ;;  %v6448_v52 = vsel %vm14465_vm11, %v9787_v58, %v9802_v3  ;;  %v9792_v8 = vunpack.i.l.bf16 %v9791_v24  ;;  %v9793_v42 = vunpack.i.h.bf16 %v9791_v24  ;;  %vm14469_vm6 = vmmov %vm14467_vm1 }
0x19e2   : > { %v9806_v55 = vpop.permute.xlu1 %9805  ;;  %v8792_v59 = vpack.c.bf16 %v6449_v9, %v6448_v52  ;;  %vm14470_vm11 = vmmov %vm14467_vm1 }
0x19e3   : > { %v9808_v49 = vunpack.i.h.bf16 %v9806_v55  ;;  %v9807_v56 = vunpack.i.l.bf16 %v9806_v55  ;;  %v6444_v57 = vsel %vm14470_vm11, %v9802_v3, %v9792_v8  ;;  %vm14475_vm11 = vmmov %vm14467_vm1 }
0x19e4   : > { %v13194_v32 = vpop.permute.xlu0 %9795 }
0x19e5   : > { %v6453_v39 = vsel %vm14467_vm1, %v9808_v49, %v9788_v5  ;;  %v6440_v44 = vsel %vm14472_vm8, %v9792_v8, %v9807_v56  ;;  %v6452_v3 = vsel %vm14467_vm1, %v9807_v56, %v9787_v58  ;;  %vm14477_vm8 = vmmov %vm14467_vm1 }
0x19e6   : > { %v13196_v29 = vpop.permute.xlu1 %9810 }
0x19e8   : > { %v9816_v62 = vpop.permute.xlu0 %9815 }
0x19e9   : > { %v9818_v26 = vunpack.i.h.bf16 %v9816_v62  ;;  %v9817_v37 = vunpack.i.l.bf16 %v9816_v62 }
0x19ea   : > { %v9841_v17 = vpop.permute.xlu1 %9840 }
0x19eb   : > { %v9843_v11 = vunpack.i.h.bf16 %v9841_v17  ;;  %v9842_v34 = vunpack.i.l.bf16 %v9841_v17 }
0x19ec   : > { %v9821_v41 = vpop.permute.xlu0 %9820 }
0x19ed   : > { %v6451_v4 = vsel %vm14466_vm13, %v9818_v26, %v9843_v11  ;;  %v6450_v50 = vsel %vm14467_vm1, %v9817_v37, %v9842_v34  ;;  %v9823_v53 = vunpack.i.h.bf16 %v9821_v41  ;;  %v9822_v1 = vunpack.i.l.bf16 %v9821_v41  ;;  %vm14471_vm13 = vmmov %vm14467_vm1 }
0x19ee   : > { %v8786_v35 = vpack.c.bf16 %v6451_v4, %v6450_v50  ;;  %v9846_v15 = vpop.permute.xlu1 %9845  ;;  %v6441_v6 = vsel %vm14471_vm13, %v9793_v42, %v9808_v49  ;;  %vm14476_vm13 = vmmov %vm14467_vm1  ;;  %v9813_v41 = vunpack.i.h.bf16 %v13196_v29  ;;  %v9812_v4 = vunpack.i.l.bf16 %v13196_v29 }
0x19ef   : > { %v6446_v36 = vsel %vm14468_vm7, %v9842_v34, %v9822_v1  ;;  %v6447_v27 = vsel %vm14469_vm6, %v9843_v11, %v9823_v53  ;;  %v9848_v61 = vunpack.i.h.bf16 %v9846_v15  ;;  %v9847_v48 = vunpack.i.l.bf16 %v9846_v15  ;;  %vm14473_vm7 = vmmov %vm14467_vm1 }
0x19f0   : > { %v9826_v33 = vpop.permute.xlu0 %9825  ;;  %8787 = vmatprep.subr.msk.bf16.mxu0 %vm14444_vm2, %v8786_v35  ;;  %vm14474_vm6 = vmmov %vm14467_vm1  ;;  %v8815_v5 = vpack.c.bf16 %v6447_v27, %v6446_v36  ;;  %v8818_v49 = vpack.c.bf16 %v6441_v6, %v6440_v44  ;;  %v8795_v29 = vpack.c.bf16 %v6453_v39, %v6452_v3 }
0x19f1   : > { %v6443_v0 = vsel %vm14473_vm7, %v9823_v53, %v9848_v61  ;;  %v6455_v51 = vsel %vm14474_vm6, %v9848_v61, %v9818_v26  ;;  %v6442_v24 = vsel %vm14475_vm11, %v9822_v1, %v9847_v48  ;;  %v6454_v55 = vsel %vm14476_vm13, %v9847_v48, %v9817_v37 }
0x19f2   : > { %v8789_v62 = vpack.c.bf16 %v6455_v51, %v6454_v55  ;;  %v8812_v9 = vpack.c.bf16 %v6443_v0, %v6442_v24  ;;  %v9851_v52 = vpop.permute.xlu1 %9850  ;;  %v9828_v17 = vunpack.i.h.bf16 %v9826_v33  ;;  %v9827_v11 = vunpack.i.l.bf16 %v9826_v33 }
0x19f3   : > { %v9853_v34 = vunpack.i.h.bf16 %v9851_v52  ;;  %v9852_v8 = vunpack.i.l.bf16 %v9851_v52  ;;  %v6445_v26 = vsel %vm14477_vm8, %v9803_v28, %v9793_v42  ;;  %vm14478_vm7 = vcmp.lt.s32.totalorder %v10593_v23, 4 }
0x19f4   : > { %v9831_v37 = vpop.permute.xlu0 %9830  ;;  %8790 = vmatpush1.bf16.msk.msra.mxu0 %vm14452_vm4, %v8789_v62  ;;  %8813 = vmatprep.subr.msk.bf16.mxu1 %vm14447_vm10, %v8812_v9  ;;  %vm14479_vm6 = vmmov %vm14478_vm7  ;;  %v9798_v53 = vunpack.i.h.bf16 %v13194_v32  ;;  %v9797_v1 = vunpack.i.l.bf16 %v13194_v32  ;;  %v8821_v15 = vpack.c.bf16 %v6445_v26, %v6444_v57 }
0x19f5   : > { %v6387_v58 = vsel %vm14478_vm7, %v9828_v17, %v9853_v34  ;;  %v6386_v56 = vsel %vm14479_vm6, %v9827_v11, %v9852_v8  ;;  %v9833_v50 = vunpack.i.h.bf16 %v9831_v37  ;;  %v9832_v28 = vunpack.i.l.bf16 %v9831_v37  ;;  %8793 = vmatprep.subr.msk.bf16.mxu0 %vm14444_vm2, %v8792_v59  ;;  %8816 = vmatpush1.bf16.msk.msra.mxu1 %vm14455_vm15, %v8815_v5  ;;  %vm14480_vm11 = vmmov %vm14479_vm6 }
0x19f6   : > { %v8798_v42 = vpack.c.bf16 %v6387_v58, %v6386_v56  ;;  %v9856_v35 = vpop.permute.xlu1 %9855  ;;  %8819 = vmatprep.subr.msk.bf16.mxu1 %vm14447_vm10, %v8818_v49  ;;  %v6385_v14 = vsel %vm14480_vm11, %v9798_v53, %v9813_v41  ;;  %vm14481_vm2 = vmmov %vm14479_vm6  ;;  %vm14489_vm11 = vnez %v14308_v43 }
0x19f7   : > { %v9858_v36 = vunpack.i.h.bf16 %v9856_v35  ;;  %v9857_v27 = vunpack.i.l.bf16 %v9856_v35  ;;  %v6384_v59 = vsel %vm14481_vm2, %v9797_v1, %v9812_v4  ;;  %vm14482_vm13 = vmmov %vm14481_vm2 }
0x19f8   : > { %v6382_v61 = vsel %vm14482_vm13, %v9852_v8, %v9832_v28  ;;  %vm14483_vm1 = vmmov %vm14481_vm2  ;;  %v9836_v48 = vpop.permute.xlu0 %9835  ;;  %8796 = vmatpush1.bf16.msk.msra.mxu0 %vm14452_vm4, %v8795_v29  ;;  %v8804_v24 = vpack.c.bf16 %v6385_v14, %v6384_v59  ;;  %v14494_v8 = vld [vmem:[#allocation23_spill] sm:$0xff] }
0x19f9   : > { %v6383_v32 = vsel %vm14483_vm1, %v9853_v34, %v9833_v50  ;;  %vm14484_vm10 = vmmov %vm14483_vm1  ;;  %8799 = vmatprep.subr.msk.bf16.mxu0 %vm14304_vm12, %v8798_v42  ;;  %v9838_v0 = vunpack.i.h.bf16 %v9836_v48  ;;  %v9837_v19 = vunpack.i.l.bf16 %v9836_v48  ;;  %8822 = vmatpush1.bf16.msk.msra.mxu1 %vm14455_vm15, %v8821_v15 }
0x19fa   : > { %v6379_v22 = vsel %vm14484_vm10, %v9833_v50, %v9858_v36  ;;  %vm14485_vm8 = vmmov %vm14483_vm1  ;;  %v9861_v51 = vpop.permute.xlu1 %9860  ;;  %v8827_v5 = vpack.c.bf16 %v6383_v32, %v6382_v61 }
0x19fb   : > { %v6391_v57 = vsel %vm14485_vm8, %v9858_v36, %v9828_v17  ;;  %vm14486_vm7 = vmmov %vm14483_vm1  ;;  %v9863_v55 = vunpack.i.h.bf16 %v9861_v51  ;;  %v9862_v3 = vunpack.i.l.bf16 %v9861_v51  ;;  %vm14495_vm8 = vnez %v14494_v8 }
0x19fc   : > { %v6378_v6 = vsel %vm14486_vm7, %v9832_v28, %v9857_v27  ;;  %vm14487_vm6 = vmmov %vm14483_vm1  ;;  %vm14496_vm7 = vcmask 785408  }
0x19fd   : > { %v6390_v39 = vsel %vm14487_vm6, %v9857_v27, %v9827_v11  ;;  %v8824_v33 = vpack.c.bf16 %v6379_v22, %v6378_v6  ;;  %vm14488_vm4 = vmmov %vm14483_vm1  ;;  %v6376_v17 = vsel %vm14483_vm1, %v9837_v19, %v9862_v3 }
0x19fe   : > { %v8801_v44 = vpack.c.bf16 %v6391_v57, %v6390_v39  ;;  %v6381_v62 = vsel %vm14488_vm4, %v9813_v41, %v9838_v0  ;;  %vm14490_vm2 = vmmov %vm14483_vm1  ;;  %v10068_v41 = vld [vmem:[%s13927_s11 + $0x50] sm:$0xff]  }
0x19ff   : > { %8825 = vmatprep.subr.msk.bf16.mxu1 %vm14489_vm11, %v8824_v33  ;;  %v6380_v9 = vsel %vm14490_vm2, %v9812_v4, %v9837_v19  ;;  %vm14491_vm13 = vmmov %vm14483_vm1  ;;  %v10069_v4 = vld [vmem:[%s13927_s11 + $0x58] sm:$0xff]  }
0x1a00   : > { %8802 = vmatpush1.bf16.msk.msra.mxu0 %vm14307_vm0, %v8801_v44  ;;  %v6377_v16 = vsel %vm14491_vm13, %v9838_v0, %v9863_v55  ;;  %vm14492_vm15 = vmmov %vm14483_vm1  ;;  %8828 = vmatpush1.bf16.msk.msra.mxu1 %vm14495_vm8, %v8827_v5  ;;  %v8833_v49 = vpack.c.bf16 %v6381_v62, %v6380_v9  ;;  %vm14500_vm13 = vcmask 261120  }
0x1a01   : > { %v6389_v52 = vsel %vm14492_vm15, %v9863_v55, %v9798_v53  ;;  %8805 = vmatprep.subr.msk.bf16.mxu0 %vm14304_vm12, %v8804_v24  ;;  %vm14493_vm10 = vmmov %vm14483_vm1  ;;  %v8830_v34 = vpack.c.bf16 %v6377_v16, %v6376_v17 }
0x1a02   : > { %v6388_v11 = vsel %vm14493_vm10, %v9862_v3, %v9797_v1  ;;  %vm14497_vm6 = vmmov %vm14496_vm7 }
0x1a03   : > { %v8807_v26 = vpack.c.bf16 %v6389_v52, %v6388_v11  ;;  %8831 = vmatprep.subr.msk.bf16.mxu1 %vm14489_vm11, %v8830_v34  ;;  %vm14498_vm4 = vmmov %vm14497_vm6 }
0x1a04   : > { %8834 = vmatpush1.bf16.msk.msra.mxu1 %vm14495_vm8, %v8833_v49  ;;  %vm14499_vm2 = vmmov %vm14498_vm4 }
0x1a05   : > { %8808 = vmatpush1.bf16.msk.msra.mxu0 %vm14307_vm0, %v8807_v26  ;;  %v6509_v29 = vpop.permute.xlu0 %6508  ;;  %vm14501_vm15 = vmmov %vm14500_vm13 }
0x1a06   : > { %vm14502_vm1 = vmmov %vm14500_vm13 }
0x1a07   : > { %8835 = vmatmul.mubr.msk.bf16.vlgmr.msra.gmra.mxu1 %vm14497_vm6, %v10068_v41  ;;  %v6514_v1 = vpop.permute.xlu1 %6513  ;;  %vm14503_vm10 = vmmov %vm14502_vm1 }
0x1a08   : > { %8809 = vmatmul.mubr.msk.bf16.vlgmr.msra.gmra.mxu0 %vm14496_vm7, %v10068_v41  ;;  %6627 = vmatprep.mubr.bf16.mxu1 %v14103_v20  ;;  %vm14504_vm7 = vcmp.lt.s32.totalorder %v10593_v23, 4 }
0x1a09   : > { %6574 = vmatprep.mubr.bf16.mxu0 %v14103_v20  ;;  %v6499_v14 = vpop.permute.xlu0 %6498  ;;  %vm14505_vm6 = vmmov %vm14504_vm7 }
0x1a0b   : > { %v6504_v61 = vpop.permute.xlu1 %6503 }
0x1a0f   : > { %8836 = vmatmul.mubr.msk.bf16.gmra.mxu1 %vm14499_vm2, %v10069_v4 }
0x1a10   : > { %8810 = vmatmul.mubr.msk.bf16.gmra.mxu0 %vm14498_vm4, %v10069_v4  ;;  %6763 = vmatprep.mubr.bf16.mxu1 %v14103_v20  ;;  %vm14506_vm4 = vmmov %vm14505_vm6 }
0x1a11   : > { %6710 = vmatprep.mubr.bf16.mxu0 %v14103_v20  ;;  %vm14507_vm2 = vmmov %vm14506_vm4 }
0x1ac7   : > { %v6619_v58 = vpop.f32.mrf.mxu1 }
0x1ac8   : > { %v6566_v37 = vpop.f32.mrf.mxu0 }
0x1ac9   : > { %v6621_v50 = vpop.f32.mrf.mxu1  ;;  %v6567_v48 = vadd.f32 %v6566_v37, %v6499_v14 }
0x1aca   : > { %v6568_v56 = vpop.f32.mrf.mxu0  ;;  %v6622_v55 = vadd.f32 %v6621_v50, %v6499_v14 }
0x1acb   : > { %v6623_v53 = vpop.f32.mrf.mxu1  ;;  %v6569_v24 = vadd.f32 %v6568_v56, %v6499_v14 }
0x1acc   : > { %v6570_v28 = vpop.f32.mrf.mxu0  ;;  %v6624_v16 = vadd.f32 %v6623_v53, %v6504_v61  ;;  %v6641_v50 = vmax.f32 %v6622_v55, 0.0 }
0x1acd   : > { %v6625_v35 = vpop.f32.mrf.mxu1  ;;  %v6571_v9 = vadd.f32 %v6570_v28, %v6504_v61 }
0x1ace   : > { %v6572_v42 = vpop.f32.mrf.mxu0  ;;  %v6626_v44 = vadd.f32 %v6625_v35, %v6504_v61  ;;  %v6620_v35 = vadd.f32 %v6619_v58, %v6499_v14  ;;  %v6644_v28 = vmax.f32 %v6624_v16, 0.0  ;;  %v10070_v14 = vld [vmem:[%s13929_s13 + $0x50] sm:$0xff]  }
0x1acf   : > { %v6629_v36 = vpop.f32.mrf.mxu1  ;;  %v6573_v22 = vadd.f32 %v6572_v42, %v6504_v61 }
0x1ad0   : > { %v6576_v15 = vpop.f32.mrf.mxu0  ;;  %v6630_v3 = vadd.f32 %v6629_v36, %v6509_v29  ;;  %v6645_v41 = vmax.f32 %v6626_v44, 0.0 }
0x1ad1   : > { %v6631_v59 = vpop.f32.mrf.mxu1  ;;  %v6577_v33 = vadd.f32 %v6576_v15, %v6509_v29  ;;  %v6643_v11 = vmax.f32 %v6573_v22, 0.0  ;;  %v6639_v15 = vmax.f32 %v6569_v24, 0.0  ;;  %v6640_v22 = vmax.f32 %v6620_v35, 0.0 }
0x1ad2   : > { %v6578_v27 = vpop.f32.mrf.mxu0  ;;  %v6632_v0 = vadd.f32 %v6631_v59, %v6509_v29 }
0x1ad3   : > { %v6579_v57 = vadd.f32 %v6578_v27, %v6509_v29  ;;  %v6633_v39 = vpop.f32.mrf.mxu1  ;;  %v6646_v4 = vmax.f32 %v6577_v33, 0.0  ;;  %v6648_v27 = vmax.f32 %v6630_v3, 0.0  ;;  %v6642_v29 = vmax.f32 %v6571_v9, 0.0 }
0x1ad4   : > { %v6580_v32 = vpop.f32.mrf.mxu0  ;;  %v6634_v19 = vadd.f32 %v6633_v39, %v6514_v1  ;;  %v6649_v37 = vmax.f32 %v6632_v0, 0.0  ;;  %v6655_v53 = vpack.c.bf16 %v6643_v11, %v6639_v15  ;;  %v6656_v58 = vpack.c.bf16 %v6644_v28, %v6640_v22  ;;  %v6818_v39 = vpop.permute.xlu1 %6817 }
0x1ad5   : > { %v6581_v6 = vadd.f32 %v6580_v32, %v6514_v1  ;;  %v6635_v62 = vpop.f32.mrf.mxu1  ;;  %v6647_v34 = vmax.f32 %v6579_v57, 0.0  ;;  %v6657_v32 = vpack.c.bf16 %v6645_v41, %v6641_v50 }
0x1ad6   : > { %v6582_v51 = vpop.f32.mrf.mxu0  ;;  %v6636_v17 = vadd.f32 %v6635_v62, %v6514_v1  ;;  %v6652_v26 = vmax.f32 %v6634_v19, 0.0 }
0x1ad7   : > { %v6583_v5 = vadd.f32 %v6582_v51, %v6514_v1  ;;  %v6650_v52 = vmax.f32 %v6581_v6, 0.0  ;;  %v6638_v1 = vmax.f32 %v6567_v48, 0.0  ;;  %v10071_v48 = vld [vmem:[%s13929_s13 + $0x58] sm:$0xff]   ;;  %v6813_v6 = vpop.permute.xlu0 %6812 }
0x1ad8   : > { %v6653_v42 = vmax.f32 %v6636_v17, 0.0  ;;  %v6660_v61 = vpack.c.bf16 %v6652_v26, %v6648_v27  ;;  %v6808_v9 = vpop.permute.xlu1 %6807 }
0x1ad9   : > { %v6651_v49 = vmax.f32 %v6583_v5, 0.0  ;;  %v6658_v36 = vpack.c.bf16 %v6650_v52, %v6646_v4  ;;  %v6654_v57 = vpack.c.bf16 %v6642_v29, %v6638_v1 }
0x1ada   : > { %v6661_v59 = vpack.c.bf16 %v6653_v42, %v6649_v37 }
0x1adb   : > { %v6659_v56 = vpack.c.bf16 %v6651_v49, %v6647_v34  ;;  %v6803_v55 = vpop.permute.xlu0 %6802 }
0x1adc   : > { %6743 = vmatprep.subr.bf16.mxu1 %v6661_v59 }
0x1add   : > { %6690 = vmatprep.subr.bf16.mxu0 %v6659_v56  ;;  %6744 = vmatpush1.bf16.msra.mxu1 %v6660_v61 }
0x1ade   : > { %6691 = vmatpush1.bf16.msra.mxu0 %v6658_v36  ;;  %6745 = vmatprep.subr.bf16.mxu1 %v6657_v32 }
0x1adf   : > { %6692 = vmatprep.subr.bf16.mxu0 %v6655_v53 }
0x1ae1   : > { %6746 = vmatpush1.bf16.msra.mxu1 %v6656_v58 }
0x1ae2   : > { %6693 = vmatpush1.bf16.msra.mxu0 %v6654_v57 }
0x1ae4   : > { %8841 = vmatmul.mubr.msk.bf16.vlgmr.msra.gmra.mxu1 %vm14501_vm15, %v10070_v14  ;;  %vm14509_vm15 = vmmov %vm14507_vm2 }
0x1ae5   : > { %8839 = vmatmul.mubr.msk.bf16.vlgmr.msra.gmra.mxu0 %vm14500_vm13, %v10070_v14  ;;  %6773 = vmatprep.mubr.bf16.mxu1 %v14103_v20  ;;  %vm14508_vm13 = vmmov %vm14507_vm2 }
0x1ae6   : > { %6720 = vmatprep.mubr.bf16.mxu0 %v14103_v20 }
0x1aec   : > { %8842 = vmatmul.mubr.msk.bf16.gmra.mxu1 %vm14503_vm10, %v10071_v48 }
0x1aed   : > { %8840 = vmatmul.mubr.msk.bf16.gmra.mxu0 %vm14502_vm1, %v10071_v48  ;;  %7129 = vmatprep.mubr.bf16.mxu1 %v14103_v20  ;;  %vm14510_vm1 = vmmov %vm14507_vm2 }
0x1aee   : > { %7076 = vmatprep.mubr.bf16.mxu0 %v14103_v20  ;;  %vm14511_vm10 = vmmov %vm14510_vm1 }
0x1ba4   : > { %v6765_v33 = vpop.f32.mrf.mxu1 }
0x1ba5   : > { %v6712_v44 = vpop.f32.mrf.mxu0  ;;  %v6786_v11 = vadd.f32 %v6765_v33, %v13094_v7 }
0x1ba6   : > { %v6784_v19 = vadd.f32 %v6712_v44, %v13078_v25  ;;  %v6767_v51 = vpop.f32.mrf.mxu1 }
0x1ba7   : > { %v6714_v0 = vpop.f32.mrf.mxu0  ;;  %v6787_v49 = vadd.f32 %v6767_v51, %v13101_v40  ;;  %v13346_v35 = vadd.f32 %v6803_v55, %v6786_v11  ;;  %v8858_v11 = vld [vmem:[%s13930_s14 + $0xd8] sm:$0xff] }
0x1ba8   : > { %v6785_v3 = vadd.f32 %v6714_v0, %v13086_v38  ;;  %v6769_v62 = vpop.f32.mrf.mxu1  ;;  %v13330_v17 = vadd.f32 %v6803_v55, %v6784_v19 }
0x1ba9   : > { %v6716_v24 = vpop.f32.mrf.mxu0  ;;  %v6790_v16 = vadd.f32 %v6769_v62, %v13088_v2  ;;  %v13353_v27 = vadd.f32 %v6803_v55, %v6787_v49  ;;  %v8850_v62 = vld [vmem:[%s13928_s12 + $0xd8] sm:$0xff] }
0x1baa   : > { %v6788_v5 = vadd.f32 %v6716_v24, %v13081_v13  ;;  %v6771_v26 = vpop.f32.mrf.mxu1  ;;  %v13338_v13 = vadd.f32 %v6803_v55, %v6785_v3 }
0x1bab   : > { %v6718_v52 = vpop.f32.mrf.mxu0  ;;  %v6791_v38 = vadd.f32 %v6771_v26, %v13096_v30  ;;  %v13340_v4 = vadd.f32 %v6808_v9, %v6790_v16  ;;  %v8848_v16 = vld [vmem:[%s13928_s12 + $0xc8] sm:$0xff] }
0x1bac   : > { %v13333_v34 = vadd.f32 %v6808_v9, %v6788_v5  ;;  %v6789_v25 = vadd.f32 %v6718_v52, %v13090_v12  ;;  %v6775_v37 = vpop.f32.mrf.mxu1  ;;  %v8849_v5 = vld [vmem:[%s13928_s12 + $0xd0] sm:$0xff]  ;;  %v8856_v26 = vld [vmem:[%s13930_s14 + $0xc8] sm:$0xff] }
0x1bad   : > { %v6722_v41 = vpop.f32.mrf.mxu0  ;;  %v13348_v12 = vadd.f32 %v6808_v9, %v6791_v38  ;;  %v9869_v36 = vpack.i.bf16 %v13340_v4, %v13346_v35  ;;  %v6794_v1 = vadd.f32 %v6775_v37, %v13132_v18  ;;  %v7002_v24 = vpack.c.bf16 %v13340_v4, %v13346_v35  ;;  %v8857_v52 = vld [vmem:[%s13930_s14 + $0xd0] sm:$0xff] }
0x1bae   : > { %v13342_v2 = vadd.f32 %v6808_v9, %v6789_v25  ;;  %v9864_v7 = vpack.i.bf16 %v13333_v34, %v13330_v17  ;;  %v6777_v15 = vpop.f32.mrf.mxu1  ;;  %v6792_v59 = vadd.f32 %v6722_v41, %v13126_v21  ;;  %v7000_v51 = vpack.c.bf16 %v13333_v34, %v13330_v17  ;;  %v8847_v9 = vld [vmem:[%s13928_s12 + $0xc0] sm:$0xff] }
0x1baf   : > { %v6724_v42 = vpop.f32.mrf.mxu0  ;;  %v6795_v28 = vadd.f32 %v6777_v15, %v13128_v60  ;;  %v13384_v14 = vadd.f32 %v6813_v6, %v6794_v1  ;;  %v7003_v0 = vpack.c.bf16 %v13348_v12, %v13353_v27  ;;  %v8855_v25 = vld [vmem:[%s13930_s14 + $0xc0] sm:$0xff] }
0x1bb0   : > { %9865 = vrot.lane.b32.xlu0 %v9864_v7, %s14121_s19  ;;  %v9879_v30 = vpack.i.bf16 %v13342_v2, %v13338_v13  ;;  %v6793_v56 = vadd.f32 %v6724_v42, %v13119_v45  ;;  %v6779_v29 = vpop.f32.mrf.mxu1  ;;  %v13378_v18 = vadd.f32 %v6813_v6, %v6792_v59  ;;  %v7001_v33 = vpack.c.bf16 %v13342_v2, %v13338_v13 }
0x1bb1   : > { %v6726_v40 = vpop.f32.mrf.mxu0  ;;  %v6798_v53 = vadd.f32 %v6779_v29, %v13121_v46 }
0x1bb2   : > { %v6796_v50 = vadd.f32 %v6726_v40, %v13116_v47  ;;  %9880 = vrot.lane.b32.xlu1 %v9879_v30, %s14121_s19  ;;  %v6781_v45 = vpop.f32.mrf.mxu1  ;;  %v9884_v47 = vpack.i.bf16 %v13348_v12, %v13353_v27  ;;  %v13371_v21 = vadd.f32 %v6813_v6, %v6793_v56 }
0x1bb3   : > { %v6728_v61 = vpop.f32.mrf.mxu0  ;;  %v6799_v57 = vadd.f32 %v6781_v45, %v13130_v31  ;;  %v13373_v60 = vadd.f32 %v6818_v39, %v6798_v53 }
0x1bb4   : > { %v6797_v32 = vadd.f32 %v6728_v61, %v13123_v54  ;;  %9870 = vrot.lane.b32.xlu0 %v9869_v36, %s14121_s19  ;;  %v13368_v22 = vadd.f32 %v6818_v39, %v6796_v50  ;;  %v13380_v54 = vadd.f32 %v6813_v6, %v6795_v28 }
0x1bb5   : > { %v13382_v58 = vadd.f32 %v6818_v39, %v6799_v57  ;;  %v9899_v55 = vpack.i.bf16 %v13373_v60, %v13384_v14 }
0x1bb6   : > { %v13375_v46 = vadd.f32 %v6818_v39, %v6797_v32  ;;  %9885 = vrot.lane.b32.xlu1 %v9884_v47, %s14121_s19  ;;  %v7004_v48 = vpack.c.bf16 %v13368_v22, %v13378_v18  ;;  %v7006_v39 = vpack.c.bf16 %v13373_v60, %v13384_v14  ;;  %v9894_v6 = vpack.i.bf16 %v13368_v22, %v13378_v18 }
0x1bb7   : > { %v7007_v44 = vpack.c.bf16 %v13382_v58, %v13380_v54  ;;  %v9924_v3 = vpack.i.bf16 %v13382_v58, %v13380_v54 }
0x1bb8   : > { %9875 = vrot.lane.b32.xlu0 %v9864_v7, %s14174_s2  ;;  %v7005_v31 = vpack.c.bf16 %v13375_v46, %v13371_v21  ;;  %v9919_v19 = vpack.i.bf16 %v13375_v46, %v13371_v21 }
0x1bb9   : > { %7101 = vmatprep.subr.bf16.mxu1 %v7007_v44 }
0x1bba   : > { %9890 = vrot.lane.b32.xlu1 %v9879_v30, %s14174_s2  ;;  %7048 = vmatprep.subr.bf16.mxu0 %v7005_v31 }
0x1bbb   : > { %7049 = vmatpush1.bf16.msra.mxu0 %v7004_v48  ;;  %7102 = vmatpush1.bf16.msra.mxu1 %v7006_v39 }
0x1bbc   : > { %9895 = vrot.lane.b32.xlu0 %v9894_v6, %s14121_s19  ;;  %7050 = vmatprep.subr.bf16.mxu0 %v7001_v33 }
0x1bbd   : > { %7103 = vmatprep.subr.bf16.mxu1 %v7003_v0 }
0x1bbe   : > { %9920 = vrot.lane.b32.xlu1 %v9919_v19, %s14121_s19 }
0x1bbf   : > { %7051 = vmatpush1.bf16.msra.mxu0 %v7000_v51  ;;  %7104 = vmatpush1.bf16.msra.mxu1 %v7002_v24 }
0x1bc0   : > { %9900 = vrot.lane.b32.xlu0 %v9899_v55, %s14121_s19 }
0x1bc2   : > { %9925 = vrot.lane.b32.xlu1 %v9924_v3, %s14121_s19  ;;  %s10129_s19 = scalar_lea.vmem %s13870_s4, 3072 }
0x1bc3   : > { %p10130_p13 = scmp.ne.s32.totalorder %s13870_s4, %s10129_s19 }
0x1bc4   : > { %9905 = vrot.lane.b32.xlu0 %v9894_v6, %s14174_s2 }
0x1bc5   : > { %p10131_p0 = pnand %p10130_p13, %p10330_p6 }
0x1bc6   : > { %9930 = vrot.lane.b32.xlu1 %v9919_v19, %s14174_s2 }
0x1bc7   : > { %p10132_p1 = pneg %p10131_p0 }
0x1bc8   : > { %9910 = vrot.lane.b32.xlu0 %v9899_v55, %s14174_s2 }
0x1bca   : > { %9935 = vrot.lane.b32.xlu1 %v9924_v3, %s14174_s2 }
0x1bcc   : > { %9915 = vrot.lane.b32.xlu0 %v9869_v36, %s14174_s2 }
0x1bce   : > { %9940 = vrot.lane.b32.xlu1 %v9884_v47, %s14174_s2 }
0x1bd0   : > { %7020 = vperm.xlu0 %9062, %v8849_v5  }
0x1bd2   : > { %7025 = vperm.xlu1 %9063, %v8850_v62  }
0x1bd4   : > { %7010 = vperm.xlu0 %9062, %v8847_v9  }
0x1bd6   : > { %7015 = vperm.xlu1 %9063, %v8848_v16  }
0x1bd8   : > { %7324 = vperm.xlu0 %9062, %v8857_v52  }
0x1bda   : > { %7329 = vperm.xlu1 %9063, %v8858_v11  }
0x1bdc   : > { %7314 = vperm.xlu0 %9062, %v8855_v25  }
0x1bde   : > { %7319 = vperm.xlu1 %9063, %v8856_v26  }
0x1c22   : > { %v9866_v49 = vpop.permute.xlu0 %9865 }
0x1c23   : > { %v9868_v40 = vunpack.i.h.bf16 %v9866_v49  ;;  %v9867_v56 = vunpack.i.l.bf16 %v9866_v49 }
0x1c24   : > { %v9881_v38 = vpop.permute.xlu1 %9880 }
0x1c25   : > { %v9883_v42 = vunpack.i.h.bf16 %v9881_v38  ;;  %v9882_v15 = vunpack.i.l.bf16 %v9881_v38 }
0x1c26   : > { %v9871_v41 = vpop.permute.xlu0 %9870 }
0x1c27   : > { %v6961_v29 = vsel %vm14504_vm7, %v9868_v40, %v9883_v42  ;;  %v6960_v36 = vsel %vm14505_vm6, %v9867_v56, %v9882_v15  ;;  %v9872_v32 = vunpack.i.l.bf16 %v9871_v41  ;;  %v9873_v33 = vunpack.i.h.bf16 %v9871_v41  ;;  %vm14512_vm7 = vmmov %vm14510_vm1 }
0x1c28   : > { %v9886_v37 = vpop.permute.xlu1 %9885  ;;  %v8868_v6 = vpack.c.bf16 %v6961_v29, %v6960_v36  ;;  %vm14513_vm6 = vmmov %vm14510_vm1 }
0x1c29   : > { %v9888_v45 = vunpack.i.h.bf16 %v9886_v37  ;;  %v9887_v47 = vunpack.i.l.bf16 %v9886_v37  ;;  %v6956_v5 = vsel %vm14510_vm1, %v9882_v15, %v9872_v32 }
0x1c2a   : > { %v13446_v7 = vpop.permute.xlu0 %9875 }
0x1c2b   : > { %v6953_v62 = vsel %vm14511_vm10, %v9873_v33, %v9888_v45  ;;  %v6965_v9 = vsel %vm14512_vm7, %v9888_v45, %v9868_v40  ;;  %v6952_v16 = vsel %vm14513_vm6, %v9872_v32, %v9887_v47  ;;  %v6964_v38 = vsel %vm14510_vm1, %v9887_v47, %v9867_v56  ;;  %vm14518_vm10 = vmmov %vm14510_vm1 }
0x1c2c   : > { %v13448_v30 = vpop.permute.xlu1 %9890  ;;  %vm14519_vm7 = vcmp.lt.s32.totalorder %v10593_v23, 8 }
0x1c2d   : > { %v9892_v32 = vunpack.i.l.bf16 %v13448_v30  ;;  %vm14520_vm6 = vmmov %vm14519_vm7 }
0x1c2e   : > { %v9896_v50 = vpop.permute.xlu0 %9895 }
0x1c2f   : > { %v9898_v28 = vunpack.i.h.bf16 %v9896_v50  ;;  %v9897_v53 = vunpack.i.l.bf16 %v9896_v50 }
0x1c30   : > { %v9921_v59 = vpop.permute.xlu1 %9920 }
0x1c31   : > { %v9923_v61 = vunpack.i.h.bf16 %v9921_v59  ;;  %v9922_v1 = vunpack.i.l.bf16 %v9921_v59 }
0x1c32   : > { %v9901_v57 = vpop.permute.xlu0 %9900 }
0x1c33   : > { %v6963_v31 = vsel %vm14506_vm4, %v9898_v28, %v9923_v61  ;;  %v6962_v48 = vsel %vm14507_vm2, %v9897_v53, %v9922_v1  ;;  %v9903_v44 = vunpack.i.h.bf16 %v9901_v57  ;;  %v9902_v39 = vunpack.i.l.bf16 %v9901_v57  ;;  %vm14514_vm4 = vmmov %vm14510_vm1 }
0x1c34   : > { %v8862_v0 = vpack.c.bf16 %v6963_v31, %v6962_v48  ;;  %v9926_v19 = vpop.permute.xlu1 %9925  ;;  %vm14515_vm2 = vmmov %vm14510_vm1  ;;  %v9878_v57 = vunpack.i.h.bf16 %v13446_v7  ;;  %v9877_v31 = vunpack.i.l.bf16 %v13446_v7 }
0x1c35   : > { %v6958_v51 = vsel %vm14508_vm13, %v9922_v1, %v9902_v39  ;;  %v6959_v24 = vsel %vm14509_vm15, %v9923_v61, %v9903_v44  ;;  %v9928_v55 = vunpack.i.h.bf16 %v9926_v19  ;;  %v9927_v3 = vunpack.i.l.bf16 %v9926_v19  ;;  %vm14516_vm13 = vmmov %vm14510_vm1 }
0x1c36   : > { %v9906_v52 = vpop.permute.xlu0 %9905  ;;  %8863 = vmatprep.subr.msk.bf16.mxu0 %vm14304_vm12, %v8862_v0  ;;  %vm14517_vm15 = vmmov %vm14510_vm1  ;;  %v8891_v41 = vpack.c.bf16 %v6959_v24, %v6958_v51  ;;  %v8894_v61 = vpack.c.bf16 %v6953_v62, %v6952_v16  ;;  %v9893_v1 = vunpack.i.h.bf16 %v13448_v30  ;;  %v8871_v30 = vpack.c.bf16 %v6965_v9, %v6964_v38 }
0x1c37   : > { %v6955_v11 = vsel %vm14514_vm4, %v9903_v44, %v9928_v55  ;;  %v6967_v25 = vsel %vm14515_vm2, %v9928_v55, %v9898_v28  ;;  %v6954_v26 = vsel %vm14516_vm13, %v9902_v39, %v9927_v3  ;;  %v6966_v49 = vsel %vm14517_vm15, %v9927_v3, %v9897_v53  ;;  %vm14521_vm4 = vmmov %vm14520_vm6 }
0x1c38   : > { %v8865_v37 = vpack.c.bf16 %v6967_v25, %v6966_v49  ;;  %v8888_v15 = vpack.c.bf16 %v6955_v11, %v6954_v26  ;;  %v9931_v40 = vpop.permute.xlu1 %9930  ;;  %v9908_v50 = vunpack.i.h.bf16 %v9906_v52  ;;  %v9907_v29 = vunpack.i.l.bf16 %v9906_v52  ;;  %vm14523_vm2 = vmmov %vm14521_vm4 }
0x1c39   : > { %v9933_v36 = vunpack.i.h.bf16 %v9931_v40  ;;  %v9932_v59 = vunpack.i.l.bf16 %v9931_v40  ;;  %v6957_v28 = vsel %vm14518_vm10, %v9883_v42, %v9873_v33  ;;  %v6897_v63 = vsel %vm14521_vm4, %v9878_v57, %v9893_v1  ;;  %vm14524_vm13 = vmmov %vm14523_vm2 }
0x1c3a   : > { %v9911_v53 = vpop.permute.xlu0 %9910  ;;  %8866 = vmatpush1.bf16.msk.msra.mxu0 %vm14307_vm0, %v8865_v37  ;;  %8889 = vmatprep.subr.msk.bf16.mxu1 %vm14489_vm11, %v8888_v15  ;;  %v8897_v39 = vpack.c.bf16 %v6957_v28, %v6956_v5  ;;  %vm14526_vm15 = vmmov %vm14523_vm2 }
0x1c3b   : > { %v6899_v56 = vsel %vm14519_vm7, %v9908_v50, %v9933_v36  ;;  %v6898_v45 = vsel %vm14520_vm6, %v9907_v29, %v9932_v59  ;;  %v9913_v47 = vunpack.i.h.bf16 %v9911_v53  ;;  %v9912_v42 = vunpack.i.l.bf16 %v9911_v53  ;;  %8869 = vmatprep.subr.msk.bf16.mxu0 %vm14304_vm12, %v8868_v6  ;;  %8892 = vmatpush1.bf16.msk.msra.mxu1 %vm14495_vm8, %v8891_v41  ;;  %vm14522_vm12 = vmmov %vm14521_vm4 }
0x1c3c   : > { %v8874_v48 = vpack.c.bf16 %v6899_v56, %v6898_v45  ;;  %v9936_v44 = vpop.permute.xlu1 %9935  ;;  %8895 = vmatprep.subr.msk.bf16.mxu1 %vm14489_vm11, %v8894_v61  ;;  %v6896_v6 = vsel %vm14522_vm12, %v9877_v31, %v9892_v32  ;;  %vm14525_vm11 = vmmov %vm14523_vm2 }
0x1c3d   : > { %v9938_v33 = vunpack.i.h.bf16 %v9936_v44  ;;  %v9937_v0 = vunpack.i.l.bf16 %v9936_v44  ;;  %v6894_v19 = vsel %vm14523_vm2, %v9932_v59, %v9912_v42  ;;  %v6895_v7 = vsel %vm14524_vm13, %v9933_v36, %v9913_v47  ;;  %vm14527_vm1 = vmmov %vm14523_vm2 }
0x1c3e   : > { %v9916_v51 = vpop.permute.xlu0 %9915  ;;  %8872 = vmatpush1.bf16.msk.msra.mxu0 %vm14307_vm0, %v8871_v30  ;;  %vm14528_vm10 = vmmov %vm14527_vm1  ;;  %v8880_v11 = vpack.c.bf16 %v6897_v63, %v6896_v6  ;;  %v8903_v49 = vpack.c.bf16 %v6895_v7, %v6894_v19  ;;  %vm14539_vm2 = vcmask 785408  }
0x1c3f   : > { %v6891_v43 = vsel %vm14525_vm11, %v9913_v47, %v9938_v33  ;;  %v6903_v24 = vsel %vm14526_vm15, %v9938_v33, %v9908_v50  ;;  %v6890_v55 = vsel %vm14527_vm1, %v9912_v42, %v9937_v0  ;;  %v6902_v3 = vsel %vm14528_vm10, %v9937_v0, %v9907_v29  ;;  %8875 = vmatprep.subr.msk.bf16.mxu0 %vm11285_vm9, %v8874_v48  ;;  %vm14530_vm0 = vmmov %vm14527_vm1 }
0x1c40   : > { %v8877_v62 = vpack.c.bf16 %v6903_v24, %v6902_v3  ;;  %v8900_v9 = vpack.c.bf16 %v6891_v43, %v6890_v55  ;;  %v9918_v16 = vunpack.i.h.bf16 %v9916_v51  ;;  %v9917_v10 = vunpack.i.l.bf16 %v9916_v51  ;;  %8898 = vmatpush1.bf16.msk.msra.mxu1 %vm14495_vm8, %v8897_v39  ;;  %v9941_v52 = vpop.permute.xlu1 %9940  ;;  %vm14533_vm7 = vmmov %vm14530_vm0 }
0x1c41   : > { %v9943_v25 = vunpack.i.h.bf16 %v9941_v52  ;;  %v9942_v26 = vunpack.i.l.bf16 %v9941_v52  ;;  %vm14534_vm6 = vmmov %vm14530_vm0  ;;  %vm14543_vm1 = vcmask 261120  }
0x1c42   : > { %v6893_v38 = vsel %vm14530_vm0, %v9893_v1, %v9918_v16  ;;  %8878 = vmatpush1.bf16.msk.msra.mxu0 %vm11324_vm3, %v8877_v62  ;;  %8901 = vmatprep.subr.msk.bf16.mxu1 %vm14348_vm14, %v8900_v9  ;;  %v6892_v15 = vsel %vm14533_vm7, %v9892_v32, %v9917_v10  ;;  %vm14535_vm8 = vmmov %vm14530_vm0  ;;  %v10072_v1 = vld [vmem:[%s13927_s11 + $0x60] sm:$0xff]   ;;  %v10073_v32 = vld [vmem:[%s13927_s11 + $0x68] sm:$0xff]  }
0x1c43   : > { %v6889_v8 = vsel %vm14534_vm6, %v9918_v16, %v9943_v25  ;;  %v6901_v40 = vsel %vm14535_vm8, %v9943_v25, %v9878_v57  ;;  %vm14536_vm4 = vmmov %vm14530_vm0  ;;  %8881 = vmatprep.subr.msk.bf16.mxu0 %vm11285_vm9, %v8880_v11  ;;  %v8909_v61 = vpack.c.bf16 %v6893_v38, %v6892_v15 }
0x1c44   : > { %v6888_v50 = vsel %vm14536_vm4, %v9917_v10, %v9942_v26  ;;  %vm14537_vm12 = vmmov %vm14530_vm0  ;;  %8904 = vmatpush1.bf16.msk.msra.mxu1 %vm14354_vm5, %v8903_v49 }
0x1c45   : > { %v6900_v29 = vsel %vm14537_vm12, %v9942_v26, %v9877_v31  ;;  %v8906_v36 = vpack.c.bf16 %v6889_v8, %v6888_v50  ;;  %vm14540_vm13 = vmmov %vm14539_vm2 }
0x1c46   : > { %v8883_v28 = vpack.c.bf16 %v6901_v40, %v6900_v29  ;;  %vm14541_vm11 = vmmov %vm14539_vm2 }
0x1c47   : > { %8907 = vmatprep.subr.msk.bf16.mxu1 %vm14348_vm14, %v8906_v36  ;;  %vm14542_vm15 = vmmov %vm14539_vm2 }
0x1c48   : > { %8884 = vmatpush1.bf16.msk.msra.mxu0 %vm11324_vm3, %v8883_v28  ;;  %8910 = vmatpush1.bf16.msk.msra.mxu1 %vm14354_vm5, %v8909_v61  ;;  %vm14544_vm10 = vmmov %vm14543_vm1 }
0x1c49   : > { %vm14545_vm0 = vmmov %vm14543_vm1 }
0x1c4a   : > { %vm14546_vm7 = vmmov %vm14545_vm0 }
0x1c4b   : > { %8885 = vmatmul.mubr.msk.bf16.vlgmr.msra.gmra.mxu0 %vm14539_vm2, %v10072_v1  ;;  %8911 = vmatmul.mubr.msk.bf16.vlgmr.msra.gmra.mxu1 %vm14540_vm13, %v10072_v1  ;;  %v7021_v30 = vpop.permute.xlu0 %7020  ;;  %vm14547_vm6 = vmmov %vm14536_vm4 }
0x1c4c   : > { %7086 = vmatprep.mubr.bf16.mxu0 %v14103_v20  ;;  %7139 = vmatprep.mubr.bf16.mxu1 %v14103_v20  ;;  %vm14548_vm8 = vmmov %vm14536_vm4 }
0x1c4d   : > { %v7026_v31 = vpop.permute.xlu1 %7025  ;;  %vm14549_vm12 = vmmov %vm14536_vm4 }
0x1c4e   : > { %vm14550_vm2 = vmmov %vm14536_vm4 }
0x1c4f   : > { %v7011_v63 = vpop.permute.xlu0 %7010  ;;  %vm14551_vm13 = vmmov %vm14550_vm2 }
0x1c51   : > { %v7016_v19 = vpop.permute.xlu1 %7015 }
0x1c53   : > { %8886 = vmatmul.mubr.msk.bf16.gmra.mxu0 %vm14541_vm11, %v10073_v32  ;;  %8912 = vmatmul.mubr.msk.bf16.gmra.mxu1 %vm14542_vm15, %v10073_v32  ;;  %vm14552_vm11 = vmmov %vm14550_vm2 }
0x1c54   : > { %7222 = vmatprep.mubr.bf16.mxu0 %v14103_v20  ;;  %7275 = vmatprep.mubr.bf16.mxu1 %v14103_v20  ;;  %vm14553_vm15 = vmmov %vm14550_vm2 }
0x1d0b   : > { %v7078_v53 = vpop.f32.mrf.mxu0  ;;  %v7131_v56 = vpop.f32.mrf.mxu1 }
0x1d0c   : > { %v7079_v51 = vadd.f32 %v7078_v53, %v7011_v63 }
0x1d0d   : > { %v7080_v45 = vpop.f32.mrf.mxu0  ;;  %v7133_v47 = vpop.f32.mrf.mxu1 }
0x1d0e   : > { %v7081_v11 = vadd.f32 %v7080_v45, %v7011_v63  ;;  %v7134_v25 = vadd.f32 %v7133_v47, %v7011_v63 }
0x1d0f   : > { %v7082_v42 = vpop.f32.mrf.mxu0  ;;  %v7135_v57 = vpop.f32.mrf.mxu1 }
0x1d10   : > { %v7083_v15 = vadd.f32 %v7082_v42, %v7016_v19  ;;  %v7136_v8 = vadd.f32 %v7135_v57, %v7016_v19  ;;  %v7153_v47 = vmax.f32 %v7134_v25, 0.0 }
0x1d11   : > { %v7084_v48 = vpop.f32.mrf.mxu0  ;;  %v7137_v44 = vpop.f32.mrf.mxu1 }
0x1d12   : > { %v7085_v43 = vadd.f32 %v7084_v48, %v7016_v19  ;;  %v7138_v62 = vadd.f32 %v7137_v44, %v7016_v19  ;;  %v7132_v44 = vadd.f32 %v7131_v56, %v7011_v63  ;;  %v7156_v42 = vmax.f32 %v7136_v8, 0.0  ;;  %v10074_v63 = vld [vmem:[%s13929_s13 + $0x60] sm:$0xff]  }
0x1d13   : > { %v7088_v39 = vpop.f32.mrf.mxu0  ;;  %v7141_v33 = vpop.f32.mrf.mxu1 }
0x1d14   : > { %v7089_v9 = vadd.f32 %v7088_v39, %v7021_v30  ;;  %v7142_v26 = vadd.f32 %v7141_v33, %v7021_v30  ;;  %v7155_v29 = vmax.f32 %v7085_v43, 0.0  ;;  %v7157_v1 = vmax.f32 %v7138_v62, 0.0 }
0x1d15   : > { %v7090_v0 = vpop.f32.mrf.mxu0  ;;  %v7143_v6 = vpop.f32.mrf.mxu1  ;;  %v7151_v39 = vmax.f32 %v7081_v11, 0.0  ;;  %v7152_v43 = vmax.f32 %v7132_v44, 0.0 }
0x1d16   : > { %v7091_v24 = vadd.f32 %v7090_v0, %v7021_v30  ;;  %v7144_v16 = vadd.f32 %v7143_v6, %v7021_v30  ;;  %v7158_v32 = vmax.f32 %v7089_v9, 0.0  ;;  %v7160_v0 = vmax.f32 %v7142_v26, 0.0 }
0x1d17   : > { %v7092_v7 = vpop.f32.mrf.mxu0  ;;  %v7145_v3 = vpop.f32.mrf.mxu1  ;;  %v7154_v30 = vmax.f32 %v7083_v15, 0.0  ;;  %v7167_v57 = vpack.c.bf16 %v7155_v29, %v7151_v39  ;;  %v7168_v56 = vpack.c.bf16 %v7156_v42, %v7152_v43 }
0x1d18   : > { %v7093_v55 = vadd.f32 %v7092_v7, %v7026_v31  ;;  %v7146_v10 = vadd.f32 %v7145_v3, %v7026_v31  ;;  %v7159_v36 = vmax.f32 %v7091_v24, 0.0  ;;  %v7161_v53 = vmax.f32 %v7144_v16, 0.0  ;;  %v7330_v3 = vpop.permute.xlu1 %7329 }
0x1d19   : > { %v7094_v52 = vpop.f32.mrf.mxu0  ;;  %v7147_v38 = vpop.f32.mrf.mxu1  ;;  %v7169_v7 = vpack.c.bf16 %v7157_v1, %v7153_v47 }
0x1d1a   : > { %v7095_v49 = vadd.f32 %v7094_v52, %v7026_v31  ;;  %v7162_v40 = vmax.f32 %v7093_v55, 0.0  ;;  %v7148_v50 = vadd.f32 %v7147_v38, %v7026_v31  ;;  %v7164_v28 = vmax.f32 %v7146_v10, 0.0  ;;  %v7325_v55 = vpop.permute.xlu0 %7324 }
0x1d1b   : > { %v7150_v31 = vmax.f32 %v7079_v51, 0.0  ;;  %v10075_v51 = vld [vmem:[%s13929_s13 + $0x68] sm:$0xff]  }
0x1d1c   : > { %v7163_v61 = vmax.f32 %v7095_v49, 0.0  ;;  %v7165_v48 = vmax.f32 %v7148_v50, 0.0  ;;  %v7170_v33 = vpack.c.bf16 %v7162_v40, %v7158_v32  ;;  %v7172_v19 = vpack.c.bf16 %v7164_v28, %v7160_v0  ;;  %v7320_v15 = vpop.permute.xlu1 %7319 }
0x1d1d   : > { %v7166_v24 = vpack.c.bf16 %v7154_v30, %v7150_v31 }
0x1d1e   : > { %v7171_v45 = vpack.c.bf16 %v7163_v61, %v7159_v36  ;;  %v7173_v6 = vpack.c.bf16 %v7165_v48, %v7161_v53  ;;  %v7315_v25 = vpop.permute.xlu0 %7314 }
0x1d20   : > { %7202 = vmatprep.subr.bf16.mxu0 %v7171_v45  ;;  %7255 = vmatprep.subr.bf16.mxu1 %v7173_v6 }
0x1d21   : > { %7203 = vmatpush1.bf16.msra.mxu0 %v7170_v33  ;;  %7256 = vmatpush1.bf16.msra.mxu1 %v7172_v19 }
0x1d22   : > { %7204 = vmatprep.subr.bf16.mxu0 %v7167_v57  ;;  %7257 = vmatprep.subr.bf16.mxu1 %v7169_v7 }
0x1d25   : > { %7205 = vmatpush1.bf16.msra.mxu0 %v7166_v24  ;;  %7258 = vmatpush1.bf16.msra.mxu1 %v7168_v56 }
0x1d28   : > { %8915 = vmatmul.mubr.msk.bf16.vlgmr.msra.gmra.mxu0 %vm14543_vm1, %v10074_v63  ;;  %8917 = vmatmul.mubr.msk.bf16.vlgmr.msra.gmra.mxu1 %vm14544_vm10, %v10074_v63  ;;  %vm14554_vm1 = vmmov %vm14550_vm2 }
0x1d29   : > { %7232 = vmatprep.mubr.bf16.mxu0 %v14103_v20  ;;  %7285 = vmatprep.mubr.bf16.mxu1 %v14103_v20  ;;  %vm14555_vm10 = vmmov %vm14554_vm1 }
0x1d30   : > { %8916 = vmatmul.mubr.msk.bf16.gmra.mxu0 %vm14545_vm0, %v10075_v51  ;;  %8918 = vmatmul.mubr.msk.bf16.gmra.mxu1 %vm14546_vm7, %v10075_v51  ;;  %vm14556_vm0 = vmmov %vm14554_vm1 }
0x1d31   : > { %7588 = vmatprep.mubr.bf16.mxu0 %v14103_v20  ;;  %7641 = vmatprep.mubr.bf16.mxu1 %v14103_v20  ;;  %vm14557_vm7 = vmmov %vm14556_vm0 }
0x1de8   : > { %v7224_v62 = vpop.f32.mrf.mxu0  ;;  %v7277_v9 = vpop.f32.mrf.mxu1 }
0x1de9   : > { %v7296_v10 = vadd.f32 %v7224_v62, %v13330_v17  ;;  %v7298_v29 = vadd.f32 %v7277_v9, %v13346_v35 }
0x1dea   : > { %v7226_v16 = vpop.f32.mrf.mxu0  ;;  %v7279_v52 = vpop.f32.mrf.mxu1 }
0x1deb   : > { %v7297_v26 = vadd.f32 %v7226_v16, %v13338_v13  ;;  %v13582_v50 = vadd.f32 %v7315_v25, %v7296_v10  ;;  %v7299_v61 = vadd.f32 %v7279_v52, %v13353_v27  ;;  %v13598_v44 = vadd.f32 %v7315_v25, %v7298_v29  ;;  %v8934_v29 = vld [vmem:[%s13930_s14 + $0xf8] sm:$0xff] }
0x1dec   : > { %v7228_v11 = vpop.f32.mrf.mxu0  ;;  %v7281_v38 = vpop.f32.mrf.mxu1 }
0x1ded   : > { %v7300_v49 = vadd.f32 %v7228_v11, %v13333_v34  ;;  %v7302_v8 = vadd.f32 %v7281_v38, %v13340_v4  ;;  %v13590_v34 = vadd.f32 %v7315_v25, %v7297_v26  ;;  %v13605_v0 = vadd.f32 %v7315_v25, %v7299_v61  ;;  %v8926_v38 = vld [vmem:[%s13928_s12 + $0xf8] sm:$0xff]  ;;  %v8683_v61 = vld [vmem:[%s13932_s16 + $0x10] sm:$0xff] }
0x1dee   : > { %v7230_v40 = vpop.f32.mrf.mxu0  ;;  %v7283_v28 = vpop.f32.mrf.mxu1 }
0x1def   : > { %v13585_v36 = vadd.f32 %v7320_v15, %v7300_v49  ;;  %v7301_v17 = vadd.f32 %v7230_v40, %v13342_v2  ;;  %v7303_v13 = vadd.f32 %v7283_v28, %v13348_v12  ;;  %v13592_v32 = vadd.f32 %v7320_v15, %v7302_v8  ;;  %v8925_v49 = vld [vmem:[%s13928_s12 + $0xf0] sm:$0xff]  ;;  %v8924_v8 = vld [vmem:[%s13928_s12 + $0xe8] sm:$0xff] }
0x1df0   : > { %v7234_v1 = vpop.f32.mrf.mxu0  ;;  %v7287_v53 = vpop.f32.mrf.mxu1  ;;  %v8933_v40 = vld [vmem:[%s13930_s14 + $0xf0] sm:$0xff]  ;;  %v8932_v28 = vld [vmem:[%s13930_s14 + $0xe8] sm:$0xff] }
0x1df1   : > { %v13594_v4 = vadd.f32 %v7320_v15, %v7301_v17  ;;  %v9944_v35 = vpack.i.bf16 %v13585_v36, %v13582_v50  ;;  %v13600_v2 = vadd.f32 %v7320_v15, %v7303_v13  ;;  %v9949_v33 = vpack.i.bf16 %v13592_v32, %v13598_v44  ;;  %v8923_v15 = vld [vmem:[%s13928_s12 + $0xe0] sm:$0xff]  ;;  %v8684_v13 = vld [vmem:[%s13932_s16 + $0x18] sm:$0xff] }
0x1df2   : > { %v7236_v48 = vpop.f32.mrf.mxu0  ;;  %v7289_v39 = vpop.f32.mrf.mxu1  ;;  %v7304_v6 = vadd.f32 %v7234_v1, %v13378_v18  ;;  %v7306_v31 = vadd.f32 %v7287_v53, %v13384_v14  ;;  %v7512_v52 = vpack.c.bf16 %v13585_v36, %v13582_v50  ;;  %v7514_v11 = vpack.c.bf16 %v13592_v32, %v13598_v44  ;;  %v8931_v17 = vld [vmem:[%s13930_s14 + $0xe0] sm:$0xff] }
0x1df3   : > { %9945 = vrot.lane.b32.xlu0 %v9944_v35, %s14174_s2  ;;  %v9959_v12 = vpack.i.bf16 %v13594_v4, %v13590_v34  ;;  %v7305_v45 = vadd.f32 %v7236_v48, %v13371_v21  ;;  %v7307_v42 = vadd.f32 %v7289_v39, %v13380_v54  ;;  %v7513_v9 = vpack.c.bf16 %v13594_v4, %v13590_v34 }
0x1df4   : > { %v7238_v27 = vpop.f32.mrf.mxu0  ;;  %v7291_v30 = vpop.f32.mrf.mxu1  ;;  %v13630_v14 = vadd.f32 %v7325_v55, %v7304_v6  ;;  %v13636_v63 = vadd.f32 %v7325_v55, %v7306_v31  ;;  %v7515_v16 = vpack.c.bf16 %v13600_v2, %v13605_v0 }
0x1df5   : > { %v7308_v47 = vadd.f32 %v7238_v27, %v13368_v22  ;;  %9960 = vrot.lane.b32.xlu1 %v9959_v12, %s14174_s2  ;;  %v7310_v57 = vadd.f32 %v7291_v30, %v13373_v60  ;;  %v9964_v22 = vpack.i.bf16 %v13600_v2, %v13605_v0  ;;  %v13623_v18 = vadd.f32 %v7325_v55, %v7305_v45 }
0x1df6   : > { %v7240_v19 = vpop.f32.mrf.mxu0  ;;  %v7293_v21 = vpop.f32.mrf.mxu1 }
0x1df7   : > { %v7309_v7 = vadd.f32 %v7240_v19, %v13375_v46  ;;  %9950 = vrot.lane.b32.xlu0 %v9949_v33, %s14174_s2  ;;  %v13620_v43 = vadd.f32 %v7330_v3, %v7308_v47  ;;  %v7311_v24 = vadd.f32 %v7293_v21, %v13382_v58  ;;  %v13625_v54 = vadd.f32 %v7330_v3, %v7310_v57 }
0x1df8   : > { %v13632_v46 = vadd.f32 %v7325_v55, %v7307_v42 }
0x1df9   : > { %v13627_v60 = vadd.f32 %v7330_v3, %v7309_v7  ;;  %9965 = vrot.lane.b32.xlu1 %v9964_v22, %s14174_s2  ;;  %v13634_v56 = vadd.f32 %v7330_v3, %v7311_v24  ;;  %v7516_v51 = vpack.c.bf16 %v13620_v43, %v13630_v14  ;;  %v7518_v3 = vpack.c.bf16 %v13625_v54, %v13636_v63 }
0x1dfa   : > { %v9974_v55 = vpack.i.bf16 %v13620_v43, %v13630_v14  ;;  %v9979_v25 = vpack.i.bf16 %v13625_v54, %v13636_v63 }
0x1dfb   : > { %9955 = vrot.lane.b32.xlu0 %v9944_v35, %s14363_s18  ;;  %v7517_v58 = vpack.c.bf16 %v13627_v60, %v13623_v18  ;;  %v7519_v62 = vpack.c.bf16 %v13634_v56, %v13632_v46  ;;  %v9999_v10 = vpack.i.bf16 %v13627_v60, %v13623_v18  ;;  %v10004_v26 = vpack.i.bf16 %v13634_v56, %v13632_v46 }
0x1dfd   : > { %9970 = vrot.lane.b32.xlu1 %v9959_v12, %s14363_s18  ;;  %7560 = vmatprep.subr.bf16.mxu0 %v7517_v58 }
0x1dfe   : > { %7561 = vmatpush1.bf16.msra.mxu0 %v7516_v51  ;;  %7613 = vmatprep.subr.bf16.mxu1 %v7519_v62 }
0x1dff   : > { %7614 = vmatpush1.bf16.msra.mxu1 %v7518_v3  ;;  %9975 = vrot.lane.b32.xlu0 %v9974_v55, %s14174_s2 }
0x1e00   : > { %7562 = vmatprep.subr.bf16.mxu0 %v7513_v9  ;;  %7615 = vmatprep.subr.bf16.mxu1 %v7515_v16 }
0x1e01   : > { %10000 = vrot.lane.b32.xlu1 %v9999_v10, %s14174_s2 }
0x1e02   : > { %7563 = vmatpush1.bf16.msra.mxu0 %v7512_v52 }
0x1e03   : > { %7616 = vmatpush1.bf16.msra.mxu1 %v7514_v11  ;;  %9980 = vrot.lane.b32.xlu0 %v9979_v25, %s14174_s2 }
0x1e05   : > { %10005 = vrot.lane.b32.xlu1 %v10004_v26, %s14174_s2 }
0x1e07   : > { %9985 = vrot.lane.b32.xlu0 %v9974_v55, %s14363_s18 }
0x1e09   : > { %10010 = vrot.lane.b32.xlu1 %v9999_v10, %s14363_s18 }
0x1e0b   : > { %9990 = vrot.lane.b32.xlu0 %v9979_v25, %s14363_s18 }
0x1e0d   : > { %10015 = vrot.lane.b32.xlu1 %v10004_v26, %s14363_s18 }
0x1e0f   : > { %9995 = vrot.lane.b32.xlu0 %v9949_v33, %s14363_s18 }
0x1e11   : > { %10020 = vrot.lane.b32.xlu1 %v9964_v22, %s14363_s18  ;;  %s10135_s18 = scalar_lea.vmem %s10134_s29, 6144 }
0x1e12   : > { %p10137_p3 = scmp.lt.s32.totalorder %s10135_s18, %s10129_s19 }
0x1e13   : > { %7532 = vperm.xlu0 %9062, %v8925_v49  }
0x1e14   : > { %p10138_p4 = por %p10137_p3, %p10136_p2 }
0x1e15   : > { %7537 = vperm.xlu1 %9063, %v8926_v38  }
0x1e16   : > { %p10139_p5 = pnand %p10138_p4, %p10132_p1 }
0x1e17   : > { %7522 = vperm.xlu0 %9062, %v8923_v15  }
0x1e19   : > { %7527 = vperm.xlu1 %9063, %v8924_v8  }
0x1e1b   : > { %7836 = vperm.xlu0 %9062, %v8933_v40  }
0x1e1d   : > { %7841 = vperm.xlu1 %9063, %v8934_v29  }
0x1e1f   : > { %7826 = vperm.xlu0 %9062, %v8931_v17  }
0x1e21   : > { %7831 = vperm.xlu1 %9063, %v8932_v28  }
0x1e23   : > { %7870 = vperm.xlu0 %9062, %v8683_v61  }
0x1e25   : > { %7875 = vperm.xlu1 %9063, %v8684_v13  }
0x1e65   : > { %v9946_v1 = vpop.permute.xlu0 %9945 }
0x1e66   : > { %v9948_v47 = vunpack.i.h.bf16 %v9946_v1  ;;  %v9947_v30 = vunpack.i.l.bf16 %v9946_v1 }
0x1e67   : > { %v9961_v53 = vpop.permute.xlu1 %9960 }
0x1e68   : > { %v9963_v12 = vunpack.i.h.bf16 %v9961_v53  ;;  %v9962_v27 = vunpack.i.l.bf16 %v9961_v53 }
0x1e69   : > { %v9951_v35 = vpop.permute.xlu0 %9950 }
0x1e6a   : > { %v7473_v6 = vsel %vm14547_vm6, %v9948_v47, %v9963_v12  ;;  %v7472_v42 = vsel %vm14548_vm8, %v9947_v30, %v9962_v27  ;;  %v9952_v22 = vunpack.i.l.bf16 %v9951_v35  ;;  %v9953_v10 = vunpack.i.h.bf16 %v9951_v35  ;;  %vm14558_vm6 = vmmov %vm14556_vm0 }
0x1e6b   : > { %v9966_v48 = vpop.permute.xlu1 %9965  ;;  %v8944_v16 = vpack.c.bf16 %v7473_v6, %v7472_v42  ;;  %vm14559_vm8 = vmmov %vm14556_vm0 }
0x1e6c   : > { %v9968_v24 = vunpack.i.h.bf16 %v9966_v48  ;;  %v9967_v58 = vunpack.i.l.bf16 %v9966_v48  ;;  %v7468_v15 = vsel %vm14552_vm11, %v9962_v27, %v9952_v22 }
0x1e6d   : > { %v13704_v39 = vpop.permute.xlu0 %9955 }
0x1e6e   : > { %v7465_v8 = vsel %vm14553_vm15, %v9953_v10, %v9968_v24  ;;  %v7477_v40 = vsel %vm14554_vm1, %v9968_v24, %v9948_v47  ;;  %v7464_v29 = vsel %vm14555_vm10, %v9952_v22, %v9967_v58 }
0x1e6f   : > { %v13706_v45 = vpop.permute.xlu1 %9970 }
0x1e70   : > { %v9972_v22 = vunpack.i.l.bf16 %v13706_v45 }
0x1e71   : > { %v9976_v33 = vpop.permute.xlu0 %9975 }
0x1e72   : > { %v9978_v19 = vunpack.i.h.bf16 %v9976_v33  ;;  %v9977_v31 = vunpack.i.l.bf16 %v9976_v33 }
0x1e73   : > { %v10001_v57 = vpop.permute.xlu1 %10000 }
0x1e74   : > { %v10003_v7 = vunpack.i.h.bf16 %v10001_v57  ;;  %v10002_v21 = vunpack.i.l.bf16 %v10001_v57 }
0x1e75   : > { %v9981_v51 = vpop.permute.xlu0 %9980 }
0x1e76   : > { %v7475_v62 = vsel %vm14536_vm4, %v9978_v19, %v10003_v7  ;;  %v7474_v3 = vsel %vm14549_vm12, %v9977_v31, %v10002_v21  ;;  %v9983_v55 = vunpack.i.h.bf16 %v9981_v51  ;;  %v9982_v9 = vunpack.i.l.bf16 %v9981_v51  ;;  %vm14560_vm4 = vmmov %vm14556_vm0 }
0x1e77   : > { %v8938_v52 = vpack.c.bf16 %v7475_v62, %v7474_v3  ;;  %v10006_v11 = vpop.permute.xlu1 %10005  ;;  %v7476_v53 = vsel %vm14560_vm4, %v9967_v58, %v9947_v30  ;;  %vm14561_vm12 = vmmov %vm14556_vm0  ;;  %v9958_v51 = vunpack.i.h.bf16 %v13704_v39  ;;  %v9957_v62 = vunpack.i.l.bf16 %v13704_v39 }
0x1e78   : > { %v7470_v25 = vsel %vm14550_vm2, %v10002_v21, %v9982_v9  ;;  %v7471_v26 = vsel %vm14551_vm13, %v10003_v7, %v9983_v55  ;;  %v10008_v49 = vunpack.i.h.bf16 %v10006_v11  ;;  %v10007_v38 = vunpack.i.l.bf16 %v10006_v11 }
0x1e79   : > { %v9986_v17 = vpop.permute.xlu0 %9985  ;;  %8939 = vmatprep.subr.msk.bf16.mxu0 %vm11285_vm9, %v8938_v52  ;;  %v8967_v35 = vpack.c.bf16 %v7471_v26, %v7470_v25  ;;  %v8970_v7 = vpack.c.bf16 %v7465_v8, %v7464_v29  ;;  %v9973_v21 = vunpack.i.h.bf16 %v13706_v45  ;;  %vm14562_vm2 = vcmp.lt.s32.totalorder %v10593_v23, 16  ;;  %v10077_v23 = vld [vmem:[%s13927_s11 + $0x78] sm:$0xff]  }
0x1e7a   : > { %v7467_v28 = vsel %vm14556_vm0, %v9983_v55, %v10008_v49  ;;  %v7479_v61 = vsel %vm14557_vm7, %v10008_v49, %v9978_v19  ;;  %v7466_v13 = vsel %vm14558_vm6, %v9982_v9, %v10007_v38  ;;  %v7478_v1 = vsel %vm14559_vm8, %v10007_v38, %v9977_v31  ;;  %vm14563_vm13 = vmmov %vm14562_vm2 }
0x1e7b   : > { %v8941_v48 = vpack.c.bf16 %v7479_v61, %v7478_v1  ;;  %v8964_v27 = vpack.c.bf16 %v7467_v28, %v7466_v13  ;;  %v10011_v47 = vpop.permute.xlu1 %10010  ;;  %v9988_v33 = vunpack.i.h.bf16 %v9986_v17  ;;  %v9987_v6 = vunpack.i.l.bf16 %v9986_v17  ;;  %vm14564_vm11 = vmmov %vm14562_vm2 }
0x1e7c   : > { %v10013_v42 = vunpack.i.h.bf16 %v10011_v47  ;;  %v10012_v57 = vunpack.i.l.bf16 %v10011_v47  ;;  %v7469_v19 = vsel %vm14561_vm12, %v9963_v12, %v9953_v10  ;;  %v8947_v45 = vpack.c.bf16 %v7477_v40, %v7476_v53  ;;  %vm14566_vm15 = vmmov %vm14562_vm2 }
0x1e7d   : > { %v9991_v31 = vpop.permute.xlu0 %9990  ;;  %8942 = vmatpush1.bf16.msk.msra.mxu0 %vm11324_vm3, %v8941_v48  ;;  %8965 = vmatprep.subr.msk.bf16.mxu1 %vm14348_vm14, %v8964_v27  ;;  %v8973_v9 = vpack.c.bf16 %v7469_v19, %v7468_v15  ;;  %v7409_v5 = vsel %vm14564_vm11, %v9958_v51, %v9973_v21  ;;  %vm14567_vm1 = vmmov %vm14562_vm2  ;;  %v14572_v15 = vld [vmem:[#allocation28_spill] sm:$0xff]  ;;  %v14577_v48 = vld [vmem:[#allocation30_spill] sm:$0xff] }
0x1e7e   : > { %v7411_v30 = vsel %vm14562_vm2, %v9988_v33, %v10013_v42  ;;  %v7410_v24 = vsel %vm14563_vm13, %v9987_v6, %v10012_v57  ;;  %v9993_v58 = vunpack.i.h.bf16 %v9991_v31  ;;  %v9992_v12 = vunpack.i.l.bf16 %v9991_v31  ;;  %8945 = vmatprep.subr.msk.bf16.mxu0 %vm11285_vm9, %v8944_v16  ;;  %8968 = vmatpush1.bf16.msk.msra.mxu1 %vm14354_vm5, %v8967_v35  ;;  %vm14565_vm9 = vmmov %vm14562_vm2  ;;  %v14575_v35 = vld [vmem:[#allocation29_spill] sm:$0xff] }
0x1e7f   : > { %v8950_v3 = vpack.c.bf16 %v7411_v30, %v7410_v24  ;;  %v10016_v55 = vpop.permute.xlu1 %10015  ;;  %8971 = vmatprep.subr.msk.bf16.mxu1 %vm14348_vm14, %v8970_v7  ;;  %v7408_v16 = vsel %vm14565_vm9, %v9957_v62, %v9972_v22  ;;  %vm14568_vm14 = vmmov %vm14567_vm1  ;;  %vm14573_vm6 = vnez %v14572_v15  ;;  %vm14576_vm8 = vnez %v14575_v35 }
0x1e80   : > { %v10018_v10 = vunpack.i.h.bf16 %v10016_v55  ;;  %v10017_v52 = vunpack.i.l.bf16 %v10016_v55  ;;  %v7406_v11 = vsel %vm14566_vm15, %v10012_v57, %v9992_v12  ;;  %v7407_v39 = vsel %vm14567_vm1, %v10013_v42, %v9993_v58  ;;  %vm14569_vm10 = vmmov %vm14567_vm1  ;;  %v14584_v57 = vld [vmem:[#allocation31_spill] sm:$0xff] }
0x1e81   : > { %v9996_v25 = vpop.permute.xlu0 %9995  ;;  %8948 = vmatpush1.bf16.msk.msra.mxu0 %vm11324_vm3, %v8947_v45  ;;  %vm14570_vm0 = vmmov %vm14567_vm1  ;;  %v8956_v28 = vpack.c.bf16 %v7409_v5, %v7408_v16  ;;  %v8979_v1 = vpack.c.bf16 %v7407_v39, %v7406_v11  ;;  %vm14578_vm4 = vnez %v14577_v48  ;;  %vm14585_vm9 = vnez %v14584_v57 }
0x1e82   : > { %v7403_v37 = vsel %vm14568_vm14, %v9993_v58, %v10018_v10  ;;  %v7415_v26 = vsel %vm14569_vm10, %v10018_v10, %v9988_v33  ;;  %v7402_v49 = vsel %vm14570_vm0, %v9992_v12, %v10017_v52  ;;  %vm14571_vm7 = vmmov %vm14570_vm0  ;;  %8951 = vmatprep.subr.msk.bf16.mxu0 %vm14573_vm6, %v8950_v3  ;;  %v9998_v29 = vunpack.i.h.bf16 %v9996_v25  ;;  %8974 = vmatpush1.bf16.msk.msra.mxu1 %vm14354_vm5, %v8973_v9 }
0x1e83   : > { %v7414_v38 = vsel %vm14571_vm7, %v10017_v52, %v9987_v6  ;;  %v8976_v40 = vpack.c.bf16 %v7403_v37, %v7402_v49  ;;  %v9997_v41 = vunpack.i.l.bf16 %v9996_v25  ;;  %v10021_v17 = vpop.permute.xlu1 %10020  ;;  %vm14574_vm3 = vmmov %vm14570_vm0  ;;  %vm14586_vm15 = vcmask 785408  }
0x1e84   : > { %v8953_v8 = vpack.c.bf16 %v7415_v26, %v7414_v38  ;;  %v10023_v61 = vunpack.i.h.bf16 %v10021_v17  ;;  %v10022_v13 = vunpack.i.l.bf16 %v10021_v17  ;;  %v7405_v53 = vsel %vm14574_vm3, %v9973_v21, %v9998_v29  ;;  %vm14579_vm12 = vmmov %vm14570_vm0  ;;  %v10076_v21 = vld [vmem:[%s13927_s11 + $0x70] sm:$0xff]  }
0x1e85   : > { %8977 = vmatprep.subr.msk.bf16.mxu1 %vm14578_vm4, %v8976_v40  ;;  %v7404_v27 = vsel %vm14579_vm12, %v9972_v22, %v9997_v41  ;;  %vm14580_vm2 = vmmov %vm14570_vm0 }
0x1e86   : > { %8954 = vmatpush1.bf16.msk.msra.mxu0 %vm14576_vm8, %v8953_v8  ;;  %v7401_v59 = vsel %vm14580_vm2, %v9998_v29, %v10023_v61  ;;  %vm14581_vm5 = vmmov %vm14570_vm0  ;;  %8980 = vmatpush1.bf16.msk.msra.mxu1 %vm14585_vm9, %v8979_v1  ;;  %v8985_v7 = vpack.c.bf16 %v7405_v53, %v7404_v27 }
0x1e87   : > { %v7413_v47 = vsel %vm14581_vm5, %v10023_v61, %v9958_v51  ;;  %vm14582_vm13 = vmmov %vm14570_vm0  ;;  %8957 = vmatprep.subr.msk.bf16.mxu0 %vm14573_vm6, %v8956_v28 }
0x1e88   : > { %v7400_v33 = vsel %vm14582_vm13, %v9997_v41, %v10022_v13  ;;  %vm14583_vm11 = vmmov %vm14570_vm0  ;;  %vm14590_vm0 = vcmask 261120  }
0x1e89   : > { %v7412_v6 = vsel %vm14583_vm11, %v10022_v13, %v9957_v62  ;;  %v8982_v42 = vpack.c.bf16 %v7401_v59, %v7400_v33  ;;  %vm14587_vm1 = vmmov %vm14586_vm15 }
0x1e8a   : > { %v8959_v19 = vpack.c.bf16 %v7413_v47, %v7412_v6  ;;  %vm14588_vm14 = vmmov %vm14587_vm1 }
0x1e8b   : > { %8983 = vmatprep.subr.msk.bf16.mxu1 %vm14578_vm4, %v8982_v42  ;;  %vm14589_vm10 = vmmov %vm14587_vm1 }
0x1e8c   : > { %8960 = vmatpush1.bf16.msk.msra.mxu0 %vm14576_vm8, %v8959_v19  ;;  %8986 = vmatpush1.bf16.msk.msra.mxu1 %vm14585_vm9, %v8985_v7  ;;  %vm14591_vm7 = vmmov %vm14590_vm0 }
0x1e8d   : > { %vm14592_vm6 = vmmov %vm14590_vm0 }
0x1e8e   : > { %v7533_v12 = vpop.permute.xlu0 %7532  ;;  %vm14593_vm3 = vmmov %vm14590_vm0 }
0x1e8f   : > { %8961 = vmatmul.mubr.msk.bf16.vlgmr.msra.gmra.mxu0 %vm14586_vm15, %v10076_v21  ;;  %8987 = vmatmul.mubr.msk.bf16.vlgmr.msra.gmra.mxu1 %vm14587_vm1, %v10076_v21  ;;  %vm14594_vm8 = vmmov %vm14590_vm0 }
0x1e90   : > { %7598 = vmatprep.mubr.bf16.mxu0 %v14103_v20  ;;  %7651 = vmatprep.mubr.bf16.mxu1 %v14103_v20  ;;  %v7538_v51 = vpop.permute.xlu1 %7537  ;;  %vm14595_vm4 = vmmov %vm14590_vm0 }
0x1e92   : > { %v7523_v52 = vpop.permute.xlu0 %7522 }
0x1e94   : > { %v7528_v16 = vpop.permute.xlu1 %7527 }
0x1e97   : > { %8962 = vmatmul.mubr.msk.bf16.gmra.mxu0 %vm14588_vm14, %v10077_v23  ;;  %8988 = vmatmul.mubr.msk.bf16.gmra.mxu1 %vm14589_vm10, %v10077_v23 }
0x1e98   : > { %7734 = vmatprep.mubr.bf16.mxu0 %v14103_v20  ;;  %7787 = vmatprep.mubr.bf16.mxu1 %v14103_v20 }
0x1f4f   : > { %v7590_v22 = vpop.f32.mrf.mxu0  ;;  %v7643_v31 = vpop.f32.mrf.mxu1 }
0x1f50   : > { %v7591_v39 = vadd.f32 %v7590_v22, %v7523_v52  ;;  %v7644_v7 = vadd.f32 %v7643_v31, %v7523_v52 }
0x1f51   : > { %v7592_v30 = vpop.f32.mrf.mxu0  ;;  %v7645_v24 = vpop.f32.mrf.mxu1 }
0x1f52   : > { %v7593_v41 = vadd.f32 %v7592_v30, %v7523_v52  ;;  %v7646_v17 = vadd.f32 %v7645_v24, %v7523_v52  ;;  %v10078_v52 = vld [vmem:[%s13929_s13 + $0x70] sm:$0xff]  }
0x1f53   : > { %v7594_v58 = vpop.f32.mrf.mxu0  ;;  %v7647_v45 = vpop.f32.mrf.mxu1 }
0x1f54   : > { %v7595_v1 = vadd.f32 %v7594_v58, %v7528_v16  ;;  %v7648_v53 = vadd.f32 %v7647_v45, %v7528_v16  ;;  %v7663_v21 = vmax.f32 %v7593_v41, 0.0  ;;  %v7665_v30 = vmax.f32 %v7646_v17, 0.0  ;;  %v7837_v17 = vpop.permute.xlu0 %7836 }
0x1f55   : > { %v7596_v62 = vpop.f32.mrf.mxu0  ;;  %v7649_v3 = vpop.f32.mrf.mxu1 }
0x1f56   : > { %v7597_v25 = vadd.f32 %v7596_v62, %v7528_v16  ;;  %v7650_v38 = vadd.f32 %v7649_v3, %v7528_v16  ;;  %v7666_v24 = vmax.f32 %v7595_v1, 0.0  ;;  %v7668_v58 = vmax.f32 %v7648_v53, 0.0 }
0x1f57   : > { %v7600_v55 = vpop.f32.mrf.mxu0  ;;  %v7653_v9 = vpop.f32.mrf.mxu1 }
0x1f58   : > { %v7601_v15 = vadd.f32 %v7600_v55, %v7533_v12  ;;  %v7654_v28 = vadd.f32 %v7653_v9, %v7533_v12  ;;  %v7667_v27 = vmax.f32 %v7597_v25, 0.0  ;;  %v7669_v6 = vmax.f32 %v7650_v38, 0.0 }
0x1f59   : > { %v7602_v10 = vpop.f32.mrf.mxu0  ;;  %v7655_v5 = vpop.f32.mrf.mxu1  ;;  %v7664_v9 = vmax.f32 %v7644_v7, 0.0 }
0x1f5a   : > { %v7603_v37 = vadd.f32 %v7602_v10, %v7533_v12  ;;  %v7656_v8 = vadd.f32 %v7655_v5, %v7533_v12  ;;  %v7670_v42 = vmax.f32 %v7601_v15, 0.0  ;;  %v7672_v23 = vmax.f32 %v7654_v28, 0.0  ;;  %v10079_v5 = vld [vmem:[%s13929_s13 + $0x78] sm:$0xff]  }
0x1f5b   : > { %v7604_v11 = vpop.f32.mrf.mxu0  ;;  %v7657_v49 = vpop.f32.mrf.mxu1  ;;  %v7679_v45 = vpack.c.bf16 %v7667_v27, %v7663_v21  ;;  %v7681_v55 = vpack.c.bf16 %v7669_v6, %v7665_v30  ;;  %v7680_v31 = vpack.c.bf16 %v7668_v58, %v7664_v9 }
0x1f5c   : > { %v7605_v26 = vadd.f32 %v7604_v11, %v7538_v51  ;;  %v7658_v40 = vadd.f32 %v7657_v49, %v7538_v51  ;;  %v7671_v59 = vmax.f32 %v7603_v37, 0.0  ;;  %v7673_v57 = vmax.f32 %v7656_v8, 0.0 }
0x1f5d   : > { %v7606_v29 = vpop.f32.mrf.mxu0  ;;  %v7659_v13 = vpop.f32.mrf.mxu1 }
0x1f5e   : > { %v7607_v61 = vadd.f32 %v7606_v29, %v7538_v51  ;;  %v7674_v35 = vmax.f32 %v7605_v26, 0.0  ;;  %v7660_v48 = vadd.f32 %v7659_v13, %v7538_v51  ;;  %v7676_v47 = vmax.f32 %v7658_v40, 0.0  ;;  %v7842_v40 = vpop.permute.xlu1 %7841 }
0x1f5f   : > { %v7662_v51 = vmax.f32 %v7591_v39, 0.0 }
0x1f60   : > { %v7675_v33 = vmax.f32 %v7607_v61, 0.0  ;;  %v7677_v19 = vmax.f32 %v7660_v48, 0.0  ;;  %v7682_v12 = vpack.c.bf16 %v7674_v35, %v7670_v42  ;;  %v7684_v3 = vpack.c.bf16 %v7676_v47, %v7672_v23 }
0x1f61   : > { %v7678_v10 = vpack.c.bf16 %v7666_v24, %v7662_v51 }
0x1f62   : > { %v7683_v22 = vpack.c.bf16 %v7675_v33, %v7671_v59  ;;  %v7685_v62 = vpack.c.bf16 %v7677_v19, %v7673_v57 }
0x1f64   : > { %7714 = vmatprep.subr.bf16.mxu0 %v7683_v22  ;;  %7767 = vmatprep.subr.bf16.mxu1 %v7685_v62 }
0x1f65   : > { %7715 = vmatpush1.bf16.msra.mxu0 %v7682_v12  ;;  %7768 = vmatpush1.bf16.msra.mxu1 %v7684_v3 }
0x1f66   : > { %7716 = vmatprep.subr.bf16.mxu0 %v7679_v45  ;;  %7769 = vmatprep.subr.bf16.mxu1 %v7681_v55 }
0x1f69   : > { %7717 = vmatpush1.bf16.msra.mxu0 %v7678_v10  ;;  %7770 = vmatpush1.bf16.msra.mxu1 %v7680_v31  ;;  %v10080_v10 = vld [vmem:[%s13931_s15 + $0x8] sm:$0xff]  }
0x1f6c   : > { %8991 = vmatmul.mubr.msk.bf16.vlgmr.msra.gmra.mxu0 %vm14590_vm0, %v10078_v52  ;;  %8993 = vmatmul.mubr.msk.bf16.vlgmr.msra.gmra.mxu1 %vm14591_vm7, %v10078_v52 }
0x1f6d   : > { %7744 = vmatprep.mubr.bf16.mxu0 %v14103_v20  ;;  %7797 = vmatprep.mubr.bf16.mxu1 %v14103_v20 }
0x1f74   : > { %8992 = vmatmul.mubr.msk.bf16.gmra.mxu0 %vm14592_vm6, %v10079_v5  ;;  %8994 = vmatmul.mubr.msk.bf16.gmra.mxu1 %vm14593_vm3, %v10079_v5 }
0x1f75   : > { %7918 = vmatprep.mubr.bf16.mxu0 %v14103_v20  ;;  %7961 = vmatprep.mubr.bf16.mxu1 %v14103_v20 }
0x202c   : > { %v7736_v16 = vpop.f32.mrf.mxu0  ;;  %v7789_v11 = vpop.f32.mrf.mxu1 }
0x202d   : > { %v7808_v61 = vadd.f32 %v7736_v16, %v13582_v50 }
0x202e   : > { %v7738_v39 = vpop.f32.mrf.mxu0  ;;  %v7791_v25 = vpop.f32.mrf.mxu1 }
0x202f   : > { %v7809_v33 = vadd.f32 %v7738_v39, %v13590_v34  ;;  %v7811_v50 = vadd.f32 %v7791_v25, %v13605_v0  ;;  %v7827_v34 = vpop.permute.xlu0 %7826 }
0x2030   : > { %v7740_v37 = vpop.f32.mrf.mxu0  ;;  %v7793_v26 = vpop.f32.mrf.mxu1  ;;  %v7844_v3 = vadd.f32 %v7827_v34, %v7808_v61 }
0x2031   : > { %v7812_v42 = vadd.f32 %v7740_v37, %v13585_v36  ;;  %v7845_v22 = vadd.f32 %v7827_v34, %v7809_v33  ;;  %v7847_v36 = vadd.f32 %v7827_v34, %v7811_v50 }
0x2032   : > { %v7742_v49 = vpop.f32.mrf.mxu0  ;;  %v7795_v38 = vpop.f32.mrf.mxu1 }
0x2033   : > { %v7813_v13 = vadd.f32 %v7742_v49, %v13594_v4  ;;  %v7815_v35 = vadd.f32 %v7795_v38, %v13600_v2  ;;  %v7814_v2 = vadd.f32 %v7793_v26, %v13592_v32  ;;  %v7871_v31 = vpop.permute.xlu0 %7870 }
0x2034   : > { %v7746_v15 = vpop.f32.mrf.mxu0  ;;  %v7799_v8 = vpop.f32.mrf.mxu1 }
0x2035   : > { %v7816_v48 = vadd.f32 %v7746_v15, %v13630_v14  ;;  %v7818_v4 = vadd.f32 %v7799_v8, %v13636_v63 }
0x2036   : > { %v7748_v29 = vpop.f32.mrf.mxu0  ;;  %v7801_v41 = vpop.f32.mrf.mxu1 }
0x2037   : > { %v7817_v20 = vadd.f32 %v7748_v29, %v13623_v18  ;;  %v7819_v27 = vadd.f32 %v7801_v41, %v13632_v46  ;;  %v7852_v0 = vadd.f32 %v7837_v17, %v7816_v48  ;;  %v7854_v30 = vadd.f32 %v7837_v17, %v7818_v4 }
0x2038   : > { %v7750_v28 = vpop.f32.mrf.mxu0  ;;  %v7803_v53 = vpop.f32.mrf.mxu1 }
0x2039   : > { %v7820_v1 = vadd.f32 %v7750_v28, %v13620_v43  ;;  %v7822_v59 = vadd.f32 %v7803_v53, %v13625_v54  ;;  %v7832_v43 = vpop.permute.xlu1 %7831  ;;  %v7853_v54 = vadd.f32 %v7837_v17, %v7817_v20  ;;  %v7855_v23 = vadd.f32 %v7837_v17, %v7819_v27 }
0x203a   : > { %v7752_v47 = vpop.f32.mrf.mxu0  ;;  %v7805_v6 = vpop.f32.mrf.mxu1  ;;  %v7849_v57 = vadd.f32 %v7832_v43, %v7813_v13  ;;  %v7851_v21 = vadd.f32 %v7832_v43, %v7815_v35  ;;  %v7848_v12 = vadd.f32 %v7832_v43, %v7812_v42  ;;  %v7850_v58 = vadd.f32 %v7832_v43, %v7814_v2 }
0x203b   : > { %v7821_v18 = vadd.f32 %v7752_v47, %v13627_v60  ;;  %v7856_v14 = vadd.f32 %v7842_v40, %v7820_v1  ;;  %v7823_v46 = vadd.f32 %v7805_v6, %v13634_v56  ;;  %v7858_v19 = vadd.f32 %v7842_v40, %v7822_v59 }
0x203c   : > { %v7810_v60 = vadd.f32 %v7789_v11, %v13598_v44  ;;  %v7861_v45 = vpack.c.bf16 %v7849_v57, %v7845_v22  ;;  %v7863_v51 = vpack.c.bf16 %v7851_v21, %v7847_v36  ;;  %v7860_v44 = vpack.c.bf16 %v7848_v12, %v7844_v3 }
0x203d   : > { %v7857_v7 = vadd.f32 %v7842_v40, %v7821_v18  ;;  %v7859_v63 = vadd.f32 %v7842_v40, %v7823_v46  ;;  %v7864_v32 = vpack.c.bf16 %v7856_v14, %v7852_v0  ;;  %v7866_v56 = vpack.c.bf16 %v7858_v19, %v7854_v30  ;;  %v7876_v26 = vpop.permute.xlu1 %7875 }
0x203e   : > { %v7846_v55 = vadd.f32 %v7827_v34, %v7810_v60 }
0x203f   : > { %v7865_v24 = vpack.c.bf16 %v7857_v7, %v7853_v54  ;;  %v7867_v62 = vpack.c.bf16 %v7859_v63, %v7855_v23 }
0x2040   : > { %v7862_v9 = vpack.c.bf16 %v7850_v58, %v7846_v55 }
0x2041   : > { %7898 = vmatprep.subr.bf16.mxu0 %v7865_v24  ;;  %7941 = vmatprep.subr.bf16.mxu1 %v7867_v62 }
0x2042   : > { %7899 = vmatpush1.bf16.msra.mxu0 %v7864_v32  ;;  %7942 = vmatpush1.bf16.msra.mxu1 %v7866_v56 }
0x2043   : > { %7900 = vmatprep.subr.bf16.mxu0 %v7861_v45  ;;  %7943 = vmatprep.subr.bf16.mxu1 %v7863_v51 }
0x2046   : > { %7901 = vmatpush1.bf16.msra.mxu0 %v7860_v44  ;;  %7944 = vmatpush1.bf16.msra.mxu1 %v7862_v9 }
0x2049   : > { %8996 = vmatmul.mubr.msk.bf16.vlgmr.msra.gmra.mxu0 %vm14594_vm8, %v10080_v10  ;;  %8997 = vmatmul.mubr.msk.bf16.vlgmr.msra.gmra.mxu1 %vm14595_vm4, %v10080_v10 }
0x2109   : > { %v7920_v52 = vpop.f32.mrf.mxu0  ;;  %v7963_v16 = vpop.f32.mrf.mxu1 }
0x210a   : > { %v7921_v5 = vadd.f32 %v7920_v52, %v7871_v31  ;;  %v7964_v11 = vadd.f32 %v7963_v16, %v7871_v31 }
0x210b   : > { %v7922_v39 = vpop.f32.mrf.mxu0  ;;  %v7965_v37 = vpop.f32.mrf.mxu1 }
0x210c   : > { %8998 = vst [vmem:[%s11723_s20 + $0x80] sm:$0xff] %v7921_v5  ;;  %v7923_v25 = vadd.f32 %v7922_v39, %v7871_v31  ;;  %9000 = vst [vmem:[%s11723_s20 + $0x90] sm:$0xff] %v7964_v11  ;;  %v7966_v49 = vadd.f32 %v7965_v37, %v7871_v31 }
0x210d   : > { %v7924_v38 = vpop.f32.mrf.mxu0  ;;  %v7967_v8 = vpop.f32.mrf.mxu1 }
0x210e   : > { %8999 = vst [vmem:[%s11723_s20 + $0x88] sm:$0xff] %v7923_v25  ;;  %v7925_v15 = vadd.f32 %v7924_v38, %v7876_v26  ;;  %9001 = vst [vmem:[%s11723_s20 + $0x98] sm:$0xff] %v7966_v49  ;;  %v7968_v40 = vadd.f32 %v7967_v8, %v7876_v26 }
0x210f   : > { %v7926_v29 = vpop.f32.mrf.mxu0  ;;  %v7969_v17 = vpop.f32.mrf.mxu1 }
0x2110   : > { %9002 = vst [vmem:[%s11723_s20 + $0xa0] sm:$0xff] %v7925_v15  ;;  %v7927_v41 = vadd.f32 %v7926_v29, %v7876_v26  ;;  %9004 = vst [vmem:[%s11723_s20 + $0xb0] sm:$0xff] %v7968_v40  ;;  %v7970_v28 = vadd.f32 %v7969_v17, %v7876_v26 }
0x2112   : > { %9003 = vst [vmem:[%s11723_s20 + $0xa8] sm:$0xff] %v7927_v41  ;;  %9005 = vst [vmem:[%s11723_s20 + $0xb8] sm:$0xff] %v7970_v28 }
0x2113   : > { %10142 = shalt.err (!%p10139_p5)
}
0x2114   : > { %s10143_s20 = scalar_lea.hbm %s13867_s25, 3072  ;;  %s10147_s5 = scalar_lea.hbm %s13933_s17, 6144 }
0x2115   : > { %p10144_p7 = scmp.ne.s32.totalorder %s13867_s25, %s10143_s20  ;;  %p10148_p12 = scmp.lt.s32.totalorder %s13867_s25, %s13933_s17 }
0x2116   : > { %p10149_p13 = scmp.lt.s32.totalorder %s10147_s5, %s10143_s20 }
0x2117   : > { %p10145_p10 = pnand %p10144_p7, %p10330_p6 }
0x2118   : > { %p10150_p0 = por %p10149_p13, %p10148_p12 }
0x2119   : > { %p10146_p11 = pneg %p10145_p10 }
0x211b   : > { %p10151_p1 = pnand %p10150_p0, %p10146_p11 }
0x211d   : > { %10154 = shalt.err (!%p10151_p1)
}
0x211e   : > { %s10199_s3 = smov 512   ;;  %s10200_s26 = smov 1024  }
0x211f   : > { %s10201_s2 = smov 32  }
0x2120   : > { %9013 = dma.vmem_to_hbm [thread:$0]  (%p10330_p6), %s13870_s4, 3072, %s13867_s25, %s7982_s21, %s10199_s3, %s10200_s26, %s10201_s2  }
0x2121 PF: > { %s14597_s19 = sld [smem:[#allocation6_spill]]  ;;  %p9016_p2 = pnand %p8065_p9, %p10334_p8 }
0x2123   : > { %p9017_p3 = pneg %p9016_p2 }
0x2127   : > { %s8010_s29 = sand.u32 1, %s14597_s19  }
0x2128   : > { %s8011_s18 = scalar_lea.sflag [#allocation4], %s8010_s29 }
0x2129   : > { %10172 = dma.done.wait (%p9017_p3), %s8011_s18, 3072  }
0x212a   : > { %10174 = vsyncadd (%p9017_p3), %s8011_s18, 4294964224  ;;  %s14599_s27 = sld [smem:[#allocation9_spill]] }
0x212b   : > { %s14600_s24 = sld [smem:[#allocation7_spill]] }
0x212c   : > { %s14601_s25 = sld [smem:[#allocation8_spill]] }
0x212d   : > { %s14602_s26 = sld [smem:[#allocation10_spill]] }
0x2130   : > { %p27_p4 = scmp.ge.s32.totalorder %s14599_s27, 4  }
0x2132   :  { %29 = sbr.rel (!%p27_p4) target bundleno = 10 (0xa), region = 197 }
0x2137   :  { %8016 = vsyncpa [#allocation4], 1 }
0x2138   :  { %8018 = vsyncpa [#allocation4 + $0x1], 1 }

</bundles_post_ra>
